<compile_context>
chip_gen: v5e
topology: v5e:2x2
jax: 0.10.0
libtpu: 0.0.40
codegen_flags: <defaults>
</compile_context>

<pallas_src>
import functools

import jax
import jax.numpy as jnp
from jax.experimental import pallas as pl
from jax.experimental.pallas import tpu as pltpu

EPS = 1e-5

# Non-center taps of the 3x3 depthwise conv, in (kh, kw) order (center = (1, 1)).
_DW_TAPS = tuple((kh, kw) for kh in range(3) for kw in range(3) if (kh, kw) != (1, 1))

# Below this contraction size a 1x1 conv is cheaper as VPU FMAs than an MXU round-trip.
_MXU_MIN_K = 64


# ---------------- in-kernel helpers (traced inside the Pallas kernel) ----------------

def _dw3x3(x, w_ref, b, mask_ref, width):
    """Depthwise 3x3 conv (stride 1, pad 1) in (N, C, H*W) layout.

    Spatial shifts are lane rolls (pltpu.roll, XLU slot) times precomputed boundary
    masks, so no unaligned pad/concat copies are materialized.
    x: (N, C, P); w_ref: (9, C, 1) taps; b: (C, 1); mask_ref: (8, 1, P).
    """
    p = x.shape[2]
    acc = x * w_ref[4] + b                               # center tap (kh=1, kw=1)
    for t, (kh, kw) in enumerate(_DW_TAPS):
        d = (kh - 1) * width + (kw - 1)                  # flat source offset
        shifted = pltpu.roll(x, (-d) % p, axis=2)        # shifted[p] = x[(p + d) % P]
        acc = acc + (shifted * mask_ref[t]) * w_ref[kh * 3 + kw]
    return acc


def _pointwise(x, w, b):
    """1x1 conv in (N, Cin, P) layout -> (N, Cout, P).  w: (Cout, Cin); b: (Cout, 1)."""
    n, cin, p = x.shape
    if cin < _MXU_MIN_K:
        # Tiny contraction: a handful of VPU FMAs beats an MXU push/pop for K=4..32.
        acc = x[:, 0:1, :] * w[:, 0:1]
        for c in range(1, cin):
            acc = acc + x[:, c:c + 1, :] * w[:, c:c + 1]
        return acc + b
    # TODO(synk): at production channel counts cast operands to bf16 (fp32 accumulate)
    # for the v6e/v7x MXU and re-validate against the fp32 reference.
    ys = [jnp.dot(w, x[i], preferred_element_type=jnp.float32) for i in range(n)]
    return jnp.stack(ys, axis=0) + b


def _bn_scale_shift(v, g, b):
    """Training-mode BatchNorm2d folded into per-channel (scale, shift).

    Single-pass biased batch statistics over (N, H*W), kept in fp32.
    v: (N, C, P); g, b: (C, 1) -> scale, shift broadcastable to (N, C, P).
    """
    n, _, p = v.shape
    inv_cnt = 1.0 / float(n * p)
    s = jnp.sum(v, axis=(0, 2), keepdims=True)           # (1, C, 1)
    ss = jnp.sum(v * v, axis=(0, 2), keepdims=True)      # (1, C, 1)
    mean = s * inv_cnt
    var = ss * inv_cnt - mean * mean
    scale = g * jax.lax.rsqrt(var + EPS)
    shift = b - mean * scale
    return scale, shift


# ---------------- the Pallas kernel: full block forward, lane-dense layout ----------------

def resnet_block_se_kernel(x_ref, dwmask_ref,
                           dw1w_ref, dw1b_ref, pw1w_ref, pw1b_ref, bn1g_ref, bn1b_ref,
                           dw2w_ref, dw2b_ref, pw2w_ref, pw2b_ref, bn2g_ref, bn2b_ref,
                           fc1w_ref, fc1b_ref, fc2w_ref, fc2b_ref,
                           dsw_ref, dsb_ref, bndg_ref, bndb_ref,
                           out_ref, *, width):
    x = x_ref[...]                                       # (N, Cin, H*W), fp32

    # Downsample branch: raw 1x1 conv now; its BN apply is deferred to the fused epilogue.
    u = _pointwise(x, dsw_ref[...], dsb_ref[...])        # (N, Cout, P)
    sd, bd = _bn_scale_shift(u, bndg_ref[...], bndb_ref[...])

    # conv1 = depthwise 3x3 + pointwise 1x1, then folded BN1 + ReLU.
    t = _dw3x3(x, dw1w_ref, dw1b_ref[...], dwmask_ref, width)
    t = _pointwise(t, pw1w_ref[...], pw1b_ref[...])
    s1, b1 = _bn_scale_shift(t, bn1g_ref[...], bn1b_ref[...])
    t = jnp.maximum(t * s1 + b1, 0.0)

    # conv2 = depthwise 3x3 + pointwise 1x1; BN2 stats only (apply is fused below).
    t = _dw3x3(t, dw2w_ref, dw2b_ref[...], dwmask_ref, width)
    v = _pointwise(t, pw2w_ref[...], pw2b_ref[...])
    s2, b2 = _bn_scale_shift(v, bn2g_ref[...], bn2b_ref[...])

    # SE block.  mean_hw(bn2(v)) is reconstructed from mean_hw(v) via the BN2 fold,
    # so bn2(v) never has to be materialized before the fused epilogue.  The FCs are
    # (N,32)x(32,2) / (N,2)x(2,32): pure VPU FMAs, no MXU round-trips.
    y = jnp.mean(v, axis=2, keepdims=True) * s2 + b2     # (N, C, 1)
    hidden = fc1w_ref.shape[0]
    gate = None
    for j in range(hidden):
        zj = jnp.sum(y * fc1w_ref[j], axis=1, keepdims=True) + fc1b_ref[j]   # (N, 1, 1)
        zj = jnp.maximum(zj, 0.0)
        contrib = zj * fc2w_ref[j]                       # (N, C, 1)
        gate = contrib if gate is None else gate + contrib
    gate = jax.nn.sigmoid(gate + fc2b_ref[...])          # (N, C, 1)

    # Fused epilogue in ONE lane-dense pass (last dim = H*W = 256, unmasked vst):
    #   relu( bn2(v)*gate + bn_d(u) ) = relu( v*(s2*gate) + b2*gate + u*sd + bd )
    out_ref[...] = jnp.maximum(v * (s2 * gate) + b2 * gate + (u * sd + bd), 0.0)


# ---------------- wrapper: parameters, masks, layout glue ----------------

_PARAM_ORDER = (
    "dw1_w", "dw1_b", "pw1_w", "pw1_b", "bn1_g", "bn1_b",
    "dw2_w", "dw2_b", "pw2_w", "pw2_b", "bn2_g", "bn2_b",
    "fc1_w", "fc1_b", "fc2_w", "fc2_b",
    "ds_w", "ds_b", "bnd_g", "bnd_b",
)


def make_params(key, in_channels, out_channels, reduction=16):
    """Deterministic parameters mirroring the PyTorch module's shapes/init style.

    Layouts are chosen for the kernel's (N, C, H*W) data layout: depthwise weights
    (9, C, 1); pointwise weights (Cout, Cin); per-channel vectors (C, 1); SE fc
    weights (hidden, C, 1) with fc2 stored transposed.
    """
    hidden = out_channels // reduction
    assert hidden >= 1, "pick out_channels >= reduction so the SE bottleneck is non-empty"
    ks = jax.random.split(key, 8)

    def normal(k, shape, std):
        return jax.random.normal(k, shape, jnp.float32) * std

    p = {}
    p["dw1_w"] = normal(ks[0], (9, in_channels, 1), (2.0 / 9.0) ** 0.5)
    p["dw1_b"] = jnp.full((in_channels, 1), 0.2, jnp.float32)
    p["pw1_w"] = normal(ks[1], (out_channels, in_channels), (2.0 / in_channels) ** 0.5)
    p["pw1_b"] = jnp.full((out_channels, 1), 0.2, jnp.float32)
    p["bn1_g"] = jnp.ones((out_channels, 1), jnp.float32)
    p["bn1_b"] = jnp.zeros((out_channels, 1), jnp.float32)

    p["dw2_w"] = normal(ks[2], (9, out_channels, 1), (2.0 / 9.0) ** 0.5)
    p["dw2_b"] = jnp.full((out_channels, 1), 0.2, jnp.float32)
    p["pw2_w"] = normal(ks[3], (out_channels, out_channels), (2.0 / out_channels) ** 0.5)
    p["pw2_b"] = jnp.full((out_channels, 1), 0.2, jnp.float32)
    p["bn2_g"] = jnp.ones((out_channels, 1), jnp.float32)
    p["bn2_b"] = jnp.zeros((out_channels, 1), jnp.float32)

    p["fc1_w"] = normal(ks[4], (hidden, out_channels, 1), 0.2)
    p["fc1_b"] = jnp.full((hidden, 1, 1), 0.05, jnp.float32)
    p["fc2_w"] = normal(ks[5], (hidden, out_channels, 1), 0.2)    # torch fc2.weight^T
    p["fc2_b"] = jnp.full((out_channels, 1), -0.05, jnp.float32)

    p["ds_w"] = normal(ks[6], (out_channels, in_channels), (1.0 / in_channels) ** 0.5)
    p["ds_b"] = jnp.full((out_channels, 1), 0.1, jnp.float32)
    p["bnd_g"] = jnp.ones((out_channels, 1), jnp.float32)
    p["bnd_b"] = jnp.zeros((out_channels, 1), jnp.float32)
    return p


def _dw_valid_masks(h, w):
    """(8, 1, H*W) fp32 masks: 1 where the (kh,kw)-shifted source pixel is in-bounds."""
    hh, ww = jnp.meshgrid(jnp.arange(h), jnp.arange(w), indexing="ij")
    ms = []
    for kh, kw in _DW_TAPS:
        sh, sw = kh - 1, kw - 1
        valid = (hh + sh >= 0) & (hh + sh < h) & (ww + sw >= 0) & (ww + sw < w)
        ms.append(valid.reshape(1, h * w).astype(jnp.float32))
    return jnp.stack(ms, axis=0)


def _vmem_limit_bytes():
    """Generation-aware VMEM budget: ~3/4 of physical, capped well under v7x's 64 MiB."""
    try:
        cap = int(pltpu.get_tpu_info().vmem_capacity_bytes)
    except Exception:
        cap = 64 << 20
    return min(cap * 3 // 4, 48 << 20)


@functools.partial(jax.jit, static_argnames=("out_channels",))
def resnet_block_se(x_nchw, params, out_channels):
    """ResNetBlockSE forward.  Accepts/returns NCHW (PyTorch convention).

    The kernel runs in a lane-dense (N, C, H*W) layout, so the NCHW <-> kernel layout
    conversions here are free row-major reshapes (no transposes, no HBM round-trips).
    """
    n, c_in, h, w = x_nchw.shape
    p = h * w
    x_flat = x_nchw.reshape(n, c_in, p)
    masks = _dw_valid_masks(h, w)
    ordered = [params[k] for k in _PARAM_ORDER]

    out_flat = pl.pallas_call(
        functools.partial(resnet_block_se_kernel, width=w),
        out_shape=jax.ShapeDtypeStruct((n, out_channels, p), jnp.float32),
        in_specs=[pl.BlockSpec(memory_space=pltpu.MemorySpace.VMEM)] * (2 + len(ordered)),
        out_specs=pl.BlockSpec(memory_space=pltpu.MemorySpace.VMEM),
        compiler_params=pltpu.CompilerParams(vmem_limit_bytes=_vmem_limit_bytes()),
    )(x_flat, masks, *ordered)

    # TODO(synk): for production shapes (e.g. 8x56x56x256) this single-invocation kernel
    # must become a gridded two-pass pipeline over H (partial BN sums/sumsq in scratch
    # across an 'arbitrary' axis, then a normalize/apply pass); that grid is also where
    # dimension_semantics=("parallel", ...) buys the second v7x TensorCore.
    return out_flat.reshape(n, out_channels, h, w)


# ---------------- pure-JAX/XLA reference (NCHW), for validation only ----------------

def reference_forward(x, prm):
    def cvec(v):                                        # (C, 1) -> (1, C, 1, 1)
        return v[:, 0][None, :, None, None]

    def dw3x3(v, w9, b):
        n, c, hh, ww = v.shape
        vp = jnp.pad(v, ((0, 0), (0, 0), (1, 1), (1, 1)))
        out = jnp.zeros_like(v)
        for kh in range(3):
            for kw in range(3):
                out = out + vp[:, :, kh:kh + hh, kw:kw + ww] * cvec(w9[kh * 3 + kw])
        return out + cvec(b)

    def pw(v, w, b):
        return jnp.einsum("oc,nchw->nohw", w, v,
                          precision=jax.lax.Precision.HIGHEST) + cvec(b)

    def bn(v, g, b):
        mu = jnp.mean(v, axis=(0, 2, 3), keepdims=True)
        var = jnp.mean((v - mu) ** 2, axis=(0, 2, 3), keepdims=True)
        return (v - mu) * jax.lax.rsqrt(var + EPS) * cvec(g) + cvec(b)

    out = jax.nn.relu(bn(pw(dw3x3(x, prm["dw1_w"], prm["dw1_b"]),
                            prm["pw1_w"], prm["pw1_b"]),
                         prm["bn1_g"], prm["bn1_b"]))
    out = bn(pw(dw3x3(out, prm["dw2_w"], prm["dw2_b"]),
                prm["pw2_w"], prm["pw2_b"]),
             prm["bn2_g"], prm["bn2_b"])
    y = jnp.mean(out, axis=(2, 3))                                        # (N, C)
    z = jax.nn.relu(y @ prm["fc1_w"][:, :, 0].T + prm["fc1_b"][:, 0, 0][None, :])
    gate = jax.nn.sigmoid(z @ prm["fc2_w"][:, :, 0] + prm["fc2_b"][:, 0][None, :])
    out = out * gate[:, :, None, None]
    ident = bn(pw(x, prm["ds_w"], prm["ds_b"]), prm["bnd_g"], prm["bnd_b"])
    return jax.nn.relu(out + ident)


if __name__ == "__main__":
    # ResNetBlockSE(in_channels=4, out_channels=32, downsample=False): stride 1 everywhere,
    # downsample branch = 1x1 conv + BN (since in_channels != out_channels), SE bottleneck 2.
    N, C_IN, C_OUT, H, W = 2, 4, 32, 16, 16

    key = jax.random.PRNGKey(0)
    kx, kp = jax.random.split(key)
    x = jax.random.normal(kx, (N, C_IN, H, W), jnp.float32)   # NCHW, like PyTorch
    params = make_params(kp, C_IN, C_OUT)

    out = jax.block_until_ready(resnet_block_se(x, params, out_channels=C_OUT))
    assert out.shape == (N, C_OUT, H, W)
    assert bool(jnp.all(out >= 0.0))                          # final ReLU

    ref = jax.block_until_ready(jax.jit(reference_forward)(x, params))
    max_err = float(jnp.max(jnp.abs(out - ref)))
    assert max_err < 1e-2, f"kernel vs reference mismatch: max abs err = {max_err:.3e}"

    print("KERNEL_OK")
</pallas_src>

<mosaic_0001>
module attributes {stable_mosaic.version = 11 : i64} {
  func.func @resnet_block_se_kernel(%arg0: memref<2x4x256xf32, #tpu.memory_space<vmem>>, %arg1: memref<8x1x256xf32, #tpu.memory_space<vmem>>, %arg2: memref<9x4x1xf32, #tpu.memory_space<vmem>>, %arg3: memref<4x1xf32, #tpu.memory_space<vmem>>, %arg4: memref<32x4xf32, #tpu.memory_space<vmem>>, %arg5: memref<32x1xf32, #tpu.memory_space<vmem>>, %arg6: memref<32x1xf32, #tpu.memory_space<vmem>>, %arg7: memref<32x1xf32, #tpu.memory_space<vmem>>, %arg8: memref<9x32x1xf32, #tpu.memory_space<vmem>>, %arg9: memref<32x1xf32, #tpu.memory_space<vmem>>, %arg10: memref<32x32xf32, #tpu.memory_space<vmem>>, %arg11: memref<32x1xf32, #tpu.memory_space<vmem>>, %arg12: memref<32x1xf32, #tpu.memory_space<vmem>>, %arg13: memref<32x1xf32, #tpu.memory_space<vmem>>, %arg14: memref<2x32x1xf32, #tpu.memory_space<vmem>>, %arg15: memref<2x1x1xf32, #tpu.memory_space<vmem>>, %arg16: memref<2x32x1xf32, #tpu.memory_space<vmem>>, %arg17: memref<32x1xf32, #tpu.memory_space<vmem>>, %arg18: memref<32x4xf32, #tpu.memory_space<vmem>>, %arg19: memref<32x1xf32, #tpu.memory_space<vmem>>, %arg20: memref<32x1xf32, #tpu.memory_space<vmem>>, %arg21: memref<32x1xf32, #tpu.memory_space<vmem>>, %arg22: memref<2x32x256xf32, #tpu.memory_space<vmem>>) attributes {dimension_semantics = [], scalar_prefetch = 0 : i64, scratch_operands = 0 : i64, tpu.core_type = #tpu.core_type<tc>} {
    %c0 = arith.constant 0 : index
    %c0_0 = arith.constant 0 : index
    %c0_1 = arith.constant 0 : index
    %0 = vector.load %arg0[%c0, %c0_0, %c0_1] : memref<2x4x256xf32, #tpu.memory_space<vmem>>, vector<2x4x256xf32>
    %c0_2 = arith.constant 0 : index
    %c0_3 = arith.constant 0 : index
    %1 = vector.load %arg18[%c0_2, %c0_3] : memref<32x4xf32, #tpu.memory_space<vmem>>, vector<32x4xf32>
    %c0_4 = arith.constant 0 : index
    %c0_5 = arith.constant 0 : index
    %2 = vector.load %arg19[%c0_4, %c0_5] : memref<32x1xf32, #tpu.memory_space<vmem>>, vector<32x1xf32>
    %3 = vector.extract_strided_slice %0 {offsets = [0, 0, 0], sizes = [2, 1, 256], strides = [1, 1, 1]} : vector<2x4x256xf32> to vector<2x1x256xf32>
    %4 = vector.extract_strided_slice %1 {offsets = [0, 0], sizes = [32, 1], strides = [1, 1]} : vector<32x4xf32> to vector<32x1xf32>
    %5 = vector.shape_cast %4 : vector<32x1xf32> to vector<1x32x1xf32>
    %6 = vector.broadcast %3 : vector<2x1x256xf32> to vector<2x32x256xf32>
    %7 = vector.broadcast %5 : vector<1x32x1xf32> to vector<2x32x256xf32>
    %8 = arith.mulf %6, %7 : vector<2x32x256xf32>
    %9 = vector.extract_strided_slice %0 {offsets = [0, 1, 0], sizes = [2, 1, 256], strides = [1, 1, 1]} : vector<2x4x256xf32> to vector<2x1x256xf32>
    %10 = vector.extract_strided_slice %1 {offsets = [0, 1], sizes = [32, 1], strides = [1, 1]} : vector<32x4xf32> to vector<32x1xf32>
    %11 = vector.shape_cast %10 : vector<32x1xf32> to vector<1x32x1xf32>
    %12 = vector.broadcast %9 : vector<2x1x256xf32> to vector<2x32x256xf32>
    %13 = vector.broadcast %11 : vector<1x32x1xf32> to vector<2x32x256xf32>
    %14 = arith.mulf %12, %13 : vector<2x32x256xf32>
    %15 = arith.addf %8, %14 : vector<2x32x256xf32>
    %16 = vector.extract_strided_slice %0 {offsets = [0, 2, 0], sizes = [2, 1, 256], strides = [1, 1, 1]} : vector<2x4x256xf32> to vector<2x1x256xf32>
    %17 = vector.extract_strided_slice %1 {offsets = [0, 2], sizes = [32, 1], strides = [1, 1]} : vector<32x4xf32> to vector<32x1xf32>
    %18 = vector.shape_cast %17 : vector<32x1xf32> to vector<1x32x1xf32>
    %19 = vector.broadcast %16 : vector<2x1x256xf32> to vector<2x32x256xf32>
    %20 = vector.broadcast %18 : vector<1x32x1xf32> to vector<2x32x256xf32>
    %21 = arith.mulf %19, %20 : vector<2x32x256xf32>
    %22 = arith.addf %15, %21 : vector<2x32x256xf32>
    %23 = vector.extract_strided_slice %0 {offsets = [0, 3, 0], sizes = [2, 1, 256], strides = [1, 1, 1]} : vector<2x4x256xf32> to vector<2x1x256xf32>
    %24 = vector.extract_strided_slice %1 {offsets = [0, 3], sizes = [32, 1], strides = [1, 1]} : vector<32x4xf32> to vector<32x1xf32>
    %25 = vector.shape_cast %24 : vector<32x1xf32> to vector<1x32x1xf32>
    %26 = vector.broadcast %23 : vector<2x1x256xf32> to vector<2x32x256xf32>
    %27 = vector.broadcast %25 : vector<1x32x1xf32> to vector<2x32x256xf32>
    %28 = arith.mulf %26, %27 : vector<2x32x256xf32>
    %29 = arith.addf %22, %28 : vector<2x32x256xf32>
    %30 = vector.shape_cast %2 : vector<32x1xf32> to vector<1x32x1xf32>
    %31 = vector.broadcast %30 : vector<1x32x1xf32> to vector<2x32x256xf32>
    %32 = arith.addf %29, %31 : vector<2x32x256xf32>
    %c0_6 = arith.constant 0 : index
    %c0_7 = arith.constant 0 : index
    %33 = vector.load %arg20[%c0_6, %c0_7] : memref<32x1xf32, #tpu.memory_space<vmem>>, vector<32x1xf32>
    %c0_8 = arith.constant 0 : index
    %c0_9 = arith.constant 0 : index
    %34 = vector.load %arg21[%c0_8, %c0_9] : memref<32x1xf32, #tpu.memory_space<vmem>>, vector<32x1xf32>
    %cst = arith.constant dense<0.000000e+00> : vector<32xf32>
    %35 = vector.multi_reduction <add>, %32, %cst [0, 2] : vector<2x32x256xf32> to vector<32xf32>
    %36 = vector.shape_cast %35 : vector<32xf32> to vector<1x32x1xf32>
    %37 = arith.mulf %32, %32 : vector<2x32x256xf32>
    %cst_10 = arith.constant dense<0.000000e+00> : vector<32xf32>
    %38 = vector.multi_reduction <add>, %37, %cst_10 [0, 2] : vector<2x32x256xf32> to vector<32xf32>
    %39 = vector.shape_cast %38 : vector<32xf32> to vector<1x32x1xf32>
    %cst_11 = arith.constant 0.001953125 : f32
    %40 = vector.broadcast %cst_11 : f32 to vector<1x32x1xf32>
    %41 = arith.mulf %36, %40 : vector<1x32x1xf32>
    %cst_12 = arith.constant 0.001953125 : f32
    %42 = vector.broadcast %cst_12 : f32 to vector<1x32x1xf32>
    %43 = arith.mulf %39, %42 : vector<1x32x1xf32>
    %44 = arith.mulf %41, %41 : vector<1x32x1xf32>
    %45 = arith.subf %43, %44 : vector<1x32x1xf32>
    %cst_13 = arith.constant 9.99999974E-6 : f32
    %46 = vector.broadcast %cst_13 : f32 to vector<1x32x1xf32>
    %47 = arith.addf %45, %46 : vector<1x32x1xf32>
    %48 = math.rsqrt %47 : vector<1x32x1xf32>
    %49 = vector.shape_cast %33 : vector<32x1xf32> to vector<1x32x1xf32>
    %50 = arith.mulf %49, %48 : vector<1x32x1xf32>
    %51 = arith.mulf %41, %50 : vector<1x32x1xf32>
    %52 = vector.shape_cast %34 : vector<32x1xf32> to vector<1x32x1xf32>
    %53 = arith.subf %52, %51 : vector<1x32x1xf32>
    %c0_14 = arith.constant 0 : index
    %c0_15 = arith.constant 0 : index
    %54 = vector.load %arg3[%c0_14, %c0_15] : memref<4x1xf32, #tpu.memory_space<vmem>>, vector<4x1xf32>
    %c4 = arith.constant 4 : index
    %c0_16 = arith.constant 0 : index
    %c0_17 = arith.constant 0 : index
    %55 = vector.load %arg2[%c4, %c0_16, %c0_17] : memref<9x4x1xf32, #tpu.memory_space<vmem>>, vector<1x4x1xf32>
    %56 = vector.shape_cast %55 : vector<1x4x1xf32> to vector<4x1xf32>
    %57 = vector.shape_cast %56 : vector<4x1xf32> to vector<1x4x1xf32>
    %58 = vector.broadcast %57 : vector<1x4x1xf32> to vector<2x4x256xf32>
    %59 = arith.mulf %0, %58 : vector<2x4x256xf32>
    %60 = vector.shape_cast %54 : vector<4x1xf32> to vector<1x4x1xf32>
    %61 = vector.broadcast %60 : vector<1x4x1xf32> to vector<2x4x256xf32>
    %62 = arith.addf %59, %61 : vector<2x4x256xf32>
    %c17_i32 = arith.constant 17 : i32
    %63 = tpu.dynamic_rotate %0 by %c17_i32 dim 2 : vector<2x4x256xf32>, i32 -> vector<2x4x256xf32>
    %c0_18 = arith.constant 0 : index
    %c0_19 = arith.constant 0 : index
    %c0_20 = arith.constant 0 : index
    %64 = vector.load %arg1[%c0_18, %c0_19, %c0_20] : memref<8x1x256xf32, #tpu.memory_space<vmem>>, vector<1x1x256xf32>
    %65 = vector.shape_cast %64 : vector<1x1x256xf32> to vector<1x256xf32>
    %66 = vector.shape_cast %65 : vector<1x256xf32> to vector<1x1x256xf32>
    %67 = vector.broadcast %66 : vector<1x1x256xf32> to vector<2x4x256xf32>
    %68 = arith.mulf %63, %67 : vector<2x4x256xf32>
    %c0_21 = arith.constant 0 : index
    %c0_22 = arith.constant 0 : index
    %c0_23 = arith.constant 0 : index
    %69 = vector.load %arg2[%c0_21, %c0_22, %c0_23] : memref<9x4x1xf32, #tpu.memory_space<vmem>>, vector<1x4x1xf32>
    %70 = vector.shape_cast %69 : vector<1x4x1xf32> to vector<4x1xf32>
    %71 = vector.shape_cast %70 : vector<4x1xf32> to vector<1x4x1xf32>
    %72 = vector.broadcast %71 : vector<1x4x1xf32> to vector<2x4x256xf32>
    %73 = arith.mulf %68, %72 : vector<2x4x256xf32>
    %74 = arith.addf %62, %73 : vector<2x4x256xf32>
    %c16_i32 = arith.constant 16 : i32
    %75 = tpu.dynamic_rotate %0 by %c16_i32 dim 2 : vector<2x4x256xf32>, i32 -> vector<2x4x256xf32>
    %c1 = arith.constant 1 : index
    %c0_24 = arith.constant 0 : index
    %c0_25 = arith.constant 0 : index
    %76 = vector.load %arg1[%c1, %c0_24, %c0_25] : memref<8x1x256xf32, #tpu.memory_space<vmem>>, vector<1x1x256xf32>
    %77 = vector.shape_cast %76 : vector<1x1x256xf32> to vector<1x256xf32>
    %78 = vector.shape_cast %77 : vector<1x256xf32> to vector<1x1x256xf32>
    %79 = vector.broadcast %78 : vector<1x1x256xf32> to vector<2x4x256xf32>
    %80 = arith.mulf %75, %79 : vector<2x4x256xf32>
    %c1_26 = arith.constant 1 : index
    %c0_27 = arith.constant 0 : index
    %c0_28 = arith.constant 0 : index
    %81 = vector.load %arg2[%c1_26, %c0_27, %c0_28] : memref<9x4x1xf32, #tpu.memory_space<vmem>>, vector<1x4x1xf32>
    %82 = vector.shape_cast %81 : vector<1x4x1xf32> to vector<4x1xf32>
    %83 = vector.shape_cast %82 : vector<4x1xf32> to vector<1x4x1xf32>
    %84 = vector.broadcast %83 : vector<1x4x1xf32> to vector<2x4x256xf32>
    %85 = arith.mulf %80, %84 : vector<2x4x256xf32>
    %86 = arith.addf %74, %85 : vector<2x4x256xf32>
    %c15_i32 = arith.constant 15 : i32
    %87 = tpu.dynamic_rotate %0 by %c15_i32 dim 2 : vector<2x4x256xf32>, i32 -> vector<2x4x256xf32>
    %c2 = arith.constant 2 : index
    %c0_29 = arith.constant 0 : index
    %c0_30 = arith.constant 0 : index
    %88 = vector.load %arg1[%c2, %c0_29, %c0_30] : memref<8x1x256xf32, #tpu.memory_space<vmem>>, vector<1x1x256xf32>
    %89 = vector.shape_cast %88 : vector<1x1x256xf32> to vector<1x256xf32>
    %90 = vector.shape_cast %89 : vector<1x256xf32> to vector<1x1x256xf32>
    %91 = vector.broadcast %90 : vector<1x1x256xf32> to vector<2x4x256xf32>
    %92 = arith.mulf %87, %91 : vector<2x4x256xf32>
    %c2_31 = arith.constant 2 : index
    %c0_32 = arith.constant 0 : index
    %c0_33 = arith.constant 0 : index
    %93 = vector.load %arg2[%c2_31, %c0_32, %c0_33] : memref<9x4x1xf32, #tpu.memory_space<vmem>>, vector<1x4x1xf32>
    %94 = vector.shape_cast %93 : vector<1x4x1xf32> to vector<4x1xf32>
    %95 = vector.shape_cast %94 : vector<4x1xf32> to vector<1x4x1xf32>
    %96 = vector.broadcast %95 : vector<1x4x1xf32> to vector<2x4x256xf32>
    %97 = arith.mulf %92, %96 : vector<2x4x256xf32>
    %98 = arith.addf %86, %97 : vector<2x4x256xf32>
    %c1_i32 = arith.constant 1 : i32
    %99 = tpu.dynamic_rotate %0 by %c1_i32 dim 2 : vector<2x4x256xf32>, i32 -> vector<2x4x256xf32>
    %c3 = arith.constant 3 : index
    %c0_34 = arith.constant 0 : index
    %c0_35 = arith.constant 0 : index
    %100 = vector.load %arg1[%c3, %c0_34, %c0_35] : memref<8x1x256xf32, #tpu.memory_space<vmem>>, vector<1x1x256xf32>
    %101 = vector.shape_cast %100 : vector<1x1x256xf32> to vector<1x256xf32>
    %102 = vector.shape_cast %101 : vector<1x256xf32> to vector<1x1x256xf32>
    %103 = vector.broadcast %102 : vector<1x1x256xf32> to vector<2x4x256xf32>
    %104 = arith.mulf %99, %103 : vector<2x4x256xf32>
    %c3_36 = arith.constant 3 : index
    %c0_37 = arith.constant 0 : index
    %c0_38 = arith.constant 0 : index
    %105 = vector.load %arg2[%c3_36, %c0_37, %c0_38] : memref<9x4x1xf32, #tpu.memory_space<vmem>>, vector<1x4x1xf32>
    %106 = vector.shape_cast %105 : vector<1x4x1xf32> to vector<4x1xf32>
    %107 = vector.shape_cast %106 : vector<4x1xf32> to vector<1x4x1xf32>
    %108 = vector.broadcast %107 : vector<1x4x1xf32> to vector<2x4x256xf32>
    %109 = arith.mulf %104, %108 : vector<2x4x256xf32>
    %110 = arith.addf %98, %109 : vector<2x4x256xf32>
    %c255_i32 = arith.constant 255 : i32
    %111 = tpu.dynamic_rotate %0 by %c255_i32 dim 2 : vector<2x4x256xf32>, i32 -> vector<2x4x256xf32>
    %c4_39 = arith.constant 4 : index
    %c0_40 = arith.constant 0 : index
    %c0_41 = arith.constant 0 : index
    %112 = vector.load %arg1[%c4_39, %c0_40, %c0_41] : memref<8x1x256xf32, #tpu.memory_space<vmem>>, vector<1x1x256xf32>
    %113 = vector.shape_cast %112 : vector<1x1x256xf32> to vector<1x256xf32>
    %114 = vector.shape_cast %113 : vector<1x256xf32> to vector<1x1x256xf32>
    %115 = vector.broadcast %114 : vector<1x1x256xf32> to vector<2x4x256xf32>
    %116 = arith.mulf %111, %115 : vector<2x4x256xf32>
    %c5 = arith.constant 5 : index
    %c0_42 = arith.constant 0 : index
    %c0_43 = arith.constant 0 : index
    %117 = vector.load %arg2[%c5, %c0_42, %c0_43] : memref<9x4x1xf32, #tpu.memory_space<vmem>>, vector<1x4x1xf32>
    %118 = vector.shape_cast %117 : vector<1x4x1xf32> to vector<4x1xf32>
    %119 = vector.shape_cast %118 : vector<4x1xf32> to vector<1x4x1xf32>
    %120 = vector.broadcast %119 : vector<1x4x1xf32> to vector<2x4x256xf32>
    %121 = arith.mulf %116, %120 : vector<2x4x256xf32>
    %122 = arith.addf %110, %121 : vector<2x4x256xf32>
    %c241_i32 = arith.constant 241 : i32
    %123 = tpu.dynamic_rotate %0 by %c241_i32 dim 2 : vector<2x4x256xf32>, i32 -> vector<2x4x256xf32>
    %c5_44 = arith.constant 5 : index
    %c0_45 = arith.constant 0 : index
    %c0_46 = arith.constant 0 : index
    %124 = vector.load %arg1[%c5_44, %c0_45, %c0_46] : memref<8x1x256xf32, #tpu.memory_space<vmem>>, vector<1x1x256xf32>
    %125 = vector.shape_cast %124 : vector<1x1x256xf32> to vector<1x256xf32>
    %126 = vector.shape_cast %125 : vector<1x256xf32> to vector<1x1x256xf32>
    %127 = vector.broadcast %126 : vector<1x1x256xf32> to vector<2x4x256xf32>
    %128 = arith.mulf %123, %127 : vector<2x4x256xf32>
    %c6 = arith.constant 6 : index
    %c0_47 = arith.constant 0 : index
    %c0_48 = arith.constant 0 : index
    %129 = vector.load %arg2[%c6, %c0_47, %c0_48] : memref<9x4x1xf32, #tpu.memory_space<vmem>>, vector<1x4x1xf32>
    %130 = vector.shape_cast %129 : vector<1x4x1xf32> to vector<4x1xf32>
    %131 = vector.shape_cast %130 : vector<4x1xf32> to vector<1x4x1xf32>
    %132 = vector.broadcast %131 : vector<1x4x1xf32> to vector<2x4x256xf32>
    %133 = arith.mulf %128, %132 : vector<2x4x256xf32>
    %134 = arith.addf %122, %133 : vector<2x4x256xf32>
    %c240_i32 = arith.constant 240 : i32
    %135 = tpu.dynamic_rotate %0 by %c240_i32 dim 2 : vector<2x4x256xf32>, i32 -> vector<2x4x256xf32>
    %c6_49 = arith.constant 6 : index
    %c0_50 = arith.constant 0 : index
    %c0_51 = arith.constant 0 : index
    %136 = vector.load %arg1[%c6_49, %c0_50, %c0_51] : memref<8x1x256xf32, #tpu.memory_space<vmem>>, vector<1x1x256xf32>
    %137 = vector.shape_cast %136 : vector<1x1x256xf32> to vector<1x256xf32>
    %138 = vector.shape_cast %137 : vector<1x256xf32> to vector<1x1x256xf32>
    %139 = vector.broadcast %138 : vector<1x1x256xf32> to vector<2x4x256xf32>
    %140 = arith.mulf %135, %139 : vector<2x4x256xf32>
    %c7 = arith.constant 7 : index
    %c0_52 = arith.constant 0 : index
    %c0_53 = arith.constant 0 : index
    %141 = vector.load %arg2[%c7, %c0_52, %c0_53] : memref<9x4x1xf32, #tpu.memory_space<vmem>>, vector<1x4x1xf32>
    %142 = vector.shape_cast %141 : vector<1x4x1xf32> to vector<4x1xf32>
    %143 = vector.shape_cast %142 : vector<4x1xf32> to vector<1x4x1xf32>
    %144 = vector.broadcast %143 : vector<1x4x1xf32> to vector<2x4x256xf32>
    %145 = arith.mulf %140, %144 : vector<2x4x256xf32>
    %146 = arith.addf %134, %145 : vector<2x4x256xf32>
    %c239_i32 = arith.constant 239 : i32
    %147 = tpu.dynamic_rotate %0 by %c239_i32 dim 2 : vector<2x4x256xf32>, i32 -> vector<2x4x256xf32>
    %c7_54 = arith.constant 7 : index
    %c0_55 = arith.constant 0 : index
    %c0_56 = arith.constant 0 : index
    %148 = vector.load %arg1[%c7_54, %c0_55, %c0_56] : memref<8x1x256xf32, #tpu.memory_space<vmem>>, vector<1x1x256xf32>
    %149 = vector.shape_cast %148 : vector<1x1x256xf32> to vector<1x256xf32>
    %150 = vector.shape_cast %149 : vector<1x256xf32> to vector<1x1x256xf32>
    %151 = vector.broadcast %150 : vector<1x1x256xf32> to vector<2x4x256xf32>
    %152 = arith.mulf %147, %151 : vector<2x4x256xf32>
    %c8 = arith.constant 8 : index
    %c0_57 = arith.constant 0 : index
    %c0_58 = arith.constant 0 : index
    %153 = vector.load %arg2[%c8, %c0_57, %c0_58] : memref<9x4x1xf32, #tpu.memory_space<vmem>>, vector<1x4x1xf32>
    %154 = vector.shape_cast %153 : vector<1x4x1xf32> to vector<4x1xf32>
    %155 = vector.shape_cast %154 : vector<4x1xf32> to vector<1x4x1xf32>
    %156 = vector.broadcast %155 : vector<1x4x1xf32> to vector<2x4x256xf32>
    %157 = arith.mulf %152, %156 : vector<2x4x256xf32>
    %158 = arith.addf %146, %157 : vector<2x4x256xf32>
    %c0_59 = arith.constant 0 : index
    %c0_60 = arith.constant 0 : index
    %159 = vector.load %arg4[%c0_59, %c0_60] : memref<32x4xf32, #tpu.memory_space<vmem>>, vector<32x4xf32>
    %c0_61 = arith.constant 0 : index
    %c0_62 = arith.constant 0 : index
    %160 = vector.load %arg5[%c0_61, %c0_62] : memref<32x1xf32, #tpu.memory_space<vmem>>, vector<32x1xf32>
    %161 = vector.extract_strided_slice %158 {offsets = [0, 0, 0], sizes = [2, 1, 256], strides = [1, 1, 1]} : vector<2x4x256xf32> to vector<2x1x256xf32>
    %162 = vector.extract_strided_slice %159 {offsets = [0, 0], sizes = [32, 1], strides = [1, 1]} : vector<32x4xf32> to vector<32x1xf32>
    %163 = vector.shape_cast %162 : vector<32x1xf32> to vector<1x32x1xf32>
    %164 = vector.broadcast %161 : vector<2x1x256xf32> to vector<2x32x256xf32>
    %165 = vector.broadcast %163 : vector<1x32x1xf32> to vector<2x32x256xf32>
    %166 = arith.mulf %164, %165 : vector<2x32x256xf32>
    %167 = vector.extract_strided_slice %158 {offsets = [0, 1, 0], sizes = [2, 1, 256], strides = [1, 1, 1]} : vector<2x4x256xf32> to vector<2x1x256xf32>
    %168 = vector.extract_strided_slice %159 {offsets = [0, 1], sizes = [32, 1], strides = [1, 1]} : vector<32x4xf32> to vector<32x1xf32>
    %169 = vector.shape_cast %168 : vector<32x1xf32> to vector<1x32x1xf32>
    %170 = vector.broadcast %167 : vector<2x1x256xf32> to vector<2x32x256xf32>
    %171 = vector.broadcast %169 : vector<1x32x1xf32> to vector<2x32x256xf32>
    %172 = arith.mulf %170, %171 : vector<2x32x256xf32>
    %173 = arith.addf %166, %172 : vector<2x32x256xf32>
    %174 = vector.extract_strided_slice %158 {offsets = [0, 2, 0], sizes = [2, 1, 256], strides = [1, 1, 1]} : vector<2x4x256xf32> to vector<2x1x256xf32>
    %175 = vector.extract_strided_slice %159 {offsets = [0, 2], sizes = [32, 1], strides = [1, 1]} : vector<32x4xf32> to vector<32x1xf32>
    %176 = vector.shape_cast %175 : vector<32x1xf32> to vector<1x32x1xf32>
    %177 = vector.broadcast %174 : vector<2x1x256xf32> to vector<2x32x256xf32>
    %178 = vector.broadcast %176 : vector<1x32x1xf32> to vector<2x32x256xf32>
    %179 = arith.mulf %177, %178 : vector<2x32x256xf32>
    %180 = arith.addf %173, %179 : vector<2x32x256xf32>
    %181 = vector.extract_strided_slice %158 {offsets = [0, 3, 0], sizes = [2, 1, 256], strides = [1, 1, 1]} : vector<2x4x256xf32> to vector<2x1x256xf32>
    %182 = vector.extract_strided_slice %159 {offsets = [0, 3], sizes = [32, 1], strides = [1, 1]} : vector<32x4xf32> to vector<32x1xf32>
    %183 = vector.shape_cast %182 : vector<32x1xf32> to vector<1x32x1xf32>
    %184 = vector.broadcast %181 : vector<2x1x256xf32> to vector<2x32x256xf32>
    %185 = vector.broadcast %183 : vector<1x32x1xf32> to vector<2x32x256xf32>
    %186 = arith.mulf %184, %185 : vector<2x32x256xf32>
    %187 = arith.addf %180, %186 : vector<2x32x256xf32>
    %188 = vector.shape_cast %160 : vector<32x1xf32> to vector<1x32x1xf32>
    %189 = vector.broadcast %188 : vector<1x32x1xf32> to vector<2x32x256xf32>
    %190 = arith.addf %187, %189 : vector<2x32x256xf32>
    %c0_63 = arith.constant 0 : index
    %c0_64 = arith.constant 0 : index
    %191 = vector.load %arg6[%c0_63, %c0_64] : memref<32x1xf32, #tpu.memory_space<vmem>>, vector<32x1xf32>
    %c0_65 = arith.constant 0 : index
    %c0_66 = arith.constant 0 : index
    %192 = vector.load %arg7[%c0_65, %c0_66] : memref<32x1xf32, #tpu.memory_space<vmem>>, vector<32x1xf32>
    %cst_67 = arith.constant dense<0.000000e+00> : vector<32xf32>
    %193 = vector.multi_reduction <add>, %190, %cst_67 [0, 2] : vector<2x32x256xf32> to vector<32xf32>
    %194 = vector.shape_cast %193 : vector<32xf32> to vector<1x32x1xf32>
    %195 = arith.mulf %190, %190 : vector<2x32x256xf32>
    %cst_68 = arith.constant dense<0.000000e+00> : vector<32xf32>
    %196 = vector.multi_reduction <add>, %195, %cst_68 [0, 2] : vector<2x32x256xf32> to vector<32xf32>
    %197 = vector.shape_cast %196 : vector<32xf32> to vector<1x32x1xf32>
    %cst_69 = arith.constant 0.001953125 : f32
    %198 = vector.broadcast %cst_69 : f32 to vector<1x32x1xf32>
    %199 = arith.mulf %194, %198 : vector<1x32x1xf32>
    %cst_70 = arith.constant 0.001953125 : f32
    %200 = vector.broadcast %cst_70 : f32 to vector<1x32x1xf32>
    %201 = arith.mulf %197, %200 : vector<1x32x1xf32>
    %202 = arith.mulf %199, %199 : vector<1x32x1xf32>
    %203 = arith.subf %201, %202 : vector<1x32x1xf32>
    %cst_71 = arith.constant 9.99999974E-6 : f32
    %204 = vector.broadcast %cst_71 : f32 to vector<1x32x1xf32>
    %205 = arith.addf %203, %204 : vector<1x32x1xf32>
    %206 = math.rsqrt %205 : vector<1x32x1xf32>
    %207 = vector.shape_cast %191 : vector<32x1xf32> to vector<1x32x1xf32>
    %208 = arith.mulf %207, %206 : vector<1x32x1xf32>
    %209 = arith.mulf %199, %208 : vector<1x32x1xf32>
    %210 = vector.shape_cast %192 : vector<32x1xf32> to vector<1x32x1xf32>
    %211 = arith.subf %210, %209 : vector<1x32x1xf32>
    %212 = vector.broadcast %208 : vector<1x32x1xf32> to vector<2x32x256xf32>
    %213 = arith.mulf %190, %212 : vector<2x32x256xf32>
    %214 = vector.broadcast %211 : vector<1x32x1xf32> to vector<2x32x256xf32>
    %215 = arith.addf %213, %214 : vector<2x32x256xf32>
    %cst_72 = arith.constant 0.000000e+00 : f32
    %216 = vector.broadcast %cst_72 : f32 to vector<2x32x256xf32>
    %217 = arith.maximumf %215, %216 : vector<2x32x256xf32>
    %c0_73 = arith.constant 0 : index
    %c0_74 = arith.constant 0 : index
    %218 = vector.load %arg9[%c0_73, %c0_74] : memref<32x1xf32, #tpu.memory_space<vmem>>, vector<32x1xf32>
    %c4_75 = arith.constant 4 : index
    %c0_76 = arith.constant 0 : index
    %c0_77 = arith.constant 0 : index
    %219 = vector.load %arg8[%c4_75, %c0_76, %c0_77] : memref<9x32x1xf32, #tpu.memory_space<vmem>>, vector<1x32x1xf32>
    %220 = vector.shape_cast %219 : vector<1x32x1xf32> to vector<32x1xf32>
    %221 = vector.shape_cast %220 : vector<32x1xf32> to vector<1x32x1xf32>
    %222 = vector.broadcast %221 : vector<1x32x1xf32> to vector<2x32x256xf32>
    %223 = arith.mulf %217, %222 : vector<2x32x256xf32>
    %224 = vector.shape_cast %218 : vector<32x1xf32> to vector<1x32x1xf32>
    %225 = vector.broadcast %224 : vector<1x32x1xf32> to vector<2x32x256xf32>
    %226 = arith.addf %223, %225 : vector<2x32x256xf32>
    %c17_i32_78 = arith.constant 17 : i32
    %227 = tpu.dynamic_rotate %217 by %c17_i32_78 dim 2 : vector<2x32x256xf32>, i32 -> vector<2x32x256xf32>
    %c0_79 = arith.constant 0 : index
    %c0_80 = arith.constant 0 : index
    %c0_81 = arith.constant 0 : index
    %228 = vector.load %arg1[%c0_79, %c0_80, %c0_81] : memref<8x1x256xf32, #tpu.memory_space<vmem>>, vector<1x1x256xf32>
    %229 = vector.shape_cast %228 : vector<1x1x256xf32> to vector<1x256xf32>
    %230 = vector.shape_cast %229 : vector<1x256xf32> to vector<1x1x256xf32>
    %231 = vector.broadcast %230 : vector<1x1x256xf32> to vector<2x32x256xf32>
    %232 = arith.mulf %227, %231 : vector<2x32x256xf32>
    %c0_82 = arith.constant 0 : index
    %c0_83 = arith.constant 0 : index
    %c0_84 = arith.constant 0 : index
    %233 = vector.load %arg8[%c0_82, %c0_83, %c0_84] : memref<9x32x1xf32, #tpu.memory_space<vmem>>, vector<1x32x1xf32>
    %234 = vector.shape_cast %233 : vector<1x32x1xf32> to vector<32x1xf32>
    %235 = vector.shape_cast %234 : vector<32x1xf32> to vector<1x32x1xf32>
    %236 = vector.broadcast %235 : vector<1x32x1xf32> to vector<2x32x256xf32>
    %237 = arith.mulf %232, %236 : vector<2x32x256xf32>
    %238 = arith.addf %226, %237 : vector<2x32x256xf32>
    %c16_i32_85 = arith.constant 16 : i32
    %239 = tpu.dynamic_rotate %217 by %c16_i32_85 dim 2 : vector<2x32x256xf32>, i32 -> vector<2x32x256xf32>
    %c1_86 = arith.constant 1 : index
    %c0_87 = arith.constant 0 : index
    %c0_88 = arith.constant 0 : index
    %240 = vector.load %arg1[%c1_86, %c0_87, %c0_88] : memref<8x1x256xf32, #tpu.memory_space<vmem>>, vector<1x1x256xf32>
    %241 = vector.shape_cast %240 : vector<1x1x256xf32> to vector<1x256xf32>
    %242 = vector.shape_cast %241 : vector<1x256xf32> to vector<1x1x256xf32>
    %243 = vector.broadcast %242 : vector<1x1x256xf32> to vector<2x32x256xf32>
    %244 = arith.mulf %239, %243 : vector<2x32x256xf32>
    %c1_89 = arith.constant 1 : index
    %c0_90 = arith.constant 0 : index
    %c0_91 = arith.constant 0 : index
    %245 = vector.load %arg8[%c1_89, %c0_90, %c0_91] : memref<9x32x1xf32, #tpu.memory_space<vmem>>, vector<1x32x1xf32>
    %246 = vector.shape_cast %245 : vector<1x32x1xf32> to vector<32x1xf32>
    %247 = vector.shape_cast %246 : vector<32x1xf32> to vector<1x32x1xf32>
    %248 = vector.broadcast %247 : vector<1x32x1xf32> to vector<2x32x256xf32>
    %249 = arith.mulf %244, %248 : vector<2x32x256xf32>
    %250 = arith.addf %238, %249 : vector<2x32x256xf32>
    %c15_i32_92 = arith.constant 15 : i32
    %251 = tpu.dynamic_rotate %217 by %c15_i32_92 dim 2 : vector<2x32x256xf32>, i32 -> vector<2x32x256xf32>
    %c2_93 = arith.constant 2 : index
    %c0_94 = arith.constant 0 : index
    %c0_95 = arith.constant 0 : index
    %252 = vector.load %arg1[%c2_93, %c0_94, %c0_95] : memref<8x1x256xf32, #tpu.memory_space<vmem>>, vector<1x1x256xf32>
    %253 = vector.shape_cast %252 : vector<1x1x256xf32> to vector<1x256xf32>
    %254 = vector.shape_cast %253 : vector<1x256xf32> to vector<1x1x256xf32>
    %255 = vector.broadcast %254 : vector<1x1x256xf32> to vector<2x32x256xf32>
    %256 = arith.mulf %251, %255 : vector<2x32x256xf32>
    %c2_96 = arith.constant 2 : index
    %c0_97 = arith.constant 0 : index
    %c0_98 = arith.constant 0 : index
    %257 = vector.load %arg8[%c2_96, %c0_97, %c0_98] : memref<9x32x1xf32, #tpu.memory_space<vmem>>, vector<1x32x1xf32>
    %258 = vector.shape_cast %257 : vector<1x32x1xf32> to vector<32x1xf32>
    %259 = vector.shape_cast %258 : vector<32x1xf32> to vector<1x32x1xf32>
    %260 = vector.broadcast %259 : vector<1x32x1xf32> to vector<2x32x256xf32>
    %261 = arith.mulf %256, %260 : vector<2x32x256xf32>
    %262 = arith.addf %250, %261 : vector<2x32x256xf32>
    %c1_i32_99 = arith.constant 1 : i32
    %263 = tpu.dynamic_rotate %217 by %c1_i32_99 dim 2 : vector<2x32x256xf32>, i32 -> vector<2x32x256xf32>
    %c3_100 = arith.constant 3 : index
    %c0_101 = arith.constant 0 : index
    %c0_102 = arith.constant 0 : index
    %264 = vector.load %arg1[%c3_100, %c0_101, %c0_102] : memref<8x1x256xf32, #tpu.memory_space<vmem>>, vector<1x1x256xf32>
    %265 = vector.shape_cast %264 : vector<1x1x256xf32> to vector<1x256xf32>
    %266 = vector.shape_cast %265 : vector<1x256xf32> to vector<1x1x256xf32>
    %267 = vector.broadcast %266 : vector<1x1x256xf32> to vector<2x32x256xf32>
    %268 = arith.mulf %263, %267 : vector<2x32x256xf32>
    %c3_103 = arith.constant 3 : index
    %c0_104 = arith.constant 0 : index
    %c0_105 = arith.constant 0 : index
    %269 = vector.load %arg8[%c3_103, %c0_104, %c0_105] : memref<9x32x1xf32, #tpu.memory_space<vmem>>, vector<1x32x1xf32>
    %270 = vector.shape_cast %269 : vector<1x32x1xf32> to vector<32x1xf32>
    %271 = vector.shape_cast %270 : vector<32x1xf32> to vector<1x32x1xf32>
    %272 = vector.broadcast %271 : vector<1x32x1xf32> to vector<2x32x256xf32>
    %273 = arith.mulf %268, %272 : vector<2x32x256xf32>
    %274 = arith.addf %262, %273 : vector<2x32x256xf32>
    %c255_i32_106 = arith.constant 255 : i32
    %275 = tpu.dynamic_rotate %217 by %c255_i32_106 dim 2 : vector<2x32x256xf32>, i32 -> vector<2x32x256xf32>
    %c4_107 = arith.constant 4 : index
    %c0_108 = arith.constant 0 : index
    %c0_109 = arith.constant 0 : index
    %276 = vector.load %arg1[%c4_107, %c0_108, %c0_109] : memref<8x1x256xf32, #tpu.memory_space<vmem>>, vector<1x1x256xf32>
    %277 = vector.shape_cast %276 : vector<1x1x256xf32> to vector<1x256xf32>
    %278 = vector.shape_cast %277 : vector<1x256xf32> to vector<1x1x256xf32>
    %279 = vector.broadcast %278 : vector<1x1x256xf32> to vector<2x32x256xf32>
    %280 = arith.mulf %275, %279 : vector<2x32x256xf32>
    %c5_110 = arith.constant 5 : index
    %c0_111 = arith.constant 0 : index
    %c0_112 = arith.constant 0 : index
    %281 = vector.load %arg8[%c5_110, %c0_111, %c0_112] : memref<9x32x1xf32, #tpu.memory_space<vmem>>, vector<1x32x1xf32>
    %282 = vector.shape_cast %281 : vector<1x32x1xf32> to vector<32x1xf32>
    %283 = vector.shape_cast %282 : vector<32x1xf32> to vector<1x32x1xf32>
    %284 = vector.broadcast %283 : vector<1x32x1xf32> to vector<2x32x256xf32>
    %285 = arith.mulf %280, %284 : vector<2x32x256xf32>
    %286 = arith.addf %274, %285 : vector<2x32x256xf32>
    %c241_i32_113 = arith.constant 241 : i32
    %287 = tpu.dynamic_rotate %217 by %c241_i32_113 dim 2 : vector<2x32x256xf32>, i32 -> vector<2x32x256xf32>
    %c5_114 = arith.constant 5 : index
    %c0_115 = arith.constant 0 : index
    %c0_116 = arith.constant 0 : index
    %288 = vector.load %arg1[%c5_114, %c0_115, %c0_116] : memref<8x1x256xf32, #tpu.memory_space<vmem>>, vector<1x1x256xf32>
    %289 = vector.shape_cast %288 : vector<1x1x256xf32> to vector<1x256xf32>
    %290 = vector.shape_cast %289 : vector<1x256xf32> to vector<1x1x256xf32>
    %291 = vector.broadcast %290 : vector<1x1x256xf32> to vector<2x32x256xf32>
    %292 = arith.mulf %287, %291 : vector<2x32x256xf32>
    %c6_117 = arith.constant 6 : index
    %c0_118 = arith.constant 0 : index
    %c0_119 = arith.constant 0 : index
    %293 = vector.load %arg8[%c6_117, %c0_118, %c0_119] : memref<9x32x1xf32, #tpu.memory_space<vmem>>, vector<1x32x1xf32>
    %294 = vector.shape_cast %293 : vector<1x32x1xf32> to vector<32x1xf32>
    %295 = vector.shape_cast %294 : vector<32x1xf32> to vector<1x32x1xf32>
    %296 = vector.broadcast %295 : vector<1x32x1xf32> to vector<2x32x256xf32>
    %297 = arith.mulf %292, %296 : vector<2x32x256xf32>
    %298 = arith.addf %286, %297 : vector<2x32x256xf32>
    %c240_i32_120 = arith.constant 240 : i32
    %299 = tpu.dynamic_rotate %217 by %c240_i32_120 dim 2 : vector<2x32x256xf32>, i32 -> vector<2x32x256xf32>
    %c6_121 = arith.constant 6 : index
    %c0_122 = arith.constant 0 : index
    %c0_123 = arith.constant 0 : index
    %300 = vector.load %arg1[%c6_121, %c0_122, %c0_123] : memref<8x1x256xf32, #tpu.memory_space<vmem>>, vector<1x1x256xf32>
    %301 = vector.shape_cast %300 : vector<1x1x256xf32> to vector<1x256xf32>
    %302 = vector.shape_cast %301 : vector<1x256xf32> to vector<1x1x256xf32>
    %303 = vector.broadcast %302 : vector<1x1x256xf32> to vector<2x32x256xf32>
    %304 = arith.mulf %299, %303 : vector<2x32x256xf32>
    %c7_124 = arith.constant 7 : index
    %c0_125 = arith.constant 0 : index
    %c0_126 = arith.constant 0 : index
    %305 = vector.load %arg8[%c7_124, %c0_125, %c0_126] : memref<9x32x1xf32, #tpu.memory_space<vmem>>, vector<1x32x1xf32>
    %306 = vector.shape_cast %305 : vector<1x32x1xf32> to vector<32x1xf32>
    %307 = vector.shape_cast %306 : vector<32x1xf32> to vector<1x32x1xf32>
    %308 = vector.broadcast %307 : vector<1x32x1xf32> to vector<2x32x256xf32>
    %309 = arith.mulf %304, %308 : vector<2x32x256xf32>
    %310 = arith.addf %298, %309 : vector<2x32x256xf32>
    %c239_i32_127 = arith.constant 239 : i32
    %311 = tpu.dynamic_rotate %217 by %c239_i32_127 dim 2 : vector<2x32x256xf32>, i32 -> vector<2x32x256xf32>
    %c7_128 = arith.constant 7 : index
    %c0_129 = arith.constant 0 : index
    %c0_130 = arith.constant 0 : index
    %312 = vector.load %arg1[%c7_128, %c0_129, %c0_130] : memref<8x1x256xf32, #tpu.memory_space<vmem>>, vector<1x1x256xf32>
    %313 = vector.shape_cast %312 : vector<1x1x256xf32> to vector<1x256xf32>
    %314 = vector.shape_cast %313 : vector<1x256xf32> to vector<1x1x256xf32>
    %315 = vector.broadcast %314 : vector<1x1x256xf32> to vector<2x32x256xf32>
    %316 = arith.mulf %311, %315 : vector<2x32x256xf32>
    %c8_131 = arith.constant 8 : index
    %c0_132 = arith.constant 0 : index
    %c0_133 = arith.constant 0 : index
    %317 = vector.load %arg8[%c8_131, %c0_132, %c0_133] : memref<9x32x1xf32, #tpu.memory_space<vmem>>, vector<1x32x1xf32>
    %318 = vector.shape_cast %317 : vector<1x32x1xf32> to vector<32x1xf32>
    %319 = vector.shape_cast %318 : vector<32x1xf32> to vector<1x32x1xf32>
    %320 = vector.broadcast %319 : vector<1x32x1xf32> to vector<2x32x256xf32>
    %321 = arith.mulf %316, %320 : vector<2x32x256xf32>
    %322 = arith.addf %310, %321 : vector<2x32x256xf32>
    %c0_134 = arith.constant 0 : index
    %c0_135 = arith.constant 0 : index
    %323 = vector.load %arg10[%c0_134, %c0_135] : memref<32x32xf32, #tpu.memory_space<vmem>>, vector<32x32xf32>
    %c0_136 = arith.constant 0 : index
    %c0_137 = arith.constant 0 : index
    %324 = vector.load %arg11[%c0_136, %c0_137] : memref<32x1xf32, #tpu.memory_space<vmem>>, vector<32x1xf32>
    %325 = vector.extract_strided_slice %322 {offsets = [0, 0, 0], sizes = [2, 1, 256], strides = [1, 1, 1]} : vector<2x32x256xf32> to vector<2x1x256xf32>
    %326 = vector.extract_strided_slice %323 {offsets = [0, 0], sizes = [32, 1], strides = [1, 1]} : vector<32x32xf32> to vector<32x1xf32>
    %327 = vector.shape_cast %326 : vector<32x1xf32> to vector<1x32x1xf32>
    %328 = vector.broadcast %325 : vector<2x1x256xf32> to vector<2x32x256xf32>
    %329 = vector.broadcast %327 : vector<1x32x1xf32> to vector<2x32x256xf32>
    %330 = arith.mulf %328, %329 : vector<2x32x256xf32>
    %331 = vector.extract_strided_slice %322 {offsets = [0, 1, 0], sizes = [2, 1, 256], strides = [1, 1, 1]} : vector<2x32x256xf32> to vector<2x1x256xf32>
    %332 = vector.extract_strided_slice %323 {offsets = [0, 1], sizes = [32, 1], strides = [1, 1]} : vector<32x32xf32> to vector<32x1xf32>
    %333 = vector.shape_cast %332 : vector<32x1xf32> to vector<1x32x1xf32>
    %334 = vector.broadcast %331 : vector<2x1x256xf32> to vector<2x32x256xf32>
    %335 = vector.broadcast %333 : vector<1x32x1xf32> to vector<2x32x256xf32>
    %336 = arith.mulf %334, %335 : vector<2x32x256xf32>
    %337 = arith.addf %330, %336 : vector<2x32x256xf32>
    %338 = vector.extract_strided_slice %322 {offsets = [0, 2, 0], sizes = [2, 1, 256], strides = [1, 1, 1]} : vector<2x32x256xf32> to vector<2x1x256xf32>
    %339 = vector.extract_strided_slice %323 {offsets = [0, 2], sizes = [32, 1], strides = [1, 1]} : vector<32x32xf32> to vector<32x1xf32>
    %340 = vector.shape_cast %339 : vector<32x1xf32> to vector<1x32x1xf32>
    %341 = vector.broadcast %338 : vector<2x1x256xf32> to vector<2x32x256xf32>
    %342 = vector.broadcast %340 : vector<1x32x1xf32> to vector<2x32x256xf32>
    %343 = arith.mulf %341, %342 : vector<2x32x256xf32>
    %344 = arith.addf %337, %343 : vector<2x32x256xf32>
    %345 = vector.extract_strided_slice %322 {offsets = [0, 3, 0], sizes = [2, 1, 256], strides = [1, 1, 1]} : vector<2x32x256xf32> to vector<2x1x256xf32>
    %346 = vector.extract_strided_slice %323 {offsets = [0, 3], sizes = [32, 1], strides = [1, 1]} : vector<32x32xf32> to vector<32x1xf32>
    %347 = vector.shape_cast %346 : vector<32x1xf32> to vector<1x32x1xf32>
    %348 = vector.broadcast %345 : vector<2x1x256xf32> to vector<2x32x256xf32>
    %349 = vector.broadcast %347 : vector<1x32x1xf32> to vector<2x32x256xf32>
    %350 = arith.mulf %348, %349 : vector<2x32x256xf32>
    %351 = arith.addf %344, %350 : vector<2x32x256xf32>
    %352 = vector.extract_strided_slice %322 {offsets = [0, 4, 0], sizes = [2, 1, 256], strides = [1, 1, 1]} : vector<2x32x256xf32> to vector<2x1x256xf32>
    %353 = vector.extract_strided_slice %323 {offsets = [0, 4], sizes = [32, 1], strides = [1, 1]} : vector<32x32xf32> to vector<32x1xf32>
    %354 = vector.shape_cast %353 : vector<32x1xf32> to vector<1x32x1xf32>
    %355 = vector.broadcast %352 : vector<2x1x256xf32> to vector<2x32x256xf32>
    %356 = vector.broadcast %354 : vector<1x32x1xf32> to vector<2x32x256xf32>
    %357 = arith.mulf %355, %356 : vector<2x32x256xf32>
    %358 = arith.addf %351, %357 : vector<2x32x256xf32>
    %359 = vector.extract_strided_slice %322 {offsets = [0, 5, 0], sizes = [2, 1, 256], strides = [1, 1, 1]} : vector<2x32x256xf32> to vector<2x1x256xf32>
    %360 = vector.extract_strided_slice %323 {offsets = [0, 5], sizes = [32, 1], strides = [1, 1]} : vector<32x32xf32> to vector<32x1xf32>
    %361 = vector.shape_cast %360 : vector<32x1xf32> to vector<1x32x1xf32>
    %362 = vector.broadcast %359 : vector<2x1x256xf32> to vector<2x32x256xf32>
    %363 = vector.broadcast %361 : vector<1x32x1xf32> to vector<2x32x256xf32>
    %364 = arith.mulf %362, %363 : vector<2x32x256xf32>
    %365 = arith.addf %358, %364 : vector<2x32x256xf32>
    %366 = vector.extract_strided_slice %322 {offsets = [0, 6, 0], sizes = [2, 1, 256], strides = [1, 1, 1]} : vector<2x32x256xf32> to vector<2x1x256xf32>
    %367 = vector.extract_strided_slice %323 {offsets = [0, 6], sizes = [32, 1], strides = [1, 1]} : vector<32x32xf32> to vector<32x1xf32>
    %368 = vector.shape_cast %367 : vector<32x1xf32> to vector<1x32x1xf32>
    %369 = vector.broadcast %366 : vector<2x1x256xf32> to vector<2x32x256xf32>
    %370 = vector.broadcast %368 : vector<1x32x1xf32> to vector<2x32x256xf32>
    %371 = arith.mulf %369, %370 : vector<2x32x256xf32>
    %372 = arith.addf %365, %371 : vector<2x32x256xf32>
    %373 = vector.extract_strided_slice %322 {offsets = [0, 7, 0], sizes = [2, 1, 256], strides = [1, 1, 1]} : vector<2x32x256xf32> to vector<2x1x256xf32>
    %374 = vector.extract_strided_slice %323 {offsets = [0, 7], sizes = [32, 1], strides = [1, 1]} : vector<32x32xf32> to vector<32x1xf32>
    %375 = vector.shape_cast %374 : vector<32x1xf32> to vector<1x32x1xf32>
    %376 = vector.broadcast %373 : vector<2x1x256xf32> to vector<2x32x256xf32>
    %377 = vector.broadcast %375 : vector<1x32x1xf32> to vector<2x32x256xf32>
    %378 = arith.mulf %376, %377 : vector<2x32x256xf32>
    %379 = arith.addf %372, %378 : vector<2x32x256xf32>
    %380 = vector.extract_strided_slice %322 {offsets = [0, 8, 0], sizes = [2, 1, 256], strides = [1, 1, 1]} : vector<2x32x256xf32> to vector<2x1x256xf32>
    %381 = vector.extract_strided_slice %323 {offsets = [0, 8], sizes = [32, 1], strides = [1, 1]} : vector<32x32xf32> to vector<32x1xf32>
    %382 = vector.shape_cast %381 : vector<32x1xf32> to vector<1x32x1xf32>
    %383 = vector.broadcast %380 : vector<2x1x256xf32> to vector<2x32x256xf32>
    %384 = vector.broadcast %382 : vector<1x32x1xf32> to vector<2x32x256xf32>
    %385 = arith.mulf %383, %384 : vector<2x32x256xf32>
    %386 = arith.addf %379, %385 : vector<2x32x256xf32>
    %387 = vector.extract_strided_slice %322 {offsets = [0, 9, 0], sizes = [2, 1, 256], strides = [1, 1, 1]} : vector<2x32x256xf32> to vector<2x1x256xf32>
    %388 = vector.extract_strided_slice %323 {offsets = [0, 9], sizes = [32, 1], strides = [1, 1]} : vector<32x32xf32> to vector<32x1xf32>
    %389 = vector.shape_cast %388 : vector<32x1xf32> to vector<1x32x1xf32>
    %390 = vector.broadcast %387 : vector<2x1x256xf32> to vector<2x32x256xf32>
    %391 = vector.broadcast %389 : vector<1x32x1xf32> to vector<2x32x256xf32>
    %392 = arith.mulf %390, %391 : vector<2x32x256xf32>
    %393 = arith.addf %386, %392 : vector<2x32x256xf32>
    %394 = vector.extract_strided_slice %322 {offsets = [0, 10, 0], sizes = [2, 1, 256], strides = [1, 1, 1]} : vector<2x32x256xf32> to vector<2x1x256xf32>
    %395 = vector.extract_strided_slice %323 {offsets = [0, 10], sizes = [32, 1], strides = [1, 1]} : vector<32x32xf32> to vector<32x1xf32>
    %396 = vector.shape_cast %395 : vector<32x1xf32> to vector<1x32x1xf32>
    %397 = vector.broadcast %394 : vector<2x1x256xf32> to vector<2x32x256xf32>
    %398 = vector.broadcast %396 : vector<1x32x1xf32> to vector<2x32x256xf32>
    %399 = arith.mulf %397, %398 : vector<2x32x256xf32>
    %400 = arith.addf %393, %399 : vector<2x32x256xf32>
    %401 = vector.extract_strided_slice %322 {offsets = [0, 11, 0], sizes = [2, 1, 256], strides = [1, 1, 1]} : vector<2x32x256xf32> to vector<2x1x256xf32>
    %402 = vector.extract_strided_slice %323 {offsets = [0, 11], sizes = [32, 1], strides = [1, 1]} : vector<32x32xf32> to vector<32x1xf32>
    %403 = vector.shape_cast %402 : vector<32x1xf32> to vector<1x32x1xf32>
    %404 = vector.broadcast %401 : vector<2x1x256xf32> to vector<2x32x256xf32>
    %405 = vector.broadcast %403 : vector<1x32x1xf32> to vector<2x32x256xf32>
    %406 = arith.mulf %404, %405 : vector<2x32x256xf32>
    %407 = arith.addf %400, %406 : vector<2x32x256xf32>
    %408 = vector.extract_strided_slice %322 {offsets = [0, 12, 0], sizes = [2, 1, 256], strides = [1, 1, 1]} : vector<2x32x256xf32> to vector<2x1x256xf32>
    %409 = vector.extract_strided_slice %323 {offsets = [0, 12], sizes = [32, 1], strides = [1, 1]} : vector<32x32xf32> to vector<32x1xf32>
    %410 = vector.shape_cast %409 : vector<32x1xf32> to vector<1x32x1xf32>
    %411 = vector.broadcast %408 : vector<2x1x256xf32> to vector<2x32x256xf32>
    %412 = vector.broadcast %410 : vector<1x32x1xf32> to vector<2x32x256xf32>
    %413 = arith.mulf %411, %412 : vector<2x32x256xf32>
    %414 = arith.addf %407, %413 : vector<2x32x256xf32>
    %415 = vector.extract_strided_slice %322 {offsets = [0, 13, 0], sizes = [2, 1, 256], strides = [1, 1, 1]} : vector<2x32x256xf32> to vector<2x1x256xf32>
    %416 = vector.extract_strided_slice %323 {offsets = [0, 13], sizes = [32, 1], strides = [1, 1]} : vector<32x32xf32> to vector<32x1xf32>
    %417 = vector.shape_cast %416 : vector<32x1xf32> to vector<1x32x1xf32>
    %418 = vector.broadcast %415 : vector<2x1x256xf32> to vector<2x32x256xf32>
    %419 = vector.broadcast %417 : vector<1x32x1xf32> to vector<2x32x256xf32>
    %420 = arith.mulf %418, %419 : vector<2x32x256xf32>
    %421 = arith.addf %414, %420 : vector<2x32x256xf32>
    %422 = vector.extract_strided_slice %322 {offsets = [0, 14, 0], sizes = [2, 1, 256], strides = [1, 1, 1]} : vector<2x32x256xf32> to vector<2x1x256xf32>
    %423 = vector.extract_strided_slice %323 {offsets = [0, 14], sizes = [32, 1], strides = [1, 1]} : vector<32x32xf32> to vector<32x1xf32>
    %424 = vector.shape_cast %423 : vector<32x1xf32> to vector<1x32x1xf32>
    %425 = vector.broadcast %422 : vector<2x1x256xf32> to vector<2x32x256xf32>
    %426 = vector.broadcast %424 : vector<1x32x1xf32> to vector<2x32x256xf32>
    %427 = arith.mulf %425, %426 : vector<2x32x256xf32>
    %428 = arith.addf %421, %427 : vector<2x32x256xf32>
    %429 = vector.extract_strided_slice %322 {offsets = [0, 15, 0], sizes = [2, 1, 256], strides = [1, 1, 1]} : vector<2x32x256xf32> to vector<2x1x256xf32>
    %430 = vector.extract_strided_slice %323 {offsets = [0, 15], sizes = [32, 1], strides = [1, 1]} : vector<32x32xf32> to vector<32x1xf32>
    %431 = vector.shape_cast %430 : vector<32x1xf32> to vector<1x32x1xf32>
    %432 = vector.broadcast %429 : vector<2x1x256xf32> to vector<2x32x256xf32>
    %433 = vector.broadcast %431 : vector<1x32x1xf32> to vector<2x32x256xf32>
    %434 = arith.mulf %432, %433 : vector<2x32x256xf32>
    %435 = arith.addf %428, %434 : vector<2x32x256xf32>
    %436 = vector.extract_strided_slice %322 {offsets = [0, 16, 0], sizes = [2, 1, 256], strides = [1, 1, 1]} : vector<2x32x256xf32> to vector<2x1x256xf32>
    %437 = vector.extract_strided_slice %323 {offsets = [0, 16], sizes = [32, 1], strides = [1, 1]} : vector<32x32xf32> to vector<32x1xf32>
    %438 = vector.shape_cast %437 : vector<32x1xf32> to vector<1x32x1xf32>
    %439 = vector.broadcast %436 : vector<2x1x256xf32> to vector<2x32x256xf32>
    %440 = vector.broadcast %438 : vector<1x32x1xf32> to vector<2x32x256xf32>
    %441 = arith.mulf %439, %440 : vector<2x32x256xf32>
    %442 = arith.addf %435, %441 : vector<2x32x256xf32>
    %443 = vector.extract_strided_slice %322 {offsets = [0, 17, 0], sizes = [2, 1, 256], strides = [1, 1, 1]} : vector<2x32x256xf32> to vector<2x1x256xf32>
    %444 = vector.extract_strided_slice %323 {offsets = [0, 17], sizes = [32, 1], strides = [1, 1]} : vector<32x32xf32> to vector<32x1xf32>
    %445 = vector.shape_cast %444 : vector<32x1xf32> to vector<1x32x1xf32>
    %446 = vector.broadcast %443 : vector<2x1x256xf32> to vector<2x32x256xf32>
    %447 = vector.broadcast %445 : vector<1x32x1xf32> to vector<2x32x256xf32>
    %448 = arith.mulf %446, %447 : vector<2x32x256xf32>
    %449 = arith.addf %442, %448 : vector<2x32x256xf32>
    %450 = vector.extract_strided_slice %322 {offsets = [0, 18, 0], sizes = [2, 1, 256], strides = [1, 1, 1]} : vector<2x32x256xf32> to vector<2x1x256xf32>
    %451 = vector.extract_strided_slice %323 {offsets = [0, 18], sizes = [32, 1], strides = [1, 1]} : vector<32x32xf32> to vector<32x1xf32>
    %452 = vector.shape_cast %451 : vector<32x1xf32> to vector<1x32x1xf32>
    %453 = vector.broadcast %450 : vector<2x1x256xf32> to vector<2x32x256xf32>
    %454 = vector.broadcast %452 : vector<1x32x1xf32> to vector<2x32x256xf32>
    %455 = arith.mulf %453, %454 : vector<2x32x256xf32>
    %456 = arith.addf %449, %455 : vector<2x32x256xf32>
    %457 = vector.extract_strided_slice %322 {offsets = [0, 19, 0], sizes = [2, 1, 256], strides = [1, 1, 1]} : vector<2x32x256xf32> to vector<2x1x256xf32>
    %458 = vector.extract_strided_slice %323 {offsets = [0, 19], sizes = [32, 1], strides = [1, 1]} : vector<32x32xf32> to vector<32x1xf32>
    %459 = vector.shape_cast %458 : vector<32x1xf32> to vector<1x32x1xf32>
    %460 = vector.broadcast %457 : vector<2x1x256xf32> to vector<2x32x256xf32>
    %461 = vector.broadcast %459 : vector<1x32x1xf32> to vector<2x32x256xf32>
    %462 = arith.mulf %460, %461 : vector<2x32x256xf32>
    %463 = arith.addf %456, %462 : vector<2x32x256xf32>
    %464 = vector.extract_strided_slice %322 {offsets = [0, 20, 0], sizes = [2, 1, 256], strides = [1, 1, 1]} : vector<2x32x256xf32> to vector<2x1x256xf32>
    %465 = vector.extract_strided_slice %323 {offsets = [0, 20], sizes = [32, 1], strides = [1, 1]} : vector<32x32xf32> to vector<32x1xf32>
    %466 = vector.shape_cast %465 : vector<32x1xf32> to vector<1x32x1xf32>
    %467 = vector.broadcast %464 : vector<2x1x256xf32> to vector<2x32x256xf32>
    %468 = vector.broadcast %466 : vector<1x32x1xf32> to vector<2x32x256xf32>
    %469 = arith.mulf %467, %468 : vector<2x32x256xf32>
    %470 = arith.addf %463, %469 : vector<2x32x256xf32>
    %471 = vector.extract_strided_slice %322 {offsets = [0, 21, 0], sizes = [2, 1, 256], strides = [1, 1, 1]} : vector<2x32x256xf32> to vector<2x1x256xf32>
    %472 = vector.extract_strided_slice %323 {offsets = [0, 21], sizes = [32, 1], strides = [1, 1]} : vector<32x32xf32> to vector<32x1xf32>
    %473 = vector.shape_cast %472 : vector<32x1xf32> to vector<1x32x1xf32>
    %474 = vector.broadcast %471 : vector<2x1x256xf32> to vector<2x32x256xf32>
    %475 = vector.broadcast %473 : vector<1x32x1xf32> to vector<2x32x256xf32>
    %476 = arith.mulf %474, %475 : vector<2x32x256xf32>
    %477 = arith.addf %470, %476 : vector<2x32x256xf32>
    %478 = vector.extract_strided_slice %322 {offsets = [0, 22, 0], sizes = [2, 1, 256], strides = [1, 1, 1]} : vector<2x32x256xf32> to vector<2x1x256xf32>
    %479 = vector.extract_strided_slice %323 {offsets = [0, 22], sizes = [32, 1], strides = [1, 1]} : vector<32x32xf32> to vector<32x1xf32>
    %480 = vector.shape_cast %479 : vector<32x1xf32> to vector<1x32x1xf32>
    %481 = vector.broadcast %478 : vector<2x1x256xf32> to vector<2x32x256xf32>
    %482 = vector.broadcast %480 : vector<1x32x1xf32> to vector<2x32x256xf32>
    %483 = arith.mulf %481, %482 : vector<2x32x256xf32>
    %484 = arith.addf %477, %483 : vector<2x32x256xf32>
    %485 = vector.extract_strided_slice %322 {offsets = [0, 23, 0], sizes = [2, 1, 256], strides = [1, 1, 1]} : vector<2x32x256xf32> to vector<2x1x256xf32>
    %486 = vector.extract_strided_slice %323 {offsets = [0, 23], sizes = [32, 1], strides = [1, 1]} : vector<32x32xf32> to vector<32x1xf32>
    %487 = vector.shape_cast %486 : vector<32x1xf32> to vector<1x32x1xf32>
    %488 = vector.broadcast %485 : vector<2x1x256xf32> to vector<2x32x256xf32>
    %489 = vector.broadcast %487 : vector<1x32x1xf32> to vector<2x32x256xf32>
    %490 = arith.mulf %488, %489 : vector<2x32x256xf32>
    %491 = arith.addf %484, %490 : vector<2x32x256xf32>
    %492 = vector.extract_strided_slice %322 {offsets = [0, 24, 0], sizes = [2, 1, 256], strides = [1, 1, 1]} : vector<2x32x256xf32> to vector<2x1x256xf32>
    %493 = vector.extract_strided_slice %323 {offsets = [0, 24], sizes = [32, 1], strides = [1, 1]} : vector<32x32xf32> to vector<32x1xf32>
    %494 = vector.shape_cast %493 : vector<32x1xf32> to vector<1x32x1xf32>
    %495 = vector.broadcast %492 : vector<2x1x256xf32> to vector<2x32x256xf32>
    %496 = vector.broadcast %494 : vector<1x32x1xf32> to vector<2x32x256xf32>
    %497 = arith.mulf %495, %496 : vector<2x32x256xf32>
    %498 = arith.addf %491, %497 : vector<2x32x256xf32>
    %499 = vector.extract_strided_slice %322 {offsets = [0, 25, 0], sizes = [2, 1, 256], strides = [1, 1, 1]} : vector<2x32x256xf32> to vector<2x1x256xf32>
    %500 = vector.extract_strided_slice %323 {offsets = [0, 25], sizes = [32, 1], strides = [1, 1]} : vector<32x32xf32> to vector<32x1xf32>
    %501 = vector.shape_cast %500 : vector<32x1xf32> to vector<1x32x1xf32>
    %502 = vector.broadcast %499 : vector<2x1x256xf32> to vector<2x32x256xf32>
    %503 = vector.broadcast %501 : vector<1x32x1xf32> to vector<2x32x256xf32>
    %504 = arith.mulf %502, %503 : vector<2x32x256xf32>
    %505 = arith.addf %498, %504 : vector<2x32x256xf32>
    %506 = vector.extract_strided_slice %322 {offsets = [0, 26, 0], sizes = [2, 1, 256], strides = [1, 1, 1]} : vector<2x32x256xf32> to vector<2x1x256xf32>
    %507 = vector.extract_strided_slice %323 {offsets = [0, 26], sizes = [32, 1], strides = [1, 1]} : vector<32x32xf32> to vector<32x1xf32>
    %508 = vector.shape_cast %507 : vector<32x1xf32> to vector<1x32x1xf32>
    %509 = vector.broadcast %506 : vector<2x1x256xf32> to vector<2x32x256xf32>
    %510 = vector.broadcast %508 : vector<1x32x1xf32> to vector<2x32x256xf32>
    %511 = arith.mulf %509, %510 : vector<2x32x256xf32>
    %512 = arith.addf %505, %511 : vector<2x32x256xf32>
    %513 = vector.extract_strided_slice %322 {offsets = [0, 27, 0], sizes = [2, 1, 256], strides = [1, 1, 1]} : vector<2x32x256xf32> to vector<2x1x256xf32>
    %514 = vector.extract_strided_slice %323 {offsets = [0, 27], sizes = [32, 1], strides = [1, 1]} : vector<32x32xf32> to vector<32x1xf32>
    %515 = vector.shape_cast %514 : vector<32x1xf32> to vector<1x32x1xf32>
    %516 = vector.broadcast %513 : vector<2x1x256xf32> to vector<2x32x256xf32>
    %517 = vector.broadcast %515 : vector<1x32x1xf32> to vector<2x32x256xf32>
    %518 = arith.mulf %516, %517 : vector<2x32x256xf32>
    %519 = arith.addf %512, %518 : vector<2x32x256xf32>
    %520 = vector.extract_strided_slice %322 {offsets = [0, 28, 0], sizes = [2, 1, 256], strides = [1, 1, 1]} : vector<2x32x256xf32> to vector<2x1x256xf32>
    %521 = vector.extract_strided_slice %323 {offsets = [0, 28], sizes = [32, 1], strides = [1, 1]} : vector<32x32xf32> to vector<32x1xf32>
    %522 = vector.shape_cast %521 : vector<32x1xf32> to vector<1x32x1xf32>
    %523 = vector.broadcast %520 : vector<2x1x256xf32> to vector<2x32x256xf32>
    %524 = vector.broadcast %522 : vector<1x32x1xf32> to vector<2x32x256xf32>
    %525 = arith.mulf %523, %524 : vector<2x32x256xf32>
    %526 = arith.addf %519, %525 : vector<2x32x256xf32>
    %527 = vector.extract_strided_slice %322 {offsets = [0, 29, 0], sizes = [2, 1, 256], strides = [1, 1, 1]} : vector<2x32x256xf32> to vector<2x1x256xf32>
    %528 = vector.extract_strided_slice %323 {offsets = [0, 29], sizes = [32, 1], strides = [1, 1]} : vector<32x32xf32> to vector<32x1xf32>
    %529 = vector.shape_cast %528 : vector<32x1xf32> to vector<1x32x1xf32>
    %530 = vector.broadcast %527 : vector<2x1x256xf32> to vector<2x32x256xf32>
    %531 = vector.broadcast %529 : vector<1x32x1xf32> to vector<2x32x256xf32>
    %532 = arith.mulf %530, %531 : vector<2x32x256xf32>
    %533 = arith.addf %526, %532 : vector<2x32x256xf32>
    %534 = vector.extract_strided_slice %322 {offsets = [0, 30, 0], sizes = [2, 1, 256], strides = [1, 1, 1]} : vector<2x32x256xf32> to vector<2x1x256xf32>
    %535 = vector.extract_strided_slice %323 {offsets = [0, 30], sizes = [32, 1], strides = [1, 1]} : vector<32x32xf32> to vector<32x1xf32>
    %536 = vector.shape_cast %535 : vector<32x1xf32> to vector<1x32x1xf32>
    %537 = vector.broadcast %534 : vector<2x1x256xf32> to vector<2x32x256xf32>
    %538 = vector.broadcast %536 : vector<1x32x1xf32> to vector<2x32x256xf32>
    %539 = arith.mulf %537, %538 : vector<2x32x256xf32>
    %540 = arith.addf %533, %539 : vector<2x32x256xf32>
    %541 = vector.extract_strided_slice %322 {offsets = [0, 31, 0], sizes = [2, 1, 256], strides = [1, 1, 1]} : vector<2x32x256xf32> to vector<2x1x256xf32>
    %542 = vector.extract_strided_slice %323 {offsets = [0, 31], sizes = [32, 1], strides = [1, 1]} : vector<32x32xf32> to vector<32x1xf32>
    %543 = vector.shape_cast %542 : vector<32x1xf32> to vector<1x32x1xf32>
    %544 = vector.broadcast %541 : vector<2x1x256xf32> to vector<2x32x256xf32>
    %545 = vector.broadcast %543 : vector<1x32x1xf32> to vector<2x32x256xf32>
    %546 = arith.mulf %544, %545 : vector<2x32x256xf32>
    %547 = arith.addf %540, %546 : vector<2x32x256xf32>
    %548 = vector.shape_cast %324 : vector<32x1xf32> to vector<1x32x1xf32>
    %549 = vector.broadcast %548 : vector<1x32x1xf32> to vector<2x32x256xf32>
    %550 = arith.addf %547, %549 : vector<2x32x256xf32>
    %c0_138 = arith.constant 0 : index
    %c0_139 = arith.constant 0 : index
    %551 = vector.load %arg12[%c0_138, %c0_139] : memref<32x1xf32, #tpu.memory_space<vmem>>, vector<32x1xf32>
    %c0_140 = arith.constant 0 : index
    %c0_141 = arith.constant 0 : index
    %552 = vector.load %arg13[%c0_140, %c0_141] : memref<32x1xf32, #tpu.memory_space<vmem>>, vector<32x1xf32>
    %cst_142 = arith.constant dense<0.000000e+00> : vector<32xf32>
    %553 = vector.multi_reduction <add>, %550, %cst_142 [0, 2] : vector<2x32x256xf32> to vector<32xf32>
    %554 = vector.shape_cast %553 : vector<32xf32> to vector<1x32x1xf32>
    %555 = arith.mulf %550, %550 : vector<2x32x256xf32>
    %cst_143 = arith.constant dense<0.000000e+00> : vector<32xf32>
    %556 = vector.multi_reduction <add>, %555, %cst_143 [0, 2] : vector<2x32x256xf32> to vector<32xf32>
    %557 = vector.shape_cast %556 : vector<32xf32> to vector<1x32x1xf32>
    %cst_144 = arith.constant 0.001953125 : f32
    %558 = vector.broadcast %cst_144 : f32 to vector<1x32x1xf32>
    %559 = arith.mulf %554, %558 : vector<1x32x1xf32>
    %cst_145 = arith.constant 0.001953125 : f32
    %560 = vector.broadcast %cst_145 : f32 to vector<1x32x1xf32>
    %561 = arith.mulf %557, %560 : vector<1x32x1xf32>
    %562 = arith.mulf %559, %559 : vector<1x32x1xf32>
    %563 = arith.subf %561, %562 : vector<1x32x1xf32>
    %cst_146 = arith.constant 9.99999974E-6 : f32
    %564 = vector.broadcast %cst_146 : f32 to vector<1x32x1xf32>
    %565 = arith.addf %563, %564 : vector<1x32x1xf32>
    %566 = math.rsqrt %565 : vector<1x32x1xf32>
    %567 = vector.shape_cast %551 : vector<32x1xf32> to vector<1x32x1xf32>
    %568 = arith.mulf %567, %566 : vector<1x32x1xf32>
    %569 = arith.mulf %559, %568 : vector<1x32x1xf32>
    %570 = vector.shape_cast %552 : vector<32x1xf32> to vector<1x32x1xf32>
    %571 = arith.subf %570, %569 : vector<1x32x1xf32>
    %cst_147 = arith.constant dense<0.000000e+00> : vector<2x32xf32>
    %572 = vector.multi_reduction <add>, %550, %cst_147 [2] : vector<2x32x256xf32> to vector<2x32xf32>
    %573 = vector.shape_cast %572 : vector<2x32xf32> to vector<2x32x1xf32>
    %cst_148 = arith.constant 2.560000e+02 : f32
    %574 = vector.broadcast %cst_148 : f32 to vector<2x32x1xf32>
    %575 = arith.divf %573, %574 : vector<2x32x1xf32>
    %576 = vector.broadcast %568 : vector<1x32x1xf32> to vector<2x32x1xf32>
    %577 = arith.mulf %575, %576 : vector<2x32x1xf32>
    %578 = vector.broadcast %571 : vector<1x32x1xf32> to vector<2x32x1xf32>
    %579 = arith.addf %577, %578 : vector<2x32x1xf32>
    %c0_149 = arith.constant 0 : index
    %c0_150 = arith.constant 0 : index
    %c0_151 = arith.constant 0 : index
    %580 = vector.load %arg14[%c0_149, %c0_150, %c0_151] : memref<2x32x1xf32, #tpu.memory_space<vmem>>, vector<1x32x1xf32>
    %581 = vector.shape_cast %580 : vector<1x32x1xf32> to vector<32x1xf32>
    %582 = vector.shape_cast %581 : vector<32x1xf32> to vector<1x32x1xf32>
    %583 = vector.broadcast %582 : vector<1x32x1xf32> to vector<2x32x1xf32>
    %584 = arith.mulf %579, %583 : vector<2x32x1xf32>
    %cst_152 = arith.constant dense<0.000000e+00> : vector<2x1xf32>
    %585 = vector.multi_reduction <add>, %584, %cst_152 [1] : vector<2x32x1xf32> to vector<2x1xf32>
    %586 = vector.shape_cast %585 : vector<2x1xf32> to vector<2x1x1xf32>
    %c0_153 = arith.constant 0 : index
    %c0_154 = arith.constant 0 : index
    %c0_155 = arith.constant 0 : index
    %587 = vector.load %arg15[%c0_153, %c0_154, %c0_155] : memref<2x1x1xf32, #tpu.memory_space<vmem>>, vector<1x1x1xf32>
    %588 = vector.shape_cast %587 : vector<1x1x1xf32> to vector<1x1xf32>
    %589 = vector.shape_cast %588 : vector<1x1xf32> to vector<1x1x1xf32>
    %590 = vector.broadcast %589 : vector<1x1x1xf32> to vector<2x1x1xf32>
    %591 = arith.addf %586, %590 : vector<2x1x1xf32>
    %cst_156 = arith.constant 0.000000e+00 : f32
    %592 = vector.broadcast %cst_156 : f32 to vector<2x1x1xf32>
    %593 = arith.maximumf %591, %592 : vector<2x1x1xf32>
    %c0_157 = arith.constant 0 : index
    %c0_158 = arith.constant 0 : index
    %c0_159 = arith.constant 0 : index
    %594 = vector.load %arg16[%c0_157, %c0_158, %c0_159] : memref<2x32x1xf32, #tpu.memory_space<vmem>>, vector<1x32x1xf32>
    %595 = vector.shape_cast %594 : vector<1x32x1xf32> to vector<32x1xf32>
    %596 = vector.shape_cast %595 : vector<32x1xf32> to vector<1x32x1xf32>
    %597 = vector.broadcast %593 : vector<2x1x1xf32> to vector<2x32x1xf32>
    %598 = vector.broadcast %596 : vector<1x32x1xf32> to vector<2x32x1xf32>
    %599 = arith.mulf %597, %598 : vector<2x32x1xf32>
    %c1_160 = arith.constant 1 : index
    %c0_161 = arith.constant 0 : index
    %c0_162 = arith.constant 0 : index
    %600 = vector.load %arg14[%c1_160, %c0_161, %c0_162] : memref<2x32x1xf32, #tpu.memory_space<vmem>>, vector<1x32x1xf32>
    %601 = vector.shape_cast %600 : vector<1x32x1xf32> to vector<32x1xf32>
    %602 = vector.shape_cast %601 : vector<32x1xf32> to vector<1x32x1xf32>
    %603 = vector.broadcast %602 : vector<1x32x1xf32> to vector<2x32x1xf32>
    %604 = arith.mulf %579, %603 : vector<2x32x1xf32>
    %cst_163 = arith.constant dense<0.000000e+00> : vector<2x1xf32>
    %605 = vector.multi_reduction <add>, %604, %cst_163 [1] : vector<2x32x1xf32> to vector<2x1xf32>
    %606 = vector.shape_cast %605 : vector<2x1xf32> to vector<2x1x1xf32>
    %c1_164 = arith.constant 1 : index
    %c0_165 = arith.constant 0 : index
    %c0_166 = arith.constant 0 : index
    %607 = vector.load %arg15[%c1_164, %c0_165, %c0_166] : memref<2x1x1xf32, #tpu.memory_space<vmem>>, vector<1x1x1xf32>
    %608 = vector.shape_cast %607 : vector<1x1x1xf32> to vector<1x1xf32>
    %609 = vector.shape_cast %608 : vector<1x1xf32> to vector<1x1x1xf32>
    %610 = vector.broadcast %609 : vector<1x1x1xf32> to vector<2x1x1xf32>
    %611 = arith.addf %606, %610 : vector<2x1x1xf32>
    %cst_167 = arith.constant 0.000000e+00 : f32
    %612 = vector.broadcast %cst_167 : f32 to vector<2x1x1xf32>
    %613 = arith.maximumf %611, %612 : vector<2x1x1xf32>
    %c1_168 = arith.constant 1 : index
    %c0_169 = arith.constant 0 : index
    %c0_170 = arith.constant 0 : index
    %614 = vector.load %arg16[%c1_168, %c0_169, %c0_170] : memref<2x32x1xf32, #tpu.memory_space<vmem>>, vector<1x32x1xf32>
    %615 = vector.shape_cast %614 : vector<1x32x1xf32> to vector<32x1xf32>
    %616 = vector.shape_cast %615 : vector<32x1xf32> to vector<1x32x1xf32>
    %617 = vector.broadcast %613 : vector<2x1x1xf32> to vector<2x32x1xf32>
    %618 = vector.broadcast %616 : vector<1x32x1xf32> to vector<2x32x1xf32>
    %619 = arith.mulf %617, %618 : vector<2x32x1xf32>
    %620 = arith.addf %599, %619 : vector<2x32x1xf32>
    %c0_171 = arith.constant 0 : index
    %c0_172 = arith.constant 0 : index
    %621 = vector.load %arg17[%c0_171, %c0_172] : memref<32x1xf32, #tpu.memory_space<vmem>>, vector<32x1xf32>
    %622 = vector.shape_cast %621 : vector<32x1xf32> to vector<1x32x1xf32>
    %623 = vector.broadcast %622 : vector<1x32x1xf32> to vector<2x32x1xf32>
    %624 = arith.addf %620, %623 : vector<2x32x1xf32>
    %625 = arith.negf %624 : vector<2x32x1xf32>
    %626 = math.exp %625 : vector<2x32x1xf32>
    %cst_173 = arith.constant 1.000000e+00 : f32
    %627 = vector.broadcast %cst_173 : f32 to vector<2x32x1xf32>
    %628 = arith.addf %627, %626 : vector<2x32x1xf32>
    %629 = arith.divf %627, %628 : vector<2x32x1xf32>
    %630 = vector.broadcast %568 : vector<1x32x1xf32> to vector<2x32x1xf32>
    %631 = arith.mulf %630, %629 : vector<2x32x1xf32>
    %632 = vector.broadcast %631 : vector<2x32x1xf32> to vector<2x32x256xf32>
    %633 = arith.mulf %550, %632 : vector<2x32x256xf32>
    %634 = vector.broadcast %571 : vector<1x32x1xf32> to vector<2x32x1xf32>
    %635 = arith.mulf %634, %629 : vector<2x32x1xf32>
    %636 = vector.broadcast %635 : vector<2x32x1xf32> to vector<2x32x256xf32>
    %637 = arith.addf %633, %636 : vector<2x32x256xf32>
    %638 = vector.broadcast %50 : vector<1x32x1xf32> to vector<2x32x256xf32>
    %639 = arith.mulf %32, %638 : vector<2x32x256xf32>
    %640 = vector.broadcast %53 : vector<1x32x1xf32> to vector<2x32x256xf32>
    %641 = arith.addf %639, %640 : vector<2x32x256xf32>
    %642 = arith.addf %637, %641 : vector<2x32x256xf32>
    %cst_174 = arith.constant 0.000000e+00 : f32
    %643 = vector.broadcast %cst_174 : f32 to vector<2x32x256xf32>
    %644 = arith.maximumf %642, %643 : vector<2x32x256xf32>
    %c0_175 = arith.constant 0 : index
    %c0_176 = arith.constant 0 : index
    %c0_177 = arith.constant 0 : index
    %645 = vector.load %arg22[%c0_175, %c0_176, %c0_177] : memref<2x32x256xf32, #tpu.memory_space<vmem>>, vector<2x32x256xf32>
    tpu.vector_store %arg22[%c0_175, %c0_176, %c0_177], %644 {strides = array<i32>} : memref<2x32x256xf32, #tpu.memory_space<vmem>>, vector<2x32x256xf32>,
    return
  }
}

</mosaic_0001>

<bundles_post_ra>
// kernel: resnet_block_se.1
= control target key start
LH: loop header
LB: loop body
LE: loop exit
PB: predicated region body
PF: predicated region fallthrough
CT: control target
= control target key end

     0   :  { %v11286_v0 = vmov 2   ;;  %v11280_v1 = vmov 0   ;;  %v11282_v5 = vmov 1   ;;  %v11284_v8 = vmov 3   ;;  %s5237_s26 = smov 16   ;;  %s11293_s23 = smov 112   ;;  %s11251_s18 = inlined_call_operand.vmem [shape: f32[32,4], index: 18, kind: input, shape index: {}]   ;;  %s11252_s19 = inlined_call_operand.vmem [shape: f32[32,1], index: 19, kind: input, shape index: {}]   ;;  %s11253_s0 = inlined_call_operand.vmem [shape: f32[2,4,256], index: 0, kind: input, shape index: {}]   ;;  %s11254_s3 = inlined_call_operand.vmem [shape: f32[4,1], index: 3, kind: input, shape index: {}]   ;;  %s11255_s2 = inlined_call_operand.vmem [shape: f32[9,4,1], index: 2, kind: input, shape index: {}]   ;;  %s11256_s4 = inlined_call_operand.vmem [shape: f32[32,4], index: 4, kind: input, shape index: {}]   ;;  %s11257_s5 = inlined_call_operand.vmem [shape: f32[32,1], index: 5, kind: input, shape index: {}]   ;;  %s11258_s1 = inlined_call_operand.vmem [shape: f32[8,1,256], index: 1, kind: input, shape index: {}]   ;;  %s11259_s6 = inlined_call_operand.vmem [shape: f32[32,1], index: 6, kind: input, shape index: {}]   ;;  %s11260_s8 = inlined_call_operand.vmem [shape: f32[9,32,1], index: 8, kind: input, shape index: {}]   ;;  %s11261_s7 = inlined_call_operand.vmem [shape: f32[32,1], index: 7, kind: input, shape index: {}]   ;;  %s11262_s9 = inlined_call_operand.vmem [shape: f32[32,1], index: 9, kind: input, shape index: {}]   ;;  %s11263_s10 = inlined_call_operand.vmem [shape: f32[32,32], index: 10, kind: input, shape index: {}]   ;;  %s11264_s11 = inlined_call_operand.vmem [shape: f32[32,1], index: 11, kind: input, shape index: {}]   ;;  %s11265_s12 = inlined_call_operand.vmem [shape: f32[32,1], index: 12, kind: input, shape index: {}]   ;;  %s11266_s13 = inlined_call_operand.vmem [shape: f32[32,1], index: 13, kind: input, shape index: {}]   ;;  %s11267_s14 = inlined_call_operand.vmem [shape: f32[2,32,1], index: 14, kind: input, shape index: {}]   ;;  %s11268_s15 = inlined_call_operand.vmem [shape: f32[2,1,1], index: 15, kind: input, shape index: {}]   ;;  %s11269_s16 = inlined_call_operand.vmem [shape: f32[2,32,1], index: 16, kind: input, shape index: {}]   ;;  %s11270_s17 = inlined_call_operand.vmem [shape: f32[32,1], index: 17, kind: input, shape index: {}]   ;;  %s11271_s20 = inlined_call_operand.vmem [shape: f32[32,1], index: 20, kind: input, shape index: {}]   ;;  %s11272_s21 = inlined_call_operand.vmem [shape: f32[32,1], index: 21, kind: input, shape index: {}]   ;;  %s11273_s22 = inlined_call_operand.vmem [shape: f32[2,32,256], index: 22, kind: output, shape index: {}]  }
   0x1   :  { %11647 = sst [smem:[#allocation152_spill]] %s11251_s18  ;;  %5055 = vset.pattern.permute.xlu0 %v11286_v0  ;;  %5050 = vset.pattern.permute.xlu1 %v11280_v1  ;;  %vm560_vm3 = vcmask 1043456  }
   0x2   :  { %11648 = sst [smem:[#allocation153_spill]] %s11252_s19  ;;  %5051 = vset.pattern.permute.xlu2 %v11282_v5 }
   0x3   :  { %11649 = sst [smem:[#allocation154_spill]] %s11253_s0  ;;  %s5238_s0 = smov 15  }
   0x4   :  { %11650 = sst [smem:[#allocation155_spill]] %s11254_s3  ;;  %s5243_s3 = smov 111  }
   0x5   :  { %11651 = sst [smem:[#allocation156_spill]] %s11255_s2  ;;  %s5239_s2 = smov 1  }
   0x6   :  { %11652 = sst [smem:[#allocation157_spill]] %s11256_s4  ;;  %s5241_s4 = smov 113  }
   0x7   :  { %11653 = sst [smem:[#allocation158_spill]] %s11257_s5 }
   0x8   :  { %s11654_s29 = sld [smem:[#allocation152_spill]] }
   0x9   :  { %s11655_s25 = sld [smem:[#allocation153_spill]] }
   0xa   :  { %s11656_s18 = sld [smem:[#allocation154_spill]] }
   0xb   :  { %s11659_s5 = sld [smem:[#allocation155_spill]] }
   0xc   :  { %s11688_s28 = sld [smem:[#allocation156_spill]] }
   0xd   :  { %s11689_s19 = sld [smem:[#allocation157_spill]] }
   0xe   :  { %v76_v2 = vld [vmem:[%s11654_s29 + $0x18] sm:$0xff]  ;;  %v75_v3 = vld [vmem:[%s11654_s29 + $0x10] sm:$0xff]  ;;  %v73_v4 = vld [vmem:[%s11654_s29] sm:$0xff] }
   0xf   :  { %216 = vperm.xlu0 %5055, %v76_v2   ;;  %107 = vperm.xlu1 %5050, %v75_v3   ;;  %v74_v6 = vld [vmem:[%s11654_s29 + $0x8] sm:$0xff]  ;;  %v77_v7 = vld [vmem:[%s11655_s25] sm:$0xff]  ;;  %v79_v10 = vld [vmem:[%s11655_s25 + $0x10] sm:$0xff] }
  0x10   :  { %144 = vperm.xlu2 %5051, %v73_v4   ;;  %v78_v9 = vld [vmem:[%s11655_s25 + $0x8] sm:$0xff]  ;;  %v80_v11 = vld [vmem:[%s11655_s25 + $0x18] sm:$0xff]  ;;  %v5428_v12 = vld [vmem:[%s11656_s18] sm:$0xff]  ;;  %s5236_s25 = smov 17  }
  0x11   :  { %11657 = vst [vmem:[#allocation2_spill] sm:$0xff] %v5428_v12  ;;  %v5433_v13 = vld [vmem:[%s11656_s18 + $0x8] sm:$0xff]  ;;  %v483_v14 = vld [vmem:[%s11659_s5] sm:$0xf]  ;;  %v131_v22 = vperm.slane %v5428_v12, 1  ;;  %v132_v23 = vperm.slane %v5428_v12, 5 }
  0x12   :  { %11658 = vst [vmem:[#allocation3_spill] sm:$0xff] %v5433_v13  ;;  %v133_v24 = vperm.slane %v5433_v13, 1  ;;  %v134_v25 = vperm.slane %v5433_v13, 5  ;;  %v191_v27 = vperm.slane %v5428_v12, 2  ;;  %v192_v28 = vperm.slane %v5428_v12, 6  ;;  %s5240_s18 = smov 127  }
  0x13   :  { %508 = vst [vmem:[#allocation1] ss:$2 sm:$0xff] %v5428_v12  ;;  %v193_v31 = vperm.slane %v5433_v13, 2  ;;  %v194_v32 = vperm.slane %v5433_v13, 6  ;;  %v83_v33 = vperm.slane %v5428_v12, 0  ;;  %v84_v34 = vperm.slane %v5428_v12, 4 }
  0x14   :  { %512 = vst [vmem:[#allocation1 + $0x10] ss:$2 sm:$0xff] %v5433_v13  ;;  %v5460_v35 = vperm.slane %v131_v22, 1  ;;  %v5462_v36 = vperm.slane %v132_v23, 1  ;;  %v85_v37 = vperm.slane %v5433_v13, 0  ;;  %v86_v38 = vperm.slane %v5433_v13, 4 }
  0x15   :  { %v5466_v39 = vperm.slane %v133_v24, 1  ;;  %v5468_v40 = vperm.slane %v134_v25, 1  ;;  %v251_v41 = vperm.slane %v5428_v12, 3  ;;  %v252_v42 = vperm.slane %v5428_v12, 7 }
  0x16   :  { %v5472_v43 = vperm.slane %v191_v27, 2  ;;  %v5474_v44 = vperm.slane %v192_v28, 2  ;;  %v253_v45 = vperm.slane %v5433_v13, 3  ;;  %v254_v46 = vperm.slane %v5433_v13, 7 }
  0x17   :  { %5056 = vset.pattern.permute.xlu0 %v11280_v1  ;;  %112 = vperm.xlu1 %5050, %v76_v2   ;;  %v5478_v47 = vperm.slane %v193_v31, 2  ;;  %v5480_v48 = vperm.slane %v194_v32, 2  ;;  %v5482_v49 = vperm.slane %v83_v33, 0  ;;  %v5484_v50 = vperm.slane %v84_v34, 0 }
  0x18   :  { %97 = vperm.xlu0 %5056, %v73_v4   ;;  %148 = vperm.xlu2 %5051, %v74_v6   ;;  %v93_v53 = vperm.slane %v85_v37, 0  ;;  %v5488_v54 = vperm.slane %v86_v38, 0  ;;  %v5492_v57 = vperm.slane %v251_v41, 3  ;;  %v5494_v58 = vperm.slane %v252_v42, 3 }
  0x19   :  { %v5502_v61 = vperm.slane %v253_v45, 3  ;;  %v5504_v62 = vperm.slane %v254_v46, 3 }
  0x1f   :  { %5052 = vset.pattern.permute.xlu1 %v11282_v5 }
  0x20   :  { %156 = vperm.xlu1 %5052, %v76_v2   ;;  %102 = vperm.xlu0 %5056, %v74_v6  }
  0x21   :  { %5053 = vset.pattern.permute.xlu2 %v11286_v0 }
  0x22   :  { %204 = vperm.xlu2 %5053, %v73_v4  }
  0x28   :  { %5054 = vset.pattern.permute.xlu1 %v11286_v0  ;;  %313 = vperm.xlu0 %5056, %v77_v7  }
  0x29   :  { %208 = vperm.xlu1 %5054, %v74_v6  }
  0x2a   :  { %212 = vperm.xlu2 %5053, %v75_v3  }
  0x30   :  { %5059 = vset.pattern.permute.xlu0 %v11282_v5 }
  0x31   :  { %5057 = vset.pattern.permute.xlu1 %v11284_v8  ;;  %152 = vperm.xlu0 %5059, %v75_v3  }
  0x32   :  { %264 = vperm.xlu1 %5057, %v73_v4   ;;  %5058 = vset.pattern.permute.xlu2 %v11284_v8 }
  0x33   :  { %268 = vperm.xlu2 %5058, %v74_v6  }
  0x3a   :  { %272 = vperm.xlu1 %5057, %v75_v3  }
  0x3b   :  { %276 = vperm.xlu2 %5058, %v76_v2  }
  0x42   :  { %5060 = vset.pattern.permute.xlu1 %v11280_v1 }
  0x43   :  { %318 = vperm.xlu1 %5060, %v78_v9   ;;  %5061 = vset.pattern.permute.xlu2 %v11280_v1 }
  0x44   :  { %323 = vperm.xlu2 %5061, %v79_v10  }
  0x4b   :  { %328 = vperm.xlu1 %5060, %v80_v11  }
  0x53   :  { %499 = vperm.xlu1 %5060, %v483_v14  }
  0x6a   :  { %v145_v15 = vpop.permute.xlu2 %144 }
  0x6b   :  { %v159_v51 = vmul.f32 %v145_v15, %v5460_v35  ;;  %v160_v52 = vmul.f32 %v145_v15, %v5462_v36  ;;  %v167_v55 = vmul.f32 %v145_v15, %v5466_v39  ;;  %v168_v56 = vmul.f32 %v145_v15, %v5468_v40 }
  0x72   :  { %v149_v16 = vpop.permute.xlu2 %148 }
  0x73   :  { %v5497_v59 = vmul.f32 %v149_v16, %v5460_v35  ;;  %v5500_v60 = vmul.f32 %v149_v16, %v5462_v36  ;;  %v169_v9 = vmul.f32 %v149_v16, %v5466_v39  ;;  %v5515_v10 = vmul.f32 %v149_v16, %v5468_v40 }
  0x7c   :  { %v205_v19 = vpop.permute.xlu2 %204 }
  0x7d   :  { %v219_v11 = vmul.f32 %v205_v19, %v5472_v43  ;;  %v220_v14 = vmul.f32 %v205_v19, %v5474_v44  ;;  %v227_v22 = vmul.f32 %v205_v19, %v5478_v47  ;;  %v228_v23 = vmul.f32 %v205_v19, %v5480_v48 }
  0x81   :  { %v108_v17 = vpop.permute.xlu1 %107  ;;  %v5440_v18 = vpop.permute.xlu0 %216 }
  0x82   :  { %11660 = vst [vmem:[#allocation4_spill] sm:$0xff] %v5440_v18  ;;  %v119_v24 = vmul.f32 %v108_v17, %v5482_v49  ;;  %v127_v25 = vmul.f32 %v108_v17, %v93_v53  ;;  %v128_v27 = vmul.f32 %v108_v17, %v5488_v54  ;;  %v5528_v16 = vmul.f32 %v5440_v18, %v5472_v43 }
  0x83   :  { %v5532_v28 = vmul.f32 %v5440_v18, %v5474_v44  ;;  %v5536_v19 = vmul.f32 %v5440_v18, %v5478_v47 }
  0x84   :  { %v5448_v26 = vpop.permute.xlu2 %212  ;;  %11661 = vst [vmem:[#allocation5_spill] sm:$0xff] %v5528_v16 }
  0x85   :  { %11662 = vst [vmem:[#allocation6_spill] sm:$0xff] %v5532_v28  ;;  %v223_v37 = vmul.f32 %v5448_v26, %v5472_v43  ;;  %v231_v38 = vmul.f32 %v5448_v26, %v5478_v47  ;;  %v5546_v41 = vmul.f32 %v5448_v26, %v5480_v48 }
  0x86   :  { %11663 = vst [vmem:[#allocation7_spill] sm:$0xff] %v5536_v19 }
  0x89   :  { %v5442_v20 = vpop.permute.xlu1 %112 }
  0x8a   :  { %v98_v21 = vpop.permute.xlu0 %97  ;;  %v5550_v42 = vmul.f32 %v5442_v20, %v5482_v49  ;;  %v5554_v45 = vmul.f32 %v5442_v20, %v5484_v50  ;;  %v5557_v46 = vmul.f32 %v5442_v20, %v93_v53 }
  0x8b   :  { %v115_v2 = vmul.f32 %v98_v21, %v5482_v49  ;;  %v116_v3 = vmul.f32 %v98_v21, %v5484_v50  ;;  %v123_v4 = vmul.f32 %v98_v21, %v93_v53  ;;  %v124_v6 = vmul.f32 %v98_v21, %v5488_v54 }
  0x8c   :  { %v120_v21 = vmul.f32 %v108_v17, %v5484_v50  ;;  %v224_v17 = vmul.f32 %v5448_v26, %v5474_v44 }
  0x8d   :  { %v5519_v15 = vpop.permute.xlu2 %268  ;;  %v175_v31 = vadd.f32 %v159_v51, %v115_v2  ;;  %v176_v32 = vadd.f32 %v160_v52, %v116_v3  ;;  %v183_v33 = vadd.f32 %v167_v55, %v123_v4  ;;  %v184_v34 = vadd.f32 %v168_v56, %v124_v6 }
  0x8e   :  { %v5561_v51 = vmul.f32 %v5442_v20, %v5488_v54  ;;  %v5565_v52 = vmul.f32 %v5519_v15, %v5492_v57  ;;  %v5569_v26 = vmul.f32 %v5519_v15, %v5494_v58  ;;  %v5573_v55 = vmul.f32 %v5519_v15, %v5502_v61 }
  0x8f   :  { %v235_v2 = vadd.f32 %v219_v11, %v175_v31  ;;  %v236_v3 = vadd.f32 %v220_v14, %v176_v32  ;;  %v243_v4 = vadd.f32 %v227_v22, %v183_v33  ;;  %v244_v6 = vadd.f32 %v228_v23, %v184_v34 }
  0x90   :  { %11664 = vst [vmem:[#allocation8_spill] sm:$0xff] %v5573_v55 }
  0x92   :  { %v5452_v29 = vpop.permute.xlu1 %156  ;;  %v5454_v30 = vpop.permute.xlu0 %102 }
  0x93   :  { %v165_v20 = vmul.f32 %v5452_v29, %v5460_v35  ;;  %v166_v13 = vmul.f32 %v5452_v29, %v5462_v36  ;;  %v117_v22 = vmul.f32 %v5454_v30, %v5482_v49  ;;  %v125_v23 = vmul.f32 %v5454_v30, %v93_v53 }
  0x94   :  { %v126_v53 = vmul.f32 %v5454_v30, %v5488_v54 }
  0x95   :  { %v5590_v31 = vpop.permute.xlu2 %276 }
  0x9a   :  { %v5506_v63 = vpop.permute.xlu0 %313 }
  0x9b   :  { %v5511_v7 = vpop.permute.xlu1 %208 }
  0xa3   :  { %v153_v56 = vpop.permute.xlu0 %152 }
  0xa4   :  { %v163_v1 = vmul.f32 %v153_v56, %v5460_v35  ;;  %v164_v5 = vmul.f32 %v153_v56, %v5462_v36  ;;  %v171_v8 = vmul.f32 %v153_v56, %v5466_v39  ;;  %v265_v0 = vpop.permute.xlu1 %264  ;;  %v118_v35 = vmul.f32 %v5454_v30, %v5484_v50 }
  0xa5   :  { %v279_v19 = vmul.f32 %v265_v0, %v5492_v57  ;;  %v280_v11 = vmul.f32 %v265_v0, %v5494_v58  ;;  %v287_v14 = vmul.f32 %v265_v0, %v5502_v61  ;;  %v288_v32 = vmul.f32 %v265_v0, %v5504_v62 }
  0xa6   :  { %v173_v36 = vmul.f32 %v5452_v29, %v5466_v39  ;;  %v172_v33 = vmul.f32 %v153_v56, %v5468_v40  ;;  %v179_v12 = vadd.f32 %v163_v1, %v119_v24  ;;  %v180_v28 = vadd.f32 %v164_v5, %v120_v21 }
  0xa7   :  { %v295_v34 = vadd.f32 %v279_v19, %v235_v2  ;;  %v296_v18 = vadd.f32 %v280_v11, %v236_v3  ;;  %v187_v55 = vadd.f32 %v171_v8, %v127_v25  ;;  %v303_v49 = vadd.f32 %v287_v14, %v243_v4 }
  0xa8   :  { %v174_v50 = vmul.f32 %v5452_v29, %v5468_v40  ;;  %v177_v39 = vadd.f32 %v5497_v59, %v117_v22  ;;  %v178_v19 = vadd.f32 %v5500_v60, %v118_v35  ;;  %v185_v1 = vadd.f32 %v169_v9, %v125_v23 }
  0xa9   :  { %v5601_v16 = vadd.f32 %v5506_v63, %v295_v34  ;;  %v5604_v0 = vadd.f32 %v5506_v63, %v296_v18  ;;  %v304_v5 = vadd.f32 %v288_v32, %v244_v6  ;;  %v221_v8 = vmul.f32 %v5511_v7, %v5472_v43 }
  0xaa   :  { %v222_v29 = vmul.f32 %v5511_v7, %v5474_v44  ;;  %v188_v40 = vadd.f32 %v172_v33, %v128_v27  ;;  %v239_v24 = vadd.f32 %v223_v37, %v179_v12  ;;  %v240_v18 = vadd.f32 %v224_v17, %v180_v28  ;;  %v324_v12 = vpop.permute.xlu2 %323 }
  0xab   :  { %11665 = vst [vmem:[#allocation9_spill] sm:$0xff] %v5601_v16  ;;  %v355_v30 = vadd.f32 %v5604_v0, %v5601_v16  ;;  %v5615_v21 = vadd.f32 %v5506_v63, %v303_v49  ;;  %v247_v59 = vadd.f32 %v231_v38, %v187_v55  ;;  %v229_v44 = vmul.f32 %v5511_v7, %v5478_v47 }
  0xac   :  { %11666 = vst [vmem:[#allocation10_spill] sm:$0xff] %v5604_v0  ;;  %v273_v54 = vpop.permute.xlu1 %272  ;;  %v230_v27 = vmul.f32 %v5511_v7, %v5480_v48  ;;  %v5626_v28 = vadd.f32 %v5506_v63, %v304_v5  ;;  %v248_v55 = vadd.f32 %v5546_v41, %v188_v40  ;;  %v186_v2 = vadd.f32 %v5515_v10, %v126_v53  ;;  %v11678_v40 = vld [vmem:[#allocation2_spill] sm:$0xff] }
  0xad   :  { %11667 = vst [vmem:[#allocation11_spill] sm:$0xff] %v5615_v21  ;;  %v283_v60 = vmul.f32 %v273_v54, %v5492_v57  ;;  %v284_v9 = vmul.f32 %v273_v54, %v5494_v58  ;;  %v291_v43 = vmul.f32 %v273_v54, %v5502_v61  ;;  %v292_v25 = vmul.f32 %v273_v54, %v5504_v62 }
  0xae   :  { %11668 = vst [vmem:[#allocation12_spill] sm:$0xff] %v5626_v28  ;;  %v356_v37 = vadd.f32 %v355_v30, %v5615_v21  ;;  %v237_v3 = vadd.f32 %v221_v8, %v177_v39  ;;  %v238_v4 = vadd.f32 %v222_v29, %v178_v19  ;;  %v290_v7 = vmul.f32 %v5519_v15, %v5504_v62 }
  0xaf   :  { %v299_v17 = vadd.f32 %v283_v60, %v239_v24  ;;  %v300_v38 = vadd.f32 %v284_v9, %v240_v18  ;;  %v307_v56 = vadd.f32 %v291_v43, %v247_v59  ;;  %v308_v11 = vadd.f32 %v292_v25, %v248_v55  ;;  %v11680_v59 = vld [vmem:[#allocation4_spill] sm:$0xff] }
  0xb0   :  { %v357_v47 = vadd.f32 %v356_v37, %v5626_v28  ;;  %v181_v14 = vadd.f32 %v165_v20, %v5550_v42  ;;  %v182_v22 = vadd.f32 %v166_v13, %v5554_v45  ;;  %v245_v41 = vadd.f32 %v229_v44, %v185_v1  ;;  %v5667_v1 = vld.sshfl [vmem:[#allocation1 + $0x8] sm:$0xff pattern:$0x75316420] }
  0xb1   :  { %v5634_v6 = vadd.f32 %v324_v12, %v299_v17  ;;  %v5636_v63 = vadd.f32 %v324_v12, %v300_v38  ;;  %v246_v35 = vadd.f32 %v230_v27, %v186_v2  ;;  %v5640_v10 = vadd.f32 %v324_v12, %v307_v56  ;;  %v11682_v27 = vld [vmem:[#allocation7_spill] sm:$0xff] }
  0xb2   :  { %358 = vadd.xlane.f32.xlu2 %v357_v47  ;;  %v189_v33 = vadd.f32 %v173_v36, %v5557_v46  ;;  %v190_v42 = vadd.f32 %v174_v50, %v5561_v51  ;;  %v297_v13 = vadd.f32 %v5565_v52, %v237_v3  ;;  %v298_v45 = vadd.f32 %v5569_v26, %v238_v4  ;;  %v11675_v51 = vld [vmem:[#allocation5_spill] sm:$0xff]  ;;  %v11676_v52 = vld [vmem:[#allocation8_spill] sm:$0xff] }
  0xb3   :  { %11669 = vst [vmem:[#allocation13_spill] sm:$0xff] %v5634_v6  ;;  %v365_v23 = vadd.f32 %v5636_v63, %v5634_v6  ;;  %v379_v15 = vmul.f32 %v5634_v6, %v5634_v6  ;;  %v380_v32 = vmul.f32 %v5636_v63, %v5636_v63  ;;  %v285_v20 = vmul.f32 %v5590_v31, %v5492_v57  ;;  %v5665_v26 = vld.sshfl [vmem:[#allocation1] sm:$0xff pattern:$0x75316420] }
  0xb4   :  { %11670 = vst [vmem:[#allocation14_spill] sm:$0xff] %v5636_v63  ;;  %v286_v34 = vmul.f32 %v5590_v31, %v5494_v58  ;;  %v5656_v53 = vadd.f32 %v324_v12, %v308_v11  ;;  %v241_v36 = vadd.f32 %v11675_v51, %v181_v14  ;;  %v305_v50 = vadd.f32 %v11676_v52, %v245_v41  ;;  %v11677_v58 = vld [vmem:[#allocation6_spill] sm:$0xff]  ;;  %v4945_v6 = vld [vmem:[%s11258_s1 + $0x2] sm:$0x3] }
  0xb5   :  { %11671 = vst [vmem:[#allocation15_spill] sm:$0xff] %v5640_v10  ;;  %v319_v49 = vpop.permute.xlu1 %318  ;;  %v366_v39 = vadd.f32 %v365_v23, %v5640_v10  ;;  %v242_v5 = vadd.f32 %v11677_v58, %v182_v22  ;;  %v306_v8 = vadd.f32 %v290_v7, %v246_v35  ;;  %v401_v29 = vadd.f32 %v380_v32, %v379_v15 }
  0xb6   :  { %11672 = vst [vmem:[#allocation16_spill] sm:$0xff] %v5656_v53  ;;  %v5659_v19 = vadd.f32 %v319_v49, %v297_v13  ;;  %v5661_v46 = vadd.f32 %v319_v49, %v298_v45  ;;  %v5672_v30 = vadd.f32 %v319_v49, %v305_v50  ;;  %v234_v60 = vmul.f32 %v11680_v59, %v5480_v48  ;;  %v513_v45 = vld.sshfl [vmem:[#allocation1 + $0x10] sm:$0xff pattern:$0x75316420] }
  0xb7   :  { %v367_v57 = vadd.f32 %v366_v39, %v5656_v53  ;;  %567 = vst [vmem:[#allocation1] ss:$2 sm:$0xff] %v11678_v40  ;;  %v387_v9 = vmul.f32 %v5640_v10, %v5640_v10  ;;  %v293_v43 = vmul.f32 %v5590_v31, %v5502_v61  ;;  %v5686_v25 = vadd.f32 %v319_v49, %v306_v8 }
  0xb8   :  { %11673 = vst [vmem:[#allocation17_spill] sm:$0xff] %v5659_v19  ;;  %v360_v54 = vadd.f32 %v5661_v46, %v5659_v19  ;;  %v377_v24 = vmul.f32 %v5659_v19, %v5659_v19  ;;  %v378_v18 = vmul.f32 %v5661_v46, %v5661_v46  ;;  %v249_v12 = vadd.f32 %v11682_v27, %v189_v33 }
  0xb9   :  { %11674 = vst [vmem:[#allocation18_spill] sm:$0xff] %v5661_v46  ;;  %368 = vadd.xlane.f32.xlu1 %v367_v57  ;;  %v294_v37 = vmul.f32 %v5590_v31, %v5504_v62  ;;  %v402_v17 = vadd.f32 %v401_v29, %v387_v9  ;;  %v250_v38 = vadd.f32 %v234_v60, %v190_v42 }
  0xba   :  { %11679 = vst [vmem:[#allocation5_spill] sm:$0xff] %v5672_v30  ;;  %v361_v44 = vadd.f32 %v360_v54, %v5672_v30  ;;  %v301_v55 = vadd.f32 %v285_v20, %v241_v36  ;;  %v302_v48 = vadd.f32 %v286_v34, %v242_v5  ;;  %v396_v2 = vadd.f32 %v378_v18, %v377_v24  ;;  %v514_v20 = vld.sshfl [vmem:[#allocation1 + $0x18] sm:$0xff pattern:$0x75316420]  ;;  %v11687_v34 = vld [vmem:[#allocation3_spill] sm:$0xff] }
  0xbb   :  { %11681 = vst [vmem:[#allocation8_spill] sm:$0xff] %v5686_v25  ;;  %v388_v61 = vmul.f32 %v5656_v53, %v5656_v53  ;;  %v385_v7 = vmul.f32 %v5672_v30, %v5672_v30  ;;  %v309_v62 = vadd.f32 %v293_v43, %v249_v12  ;;  %v310_v22 = vadd.f32 %v294_v37, %v250_v38 }
  0xbc   :  { %v362_v56 = vadd.f32 %v361_v44, %v5686_v25  ;;  %v375_v41 = vmul.f32 %v5601_v16, %v5601_v16  ;;  %v376_v32 = vmul.f32 %v5604_v0, %v5604_v0  ;;  %v386_v33 = vmul.f32 %v5686_v25, %v5686_v25  ;;  %571 = vst [vmem:[#allocation1 + $0x10] ss:$2 sm:$0xff] %v11687_v34 }
  0xbd   :  { %v329_v3 = vpop.permute.xlu1 %328  ;;  %v403_v14 = vadd.f32 %v402_v17, %v388_v61  ;;  %v397_v35 = vadd.f32 %v396_v2, %v385_v7  ;;  %v383_v36 = vmul.f32 %v5615_v21, %v5615_v21  ;;  %v384_v58 = vmul.f32 %v5626_v28, %v5626_v28  ;;  %v544_v61 = vld [vmem:[%s11688_s28] sm:$0xf] }
  0xbe   :  { %v5695_v4 = vadd.f32 %v329_v3, %v301_v55  ;;  %v5697_v47 = vadd.f32 %v329_v3, %v302_v48  ;;  %363 = vadd.xlane.f32.xlu0 %v362_v56  ;;  %v568_v31 = vld.sshfl [vmem:[#allocation1] sm:$0xff pattern:$0x75316420]  ;;  %v5701_v11 = vld.sshfl [vmem:[#allocation1 + $0x8] sm:$0xff pattern:$0x75316420]  ;;  %v5706_v23 = vadd.f32 %v329_v3, %v309_v62  ;;  %v5714_v42 = vadd.f32 %v329_v3, %v310_v22 }
  0xbf   :  { %625 = vst [vmem:[#allocation1] ss:$2 sm:$0xff] %v11678_v40  ;;  %v398_v49 = vadd.f32 %v397_v35, %v386_v33  ;;  %v391_v51 = vadd.f32 %v376_v32, %v375_v41  ;;  %v4948_v62 = vld [vmem:[%s11688_s28 + $0x8] sm:$0xf]  ;;  %v4954_v35 = vld [vmem:[%s11688_s28 + $0x18] sm:$0xf] }
  0xc0   :  { %11683 = vst [vmem:[#allocation6_spill] sm:$0xff] %v5695_v4  ;;  %v370_v15 = vadd.f32 %v5697_v47, %v5695_v4  ;;  %v381_v50 = vmul.f32 %v5695_v4, %v5695_v4  ;;  %v382_v57 = vmul.f32 %v5697_v47, %v5697_v47  ;;  %v389_v24 = vmul.f32 %v5706_v23, %v5706_v23  ;;  %v5787_v33 = vld [vmem:[%s11689_s19 + $0x8] sm:$0xff]  ;;  %v534_v21 = vld [vmem:[%s11258_s1] sm:$0x3] }
  0xc1   :  { %11684 = vst [vmem:[#allocation2_spill] sm:$0xff] %v5697_v47  ;;  %404 = vadd.xlane.f32.xlu1 %v403_v14  ;;  %v392_v52 = vadd.f32 %v391_v51, %v383_v36  ;;  %v390_v59 = vmul.f32 %v5714_v42, %v5714_v42  ;;  %v5244_v0 = vmov 839922192   ;;  %v5945_v30 = vperm.slane %v534_v21, 1 }
  0xc2   :  { %11685 = vst [vmem:[#allocation4_spill] sm:$0xff] %v5706_v23  ;;  %v371_v13 = vadd.f32 %v370_v15, %v5706_v23  ;;  %v406_v54 = vadd.f32 %v382_v57, %v381_v50  ;;  %v976_v57 = vld [vmem:[%s11689_s19 + $0x18] sm:$0xff]  ;;  %v527_v23 = vlaneseq  ;;  %v5941_v16 = vunpack.c.l.s4 %v5244_v0  ;;  %v4947_v0 = vld [vmem:[%s11258_s1 + $0x4] sm:$0x3] }
  0xc3   :  { %11686 = vst [vmem:[#allocation7_spill] sm:$0xff] %v5714_v42  ;;  %v573_v5 = vld.sshfl [vmem:[#allocation1 + $0x18] sm:$0xff pattern:$0x75316420]  ;;  %v393_v29 = vadd.f32 %v392_v52, %v384_v58  ;;  %v11694_v52 = vmov 2   ;;  %v11696_v58 = vmov 3  }
  0xc4   :  { %v372_v39 = vadd.f32 %v371_v13, %v5714_v42  ;;  %v572_v8 = vld.sshfl [vmem:[#allocation1 + $0x10] sm:$0xff pattern:$0x75316420]  ;;  %v407_v18 = vadd.f32 %v406_v54, %v389_v24  ;;  %v973_v54 = vld [vmem:[%s11689_s19] sm:$0xff]  ;;  %v5933_v28 = vand.u32 127, %v527_v23  ;;  %11704 = vst [vmem:[#allocation27_spill] sm:$0xff] %v5945_v30 }
  0xc5   :  { %629 = vst [vmem:[#allocation1 + $0x10] ss:$2 sm:$0xff] %v11687_v34 }
  0xc6   :  { %399 = vadd.xlane.f32.xlu0 %v398_v49  ;;  %373 = vadd.xlane.f32.xlu2 %v372_v39  ;;  %v626_v43 = vld.sshfl [vmem:[#allocation1] sm:$0xff pattern:$0x75316420]  ;;  %v408_v44 = vadd.f32 %v407_v18, %v390_v59  ;;  %v627_v27 = vld.sshfl [vmem:[#allocation1 + $0x8] sm:$0xff pattern:$0x75316420] }
  0xc7   :  { %683 = vst [vmem:[#allocation1] ss:$2 sm:$0xff] %v11678_v40  ;;  %v975_v49 = vld [vmem:[%s11689_s19 + $0x10] sm:$0xff]  ;;  %v11700_v18 = vmov 1   ;;  %vm529_vm0 = vcmp.lt.s32.totalorder %v5933_v28, 17  ;;  %vm644_vm1 = vcmp.lt.s32.totalorder %v5933_v28, 15 }
  0xc8   :  { %v4944_v59 = vld [vmem:[%s11688_s28 + $0x10] sm:$0xf]  ;;  %11703 = vst [vmem:[#allocation26_spill] sm:$0xff] %v5933_v28  ;;  %vm586_vm2 = vcmp.lt.s32.totalorder %v5933_v28, 16  ;;  %vm702_vm4 = vcmp.lt.s32.totalorder %v5933_v28, 1  ;;  %vm760_vm5 = vcmp.lt.s32.totalorder %v5933_v28, 127 }
  0xc9   :  { %vm818_vm6 = vcmp.lt.s32.totalorder %v5933_v28, 113  ;;  %vm876_vm7 = vcmp.lt.s32.totalorder %v5933_v28, 112  ;;  %vm934_vm8 = vcmp.lt.s32.totalorder %v5933_v28, 111  ;;  %s11778_s19 = smov 112  }
  0xcc   :  { %v630_v60 = vld.sshfl [vmem:[#allocation1 + $0x10] sm:$0xff pattern:$0x75316420]  ;;  %v631_v9 = vld.sshfl [vmem:[#allocation1 + $0x18] sm:$0xff pattern:$0x75316420] }
  0xcd   :  { %687 = vst [vmem:[#allocation1 + $0x10] ss:$2 sm:$0xff] %v11687_v34 }
  0xce   :  { %394 = vadd.xlane.f32.xlu2 %v393_v29  ;;  %v684_v12 = vld.sshfl [vmem:[#allocation1] sm:$0xff pattern:$0x75316420]  ;;  %v685_v37 = vld.sshfl [vmem:[#allocation1 + $0x8] sm:$0xff pattern:$0x75316420] }
  0xcf   :  { %741 = vst [vmem:[#allocation1] ss:$2 sm:$0xff] %v11678_v40 }
  0xd4   :  { %v688_v17 = vld.sshfl [vmem:[#allocation1 + $0x10] sm:$0xff pattern:$0x75316420]  ;;  %v689_v38 = vld.sshfl [vmem:[#allocation1 + $0x18] sm:$0xff pattern:$0x75316420] }
  0xd5   :  { %745 = vst [vmem:[#allocation1 + $0x10] ss:$2 sm:$0xff] %v11687_v34 }
  0xd6   :  { %409 = vadd.xlane.f32.xlu2 %v408_v44  ;;  %v743_v55 = vld.sshfl [vmem:[#allocation1 + $0x8] sm:$0xff pattern:$0x75316420]  ;;  %v742_v48 = vld.sshfl [vmem:[#allocation1] sm:$0xff pattern:$0x75316420] }
  0xd7   :  { %799 = vst [vmem:[#allocation1] ss:$2 sm:$0xff] %v11678_v40 }
  0xda   :  { %523 = vrot.lane.b32.xlu1 %v5667_v1, %s5236_s25  ;;  %521 = vrot.lane.b32.xlu0 %v513_v45, %s5236_s25  ;;  %v5791_v45 = vpop.permute.xlu1 %499 }
  0xdc   :  { %v746_v1 = vld.sshfl [vmem:[#allocation1 + $0x10] sm:$0xff pattern:$0x75316420]  ;;  %v747_v56 = vld.sshfl [vmem:[#allocation1 + $0x18] sm:$0xff pattern:$0x75316420] }
  0xdd   :  { %803 = vst [vmem:[#allocation1 + $0x10] ss:$2 sm:$0xff] %v11687_v34 }
  0xde   :  { %v800_v2 = vld.sshfl [vmem:[#allocation1] sm:$0xff pattern:$0x75316420]  ;;  %v801_v3 = vld.sshfl [vmem:[#allocation1 + $0x8] sm:$0xff pattern:$0x75316420] }
  0xdf   :  { %857 = vst [vmem:[#allocation1] ss:$2 sm:$0xff] %v11678_v40 }
  0xe2   :  { %578 = vrot.lane.b32.xlu1 %v568_v31, %s5237_s26  ;;  %525 = vrot.lane.b32.xlu0 %v514_v20, %s5236_s25 }
  0xe4   :  { %v804_v7 = vld.sshfl [vmem:[#allocation1 + $0x10] sm:$0xff pattern:$0x75316420] }
  0xe6   :  { %v858_v22 = vld.sshfl [vmem:[#allocation1] sm:$0xff pattern:$0x75316420]  ;;  %v859_v41 = vld.sshfl [vmem:[#allocation1 + $0x8] sm:$0xff pattern:$0x75316420] }
  0xe7   :  { %915 = vst [vmem:[#allocation1] ss:$2 sm:$0xff] %v11678_v40 }
  0xea   :  { %584 = vrot.lane.b32.xlu1 %v573_v5, %s5237_s26  ;;  %580 = vrot.lane.b32.xlu0 %v572_v8, %s5237_s26  ;;  %v4956_v5 = vld [vmem:[%s11688_s28 + $0x1c] sm:$0xf] }
  0xee   :  { %519 = vrot.lane.b32.xlu2 %v5665_v26, %s5236_s25  ;;  %v805_v26 = vld.sshfl [vmem:[#allocation1 + $0x18] sm:$0xff pattern:$0x75316420]  ;;  %v916_v32 = vld.sshfl [vmem:[#allocation1] sm:$0xff pattern:$0x75316420] }
  0xef   :  { %861 = vst [vmem:[#allocation1 + $0x10] ss:$2 sm:$0xff] %v11687_v34 }
  0xf2   :  { %638 = vrot.lane.b32.xlu1 %v630_v60, %s5238_s0  ;;  %640 = vrot.lane.b32.xlu0 %v627_v27, %s5238_s0  ;;  %v917_v60 = vld.sshfl [vmem:[#allocation1 + $0x8] sm:$0xff pattern:$0x75316420] }
  0xf6   :  { %547 = vperm.xlu2 %5061, %v544_v61   ;;  %v862_v31 = vld.sshfl [vmem:[#allocation1 + $0x10] sm:$0xff pattern:$0x75316420]  ;;  %v863_v14 = vld.sshfl [vmem:[#allocation1 + $0x18] sm:$0xff pattern:$0x75316420] }
  0xf7   :  { %919 = vst [vmem:[#allocation1 + $0x10] ss:$2 sm:$0xff] %v11687_v34 }
  0xfa   :  { %664 = vperm.xlu1 %5060, %v4948_v62   ;;  %694 = vrot.lane.b32.xlu0 %v684_v12, %s5239_s2  ;;  %v4946_v12 = vld [vmem:[%s11688_s28 + $0x4] sm:$0xf] }
  0xfe   :  { %582 = vrot.lane.b32.xlu2 %v5701_v11, %s5237_s26  ;;  %v4950_v11 = vld [vmem:[%s11688_s28 + $0xc] sm:$0xf]  ;;  %v920_v15 = vld.sshfl [vmem:[#allocation1 + $0x10] sm:$0xff pattern:$0x75316420] }
  0xff   :  { %v921_v20 = vld.sshfl [vmem:[#allocation1 + $0x18] sm:$0xff pattern:$0x75316420] }
 0x102   :  { %698 = vrot.lane.b32.xlu1 %v685_v37, %s5239_s2  ;;  %700 = vrot.lane.b32.xlu0 %v689_v38, %s5239_s2 }
 0x106   :  { %636 = vrot.lane.b32.xlu2 %v626_v43, %s5238_s0  ;;  %v11701_v43 = vmov 0  }
 0x10a   :  { %752 = vrot.lane.b32.xlu1 %v742_v48, %s5240_s18  ;;  %754 = vrot.lane.b32.xlu0 %v746_v1, %s5240_s18 }
 0x10e   :  { %642 = vrot.lane.b32.xlu2 %v631_v9, %s5238_s0 }
 0x112   :  { %758 = vrot.lane.b32.xlu1 %v747_v56, %s5240_s18  ;;  %814 = vrot.lane.b32.xlu0 %v801_v3, %s5241_s4 }
 0x116   :  { %696 = vrot.lane.b32.xlu2 %v688_v17, %s5239_s2 }
 0x11a   :  { %812 = vrot.lane.b32.xlu1 %v804_v7, %s5241_s4  ;;  %868 = vrot.lane.b32.xlu0 %v858_v22, %s11293_s23 }
 0x11e   :  { %722 = vperm.xlu2 %5061, %v4950_v11  }
 0x122   :  { %838 = vperm.xlu1 %5060, %v4954_v35   ;;  %874 = vrot.lane.b32.xlu0 %v863_v14, %s11293_s23 }
 0x125   :  { %v5789_v13 = vpop.xlane.xlu2 %358 }
 0x126   :  { %756 = vrot.lane.b32.xlu2 %v743_v55, %s5240_s18  ;;  %11690 = vst [vmem:[#allocation3_spill] sm:$0xff] %v5789_v13  ;;  %v4952_v55 = vld [vmem:[%s11688_s28 + $0x14] sm:$0xf] }
 0x12a   :  { %872 = vrot.lane.b32.xlu1 %v859_v41, %s11293_s23  ;;  %928 = vrot.lane.b32.xlu0 %v920_v15, %s5243_s3 }
 0x12c   :  { %v5801_v51 = vpop.xlane.xlu1 %368 }
 0x12d   :  { %11692 = vst [vmem:[#allocation20_spill] sm:$0xff] %v5801_v51 }
 0x12e   :  { %810 = vrot.lane.b32.xlu2 %v800_v2, %s5241_s4  ;;  %v4958_v2 = vld [vmem:[%s11688_s28 + $0x20] sm:$0xf] }
 0x131   :  { %v5803_v36 = vpop.xlane.xlu0 %363 }
 0x132   :  { %926 = vrot.lane.b32.xlu1 %v916_v32, %s5243_s3  ;;  %1048 = vperm.xlu0 %5059, %v5787_v33   ;;  %11693 = vst [vmem:[#allocation21_spill] sm:$0xff] %v5803_v36  ;;  %v11707_v36 = vunpack.c.0.s8 %v5941_v16 }
 0x134   :  { %v5818_v8 = vpop.xlane.xlu1 %404  ;;  %v5997_v51 = vperm.slane %v5791_v45, %v11707_v36  ;;  %v6011_v36 = vperm.slane %v4947_v0, 0 }
 0x135   :  { %11697 = vst [vmem:[#allocation23_spill] sm:$0xff] %v5818_v8  ;;  %v4949_v8 = vld [vmem:[%s11258_s1 + $0x6] sm:$0x3] }
 0x136   :  { %816 = vrot.lane.b32.xlu2 %v805_v26, %s5241_s4  ;;  %11710 = vst [vmem:[#allocation32_spill] sm:$0xff] %v6011_v36 }
 0x139   :  { %v5799_v39 = vpop.xlane.xlu2 %373  ;;  %v5820_v29 = vpop.xlane.xlu0 %399 }
 0x13a   :  { %11691 = vst [vmem:[#allocation19_spill] sm:$0xff] %v5799_v39  ;;  %932 = vrot.lane.b32.xlu1 %v921_v20, %s5243_s3  ;;  %5066 = vset.pattern.permute.xlu0 %v11694_v52 }
 0x13b   :  { %1112 = vperm.xlu0 %5066, %v975_v49   ;;  %11698 = vst [vmem:[#allocation24_spill] sm:$0xff] %v5820_v29 }
 0x13e   :  { %870 = vrot.lane.b32.xlu2 %v862_v31, %s11293_s23  ;;  %s11702_s23 = sld [smem:[#allocation158_spill]] }
 0x141   :  { %v5808_v50 = vpop.xlane.xlu2 %394 }
 0x142   :  { %11695 = vst [vmem:[#allocation22_spill] sm:$0xff] %v5808_v50  ;;  %1002 = vperm.xlu1 %5060, %v5787_v33   ;;  %v5971_v50 = vperm.slane %v534_v21, 0 }
 0x143   :  { %5069 = vset.pattern.permute.xlu0 %v11696_v58 }
 0x144   :  { %1176 = vperm.xlu0 %5069, %v976_v57   ;;  %v978_v14 = vld [vmem:[%s11702_s23 + $0x8] sm:$0xff]  ;;  %v980_v35 = vld [vmem:[%s11702_s23 + $0x18] sm:$0xff]  ;;  %11706 = vst [vmem:[#allocation29_spill] sm:$0xff] %v5971_v50 }
 0x146   :  { %896 = vperm.xlu2 %5061, %v4956_v5   ;;  %v977_v5 = vld [vmem:[%s11702_s23] sm:$0xff] }
 0x149   :  { %v5825_v24 = vpop.xlane.xlu2 %409 }
 0x14a   :  { %11699 = vst [vmem:[#allocation25_spill] sm:$0xff] %v5825_v24  ;;  %5062 = vset.pattern.permute.xlu1 %v11700_v18  ;;  %v5967_v24 = vperm.slane %v4947_v0, 1 }
 0x14b   :  { %1044 = vperm.xlu1 %5062, %v973_v54  }
 0x14c   :  { %v5831_v9 = vpop.permute.xlu1 %523  ;;  %5070 = vset.pattern.permute.xlu0 %v11701_v43  ;;  %v5834_v44 = vpop.permute.xlu0 %521  ;;  %11705 = vst [vmem:[#allocation28_spill] sm:$0xff] %v5967_v24 }
 0x14d   :  { %488 = vperm.xlu0 %5070, %v4944_v59  }
 0x14e   :  { %930 = vrot.lane.b32.xlu2 %v917_v60, %s5243_s3 }
 0x151   :  { %v5837_v27 = vpop.permute.xlu2 %519 }
 0x152   :  { %v530_v23 = vsel %vm529_vm0, %v5837_v27, %v5831_v9 }
 0x153   :  { %1056 = vperm.xlu1 %5062, %v976_v57   ;;  %v541_v10 = vmul.f32 %v5945_v30, %v530_v23  ;;  %v532_v23 = vsel %vm529_vm0, %v5831_v9, %v5837_v27  ;;  %v6000_v9 = vperm.slane %v4945_v6, 0  ;;  %v6002_v27 = vperm.slane %v4945_v6, 1 }
 0x154   :  { %v5842_v37 = vpop.permute.xlu1 %578  ;;  %v5844_v17 = vpop.permute.xlu0 %525 }
 0x155   :  { %606 = vperm.xlu0 %5070, %v4946_v12   ;;  %v531_v19 = vsel %vm529_vm0, %v5834_v44, %v5844_v17  ;;  %v533_v21 = vsel %vm529_vm0, %v5844_v17, %v5834_v44  ;;  %11708 = vst [vmem:[#allocation30_spill] sm:$0xff] %v6000_v9  ;;  %v540_v17 = vmul.f32 %v5971_v50, %v532_v23 }
 0x156   :  { %997 = vperm.xlu2 %5061, %v973_v54   ;;  %v543_v63 = vmul.f32 %v5945_v30, %v531_v19  ;;  %11709 = vst [vmem:[#allocation31_spill] sm:$0xff] %v6002_v27  ;;  %v542_v45 = vmul.f32 %v5971_v50, %v533_v21 }
 0x159   :  { %v5846_v38 = vpop.permute.xlu2 %547 }
 0x15a   :  { %v551_v53 = vmul.f32 %v5846_v38, %v541_v10  ;;  %v553_v29 = vmul.f32 %v5846_v38, %v543_v63 }
 0x15b   :  { %5065 = vset.pattern.permute.xlu1 %v11694_v52 }
 0x15c   :  { %1108 = vperm.xlu1 %5065, %v5787_v33   ;;  %v5853_v48 = vpop.permute.xlu1 %584  ;;  %v5855_v1 = vpop.permute.xlu0 %580  ;;  %v558_v6 = vrot.slane %v551_v53, 4  ;;  %v559_v30 = vrot.slane %v553_v29, 4 }
 0x15d   :  { %780 = vperm.xlu0 %5070, %v4952_v55   ;;  %v588_v23 = vsel %vm586_vm2, %v5855_v1, %v5853_v48 }
 0x15e   :  { %1012 = vperm.xlu2 %5061, %v976_v57  }
 0x161   :  { %v5857_v56 = vpop.permute.xlu2 %582 }
 0x162   :  { %v589_v29 = vsel %vm586_vm2, %v5857_v56, %v5842_v37 }
 0x164   :  { %5067 = vset.pattern.permute.xlu1 %v11696_v58  ;;  %v5863_v3 = vpop.permute.xlu1 %638  ;;  %v5865_v61 = vpop.permute.xlu0 %640 }
 0x165   :  { %1164 = vperm.xlu1 %5067, %v973_v54   ;;  %954 = vperm.xlu0 %5070, %v4958_v2  }
 0x166   :  { %5063 = vset.pattern.permute.xlu2 %v11700_v18 }
 0x167   :  { %1052 = vperm.xlu2 %5063, %v975_v49  }
 0x169   :  { %v5868_v7 = vpop.permute.xlu2 %636 }
 0x16a   :  { %v645_v13 = vsel %vm644_vm1, %v5868_v7, %v5865_v61  ;;  %v647_v0 = vsel %vm644_vm1, %v5865_v61, %v5868_v7  ;;  %v550_v7 = vmul.f32 %v5846_v38, %v540_v17  ;;  %v6070_v17 = vmul.f32 %v6000_v9, %v589_v29 }
 0x16b   :  { %v657_v10 = vmul.f32 %v5967_v24, %v645_v13  ;;  %v590_v13 = vsel %vm586_vm2, %v5853_v48, %v5855_v1 }
 0x16c   :  { %v5870_v26 = vpop.permute.xlu1 %664  ;;  %v5872_v62 = vpop.permute.xlu0 %694  ;;  %v6054_v21 = vmul.f32 %v6000_v9, %v590_v13 }
 0x16d   :  { %1172 = vperm.xlu1 %5067, %v975_v49   ;;  %1007 = vperm.xlu0 %5070, %v975_v49   ;;  %v668_v48 = vmul.f32 %v5870_v26, %v657_v10  ;;  %v587_v10 = vsel %vm586_vm2, %v5842_v37, %v5857_v56  ;;  %v6074_v37 = vsel %vm560_vm3, %v550_v7, %v558_v6 }
 0x16e   :  { %v599_v13 = vmul.f32 %v6002_v27, %v587_v10  ;;  %v11717_v10 = vunpack.c.0.s8 %v5941_v16 }
 0x16f   :  { %5064 = vset.pattern.permute.xlu2 %v11694_v52 }
 0x170   :  { %1104 = vperm.xlu2 %5064, %v973_v54  }
 0x171   :  { %v5875_v31 = vpop.permute.xlu2 %642 }
 0x172   :  { %v646_v19 = vsel %vm644_vm1, %v5863_v3, %v5875_v31  ;;  %v648_v53 = vsel %vm644_vm1, %v5875_v31, %v5863_v3  ;;  %v552_v31 = vmul.f32 %v5846_v38, %v542_v45  ;;  %v4951_v38 = vld [vmem:[%s11258_s1 + $0x8] sm:$0x3] }
 0x173   :  { %v659_v63 = vmul.f32 %v5967_v24, %v646_v19  ;;  %v6021_v19 = vperm.slane %v4949_v8, 1  ;;  %v656_v24 = vmul.f32 %v6011_v36, %v647_v0  ;;  %v658_v50 = vmul.f32 %v6011_v36, %v648_v53 }
 0x174   :  { %v5880_v22 = vpop.permute.xlu1 %698  ;;  %v5882_v41 = vpop.permute.xlu0 %700  ;;  %v6077_v56 = vsel %vm560_vm3, %v552_v31, %v559_v30  ;;  %v6101_v31 = vperm.slane %v4951_v38, 1 }
 0x175   :  { %5072 = vset.pattern.permute.xlu1 %v11701_v43  ;;  %11712 = vst [vmem:[#allocation34_spill] sm:$0xff] %v6021_v19  ;;  %v670_v1 = vmul.f32 %v5870_v26, %v659_v63  ;;  %v6061_v63 = vmul.f32 %v6002_v27, %v588_v23  ;;  %v675_v23 = vrot.slane %v668_v48, 4  ;;  %v705_v6 = vsel %vm702_vm4, %v5880_v22, %v5872_v62 }
 0x176   :  { %1218 = vperm.xlu1 %5072, %v978_v14   ;;  %v667_v48 = vmul.f32 %v5870_v26, %v656_v24  ;;  %11714 = vst [vmem:[#allocation36_spill] sm:$0xff] %v6101_v31 }
 0x177   :  { %v676_v0 = vrot.slane %v670_v1, 4 }
 0x178   :  { %1116 = vperm.xlu2 %5064, %v976_v57   ;;  %v6110_v24 = vsel %vm560_vm3, %v667_v48, %v675_v23 }
 0x179   :  { %v5885_v11 = vpop.permute.xlu2 %696 }
 0x17a   :  { %v704_v61 = vsel %vm702_vm4, %v5885_v11, %v5882_v41  ;;  %v706_v1 = vsel %vm702_vm4, %v5882_v41, %v5885_v11  ;;  %v4955_v11 = vld [vmem:[%s11258_s1 + $0xc] sm:$0x3] }
 0x17b   :  { %v717_v45 = vmul.f32 %v6021_v19, %v704_v61  ;;  %v6092_v61 = vperm.slane %v4951_v38, 0 }
 0x17c   :  { %v5890_v15 = vpop.permute.xlu1 %752  ;;  %v5892_v32 = vpop.permute.xlu0 %754 }
 0x17d   :  { %11713 = vst [vmem:[#allocation35_spill] sm:$0xff] %v6092_v61 }
 0x17e   :  { %1228 = vperm.xlu1 %5072, %v980_v35  }
 0x180   :  { %5068 = vset.pattern.permute.xlu2 %v11696_v58 }
 0x181   :  { %v5895_v20 = vpop.permute.xlu2 %722  ;;  %1168 = vperm.xlu2 %5068, %v5787_v33   ;;  %v979_v33 = vld [vmem:[%s11702_s23 + $0x10] sm:$0xff] }
 0x182   :  { %v728_v30 = vmul.f32 %v5895_v20, %v717_v45 }
 0x184   :  { %v5898_v49 = vpop.permute.xlu1 %758  ;;  %v5900_v57 = vpop.permute.xlu0 %814 }
 0x185   :  { %v764_v48 = vsel %vm760_vm5, %v5898_v49, %v5892_v32 }
 0x189   :  { %v5905_v54 = vpop.permute.xlu2 %756  ;;  %5071 = vset.pattern.permute.xlu2 %v11701_v43  ;;  %v6013_v43 = vperm.slane %v4949_v8, 0  ;;  %v703_v8 = vsel %vm702_vm4, %v5872_v62, %v5880_v22 }
 0x18a   :  { %1213 = vperm.xlu2 %5071, %v977_v5   ;;  %v715_v52 = vmul.f32 %v6021_v19, %v703_v8  ;;  %v4953_v8 = vld [vmem:[%s11258_s1 + $0xa] sm:$0x3]  ;;  %v734_v19 = vrot.slane %v728_v30, 4 }
 0x18b   :  { %11711 = vst [vmem:[#allocation33_spill] sm:$0xff] %v6013_v43  ;;  %v6103_v62 = vperm.slane %v4953_v8, 0  ;;  %v6105_v22 = vperm.slane %v4953_v8, 1  ;;  %v716_v8 = vmul.f32 %v6013_v43, %v706_v1  ;;  %v6143_v1 = vperm.slane %v4955_v11, 0 }
 0x18c   :  { %v5908_v59 = vpop.permute.xlu1 %812  ;;  %v5910_v60 = vpop.permute.xlu0 %868  ;;  %v726_v53 = vmul.f32 %v5895_v20, %v715_v52  ;;  %v669_v52 = vmul.f32 %v5870_v26, %v658_v50  ;;  %v714_v26 = vmul.f32 %v6013_v43, %v705_v6 }
 0x18d   :  { %11715 = vst [vmem:[#allocation37_spill] sm:$0xff] %v6103_v62  ;;  %v727_v30 = vmul.f32 %v5895_v20, %v716_v8 }
 0x18e   :  { %11716 = vst [vmem:[#allocation38_spill] sm:$0xff] %v6105_v22  ;;  %v6113_v50 = vsel %vm560_vm3, %v669_v52, %v676_v0  ;;  %v733_v41 = vrot.slane %v726_v53, 4  ;;  %v725_v23 = vmul.f32 %v5895_v20, %v714_v26  ;;  %v762_v0 = vsel %vm760_vm5, %v5892_v32, %v5898_v49 }
 0x18f   :  { %v761_v52 = vsel %vm760_vm5, %v5890_v15, %v5905_v54  ;;  %11718 = vst [vmem:[#allocation39_spill] sm:$0xff] %v6143_v1  ;;  %v6153_v20 = vperm.slane %v4955_v11, 1  ;;  %v736_v32 = vsel %vm560_vm3, %v727_v30, %v734_v19  ;;  %v774_v49 = vmul.f32 %v6092_v61, %v762_v0 }
 0x191   :  { %v5915_v12 = vpop.permute.xlu2 %810  ;;  %11719 = vst [vmem:[#allocation40_spill] sm:$0xff] %v6153_v20 }
 0x192   :  { %1223 = vperm.xlu2 %5071, %v979_v33   ;;  %v821_v16 = vsel %vm818_vm6, %v5900_v57, %v5915_v12 }
 0x194   :  { %v5917_v55 = vpop.permute.xlu1 %838  ;;  %v5919_v2 = vpop.permute.xlu0 %874 }
 0x199   :  { %v5921_v14 = vpop.permute.xlu2 %816 }
 0x19a   :  { %v820_v0 = vsel %vm818_vm6, %v5908_v59, %v5921_v14 }
 0x19c   :  { %v5923_v35 = vpop.permute.xlu1 %872  ;;  %v5925_v5 = vpop.permute.xlu0 %928 }
 0x1a1   :  { %v5927_v42 = vpop.permute.xlu2 %870 }
 0x1a4   :  { %v5929_v47 = vpop.permute.xlu1 %926  ;;  %v5931_v4 = vpop.permute.xlu0 %1048 }
 0x1a9   :  { %v5935_v33 = vpop.permute.xlu2 %896 }
 0x1ac   :  { %v5943_v25 = vpop.permute.xlu1 %932 }
 0x1ad   :  { %v5947_v46 = vpop.permute.xlu0 %1112 }
 0x1b1   :  { %v5969_v39 = vpop.permute.xlu2 %930 }
 0x1b4   :  { %v6004_v44 = vpop.permute.xlu1 %1002 }
 0x1b6   :  { %v6015_v58 = vpop.permute.xlu0 %1176 }
 0x1b9   :  { %v6049_v3 = vpop.permute.xlu2 %997 }
 0x1bd   :  { %v6084_v29 = vpop.permute.xlu1 %1044 }
 0x1bf   :  { %v489_v7 = vpop.permute.xlu0 %488 }
 0x1c0   :  { %v493_v45 = vperm.slane %v489_v7, %v11717_v10  ;;  %v6146_v7 = vsel %vm560_vm3, %v725_v23, %v733_v41  ;;  %v819_v10 = vsel %vm818_vm6, %v5915_v12, %v5900_v57 }
 0x1c1   :  { %v6119_v38 = vpop.permute.xlu2 %1012 }
 0x1c2   :  { %v495_v53 = vmul.f32 %v493_v45, %v11678_v40  ;;  %v496_v6 = vmul.f32 %v493_v45, %v11687_v34  ;;  %v763_v40 = vsel %vm760_vm5, %v5905_v54, %v5890_v15  ;;  %v831_v34 = vmul.f32 %v6105_v22, %v821_v16 }
 0x1c3   :  { %v822_v45 = vsel %vm818_vm6, %v5921_v14, %v5908_v59  ;;  %v775_v15 = vmul.f32 %v6101_v31, %v764_v48  ;;  %v772_v54 = vmul.f32 %v6092_v61, %v761_v52  ;;  %v773_v8 = vmul.f32 %v6101_v31, %v763_v40 }
 0x1c4   :  { %v506_v19 = vadd.f32 %v5997_v51, %v495_v53  ;;  %v507_v41 = vadd.f32 %v5997_v51, %v496_v6  ;;  %v830_v16 = vmul.f32 %v6103_v62, %v819_v10  ;;  %v842_v23 = vmul.f32 %v5917_v55, %v831_v34  ;;  %v4957_v51 = vld [vmem:[%s11258_s1 + $0xe] sm:$0x3] }
 0x1c5   :  { %v6165_v26 = vpop.permute.xlu1 %1056  ;;  %v833_v53 = vmul.f32 %v6105_v22, %v822_v45  ;;  %v879_v52 = vsel %vm876_vm7, %v5923_v35, %v5910_v60  ;;  %v880_v59 = vsel %vm876_vm7, %v5919_v2, %v5927_v42  ;;  %v6198_v34 = vperm.slane %v4957_v51, 0 }
 0x1c6   :  { %v565_v14 = vadd.f32 %v6074_v37, %v506_v19  ;;  %v566_v40 = vadd.f32 %v6077_v56, %v507_v41  ;;  %v832_v45 = vmul.f32 %v6103_v62, %v820_v0  ;;  %v877_v37 = vsel %vm876_vm7, %v5910_v60, %v5923_v35 }
 0x1c7   :  { %v607_v11 = vpop.permute.xlu0 %606  ;;  %11720 = vst [vmem:[#allocation41_spill] sm:$0xff] %v6198_v34  ;;  %v889_v56 = vmul.f32 %v6153_v20, %v879_v52  ;;  %v878_v19 = vsel %vm876_vm7, %v5927_v42, %v5919_v2  ;;  %v891_v41 = vmul.f32 %v6153_v20, %v880_v59  ;;  %v841_v0 = vmul.f32 %v5917_v55, %v830_v16 }
 0x1c8   :  { %v610_v57 = vmul.f32 %v607_v11, %v599_v13  ;;  %v612_v12 = vmul.f32 %v607_v11, %v6061_v63  ;;  %v609_v13 = vmul.f32 %v607_v11, %v6070_v17  ;;  %v611_v63 = vmul.f32 %v607_v11, %v6054_v21 }
 0x1c9   :  { %v6184_v6 = vpop.permute.xlu2 %1052  ;;  %v6200_v17 = vperm.slane %v4957_v51, 1  ;;  %v844_v11 = vmul.f32 %v5917_v55, %v833_v53  ;;  %v849_v53 = vrot.slane %v842_v23, 4  ;;  %v900_v60 = vmul.f32 %v5935_v33, %v889_v56 }
 0x1ca   :  { %v617_v30 = vrot.slane %v610_v57, 4  ;;  %v618_v48 = vrot.slane %v612_v12, 4  ;;  %v902_v35 = vmul.f32 %v5935_v33, %v891_v41  ;;  %v843_v42 = vmul.f32 %v5917_v55, %v832_v45 }
 0x1cb   :  { %11721 = vst [vmem:[#allocation42_spill] sm:$0xff] %v6200_v17  ;;  %v850_v2 = vrot.slane %v844_v11, 4  ;;  %v888_v59 = vmul.f32 %v6143_v1, %v877_v37  ;;  %v937_v55 = vsel %vm934_vm8, %v5969_v39, %v5929_v47  ;;  %v936_v11 = vsel %vm934_vm8, %v5925_v5, %v5943_v25 }
 0x1cc   :  { %v619_v21 = vsel %vm560_vm3, %v609_v13, %v617_v30  ;;  %v620_v10 = vsel %vm560_vm3, %v611_v63, %v618_v48  ;;  %v908_v45 = vrot.slane %v902_v35, 4 }
 0x1cd   :  { %v623_v57 = vadd.f32 %v619_v21, %v565_v14  ;;  %v624_v12 = vadd.f32 %v620_v10, %v566_v40  ;;  %v890_v14 = vmul.f32 %v6143_v1, %v878_v19  ;;  %v938_v21 = vsel %vm934_vm8, %v5943_v25, %v5925_v5 }
 0x1ce   :  { %v6216_v51 = vpop.permute.xlu1 %1108  ;;  %v907_v10 = vrot.slane %v900_v60, 4  ;;  %v949_v56 = vmul.f32 %v6200_v17, %v938_v21  ;;  %v947_v19 = vmul.f32 %v6200_v17, %v937_v55  ;;  %v899_v41 = vmul.f32 %v5935_v33, %v888_v59 }
 0x1cf   :  { %v681_v13 = vadd.f32 %v6110_v24, %v623_v57  ;;  %v682_v63 = vadd.f32 %v6113_v50, %v624_v12  ;;  %v781_v30 = vpop.permute.xlu0 %780  ;;  %v935_v57 = vsel %vm934_vm8, %v5929_v47, %v5969_v39 }
 0x1d0   :  { %v784_v48 = vmul.f32 %v781_v30, %v773_v8  ;;  %v786_v52 = vmul.f32 %v781_v30, %v775_v15  ;;  %v783_v23 = vmul.f32 %v781_v30, %v772_v54  ;;  %v785_v24 = vmul.f32 %v781_v30, %v774_v49 }
 0x1d1   :  { %v6226_v16 = vpop.permute.xlu2 %1104  ;;  %v739_v15 = vadd.f32 %v6146_v7, %v681_v13  ;;  %v740_v8 = vadd.f32 %v736_v32, %v682_v63  ;;  %v851_v7 = vsel %vm560_vm3, %v841_v0, %v849_v53  ;;  %v852_v32 = vsel %vm560_vm3, %v843_v42, %v850_v2 }
 0x1d2   :  { %v791_v40 = vrot.slane %v784_v48, 4  ;;  %v792_v50 = vrot.slane %v786_v52, 4  ;;  %v901_v13 = vmul.f32 %v5935_v33, %v890_v14  ;;  %v948_v30 = vmul.f32 %v6198_v34, %v936_v11 }
 0x1d3   :  { %v946_v47 = vmul.f32 %v6198_v34, %v935_v57  ;;  %v909_v60 = vsel %vm560_vm3, %v899_v41, %v907_v10 }
 0x1d4   :  { %v793_v54 = vsel %vm560_vm3, %v783_v23, %v791_v40  ;;  %v794_v49 = vsel %vm560_vm3, %v785_v24, %v792_v50  ;;  %v910_v35 = vsel %vm560_vm3, %v901_v13, %v908_v45 }
 0x1d5   :  { %v797_v12 = vadd.f32 %v793_v54, %v739_v15  ;;  %v798_v37 = vadd.f32 %v794_v49, %v740_v8 }
 0x1d7   :  { %v855_v25 = vadd.f32 %v851_v7, %v797_v12  ;;  %v856_v5 = vadd.f32 %v852_v32, %v798_v37  ;;  %v955_v63 = vpop.permute.xlu0 %954  ;;  %v6255_v39 = vpop.permute.xlu1 %1164 }
 0x1d8   :  { %v958_v0 = vmul.f32 %v955_v63, %v947_v19  ;;  %v960_v53 = vmul.f32 %v955_v63, %v949_v56  ;;  %v957_v48 = vmul.f32 %v955_v63, %v946_v47  ;;  %v959_v52 = vmul.f32 %v955_v63, %v948_v30 }
 0x1d9   :  { %v913_v33 = vadd.f32 %v909_v60, %v855_v25  ;;  %v914_v59 = vadd.f32 %v910_v35, %v856_v5  ;;  %v1117_v14 = vpop.permute.xlu2 %1116 }
 0x1da   :  { %v965_v42 = vrot.slane %v958_v0, 4  ;;  %v966_v2 = vrot.slane %v960_v53, 4 }
 0x1dc   :  { %v967_v23 = vsel %vm560_vm3, %v957_v48, %v965_v42  ;;  %v968_v24 = vsel %vm560_vm3, %v959_v52, %v966_v2 }
 0x1dd   :  { %v971_v40 = vadd.f32 %v967_v23, %v913_v33  ;;  %v6261_v50 = vadd.f32 %v968_v24, %v914_v59 }
 0x1df   :  { %v983_v21 = vperm.slane %v971_v40, 0  ;;  %v984_v55 = vperm.slane %v971_v40, 4  ;;  %v985_v15 = vperm.slane %v6261_v50, 0  ;;  %v1031_v8 = vperm.slane %v971_v40, 1  ;;  %v1173_v41 = vpop.permute.xlu1 %1172 }
 0x1e0   :  { %v1032_v10 = vperm.slane %v971_v40, 5  ;;  %v1033_v45 = vperm.slane %v6261_v50, 1  ;;  %v1091_v54 = vperm.slane %v971_v40, 2  ;;  %v1092_v49 = vperm.slane %v971_v40, 6 }
 0x1e1   :  { %v6265_v11 = vperm.slane %v983_v21, 0  ;;  %v6267_v57 = vperm.slane %v984_v55, 0  ;;  %v6269_v12 = vperm.slane %v985_v15, 0  ;;  %v6271_v37 = vperm.slane %v1031_v8, 1  ;;  %v6299_v42 = vpop.permute.xlu2 %1168 }
 0x1e2   :  { %v6273_v7 = vperm.slane %v1032_v10, 1  ;;  %v6275_v32 = vperm.slane %v1033_v45, 1  ;;  %v1093_v56 = vperm.slane %v6261_v50, 2  ;;  %v1094_v19 = vperm.slane %v6261_v50, 6 }
 0x1e3   :  { %v1021_v13 = vmul.f32 %v6119_v38, %v6265_v11  ;;  %v1022_v25 = vmul.f32 %v6119_v38, %v6267_v57  ;;  %v1029_v5 = vmul.f32 %v6119_v38, %v6269_v12  ;;  %v1065_v63 = vmul.f32 %v6165_v26, %v6271_v37 }
 0x1e4   :  { %v1066_v30 = vmul.f32 %v6165_v26, %v6273_v7  ;;  %v1073_v47 = vmul.f32 %v6165_v26, %v6275_v32  ;;  %v6291_v0 = vperm.slane %v1091_v54, 2  ;;  %v6293_v53 = vperm.slane %v1092_v49, 2 }
 0x1e5   :  { %v1081_v60 = vadd.f32 %v1065_v63, %v1021_v13  ;;  %v6295_v35 = vperm.slane %v1093_v56, 2  ;;  %v6297_v48 = vperm.slane %v1094_v19, 2  ;;  %v1151_v52 = vperm.slane %v971_v40, 3  ;;  %v1008_v56 = vpop.permute.xlu0 %1007 }
 0x1e6   :  { %v1082_v2 = vadd.f32 %v1066_v30, %v1022_v25  ;;  %v1089_v33 = vadd.f32 %v1073_v47, %v1029_v5  ;;  %v1125_v59 = vmul.f32 %v1117_v14, %v6291_v0  ;;  %v1126_v23 = vmul.f32 %v1117_v14, %v6293_v53 }
 0x1e7   :  { %v1152_v24 = vperm.slane %v971_v40, 7  ;;  %v1153_v21 = vperm.slane %v6261_v50, 3  ;;  %v1133_v55 = vmul.f32 %v1117_v14, %v6295_v35  ;;  %v6306_v15 = vmul.f32 %v1117_v14, %v6297_v48 }
 0x1e8   :  { %v1154_v8 = vperm.slane %v6261_v50, 7  ;;  %v1159_v10 = vperm.slane %v1151_v52, 3  ;;  %v1141_v45 = vadd.f32 %v1125_v59, %v1081_v60  ;;  %v986_v19 = vperm.slane %v6261_v50, 4  ;;  %v6330_v59 = vpop.permute.xlu1 %1218 }
 0x1e9   :  { %v1160_v54 = vperm.slane %v1152_v24, 3  ;;  %v6309_v49 = vperm.slane %v1153_v21, 3  ;;  %v1142_v13 = vadd.f32 %v1126_v23, %v1082_v2  ;;  %v6312_v25 = vadd.f32 %v1133_v55, %v1089_v33  ;;  %v6353_v1 = vpop.permute.xlu2 %1213 }
 0x1ea   :  { %v6314_v40 = vperm.slane %v1154_v8, 3  ;;  %v1019_v5 = vmul.f32 %v1008_v56, %v6265_v11  ;;  %v6317_v63 = vmul.f32 %v1173_v41, %v1159_v10  ;;  %v6321_v30 = vperm.slane %v986_v19, 0 }
 0x1eb   :  { %v6319_v14 = vmul.f32 %v1173_v41, %v1160_v54  ;;  %v1020_v47 = vmul.f32 %v1008_v56, %v6267_v57  ;;  %v1027_v60 = vmul.f32 %v1008_v56, %v6269_v12  ;;  %v1034_v52 = vperm.slane %v6261_v50, 5 }
 0x1ec   :  { %v1063_v2 = vmul.f32 %v6184_v6, %v6271_v37  ;;  %v1064_v33 = vmul.f32 %v6184_v6, %v6273_v7  ;;  %v6333_v23 = vmul.f32 %v1173_v41, %v6309_v49  ;;  %v6336_v24 = vmul.f32 %v1173_v41, %v6314_v40 }
 0x1ed   :  { %v1028_v21 = vmul.f32 %v1008_v56, %v6321_v30  ;;  %v1071_v55 = vmul.f32 %v6184_v6, %v6275_v32  ;;  %v6341_v50 = vperm.slane %v1034_v52, 1  ;;  %v1181_v19 = vmul.f32 %v6299_v42, %v1159_v10 }
 0x1ee   :  { %v1079_v8 = vadd.f32 %v1063_v2, %v1019_v5  ;;  %v1182_v17 = vmul.f32 %v6299_v42, %v1160_v54  ;;  %v1080_v34 = vadd.f32 %v1064_v33, %v1020_v47  ;;  %v6347_v20 = vmul.f32 %v6299_v42, %v6309_v49 }
 0x1ef   :  { %v1017_v41 = vmul.f32 %v6004_v44, %v6265_v11  ;;  %v1018_v56 = vmul.f32 %v6004_v44, %v6267_v57  ;;  %v1072_v5 = vmul.f32 %v6184_v6, %v6341_v50  ;;  %v6357_v52 = vadd.f32 %v1071_v55, %v1027_v60 }
 0x1f0   :  { %v1061_v47 = vmul.f32 %v5931_v4, %v6271_v37  ;;  %v1062_v2 = vmul.f32 %v5931_v4, %v6273_v7  ;;  %v1121_v33 = vmul.f32 %v6216_v51, %v6291_v0  ;;  %v1015_v22 = vmul.f32 %v6049_v3, %v6265_v11  ;;  %v6385_v18 = vpop.permute.xlu1 %1228 }
 0x1f1   :  { %v1016_v62 = vmul.f32 %v6049_v3, %v6267_v57  ;;  %v1059_v6 = vmul.f32 %v6084_v29, %v6271_v37  ;;  %v1122_v31 = vmul.f32 %v6216_v51, %v6293_v53  ;;  %v1060_v61 = vmul.f32 %v6084_v29, %v6273_v7 }
 0x1f2   :  { %v1077_v60 = vadd.f32 %v1061_v47, %v1017_v41  ;;  %v1078_v55 = vadd.f32 %v1062_v2, %v1018_v56  ;;  %v1119_v36 = vmul.f32 %v6226_v16, %v6291_v0  ;;  %v1120_v11 = vmul.f32 %v6226_v16, %v6293_v53 }
 0x1f3   :  { %v1075_v43 = vadd.f32 %v1059_v6, %v1015_v22  ;;  %v1179_v57 = vmul.f32 %v6255_v39, %v1159_v10  ;;  %v1076_v37 = vadd.f32 %v1060_v61, %v1016_v62  ;;  %v1180_v41 = vmul.f32 %v6255_v39, %v1160_v54 }
 0x1f4   :  { %v1137_v27 = vadd.f32 %v1121_v33, %v1077_v60  ;;  %v1138_v9 = vadd.f32 %v1122_v31, %v1078_v55  ;;  %v1185_v47 = vmul.f32 %v6015_v58, %v1159_v10  ;;  %v1186_v2 = vmul.f32 %v6015_v58, %v1160_v54 }
 0x1f5   :  { %v1135_v56 = vadd.f32 %v1119_v36, %v1075_v43  ;;  %v1123_v22 = vmul.f32 %v5947_v46, %v6291_v0  ;;  %v1136_v28 = vadd.f32 %v1120_v11, %v1076_v37  ;;  %v1124_v33 = vmul.f32 %v5947_v46, %v6293_v53  ;;  %v1224_v53 = vpop.permute.xlu2 %1223 }
 0x1f6   :  { %v1197_v7 = vadd.f32 %v1181_v19, %v1137_v27  ;;  %v1198_v6 = vadd.f32 %v1182_v17, %v1138_v9  ;;  %v1190_v61 = vmul.f32 %v6299_v42, %v6314_v40  ;;  %v1201_v43 = vadd.f32 %v1185_v47, %v1141_v45 }
 0x1f7   :  { %v1195_v31 = vadd.f32 %v1179_v57, %v1135_v56  ;;  %v1139_v36 = vadd.f32 %v1123_v22, %v1079_v8  ;;  %v1088_v62 = vadd.f32 %v1072_v5, %v1028_v21  ;;  %v1196_v10 = vadd.f32 %v1180_v41, %v1136_v28 }
 0x1f8   :  { %v1202_v54 = vadd.f32 %v1186_v2, %v1142_v13  ;;  %v1140_v60 = vadd.f32 %v1124_v33, %v1080_v34  ;;  %v6392_v0 = vadd.f32 %v6330_v59, %v1197_v7  ;;  %v6395_v9 = vadd.f32 %v6330_v59, %v1198_v6 }
 0x1f9   :  { %v6398_v27 = vadd.f32 %v6353_v1, %v1195_v31  ;;  %v6401_v17 = vadd.f32 %v6385_v18, %v1201_v43  ;;  %v1199_v28 = vadd.f32 %v6317_v63, %v1139_v36  ;;  %v1025_v34 = vmul.f32 %v6004_v44, %v6269_v12 }
 0x1fa   :  { %v6404_v42 = vadd.f32 %v6385_v18, %v1202_v54  ;;  %v1026_v45 = vmul.f32 %v6004_v44, %v6321_v30  ;;  %v6412_v13 = vadd.f32 %v6353_v1, %v1196_v10  ;;  %v1200_v21 = vadd.f32 %v6319_v14, %v1140_v60 }
 0x1fb   :  { %v1069_v8 = vmul.f32 %v5931_v4, %v6275_v32  ;;  %v1070_v19 = vmul.f32 %v5931_v4, %v6341_v50  ;;  %v6419_v5 = vadd.f32 %v1224_v53, %v1199_v28  ;;  %v1129_v63 = vmul.f32 %v6216_v51, %v6295_v35 }
 0x1fc   :  { %v1130_v55 = vmul.f32 %v6216_v51, %v6297_v48  ;;  %v1023_v44 = vmul.f32 %v6049_v3, %v6269_v12  ;;  %v1024_v14 = vmul.f32 %v6049_v3, %v6321_v30  ;;  %v1067_v37 = vmul.f32 %v6084_v29, %v6275_v32 }
 0x1fd   :  { %v1085_v11 = vadd.f32 %v1069_v8, %v1025_v34  ;;  %v1086_v57 = vadd.f32 %v1070_v19, %v1026_v45  ;;  %v6431_v4 = vadd.f32 %v1224_v53, %v1200_v21  ;;  %v1260_v41 = vadd.f32 %v6395_v9, %v6392_v0 }
 0x1fe   :  { %v1068_v56 = vmul.f32 %v6084_v29, %v6341_v50  ;;  %v1127_v51 = vmul.f32 %v6226_v16, %v6295_v35  ;;  %v1083_v2 = vadd.f32 %v1067_v37, %v1023_v44  ;;  %v1128_v3 = vmul.f32 %v6226_v16, %v6297_v48 }
 0x1ff   :  { %v1145_v12 = vadd.f32 %v1129_v63, %v1085_v11  ;;  %v1146_v47 = vadd.f32 %v1130_v55, %v1086_v57  ;;  %v1187_v32 = vmul.f32 %v6255_v39, %v6309_v49  ;;  %v1131_v7 = vmul.f32 %v5947_v46, %v6295_v35 }
 0x200   :  { %v1084_v22 = vadd.f32 %v1068_v56, %v1024_v14  ;;  %v1132_v6 = vmul.f32 %v5947_v46, %v6297_v48  ;;  %v1143_v31 = vadd.f32 %v1127_v51, %v1083_v2  ;;  %v1188_v43 = vmul.f32 %v6255_v39, %v6314_v40 }
 0x201   :  { %v1205_v29 = vadd.f32 %v6347_v20, %v1145_v12  ;;  %v1206_v33 = vadd.f32 %v1190_v61, %v1146_v47  ;;  %v1147_v16 = vadd.f32 %v1131_v7, %v6357_v52  ;;  %v1275_v54 = vmul.f32 %v6398_v27, %v6398_v27 }
 0x202   :  { %v1144_v36 = vadd.f32 %v1128_v3, %v1084_v22  ;;  %v1148_v10 = vadd.f32 %v1132_v6, %v1088_v62  ;;  %v1203_v35 = vadd.f32 %v1187_v32, %v1143_v31  ;;  %v1255_v46 = vadd.f32 %v6412_v13, %v6398_v27 }
 0x203   :  { %v6454_v60 = vadd.f32 %v6330_v59, %v1205_v29  ;;  %v1276_v20 = vmul.f32 %v6412_v13, %v6412_v13  ;;  %v1207_v39 = vadd.f32 %v6333_v23, %v1147_v16  ;;  %v1265_v52 = vadd.f32 %v6431_v4, %v6419_v5 }
 0x204   :  { %v1204_v48 = vadd.f32 %v1188_v43, %v1144_v36  ;;  %v1030_v61 = vmul.f32 %v6119_v38, %v6321_v30  ;;  %v6466_v62 = vadd.f32 %v6330_v59, %v1206_v33  ;;  %v6470_v34 = vadd.f32 %v6353_v1, %v1203_v35 }
 0x205   :  { %v1261_v28 = vadd.f32 %v1260_v41, %v6454_v60  ;;  %v1074_v45 = vmul.f32 %v6165_v26, %v6341_v50  ;;  %v1208_v23 = vadd.f32 %v6336_v24, %v1148_v10  ;;  %v6478_v8 = vadd.f32 %v1224_v53, %v1207_v39 }
 0x206   :  { %v6475_v21 = vadd.f32 %v6353_v1, %v1204_v48  ;;  %v1291_v19 = vadd.f32 %v1276_v20, %v1275_v54  ;;  %v1256_v30 = vadd.f32 %v1255_v46, %v6470_v34  ;;  %v1193_v63 = vmul.f32 %v6015_v58, %v6309_v49 }
 0x207   :  { %v1262_v38 = vadd.f32 %v1261_v28, %v6466_v62  ;;  %v1090_v59 = vadd.f32 %v1074_v45, %v1030_v61  ;;  %v6484_v55 = vadd.f32 %v1224_v53, %v1208_v23  ;;  %v1266_v26 = vadd.f32 %v1265_v52, %v6478_v8 }
 0x208   :  { %v1283_v1 = vmul.f32 %v6470_v34, %v6470_v34  ;;  %v1257_v24 = vadd.f32 %v1256_v30, %v6475_v21  ;;  %v1209_v44 = vadd.f32 %v1193_v63, %v6312_v25  ;;  %v1270_v11 = vadd.f32 %v6404_v42, %v6401_v17 }
 0x209   :  { %1263 = vadd.xlane.f32.xlu2 %v1262_v38  ;;  %v1150_v50 = vadd.f32 %v6306_v15, %v1090_v59  ;;  %v1267_v57 = vadd.f32 %v1266_v26, %v6484_v55  ;;  %v1277_v49 = vmul.f32 %v6392_v0, %v6392_v0  ;;  %v1278_v53 = vmul.f32 %v6395_v9, %v6395_v9 }
 0x20a   :  { %1258 = vadd.xlane.f32.xlu0 %v1257_v24  ;;  %v1284_v14 = vmul.f32 %v6475_v21, %v6475_v21  ;;  %v1292_v37 = vadd.f32 %v1291_v19, %v1283_v1  ;;  %v1194_v15 = vmul.f32 %v6015_v58, %v6314_v40  ;;  %v6504_v25 = vadd.f32 %v6385_v18, %v1209_v44 }
 0x20b   :  { %1268 = vadd.xlane.f32.xlu1 %v1267_v57  ;;  %v1285_v41 = vmul.f32 %v6454_v60, %v6454_v60  ;;  %v1296_v56 = vadd.f32 %v1278_v53, %v1277_v49  ;;  %v1281_v51 = vmul.f32 %v6401_v17, %v6401_v17  ;;  %v1282_v12 = vmul.f32 %v6404_v42, %v6404_v42 }
 0x20c   :  { %v1210_v47 = vadd.f32 %v1194_v15, %v1150_v50  ;;  %v1271_v2 = vadd.f32 %v1270_v11, %v6504_v25  ;;  %v1279_v58 = vmul.f32 %v6419_v5, %v6419_v5  ;;  %v1280_v40 = vmul.f32 %v6431_v4, %v6431_v4 }
 0x20d   :  { %v1297_v3 = vadd.f32 %v1296_v56, %v1285_v41  ;;  %v1293_v22 = vadd.f32 %v1292_v37, %v1284_v14  ;;  %v1306_v7 = vadd.f32 %v1282_v12, %v1281_v51  ;;  %v1286_v6 = vmul.f32 %v6466_v62, %v6466_v62 }
 0x20e   :  { %v6518_v32 = vadd.f32 %v6385_v18, %v1210_v47  ;;  %v1289_v33 = vmul.f32 %v6504_v25, %v6504_v25  ;;  %v1301_v31 = vadd.f32 %v1280_v40, %v1279_v58  ;;  %v1287_v16 = vmul.f32 %v6478_v8, %v6478_v8 }
 0x20f   :  { %v1298_v43 = vadd.f32 %v1297_v3, %v1286_v6  ;;  %v1288_v35 = vmul.f32 %v6484_v55, %v6484_v55 }
 0x210   :  { %v1272_v29 = vadd.f32 %v1271_v2, %v6518_v32  ;;  %v1307_v36 = vadd.f32 %v1306_v7, %v1289_v33  ;;  %v1290_v18 = vmul.f32 %v6518_v32, %v6518_v32  ;;  %v1302_v10 = vadd.f32 %v1301_v31, %v1287_v16  ;;  %v1247_v31 = vld [vmem:[%s11259_s6] sm:$0xff] }
 0x211   :  { %1294 = vadd.xlane.f32.xlu2 %v1293_v22 }
 0x212   :  { %1273 = vadd.xlane.f32.xlu0 %v1272_v29  ;;  %v1308_v54 = vadd.f32 %v1307_v36, %v1290_v18  ;;  %v1303_v46 = vadd.f32 %v1302_v10, %v1288_v35 }
 0x213   :  { %1299 = vadd.xlane.f32.xlu1 %v1298_v43 }
 0x219   :  { %1309 = vadd.xlane.f32.xlu2 %v1308_v54 }
 0x21a   :  { %1304 = vadd.xlane.f32.xlu0 %v1303_v46  ;;  %v1248_v46 = vld [vmem:[%s11259_s6 + $0x8] sm:$0xff] }
 0x27c   :  { %v1264_v20 = vpop.xlane.xlu2 %1263 }
 0x27d   :  { %v1259_v48 = vpop.xlane.xlu0 %1258  ;;  %v6533_v61 = vmul.f32 0.001953125, %v1264_v20 }
 0x27e   :  { %v1269_v39 = vpop.xlane.xlu1 %1268  ;;  %v6531_v52 = vmul.f32 0.001953125, %v1259_v48 }
 0x27f   :  { %v1320_v59 = vmul.f32 %v6533_v61, %v6533_v61  ;;  %v6541_v50 = vmul.f32 0.001953125, %v1269_v39 }
 0x280   :  { %v1319_v45 = vmul.f32 %v6531_v52, %v6531_v52 }
 0x281   :  { %v1321_v14 = vmul.f32 %v6541_v50, %v6541_v50 }
 0x284   :  { %v1295_v28 = vpop.xlane.xlu2 %1294 }
 0x285   :  { %v1315_v23 = vmul.f32 0.001953125, %v1295_v28  ;;  %v1274_v19 = vpop.xlane.xlu0 %1273 }
 0x286   :  { %v1300_v30 = vpop.xlane.xlu1 %1299  ;;  %v6539_v26 = vmul.f32 0.001953125, %v1274_v19 }
 0x287   :  { %v1323_v38 = vsub.f32 %v1315_v23, %v1319_v45  ;;  %v1316_v63 = vmul.f32 0.001953125, %v1300_v30  ;;  %v1250_v30 = vld [vmem:[%s11259_s6 + $0x18] sm:$0xff] }
 0x288   :  { %v1322_v57 = vmul.f32 %v6539_v26, %v6539_v26 }
 0x289   :  { %v1327_v1 = vadd.f32 1e-05, %v1323_v38  ;;  %v1324_v24 = vsub.f32 %v1316_v63, %v1320_v59  ;;  %v1249_v63 = vld [vmem:[%s11259_s6 + $0x10] sm:$0xff] }
 0x28b   :  { %5163 = vrsqrt.f32 %v1327_v1  ;;  %v1328_v44 = vadd.f32 1e-05, %v1324_v24  ;;  %vm1337_vm10 = vweird.f32 %v1327_v1 }
 0x28c   :  { %v1310_v11 = vpop.xlane.xlu2 %1309 }
 0x28d   :  { %v1318_v49 = vmul.f32 0.001953125, %v1310_v11  ;;  %5165 = vrsqrt.f32 %v1328_v44  ;;  %v1305_v53 = vpop.xlane.xlu0 %1304  ;;  %vm1347_vm13 = vweird.f32 %v1328_v44 }
 0x28e   :  { %v1317_v37 = vmul.f32 0.001953125, %v1305_v53 }
 0x28f   :  { %v1326_v15 = vsub.f32 %v1318_v49, %v1322_v57  ;;  %v4959_v49 = vld [vmem:[%s11260_s8 + $0x80] sm:$0xff] }
 0x290   :  { %v1325_v56 = vsub.f32 %v1317_v37, %v1321_v14  ;;  %v1252_v14 = vld [vmem:[%s11261_s7 + $0x8] sm:$0xff] }
 0x291   :  { %v5164_v41 = vpop.eup %5163  ;;  %v1330_v51 = vadd.f32 1e-05, %v1326_v15  ;;  %v1251_v15 = vld [vmem:[%s11261_s7] sm:$0xff] }
 0x292   :  { %v1332_v12 = vmul.f32 %v5164_v41, %v1327_v1  ;;  %v1329_v47 = vadd.f32 1e-05, %v1325_v56  ;;  %vm1338_vm9 = vweird.f32 %v5164_v41 }
 0x293   :  { %5167 = vrsqrt.f32 %v1330_v51  ;;  %v5166_v2 = vpop.eup %5165  ;;  %vm1339_vm11 = vmor %vm1337_vm10, %vm1338_vm9  ;;  %vm1367_vm9 = vweird.f32 %v1330_v51 }
 0x294   :  { %v1333_v58 = vmul.f32 %v5164_v41, %v1332_v12  ;;  %v1342_v40 = vmul.f32 %v5166_v2, %v1328_v44  ;;  %5169 = vrsqrt.f32 %v1329_v47  ;;  %vm1348_vm12 = vweird.f32 %v5166_v2  ;;  %v1254_v12 = vld [vmem:[%s11261_s7 + $0x18] sm:$0xff] }
 0x295   :  { %vm1349_vm14 = vmor %vm1347_vm13, %vm1348_vm12 }
 0x296   :  { %v1334_v3 = vmul.f32 0.5, %v1333_v58  ;;  %v1343_v22 = vmul.f32 %v5166_v2, %v1342_v40  ;;  %v1473_v40 = vld [vmem:[%s11262_s9 + $0x10] sm:$0xff] }
 0x298   :  { %v1335_v7 = vsub.f32 1.5, %v1334_v3  ;;  %v1344_v29 = vmul.f32 0.5, %v1343_v22  ;;  %v1616_v3 = vld [vmem:[%s11260_s8] sm:$0xff]  ;;  %v1472_v22 = vld [vmem:[%s11262_s9 + $0x8] sm:$0xff] }
 0x299   :  { %v5168_v6 = vpop.eup %5167 }
 0x29a   :  { %v1362_v33 = vmul.f32 %v5168_v6, %v1330_v51  ;;  %v1336_v43 = vmul.f32 %v5164_v41, %v1335_v7  ;;  %v5170_v36 = vpop.eup %5169  ;;  %v1345_v16 = vsub.f32 1.5, %v1344_v29  ;;  %vm1368_vm15 = vweird.f32 %v5168_v6  ;;  %v4962_v51 = vld [vmem:[%s11260_s8 + $0x98] sm:$0xff]  ;;  %v1471_v7 = vld [vmem:[%s11262_s9] sm:$0xff]  ;;  %v1618_v29 = vld [vmem:[%s11260_s8 + $0x10] sm:$0xff] }
 0x29b   :  { %v1352_v18 = vmul.f32 %v5170_v36, %v1329_v47  ;;  %vm1358_vm3 = vweird.f32 %v5170_v36  ;;  %vm1369_vm10 = vmor %vm1367_vm9, %vm1368_vm15 }
 0x29c   :  { %v1363_v10 = vmul.f32 %v5168_v6, %v1362_v33  ;;  %v1340_v54 = vsel %vm1339_vm11, %v5164_v41, %v1336_v43  ;;  %v1346_v20 = vmul.f32 %v5166_v2, %v1345_v16  ;;  %vm1357_vm11 = vweird.f32 %v1329_v47  ;;  %v1253_v47 = vld [vmem:[%s11261_s7 + $0x10] sm:$0xff]  ;;  %v1474_v33 = vld [vmem:[%s11262_s9 + $0x18] sm:$0xff] }
 0x29d   :  { %v1371_v35 = vmul.f32 %v1340_v54, %v1247_v31  ;;  %v1353_v48 = vmul.f32 %v5170_v36, %v1352_v18  ;;  %vm1359_vm12 = vmor %vm1357_vm11, %vm1358_vm3  ;;  %v1617_v31 = vld [vmem:[%s11260_s8 + $0x8] sm:$0xff] }
 0x29e   :  { %v1364_v39 = vmul.f32 0.5, %v1363_v10  ;;  %v1350_v28 = vsel %vm1349_vm14, %v5166_v2, %v1346_v20 }
 0x29f   :  { %1385 = vperm.xlu1 %5072, %v1371_v35   ;;  %v1354_v45 = vmul.f32 0.5, %v1353_v48  ;;  %v1372_v23 = vmul.f32 %v1350_v28, %v1248_v46  ;;  %v1375_v37 = vmul.f32 %v1371_v35, %v6531_v52 }
 0x2a0   :  { %v1365_v19 = vsub.f32 1.5, %v1364_v39 }
 0x2a1   :  { %1390 = vperm.xlu0 %5070, %v1372_v23   ;;  %v1355_v38 = vsub.f32 1.5, %v1354_v45  ;;  %v1376_v53 = vmul.f32 %v1372_v23, %v6533_v61  ;;  %v1379_v56 = vsub.f32 %v1251_v15, %v1375_v37 }
 0x2a2   :  { %v1366_v59 = vmul.f32 %v5168_v6, %v1365_v19 }
 0x2a3   :  { %v1356_v1 = vmul.f32 %v5170_v36, %v1355_v38  ;;  %v1380_v41 = vsub.f32 %v1252_v14, %v1376_v53 }
 0x2a4   :  { %v1370_v24 = vsel %vm1369_vm10, %v5168_v6, %v1366_v59  ;;  %v1619_v6 = vld [vmem:[%s11260_s8 + $0x18] sm:$0xff]  ;;  %vm4414_vm10 = vcmask 7168  }
 0x2a5   :  { %v1374_v44 = vmul.f32 %v1370_v24, %v1250_v30  ;;  %v1360_v11 = vsel %vm1359_vm12, %v5170_v36, %v1356_v1 }
 0x2a6   :  { %v1373_v57 = vmul.f32 %v1360_v11, %v1249_v63 }
 0x2a7   :  { %1400 = vperm.xlu1 %5072, %v1374_v44   ;;  %v1378_v61 = vmul.f32 %v1374_v44, %v6539_v26  ;;  %v4961_v26 = vld [vmem:[%s11260_s8 + $0x90] sm:$0xff] }
 0x2a8   :  { %1395 = vperm.xlu2 %5071, %v1373_v57   ;;  %v1377_v52 = vmul.f32 %v1373_v57, %v6541_v50  ;;  %v4960_v50 = vld [vmem:[%s11260_s8 + $0x88] sm:$0xff] }
 0x2a9   :  { %1482 = vperm.xlu0 %5070, %v4959_v49   ;;  %v1382_v2 = vsub.f32 %v1254_v12, %v1378_v61 }
 0x2aa   :  { %v1381_v58 = vsub.f32 %v1253_v47, %v1377_v52 }
 0x2af   :  { %1426 = vperm.xlu1 %5072, %v1380_v41  }
 0x2b0   :  { %1421 = vperm.xlu2 %5071, %v1379_v56  }
 0x2b1   :  { %1497 = vperm.xlu0 %5070, %v4962_v51  }
 0x2b7   :  { %1436 = vperm.xlu1 %5072, %v1382_v2  }
 0x2b8   :  { %1431 = vperm.xlu2 %5071, %v1381_v58  }
 0x2b9   :  { %1528 = vperm.xlu0 %5070, %v1473_v40  }
 0x2bf   :  { %1492 = vperm.xlu1 %5072, %v4961_v26  }
 0x2c0   :  { %1487 = vperm.xlu2 %5071, %v4960_v50  }
 0x2c1   :  { %1622 = vperm.xlu0 %5070, %v1616_v3  }
 0x2c7   :  { %1523 = vperm.xlu1 %5072, %v1472_v22  }
 0x2c8   :  { %1518 = vperm.xlu2 %5071, %v1471_v7  }
 0x2c9   :  { %1637 = vperm.xlu0 %5070, %v1619_v6  }
 0x2cf   :  { %1632 = vperm.xlu1 %5072, %v1618_v29  }
 0x2d0   :  { %1533 = vperm.xlu2 %5071, %v1474_v33   ;;  %v4964_v33 = vld [vmem:[%s11260_s8 + $0x28] sm:$0xff] }
 0x2d8   :  { %1627 = vperm.xlu2 %5071, %v1617_v31   ;;  %v4965_v31 = vld [vmem:[%s11260_s8 + $0x30] sm:$0xff] }
 0x302   :  { %v1396_v43 = vpop.permute.xlu2 %1395 }
 0x303   :  { %v1407_v10 = vmul.f32 %v1396_v43, %v6419_v5  ;;  %v1415_v49 = vmul.f32 %v1396_v43, %v6478_v8  ;;  %v1408_v56 = vmul.f32 %v1396_v43, %v6431_v4 }
 0x30a   :  { %v1422_v36 = vpop.permute.xlu2 %1421 }
 0x311   :  { %v1386_v16 = vpop.permute.xlu1 %1385 }
 0x312   :  { %v1403_v18 = vmul.f32 %v1386_v16, %v6398_v27  ;;  %v1432_v54 = vpop.permute.xlu2 %1431  ;;  %v1411_v38 = vmul.f32 %v1386_v16, %v6470_v34  ;;  %v1404_v63 = vmul.f32 %v1386_v16, %v6412_v13  ;;  %v1412_v4 = vmul.f32 %v1386_v16, %v6475_v21  ;;  %v4963_v16 = vld [vmem:[%s11260_s8 + $0x20] sm:$0xff] }
 0x313   :  { %v1443_v46 = vadd.f32 %v1432_v54, %v1407_v10  ;;  %v1391_v28 = vpop.permute.xlu0 %1390  ;;  %v1451_v14 = vadd.f32 %v1432_v54, %v1415_v49  ;;  %v1444_v51 = vadd.f32 %v1432_v54, %v1408_v56  ;;  %v4970_v49 = vld [vmem:[%s11260_s8 + $0x58] sm:$0xff] }
 0x314   :  { %v1439_v35 = vadd.f32 %v1422_v36, %v1403_v18  ;;  %v1405_v45 = vmul.f32 %v1391_v28, %v6392_v0  ;;  %v1413_v27 = vmul.f32 %v1391_v28, %v6454_v60  ;;  %v1447_v0 = vadd.f32 %v1422_v36, %v1411_v38 }
 0x315   :  { %v6615_v48 = vmax.f32 %v1443_v46, 0.0  ;;  %v1440_v1 = vadd.f32 %v1422_v36, %v1404_v63  ;;  %v6651_v41 = vmax.f32 %v1451_v14, 0.0  ;;  %v1406_v8 = vmul.f32 %v1391_v28, %v6395_v9 }
 0x316   :  { %v6613_v20 = vmax.f32 %v1439_v35, 0.0  ;;  %v6634_v11 = vmax.f32 %v1447_v0, 0.0  ;;  %v6664_v52 = vmax.f32 %v1444_v51, 0.0  ;;  %v1448_v58 = vadd.f32 %v1422_v36, %v1412_v4 }
 0x317   :  { %1556 = vrot.lane.b32.xlu2 %v6615_v48, %s5236_s25  ;;  %v6638_v57 = vmax.f32 %v1440_v1, 0.0 }
 0x318   :  { %1552 = vrot.lane.b32.xlu1 %v6613_v20, %s5236_s25  ;;  %v6680_v21 = vmax.f32 %v1448_v58, 0.0 }
 0x319   :  { %v1401_v39 = vpop.permute.xlu1 %1400 }
 0x31a   :  { %v1409_v60 = vmul.f32 %v1401_v39, %v6401_v17  ;;  %v1417_v13 = vmul.f32 %v1401_v39, %v6504_v25  ;;  %v1410_v53 = vmul.f32 %v1401_v39, %v6404_v42  ;;  %v1416_v42 = vmul.f32 %v1396_v43, %v6484_v55  ;;  %v6697_v3 = vpop.permute.xlu2 %1487 }
 0x31b   :  { %v1414_v55 = vmul.f32 %v1391_v28, %v6466_v62  ;;  %v1418_v62 = vmul.f32 %v1401_v39, %v6518_v32  ;;  %v6721_v7 = vpop.permute.xlu0 %1482 }
 0x31c   :  { %v1452_v61 = vadd.f32 %v1432_v54, %v1416_v42  ;;  %v4966_v54 = vld [vmem:[%s11260_s8 + $0x38] sm:$0xff] }
 0x31e   :  { %v6667_v47 = vmax.f32 %v1452_v61, 0.0 }
 0x321   :  { %v1427_v5 = vpop.permute.xlu1 %1426 }
 0x322   :  { %v1441_v23 = vadd.f32 %v1427_v5, %v1405_v45  ;;  %v1449_v19 = vadd.f32 %v1427_v5, %v1413_v27  ;;  %v1442_v12 = vadd.f32 %v1427_v5, %v1406_v8  ;;  %v1450_v9 = vadd.f32 %v1427_v5, %v1414_v55  ;;  %v6705_v32 = vpop.permute.xlu2 %1518 }
 0x323   :  { %v6731_v29 = vpop.permute.xlu0 %1497 }
 0x324   :  { %v6624_v30 = vmax.f32 %v1441_v23, 0.0  ;;  %v6626_v59 = vmax.f32 %v1449_v19, 0.0  ;;  %v6669_v2 = vmax.f32 %v1442_v12, 0.0  ;;  %v6678_v40 = vmax.f32 %v1450_v9, 0.0  ;;  %11725 = vst [vmem:[#allocation46_spill] sm:$0xff] %v6731_v29 }
 0x326   :  { %1554 = vrot.lane.b32.xlu0 %v6624_v30, %s5236_s25  ;;  %1562 = vrot.lane.b32.xlu2 %v6626_v59, %s5236_s25 }
 0x329   :  { %v1437_v24 = vpop.permute.xlu1 %1436 }
 0x32a   :  { %v1445_v44 = vadd.f32 %v1437_v24, %v1409_v60  ;;  %v1453_v17 = vadd.f32 %v1437_v24, %v1417_v13  ;;  %v1446_v37 = vadd.f32 %v1437_v24, %v1410_v53  ;;  %v1454_v26 = vadd.f32 %v1437_v24, %v1418_v62  ;;  %v6713_v22 = vpop.permute.xlu2 %1533  ;;  %v4967_v60 = vld [vmem:[%s11260_s8 + $0x40] sm:$0xff]  ;;  %v4969_v13 = vld [vmem:[%s11260_s8 + $0x50] sm:$0xff] }
 0x32b   :  { %11724 = vst [vmem:[#allocation45_spill] sm:$0xff] %v6713_v22  ;;  %v6743_v36 = vpop.permute.xlu0 %1528 }
 0x32c   :  { %v6636_v34 = vmax.f32 %v1445_v44, 0.0  ;;  %v6649_v15 = vmax.f32 %v1453_v17, 0.0  ;;  %v6653_v25 = vmax.f32 %v1446_v37, 0.0  ;;  %v6689_v50 = vmax.f32 %v1454_v26, 0.0  ;;  %v4968_v37 = vld [vmem:[%s11260_s8 + $0x48] sm:$0xff] }
 0x32e   :  { %1560 = vrot.lane.b32.xlu0 %v6634_v11, %s5236_s25  ;;  %1558 = vrot.lane.b32.xlu1 %v6636_v34, %s5236_s25  ;;  %11722 = vst [vmem:[#allocation43_spill] sm:$0xff] %v6649_v15 }
 0x32f   :  { %1568 = vrot.lane.b32.xlu2 %v6638_v57, %s5236_s25  ;;  %11723 = vst [vmem:[#allocation44_spill] sm:$0xff] %v6689_v50 }
 0x331   :  { %v6748_v18 = vpop.permute.xlu1 %1492 }
 0x332   :  { %v6729_v6 = vpop.permute.xlu2 %1627 }
 0x333   :  { %v6759_v35 = vpop.permute.xlu0 %1622 }
 0x336   :  { %1566 = vrot.lane.b32.xlu0 %v6649_v15, %s5236_s25  ;;  %1564 = vrot.lane.b32.xlu1 %v6651_v41, %s5236_s25 }
 0x337   :  { %1574 = vrot.lane.b32.xlu2 %v6653_v25, %s5236_s25 }
 0x339   :  { %v6763_v46 = vpop.permute.xlu1 %1523 }
 0x33b   :  { %v6775_v28 = vpop.permute.xlu0 %1637 }
 0x33c   :  { %11726 = vst [vmem:[#allocation47_spill] sm:$0xff] %v6775_v28 }
 0x33e   :  { %1572 = vrot.lane.b32.xlu0 %v6664_v52, %s5236_s25  ;;  %1570 = vrot.lane.b32.xlu1 %v6669_v2, %s5236_s25 }
 0x33f   :  { %1580 = vrot.lane.b32.xlu2 %v6667_v47, %s5236_s25 }
 0x341   :  { %v6777_v45 = vpop.permute.xlu1 %1632 }
 0x346   :  { %1578 = vrot.lane.b32.xlu0 %v6678_v40, %s5236_s25  ;;  %1576 = vrot.lane.b32.xlu1 %v6680_v21, %s5236_s25 }
 0x347   :  { %1672 = vrot.lane.b32.xlu2 %v6613_v20, %s5237_s26 }
 0x34e   :  { %1676 = vrot.lane.b32.xlu0 %v6615_v48, %s5237_s26  ;;  %1582 = vrot.lane.b32.xlu1 %v6689_v50, %s5236_s25 }
 0x34f   :  { %1678 = vrot.lane.b32.xlu2 %v6636_v34, %s5237_s26 }
 0x356   :  { %1682 = vrot.lane.b32.xlu0 %v6626_v59, %s5237_s26  ;;  %1674 = vrot.lane.b32.xlu1 %v6624_v30, %s5237_s26 }
 0x357   :  { %1684 = vrot.lane.b32.xlu2 %v6651_v41, %s5237_s26 }
 0x35e   :  { %1688 = vrot.lane.b32.xlu0 %v6638_v57, %s5237_s26  ;;  %1680 = vrot.lane.b32.xlu1 %v6634_v11, %s5237_s26 }
 0x35f   :  { %1690 = vrot.lane.b32.xlu2 %v6669_v2, %s5237_s26 }
 0x366   :  { %1694 = vrot.lane.b32.xlu0 %v6653_v25, %s5237_s26  ;;  %1686 = vrot.lane.b32.xlu1 %v6649_v15, %s5237_s26 }
 0x367   :  { %1696 = vrot.lane.b32.xlu2 %v6680_v21, %s5237_s26 }
 0x36e   :  { %1700 = vrot.lane.b32.xlu0 %v6667_v47, %s5237_s26  ;;  %1692 = vrot.lane.b32.xlu1 %v6664_v52, %s5237_s26 }
 0x36f   :  { %1702 = vrot.lane.b32.xlu2 %v6689_v50, %s5237_s26 }
 0x371   :  { %v6741_v43 = vpop.permute.xlu2 %1556 }
 0x376   :  { %1748 = vperm.xlu0 %5070, %v4964_v33   ;;  %1698 = vrot.lane.b32.xlu1 %v6678_v40, %s5237_s26 }
 0x377   :  { %1753 = vperm.xlu2 %5071, %v4965_v31  }
 0x37e   :  { %1793 = vrot.lane.b32.xlu0 %v6613_v20, %s5238_s0  ;;  %1743 = vperm.xlu1 %5072, %v4963_v16  }
 0x37f   :  { %1795 = vrot.lane.b32.xlu2 %v6624_v30, %s5238_s0 }
 0x380   :  { %v6754_v10 = vpop.permute.xlu2 %1562 }
 0x386   :  { %1799 = vrot.lane.b32.xlu0 %v6636_v34, %s5238_s0  ;;  %1758 = vperm.xlu1 %5072, %v4966_v54   ;;  %v4971_v54 = vld [vmem:[%s11260_s8 + $0x60] sm:$0xff] }
 0x387   :  { %1801 = vrot.lane.b32.xlu2 %v6634_v11, %s5238_s0 }
 0x389   :  { %v6767_v39 = vpop.permute.xlu2 %1568 }
 0x38a   :  { %v6789_v23 = vpop.permute.xlu1 %1552 }
 0x38e   :  { %1805 = vrot.lane.b32.xlu0 %v6651_v41, %s5238_s0  ;;  %1797 = vrot.lane.b32.xlu1 %v6615_v48, %s5238_s0 }
 0x38f   :  { %1807 = vrot.lane.b32.xlu2 %v6649_v15, %s5238_s0 }
 0x391   :  { %v6779_v27 = vpop.permute.xlu2 %1574 }
 0x396   :  { %1811 = vrot.lane.b32.xlu0 %v6669_v2, %s5238_s0  ;;  %1803 = vrot.lane.b32.xlu1 %v6626_v59, %s5238_s0 }
 0x397   :  { %1813 = vrot.lane.b32.xlu2 %v6664_v52, %s5238_s0 }
 0x398   :  { %v6787_v5 = vpop.permute.xlu0 %1554 }
 0x399   :  { %v6791_v19 = vpop.permute.xlu2 %1580 }
 0x39e   :  { %1817 = vrot.lane.b32.xlu0 %v6680_v21, %s5238_s0  ;;  %1809 = vrot.lane.b32.xlu1 %v6638_v57, %s5238_s0 }
 0x39f   :  { %1819 = vrot.lane.b32.xlu2 %v6678_v40, %s5238_s0 }
 0x3a0   :  { %v6799_v38 = vpop.permute.xlu0 %1560  ;;  %v6801_v63 = vpop.permute.xlu1 %1558 }
 0x3a1   :  { %v6803_v0 = vpop.permute.xlu2 %1672 }
 0x3a6   :  { %1823 = vrot.lane.b32.xlu0 %v6689_v50, %s5238_s0  ;;  %1815 = vrot.lane.b32.xlu1 %v6653_v25, %s5238_s0 }
 0x3a7   :  { %1864 = vperm.xlu2 %5071, %v4967_v60   ;;  %v4972_v60 = vld [vmem:[%s11260_s8 + $0x68] sm:$0xff] }
 0x3a8   :  { %v6812_v1 = vpop.permute.xlu0 %1566  ;;  %v6814_v24 = vpop.permute.xlu1 %1564 }
 0x3a9   :  { %11727 = vst [vmem:[#allocation48_spill] sm:$0xff] %v6812_v1  ;;  %v6816_v44 = vpop.permute.xlu2 %1678 }
 0x3aa   :  { %11728 = vst [vmem:[#allocation49_spill] sm:$0xff] %v6816_v44 }
 0x3ae   :  { %1874 = vperm.xlu0 %5070, %v4969_v13   ;;  %1821 = vrot.lane.b32.xlu1 %v6667_v47, %s5238_s0 }
 0x3af   :  { %1879 = vperm.xlu2 %5071, %v4970_v49  }
 0x3b0   :  { %v6826_v53 = vpop.permute.xlu0 %1572  ;;  %v6828_v17 = vpop.permute.xlu1 %1570 }
 0x3b1   :  { %v6830_v14 = vpop.permute.xlu2 %1684 }
 0x3b6   :  { %1916 = vrot.lane.b32.xlu0 %v6624_v30, %s5239_s2  ;;  %1869 = vperm.xlu1 %5072, %v4968_v37  }
 0x3b7   :  { %1918 = vrot.lane.b32.xlu2 %v6615_v48, %s5239_s2 }
 0x3b8   :  { %v6839_v56 = vpop.permute.xlu0 %1578  ;;  %v6841_v42 = vpop.permute.xlu1 %1576 }
 0x3b9   :  { %v6843_v8 = vpop.permute.xlu2 %1690 }
 0x3be   :  { %1922 = vrot.lane.b32.xlu0 %v6634_v11, %s5239_s2  ;;  %1914 = vrot.lane.b32.xlu1 %v6613_v20, %s5239_s2 }
 0x3bf   :  { %1924 = vrot.lane.b32.xlu2 %v6626_v59, %s5239_s2 }
 0x3c0   :  { %v6851_v51 = vpop.permute.xlu0 %1676  ;;  %v6853_v61 = vpop.permute.xlu1 %1582 }
 0x3c1   :  { %11729 = vst [vmem:[#allocation50_spill] sm:$0xff] %v6853_v61  ;;  %v6855_v12 = vpop.permute.xlu2 %1696  ;;  %v4973_v61 = vld [vmem:[%s11260_s8 + $0x70] sm:$0xff] }
 0x3c2   :  { %11730 = vst [vmem:[#allocation51_spill] sm:$0xff] %v6855_v12 }
 0x3c6   :  { %1928 = vrot.lane.b32.xlu0 %v6649_v15, %s5239_s2  ;;  %1920 = vrot.lane.b32.xlu1 %v6636_v34, %s5239_s2 }
 0x3c7   :  { %1930 = vrot.lane.b32.xlu2 %v6638_v57, %s5239_s2 }
 0x3c8   :  { %v6863_v4 = vpop.permute.xlu0 %1682  ;;  %v6865_v55 = vpop.permute.xlu1 %1674 }
 0x3c9   :  { %v6867_v9 = vpop.permute.xlu2 %1702 }
 0x3ca   :  { %11731 = vst [vmem:[#allocation52_spill] sm:$0xff] %v6867_v9 }
 0x3ce   :  { %1934 = vrot.lane.b32.xlu0 %v6664_v52, %s5239_s2  ;;  %1926 = vrot.lane.b32.xlu1 %v6651_v41, %s5239_s2 }
 0x3cf   :  { %1936 = vrot.lane.b32.xlu2 %v6653_v25, %s5239_s2 }
 0x3d0   :  { %v6875_v58 = vpop.permute.xlu0 %1688  ;;  %v6877_v62 = vpop.permute.xlu1 %1680 }
 0x3d1   :  { %v6879_v26 = vpop.permute.xlu2 %1753 }
 0x3d2   :  { %11732 = vst [vmem:[#allocation53_spill] sm:$0xff] %v6879_v26  ;;  %v1509_v26 = vmul.f32 %v6721_v7, %v6680_v21 }
 0x3d6   :  { %1940 = vrot.lane.b32.xlu0 %v6678_v40, %s5239_s2  ;;  %1932 = vrot.lane.b32.xlu1 %v6669_v2, %s5239_s2 }
 0x3d7   :  { %1942 = vrot.lane.b32.xlu2 %v6667_v47, %s5239_s2 }
 0x3d8   :  { %v6887_v33 = vpop.permute.xlu0 %1694  ;;  %v6889_v31 = vpop.permute.xlu1 %1686 }
 0x3d9   :  { %11733 = vst [vmem:[#allocation54_spill] sm:$0xff] %v6887_v33  ;;  %v6891_v16 = vpop.permute.xlu2 %1795 }
 0x3da   :  { %11734 = vst [vmem:[#allocation55_spill] sm:$0xff] %v6889_v31  ;;  %v4974_v31 = vld [vmem:[%s11260_s8 + $0x78] sm:$0xff] }
 0x3db   :  { %11735 = vst [vmem:[#allocation56_spill] sm:$0xff] %v6891_v16 }
 0x3de   :  { %1985 = vperm.xlu0 %5070, %v4971_v54   ;;  %1938 = vrot.lane.b32.xlu1 %v6680_v21, %s5239_s2 }
 0x3df   :  { %1990 = vperm.xlu2 %5071, %v4972_v60  }
 0x3e0   :  { %v6901_v13 = vpop.permute.xlu0 %1700  ;;  %v6903_v49 = vpop.permute.xlu1 %1692 }
 0x3e1   :  { %v6905_v37 = vpop.permute.xlu2 %1801 }
 0x3e2   :  { %11736 = vst [vmem:[#allocation57_spill] sm:$0xff] %v6905_v37 }
 0x3e6   :  { %2000 = vperm.xlu0 %5070, %v4974_v31   ;;  %1944 = vrot.lane.b32.xlu1 %v6689_v50, %s5239_s2 }
 0x3e7   :  { %2035 = vrot.lane.b32.xlu2 %v6613_v20, %s5240_s18 }
 0x3e8   :  { %v6914_v54 = vpop.permute.xlu0 %1748  ;;  %v6916_v60 = vpop.permute.xlu1 %1698 }
 0x3e9   :  { %11737 = vst [vmem:[#allocation58_spill] sm:$0xff] %v6914_v54  ;;  %v6918_v9 = vpop.permute.xlu2 %1807  ;;  %v7288_v54 = vld [vmem:[%s11263_s10 + $0x10] sm:$0xff] }
 0x3ea   :  { %11738 = vst [vmem:[#allocation59_spill] sm:$0xff] %v6918_v9 }
 0x3ee   :  { %2039 = vrot.lane.b32.xlu0 %v6615_v48, %s5240_s18  ;;  %1995 = vperm.xlu1 %5072, %v4973_v61  }
 0x3ef   :  { %2041 = vrot.lane.b32.xlu2 %v6636_v34, %s5240_s18 }
 0x3f0   :  { %v6927_v31 = vpop.permute.xlu0 %1793  ;;  %v6929_v1 = vpop.permute.xlu1 %1743 }
 0x3f1   :  { %11739 = vst [vmem:[#allocation60_spill] sm:$0xff] %v6927_v31  ;;  %v6931_v16 = vpop.permute.xlu2 %1813 }
 0x3f2   :  { %11740 = vst [vmem:[#allocation61_spill] sm:$0xff] %v6929_v1 }
 0x3f3   :  { %11741 = vst [vmem:[#allocation62_spill] sm:$0xff] %v6931_v16 }
 0x3f6   :  { %2045 = vrot.lane.b32.xlu0 %v6626_v59, %s5240_s18  ;;  %2037 = vrot.lane.b32.xlu1 %v6624_v30, %s5240_s18 }
 0x3f7   :  { %2047 = vrot.lane.b32.xlu2 %v6651_v41, %s5240_s18 }
 0x3f8   :  { %v6939_v9 = vpop.permute.xlu0 %1799  ;;  %v6941_v61 = vpop.permute.xlu1 %1758 }
 0x3f9   :  { %11742 = vst [vmem:[#allocation63_spill] sm:$0xff] %v6939_v9  ;;  %v6943_v37 = vpop.permute.xlu2 %1819 }
 0x3fa   :  { %11743 = vst [vmem:[#allocation64_spill] sm:$0xff] %v6941_v61 }
 0x3fb   :  { %11744 = vst [vmem:[#allocation65_spill] sm:$0xff] %v6943_v37 }
 0x3fe   :  { %2051 = vrot.lane.b32.xlu0 %v6638_v57, %s5240_s18  ;;  %2043 = vrot.lane.b32.xlu1 %v6634_v11, %s5240_s18 }
 0x3ff   :  { %2053 = vrot.lane.b32.xlu2 %v6669_v2, %s5240_s18 }
 0x400   :  { %v6951_v16 = vpop.permute.xlu0 %1805  ;;  %v6953_v31 = vpop.permute.xlu1 %1797 }
 0x401   :  { %11745 = vst [vmem:[#allocation66_spill] sm:$0xff] %v6951_v16  ;;  %v6955_v1 = vpop.permute.xlu2 %1864 }
 0x402   :  { %11746 = vst [vmem:[#allocation67_spill] sm:$0xff] %v6953_v31 }
 0x403   :  { %11747 = vst [vmem:[#allocation68_spill] sm:$0xff] %v6955_v1 }
 0x406   :  { %2057 = vrot.lane.b32.xlu0 %v6653_v25, %s5240_s18  ;;  %2049 = vrot.lane.b32.xlu1 %v6649_v15, %s5240_s18 }
 0x407   :  { %2059 = vrot.lane.b32.xlu2 %v6680_v21, %s5240_s18 }
 0x408   :  { %v6963_v37 = vpop.permute.xlu0 %1811  ;;  %v6965_v9 = vpop.permute.xlu1 %1803 }
 0x409   :  { %11748 = vst [vmem:[#allocation69_spill] sm:$0xff] %v6963_v37  ;;  %v6967_v61 = vpop.permute.xlu2 %1879 }
 0x40a   :  { %11749 = vst [vmem:[#allocation70_spill] sm:$0xff] %v6965_v9  ;;  %v4976_v9 = vld [vmem:[%s11260_s8 + $0xa8] sm:$0xff] }
 0x40b   :  { %11750 = vst [vmem:[#allocation71_spill] sm:$0xff] %v6967_v61  ;;  %v4977_v61 = vld [vmem:[%s11260_s8 + $0xb0] sm:$0xff] }
 0x40e   :  { %2063 = vrot.lane.b32.xlu0 %v6667_v47, %s5240_s18  ;;  %2055 = vrot.lane.b32.xlu1 %v6664_v52, %s5240_s18 }
 0x40f   :  { %2065 = vrot.lane.b32.xlu2 %v6689_v50, %s5240_s18 }
 0x410   :  { %v6975_v1 = vpop.permute.xlu0 %1817  ;;  %v6977_v16 = vpop.permute.xlu1 %1809 }
 0x411   :  { %11751 = vst [vmem:[#allocation72_spill] sm:$0xff] %v6975_v1  ;;  %v6979_v31 = vpop.permute.xlu2 %1918 }
 0x412   :  { %11752 = vst [vmem:[#allocation73_spill] sm:$0xff] %v6977_v16 }
 0x413   :  { %11753 = vst [vmem:[#allocation74_spill] sm:$0xff] %v6979_v31  ;;  %v4975_v31 = vld [vmem:[%s11260_s8 + $0xa0] sm:$0xff] }
 0x416   :  { %2111 = vperm.xlu0 %5070, %v4976_v9   ;;  %2061 = vrot.lane.b32.xlu1 %v6678_v40, %s5240_s18 }
 0x417   :  { %2116 = vperm.xlu2 %5071, %v4977_v61  }
 0x418   :  { %v6989_v37 = vpop.permute.xlu0 %1823  ;;  %v6991_v1 = vpop.permute.xlu1 %1815 }
 0x419   :  { %11754 = vst [vmem:[#allocation75_spill] sm:$0xff] %v6989_v37  ;;  %v6993_v16 = vpop.permute.xlu2 %1924 }
 0x41a   :  { %11755 = vst [vmem:[#allocation76_spill] sm:$0xff] %v6991_v1 }
 0x41b   :  { %11756 = vst [vmem:[#allocation77_spill] sm:$0xff] %v6993_v16  ;;  %v4978_v16 = vld [vmem:[%s11260_s8 + $0xb8] sm:$0xff] }
 0x41e   :  { %2156 = vrot.lane.b32.xlu0 %v6613_v20, %s5241_s4  ;;  %2106 = vperm.xlu1 %5072, %v4975_v31  }
 0x41f   :  { %2158 = vrot.lane.b32.xlu2 %v6624_v30, %s5241_s4 }
 0x420   :  { %v7002_v9 = vpop.permute.xlu0 %1874  ;;  %v7004_v61 = vpop.permute.xlu1 %1821 }
 0x421   :  { %11757 = vst [vmem:[#allocation78_spill] sm:$0xff] %v7002_v9  ;;  %v7006_v37 = vpop.permute.xlu2 %1930 }
 0x422   :  { %11758 = vst [vmem:[#allocation79_spill] sm:$0xff] %v7004_v61 }
 0x423   :  { %11759 = vst [vmem:[#allocation80_spill] sm:$0xff] %v7006_v37 }
 0x426   :  { %2162 = vrot.lane.b32.xlu0 %v6636_v34, %s5241_s4  ;;  %2121 = vperm.xlu1 %5072, %v4978_v16  }
 0x427   :  { %2164 = vrot.lane.b32.xlu2 %v6634_v11, %s5241_s4 }
 0x428   :  { %v7015_v31 = vpop.permute.xlu0 %1916  ;;  %v7017_v1 = vpop.permute.xlu1 %1869 }
 0x429   :  { %11760 = vst [vmem:[#allocation81_spill] sm:$0xff] %v7015_v31  ;;  %v7019_v9 = vpop.permute.xlu2 %1936 }
 0x42a   :  { %11761 = vst [vmem:[#allocation82_spill] sm:$0xff] %v7017_v1 }
 0x42b   :  { %11762 = vst [vmem:[#allocation83_spill] sm:$0xff] %v7019_v9 }
 0x42e   :  { %2168 = vrot.lane.b32.xlu0 %v6651_v41, %s5241_s4  ;;  %2160 = vrot.lane.b32.xlu1 %v6615_v48, %s5241_s4 }
 0x42f   :  { %2170 = vrot.lane.b32.xlu2 %v6649_v15, %s5241_s4 }
 0x430   :  { %v7027_v37 = vpop.permute.xlu0 %1922  ;;  %v7029_v16 = vpop.permute.xlu1 %1914 }
 0x431   :  { %11763 = vst [vmem:[#allocation84_spill] sm:$0xff] %v7027_v37  ;;  %v7031_v61 = vpop.permute.xlu2 %1942 }
 0x432   :  { %11764 = vst [vmem:[#allocation85_spill] sm:$0xff] %v7029_v16 }
 0x433   :  { %11765 = vst [vmem:[#allocation86_spill] sm:$0xff] %v7031_v61 }
 0x436   :  { %2174 = vrot.lane.b32.xlu0 %v6669_v2, %s5241_s4  ;;  %2166 = vrot.lane.b32.xlu1 %v6626_v59, %s5241_s4 }
 0x437   :  { %2176 = vrot.lane.b32.xlu2 %v6664_v52, %s5241_s4 }
 0x438   :  { %v7039_v9 = vpop.permute.xlu0 %1928  ;;  %v7041_v31 = vpop.permute.xlu1 %1920 }
 0x439   :  { %11766 = vst [vmem:[#allocation87_spill] sm:$0xff] %v7039_v9  ;;  %v7043_v1 = vpop.permute.xlu2 %1990  ;;  %v4979_v9 = vld [vmem:[%s11260_s8 + $0xc0] sm:$0xff] }
 0x43a   :  { %11767 = vst [vmem:[#allocation88_spill] sm:$0xff] %v7041_v31 }
 0x43b   :  { %11768 = vst [vmem:[#allocation89_spill] sm:$0xff] %v7043_v1 }
 0x43e   :  { %2180 = vrot.lane.b32.xlu0 %v6680_v21, %s5241_s4  ;;  %2172 = vrot.lane.b32.xlu1 %v6638_v57, %s5241_s4 }
 0x43f   :  { %2182 = vrot.lane.b32.xlu2 %v6678_v40, %s5241_s4 }
 0x440   :  { %v7051_v61 = vpop.permute.xlu0 %1934  ;;  %v7053_v37 = vpop.permute.xlu1 %1926 }
 0x441   :  { %11769 = vst [vmem:[#allocation90_spill] sm:$0xff] %v7051_v61  ;;  %v7055_v16 = vpop.permute.xlu2 %2035 }
 0x442   :  { %11770 = vst [vmem:[#allocation91_spill] sm:$0xff] %v7053_v37  ;;  %v4982_v37 = vld [vmem:[%s11260_s8 + $0xd8] sm:$0xff] }
 0x443   :  { %11771 = vst [vmem:[#allocation92_spill] sm:$0xff] %v7055_v16  ;;  %v4981_v16 = vld [vmem:[%s11260_s8 + $0xd0] sm:$0xff] }
 0x446   :  { %2186 = vrot.lane.b32.xlu0 %v6689_v50, %s5241_s4  ;;  %2178 = vrot.lane.b32.xlu1 %v6653_v25, %s5241_s4 }
 0x447   :  { %2227 = vperm.xlu2 %5071, %v4979_v9  }
 0x448   :  { %v7064_v1 = vpop.permute.xlu0 %1940  ;;  %v7066_v31 = vpop.permute.xlu1 %1932 }
 0x449   :  { %11772 = vst [vmem:[#allocation93_spill] sm:$0xff] %v7064_v1  ;;  %v7068_v61 = vpop.permute.xlu2 %2041 }
 0x44a   :  { %11773 = vst [vmem:[#allocation94_spill] sm:$0xff] %v7066_v31 }
 0x44b   :  { %11774 = vst [vmem:[#allocation95_spill] sm:$0xff] %v7068_v61  ;;  %v4980_v61 = vld [vmem:[%s11260_s8 + $0xc8] sm:$0xff] }
 0x44e   :  { %2237 = vperm.xlu0 %5070, %v4981_v16   ;;  %2184 = vrot.lane.b32.xlu1 %v6667_v47, %s5241_s4 }
 0x44f   :  { %2242 = vperm.xlu2 %5071, %v4982_v37  }
 0x450   :  { %v7078_v9 = vpop.permute.xlu0 %1985  ;;  %v7080_v1 = vpop.permute.xlu1 %1938 }
 0x451   :  { %11775 = vst [vmem:[#allocation96_spill] sm:$0xff] %v7078_v9  ;;  %v7082_v31 = vpop.permute.xlu2 %2047 }
 0x452   :  { %11776 = vst [vmem:[#allocation97_spill] sm:$0xff] %v7080_v1 }
 0x453   :  { %11777 = vst [vmem:[#allocation98_spill] sm:$0xff] %v7082_v31 }
 0x456   :  { %2279 = vrot.lane.b32.xlu0 %v6624_v30, %s11778_s19  ;;  %2232 = vperm.xlu1 %5072, %v4980_v61  }
 0x457   :  { %2281 = vrot.lane.b32.xlu2 %v6615_v48, %s11778_s19 }
 0x458   :  { %v7091_v16 = vpop.permute.xlu0 %2000  ;;  %v7093_v37 = vpop.permute.xlu1 %1944 }
 0x459   :  { %11779 = vst [vmem:[#allocation99_spill] sm:$0xff] %v7091_v16  ;;  %v7095_v9 = vpop.permute.xlu2 %2053 }
 0x45a   :  { %11780 = vst [vmem:[#allocation100_spill] sm:$0xff] %v7093_v37 }
 0x45b   :  { %11781 = vst [vmem:[#allocation101_spill] sm:$0xff] %v7095_v9 }
 0x45e   :  { %2285 = vrot.lane.b32.xlu0 %v6634_v11, %s11778_s19  ;;  %2277 = vrot.lane.b32.xlu1 %v6613_v20, %s11778_s19 }
 0x45f   :  { %2287 = vrot.lane.b32.xlu2 %v6626_v59, %s11778_s19 }
 0x460   :  { %v7103_v31 = vpop.permute.xlu0 %2039  ;;  %v7105_v61 = vpop.permute.xlu1 %1995 }
 0x461   :  { %11782 = vst [vmem:[#allocation102_spill] sm:$0xff] %v7103_v31  ;;  %v7107_v1 = vpop.permute.xlu2 %2059 }
 0x462   :  { %11783 = vst [vmem:[#allocation103_spill] sm:$0xff] %v7105_v61 }
 0x463   :  { %11784 = vst [vmem:[#allocation104_spill] sm:$0xff] %v7107_v1 }
 0x466   :  { %2291 = vrot.lane.b32.xlu0 %v6649_v15, %s11778_s19  ;;  %2283 = vrot.lane.b32.xlu1 %v6636_v34, %s11778_s19 }
 0x467   :  { %2293 = vrot.lane.b32.xlu2 %v6638_v57, %s11778_s19 }
 0x468   :  { %v7115_v37 = vpop.permute.xlu0 %2045  ;;  %v7117_v9 = vpop.permute.xlu1 %2037 }
 0x469   :  { %11785 = vst [vmem:[#allocation105_spill] sm:$0xff] %v7115_v37  ;;  %v7119_v16 = vpop.permute.xlu2 %2065 }
 0x46a   :  { %11786 = vst [vmem:[#allocation106_spill] sm:$0xff] %v7117_v9 }
 0x46b   :  { %11787 = vst [vmem:[#allocation107_spill] sm:$0xff] %v7119_v16 }
 0x46e   :  { %2297 = vrot.lane.b32.xlu0 %v6664_v52, %s11778_s19  ;;  %2289 = vrot.lane.b32.xlu1 %v6651_v41, %s11778_s19 }
 0x46f   :  { %2299 = vrot.lane.b32.xlu2 %v6653_v25, %s11778_s19 }
 0x470   :  { %v7127_v1 = vpop.permute.xlu0 %2051  ;;  %v7129_v31 = vpop.permute.xlu1 %2043 }
 0x471   :  { %11788 = vst [vmem:[#allocation108_spill] sm:$0xff] %v7127_v1  ;;  %v7131_v61 = vpop.permute.xlu2 %2116 }
 0x472   :  { %11789 = vst [vmem:[#allocation109_spill] sm:$0xff] %v7129_v31  ;;  %v4983_v31 = vld [vmem:[%s11260_s8 + $0xe0] sm:$0xff] }
 0x473   :  { %11790 = vst [vmem:[#allocation110_spill] sm:$0xff] %v7131_v61  ;;  %v4984_v61 = vld [vmem:[%s11260_s8 + $0xe8] sm:$0xff] }
 0x476   :  { %2303 = vrot.lane.b32.xlu0 %v6678_v40, %s11778_s19  ;;  %2295 = vrot.lane.b32.xlu1 %v6669_v2, %s11778_s19 }
 0x477   :  { %2305 = vrot.lane.b32.xlu2 %v6667_v47, %s11778_s19 }
 0x478   :  { %v7139_v16 = vpop.permute.xlu0 %2057  ;;  %v7141_v37 = vpop.permute.xlu1 %2049 }
 0x479   :  { %11791 = vst [vmem:[#allocation111_spill] sm:$0xff] %v7139_v16  ;;  %v7143_v9 = vpop.permute.xlu2 %2158 }
 0x47a   :  { %11792 = vst [vmem:[#allocation112_spill] sm:$0xff] %v7141_v37 }
 0x47b   :  { %11793 = vst [vmem:[#allocation113_spill] sm:$0xff] %v7143_v9  ;;  %v4986_v9 = vld [vmem:[%s11260_s8 + $0xf8] sm:$0xff] }
 0x47e   :  { %2348 = vperm.xlu0 %5070, %v4983_v31   ;;  %2301 = vrot.lane.b32.xlu1 %v6680_v21, %s11778_s19 }
 0x47f   :  { %2353 = vperm.xlu2 %5071, %v4984_v61  }
 0x480   :  { %v7153_v1 = vpop.permute.xlu0 %2063  ;;  %v7155_v16 = vpop.permute.xlu1 %2055 }
 0x481   :  { %11794 = vst [vmem:[#allocation114_spill] sm:$0xff] %v7153_v1  ;;  %v7157_v37 = vpop.permute.xlu2 %2164 }
 0x482   :  { %11795 = vst [vmem:[#allocation115_spill] sm:$0xff] %v7155_v16 }
 0x483   :  { %11796 = vst [vmem:[#allocation116_spill] sm:$0xff] %v7157_v37  ;;  %v4985_v37 = vld [vmem:[%s11260_s8 + $0xf0] sm:$0xff] }
 0x486   :  { %2363 = vperm.xlu0 %5070, %v4986_v9   ;;  %2307 = vrot.lane.b32.xlu1 %v6689_v50, %s11778_s19 }
 0x487   :  { %2398 = vrot.lane.b32.xlu2 %v6613_v20, %s5243_s3 }
 0x488   :  { %v7166_v31 = vpop.permute.xlu0 %2111  ;;  %v7168_v61 = vpop.permute.xlu1 %2061 }
 0x489   :  { %11797 = vst [vmem:[#allocation117_spill] sm:$0xff] %v7166_v31  ;;  %v7170_v1 = vpop.permute.xlu2 %2170 }
 0x48a   :  { %11798 = vst [vmem:[#allocation118_spill] sm:$0xff] %v7168_v61 }
 0x48b   :  { %11799 = vst [vmem:[#allocation119_spill] sm:$0xff] %v7170_v1 }
 0x48e   :  { %2402 = vrot.lane.b32.xlu0 %v6615_v48, %s5243_s3  ;;  %2358 = vperm.xlu1 %5072, %v4985_v37  }
 0x48f   :  { %2404 = vrot.lane.b32.xlu2 %v6636_v34, %s5243_s3 }
 0x490   :  { %v7179_v9 = vpop.permute.xlu0 %2156  ;;  %v7181_v16 = vpop.permute.xlu1 %2106 }
 0x491   :  { %11800 = vst [vmem:[#allocation120_spill] sm:$0xff] %v7179_v9  ;;  %v7183_v31 = vpop.permute.xlu2 %2176 }
 0x492   :  { %11801 = vst [vmem:[#allocation121_spill] sm:$0xff] %v7181_v16 }
 0x493   :  { %11802 = vst [vmem:[#allocation122_spill] sm:$0xff] %v7183_v31 }
 0x496   :  { %2408 = vrot.lane.b32.xlu0 %v6626_v59, %s5243_s3  ;;  %2400 = vrot.lane.b32.xlu1 %v6624_v30, %s5243_s3 }
 0x497   :  { %2410 = vrot.lane.b32.xlu2 %v6651_v41, %s5243_s3 }
 0x498   :  { %v7191_v1 = vpop.permute.xlu0 %2162  ;;  %v7193_v37 = vpop.permute.xlu1 %2121 }
 0x499   :  { %11803 = vst [vmem:[#allocation123_spill] sm:$0xff] %v7191_v1  ;;  %v7195_v61 = vpop.permute.xlu2 %2182 }
 0x49a   :  { %11804 = vst [vmem:[#allocation124_spill] sm:$0xff] %v7193_v37 }
 0x49b   :  { %11805 = vst [vmem:[#allocation125_spill] sm:$0xff] %v7195_v61 }
 0x49e   :  { %2414 = vrot.lane.b32.xlu0 %v6638_v57, %s5243_s3  ;;  %2406 = vrot.lane.b32.xlu1 %v6634_v11, %s5243_s3 }
 0x49f   :  { %2416 = vrot.lane.b32.xlu2 %v6669_v2, %s5243_s3 }
 0x4a0   :  { %v7203_v31 = vpop.permute.xlu0 %2168  ;;  %v7205_v9 = vpop.permute.xlu1 %2160 }
 0x4a1   :  { %11806 = vst [vmem:[#allocation126_spill] sm:$0xff] %v7203_v31  ;;  %v7207_v16 = vpop.permute.xlu2 %2227 }
 0x4a2   :  { %11807 = vst [vmem:[#allocation127_spill] sm:$0xff] %v7205_v9 }
 0x4a3   :  { %11808 = vst [vmem:[#allocation128_spill] sm:$0xff] %v7207_v16 }
 0x4a6   :  { %2420 = vrot.lane.b32.xlu0 %v6653_v25, %s5243_s3  ;;  %2412 = vrot.lane.b32.xlu1 %v6649_v15, %s5243_s3 }
 0x4a7   :  { %2422 = vrot.lane.b32.xlu2 %v6680_v21, %s5243_s3 }
 0x4a8   :  { %v7215_v61 = vpop.permute.xlu0 %2174  ;;  %v7217_v1 = vpop.permute.xlu1 %2166 }
 0x4a9   :  { %11809 = vst [vmem:[#allocation129_spill] sm:$0xff] %v7215_v61  ;;  %v7219_v37 = vpop.permute.xlu2 %2242  ;;  %v4988_v61 = vld [vmem:[%s11260_s8 + $0x108] sm:$0xff] }
 0x4aa   :  { %11810 = vst [vmem:[#allocation130_spill] sm:$0xff] %v7217_v1  ;;  %v4989_v1 = vld [vmem:[%s11260_s8 + $0x110] sm:$0xff] }
 0x4ab   :  { %11811 = vst [vmem:[#allocation131_spill] sm:$0xff] %v7219_v37 }
 0x4ae   :  { %2426 = vrot.lane.b32.xlu0 %v6667_v47, %s5243_s3  ;;  %2418 = vrot.lane.b32.xlu1 %v6664_v52, %s5243_s3 }
 0x4af   :  { %2428 = vrot.lane.b32.xlu2 %v6689_v50, %s5243_s3 }
 0x4b0   :  { %v7227_v31 = vpop.permute.xlu0 %2180  ;;  %v7229_v15 = vpop.permute.xlu1 %2172 }
 0x4b1   :  { %11812 = vst [vmem:[#allocation132_spill] sm:$0xff] %v7227_v31  ;;  %v7231_v9 = vpop.permute.xlu2 %2281  ;;  %v4990_v31 = vld [vmem:[%s11260_s8 + $0x118] sm:$0xff] }
 0x4b2   :  { %11813 = vst [vmem:[#allocation133_spill] sm:$0xff] %v7229_v15  ;;  %v4987_v15 = vld [vmem:[%s11260_s8 + $0x100] sm:$0xff] }
 0x4b3   :  { %11814 = vst [vmem:[#allocation134_spill] sm:$0xff] %v7231_v9  ;;  %v7250_v9 = vld [vmem:[%s11263_s10] sm:$0xff] }
 0x4b6   :  { %2474 = vperm.xlu0 %5070, %v4988_v61   ;;  %2424 = vrot.lane.b32.xlu1 %v6678_v40, %s5243_s3  ;;  %v7258_v61 = vld [vmem:[%s11263_s10 + $0x8] sm:$0xff] }
 0x4b7   :  { %2479 = vperm.xlu2 %5071, %v4989_v1  }
 0x4b8   :  { %v7241_v50 = vpop.permute.xlu0 %2186  ;;  %v7243_v37 = vpop.permute.xlu1 %2178 }
 0x4b9   :  { %11815 = vst [vmem:[#allocation135_spill] sm:$0xff] %v7241_v50  ;;  %v7245_v16 = vpop.permute.xlu2 %2287 }
 0x4ba   :  { %11816 = vst [vmem:[#allocation136_spill] sm:$0xff] %v7243_v37  ;;  %v7271_v37 = vld [vmem:[%s11263_s10 + $0x18] sm:$0xff] }
 0x4bb   :  { %11817 = vst [vmem:[#allocation137_spill] sm:$0xff] %v7245_v16 }
 0x4be   :  { %2533 = vperm.xlu0 %5070, %v7250_v9   ;;  %2469 = vperm.xlu1 %5072, %v4987_v15   ;;  %v11821_v15 = vmov 1  }
 0x4bf   :  { %2538 = vperm.xlu2 %5071, %v7258_v61  }
 0x4c0   :  { %v7262_v1 = vpop.permute.xlu0 %2237  ;;  %v7264_v50 = vpop.permute.xlu1 %2184 }
 0x4c1   :  { %11818 = vst [vmem:[#allocation138_spill] sm:$0xff] %v7262_v1  ;;  %v7266_v16 = vpop.permute.xlu2 %2293 }
 0x4c2   :  { %11819 = vst [vmem:[#allocation139_spill] sm:$0xff] %v7264_v50 }
 0x4c3   :  { %11820 = vst [vmem:[#allocation140_spill] sm:$0xff] %v7266_v16 }
 0x4c6   :  { %2548 = vperm.xlu0 %5070, %v7271_v37   ;;  %2484 = vperm.xlu1 %5072, %v4990_v31   ;;  %v1500_v31 = vmul.f32 %v6721_v7, %v6613_v20  ;;  %v1506_v20 = vmul.f32 %v6731_v29, %v6636_v34  ;;  %v1504_v34 = vmul.f32 %v6748_v18, %v6615_v48 }
 0x4c7   :  { %5073 = vset.pattern.permute.xlu2 %v11821_v15 }
 0x4c8   :  { %2572 = vperm.xlu2 %5073, %v7250_v9   ;;  %v7279_v1 = vpop.permute.xlu0 %2279  ;;  %v7281_v50 = vpop.permute.xlu1 %2232  ;;  %v7313_v12 = vadd.f32 %v6705_v32, %v1500_v31  ;;  %v1505_v31 = vmul.f32 %v6748_v18, %v6664_v52 }
 0x4c9   :  { %11822 = vst [vmem:[#allocation141_spill] sm:$0xff] %v7279_v1  ;;  %v7283_v16 = vpop.permute.xlu2 %2299  ;;  %v1501_v1 = vmul.f32 %v6721_v7, %v6638_v57  ;;  %v1507_v57 = vmul.f32 %v6731_v29, %v6653_v25  ;;  %v1512_v25 = vmul.f32 %v6748_v18, %v6651_v41  ;;  %v7348_v41 = vmul.f32 %v6697_v3, %v6678_v40  ;;  %v11834_v29 = vld [vmem:[#allocation27_spill] sm:$0xff] }
 0x4ca   :  { %11823 = vst [vmem:[#allocation142_spill] sm:$0xff] %v7281_v50 }
 0x4cb   :  { %11824 = vst [vmem:[#allocation143_spill] sm:$0xff] %v7283_v16  ;;  %v1508_v16 = vmul.f32 %v6721_v7, %v6634_v11  ;;  %v1513_v11 = vmul.f32 %v6748_v18, %v6667_v47  ;;  %v7324_v7 = vadd.f32 %v6705_v32, %v1509_v26  ;;  %v1503_v47 = vmul.f32 %v6697_v3, %v6669_v2 }
 0x4cc   :  { %v7344_v48 = vadd.f32 %v6713_v22, %v1507_v57  ;;  %v1592_v2 = vsel %vm529_vm0, %v6767_v39, %v6789_v23  ;;  %v7372_v26 = vadd.f32 %v6743_v36, %v1512_v25  ;;  %v1590_v57 = vsel %vm529_vm0, %v6814_v24, %v6791_v19 }
 0x4cd   :  { %v7321_v21 = vadd.f32 %v6705_v32, %v1508_v16  ;;  %v7338_v16 = vmul.f32 %v6697_v3, %v6626_v59  ;;  %v1584_v59 = vsel %vm529_vm0, %v6789_v23, %v6767_v39  ;;  %v7361_v18 = vadd.f32 %v6743_v36, %v1513_v11 }
 0x4ce   :  { %5075 = vset.pattern.permute.xlu0 %v11821_v15  ;;  %2543 = vperm.xlu1 %5072, %v7288_v54   ;;  %v1598_v11 = vsel %vm529_vm0, %v6791_v19, %v6814_v24  ;;  %v1585_v19 = vsel %vm529_vm0, %v6787_v5, %v6828_v17  ;;  %v1586_v24 = vsel %vm529_vm0, %v6741_v43, %v6826_v53 }
 0x4cf   :  { %2580 = vperm.xlu0 %5075, %v7288_v54  }
 0x4d0   :  { %2584 = vperm.xlu2 %5073, %v7271_v37   ;;  %v7298_v50 = vpop.permute.xlu0 %2285  ;;  %v7304_v33 = vpop.permute.xlu1 %2277 }
 0x4d1   :  { %11825 = vst [vmem:[#allocation144_spill] sm:$0xff] %v7298_v50  ;;  %v7306_v44 = vpop.permute.xlu2 %2305  ;;  %v7316_v50 = vadd.f32 %v6705_v32, %v1501_v1  ;;  %v1502_v1 = vmul.f32 %v6697_v3, %v6624_v30  ;;  %v7341_v32 = vadd.f32 %v6713_v22, %v1506_v20  ;;  %v11828_v30 = vmov 2  }
 0x4d2   :  { %11826 = vst [vmem:[#allocation145_spill] sm:$0xff] %v7304_v33  ;;  %v1595_v3 = vsel %vm529_vm0, %v6779_v27, %v6801_v63  ;;  %v1587_v20 = vsel %vm529_vm0, %v6801_v63, %v6779_v27  ;;  %v1594_v27 = vsel %vm529_vm0, %v6826_v53, %v6741_v43  ;;  %v1589_v43 = vsel %vm529_vm0, %v6754_v10, %v6839_v56 }
 0x4d3   :  { %11827 = vst [vmem:[#allocation146_spill] sm:$0xff] %v7306_v44  ;;  %v1538_v25 = vadd.f32 %v6763_v46, %v1502_v1  ;;  %v1601_v44 = vmul.f32 %v1584_v59, %v11834_v29  ;;  %v1613_v59 = vmul.f32 %v1590_v57, %v11834_v29  ;;  %v1539_v53 = vadd.f32 %v6763_v46, %v1503_v47 }
 0x4d4   :  { %v1605_v57 = vmul.f32 %v1586_v24, %v11834_v29  ;;  %v1611_v47 = vmul.f32 %v1589_v43, %v11834_v29 }
 0x4d6   :  { %5074 = vset.pattern.permute.xlu1 %v11821_v15  ;;  %v7375_v15 = vadd.f32 %v6743_v36, %v1504_v34  ;;  %v1541_v34 = vadd.f32 %v6743_v36, %v1505_v31  ;;  %v1593_v36 = vsel %vm529_vm0, %v6828_v17, %v6787_v5  ;;  %v1607_v31 = vmul.f32 %v1587_v20, %v11834_v29 }
 0x4d7   :  { %5078 = vset.pattern.permute.xlu0 %v11828_v30  ;;  %2576 = vperm.xlu1 %5074, %v7258_v61   ;;  %v1596_v5 = vsel %vm529_vm0, %v6841_v42, %v6799_v38  ;;  %v1603_v20 = vmul.f32 %v1585_v19, %v11834_v29 }
 0x4d8   :  { %5077 = vset.pattern.permute.xlu2 %v11828_v30  ;;  %v7365_v40 = vpop.permute.xlu0 %2291  ;;  %v7377_v39 = vpop.permute.xlu1 %2283  ;;  %2636 = vperm.xlu0 %5078, %v7271_v37  }
 0x4d9   :  { %11830 = vst [vmem:[#allocation147_spill] sm:$0xff] %v7365_v40  ;;  %2628 = vperm.xlu2 %5077, %v7258_v61   ;;  %v7381_v23 = vpop.permute.xlu2 %2353  ;;  %v11833_v40 = vld [vmem:[#allocation29_spill] sm:$0xff] }
 0x4da   :  { %11831 = vst [vmem:[#allocation148_spill] sm:$0xff] %v7377_v39  ;;  %v1600_v22 = vmul.f32 %v1592_v2, %v11833_v40  ;;  %v1606_v63 = vmul.f32 %v1595_v3, %v11833_v40  ;;  %v1612_v1 = vmul.f32 %v1598_v11, %v11833_v40  ;;  %v1597_v2 = vsel %vm529_vm0, %v6839_v56, %v6754_v10 }
 0x4db   :  { %11832 = vst [vmem:[#allocation149_spill] sm:$0xff] %v7381_v23  ;;  %v1604_v3 = vmul.f32 %v1594_v27, %v11833_v40  ;;  %v1602_v17 = vmul.f32 %v1593_v36, %v11833_v40  ;;  %v1641_v27 = vmul.f32 %v6759_v35, %v1601_v44  ;;  %v1610_v39 = vmul.f32 %v1597_v2, %v11833_v40 }
 0x4dc   :  { %v1640_v11 = vmul.f32 %v6759_v35, %v1600_v22  ;;  %v1646_v23 = vmul.f32 %v6775_v28, %v1606_v63  ;;  %v1588_v10 = vsel %vm529_vm0, %v6799_v38, %v6841_v42  ;;  %v1608_v56 = vmul.f32 %v1596_v5, %v11833_v40 }
 0x4dd   :  { %v11461_v44 = vmov 4   ;;  %v1652_v19 = vmul.f32 %v6777_v45, %v1612_v1  ;;  %v1653_v36 = vmul.f32 %v6777_v45, %v1613_v59  ;;  %v1644_v38 = vmul.f32 %v6777_v45, %v1604_v3 }
 0x4de   :  { %v11837_v42 = vmov 3   ;;  %v1642_v24 = vmul.f32 %v6729_v6, %v1602_v17  ;;  %v1643_v2 = vmul.f32 %v6729_v6, %v1603_v20  ;;  %v1645_v5 = vmul.f32 %v6777_v45, %v1605_v57 }
 0x4df   :  { %5076 = vset.pattern.permute.xlu1 %v11828_v30  ;;  %v1647_v30 = vmul.f32 %v6775_v28, %v1607_v31  ;;  %v1546_v31 = vadd.f32 %v6763_v46, %v7338_v16  ;;  %v1547_v1 = vadd.f32 %v6763_v46, %v7348_v41  ;;  %v1609_v59 = vmul.f32 %v1588_v10, %v11834_v29  ;;  %v11914_v29 = vld [vmem:[#allocation95_spill] sm:$0xff] }
 0x4e0   :  { %v7441_v33 = vpop.permute.xlu0 %2297  ;;  %2624 = vperm.xlu1 %5076, %v7250_v9   ;;  %v7450_v22 = vpop.permute.xlu1 %2289  ;;  %5081 = vset.pattern.permute.xlu0 %v11461_v44  ;;  %v1650_v3 = vmul.f32 %v6729_v6, %v1610_v39  ;;  %v7472_v43 = vadd.f32 %v1640_v11, %v7313_v12  ;;  %v7475_v17 = vadd.f32 %v1641_v27, %v7316_v50  ;;  %v11838_v27 = vld [vmem:[#allocation30_spill] sm:$0xff] }
 0x4e1   :  { %11835 = vst [vmem:[#allocation150_spill] sm:$0xff] %v7441_v33  ;;  %v7453_v63 = vpop.permute.xlu2 %2398  ;;  %5079 = vset.pattern.permute.xlu2 %v11837_v42  ;;  %2728 = vperm.xlu0 %5081, %v7250_v9   ;;  %v1648_v45 = vmul.f32 %v6759_v35, %v1608_v56  ;;  %v1651_v20 = vmul.f32 %v6729_v6, %v1611_v47  ;;  %v11839_v47 = vld [vmem:[#allocation51_spill] sm:$0xff] }
 0x4e2   :  { %11836 = vst [vmem:[#allocation151_spill] sm:$0xff] %v7450_v22  ;;  %2676 = vperm.xlu2 %5079, %v7250_v9   ;;  %v7480_v57 = vadd.f32 %v1646_v23, %v7341_v32  ;;  %v7483_v16 = vadd.f32 %v1647_v30, %v7344_v48  ;;  %v1668_v46 = vadd.f32 %v1652_v19, %v7372_v26  ;;  %v11840_v19 = vld [vmem:[#allocation31_spill] sm:$0xff]  ;;  %v11915_v22 = vld [vmem:[#allocation117_spill] sm:$0xff] }
 0x4e3   :  { %v7487_v41 = vadd.f32 %v1653_v36, %v7361_v18  ;;  %v7489_v12 = vadd.f32 %v1642_v24, %v1538_v25  ;;  %v7491_v39 = vadd.f32 %v1643_v2, %v1539_v53  ;;  %v7494_v50 = vadd.f32 %v1644_v38, %v7375_v15 }
 0x4e4   :  { %v7496_v11 = vadd.f32 %v1645_v5, %v1541_v34  ;;  %v1649_v6 = vmul.f32 %v6759_v35, %v1609_v59  ;;  %v7499_v32 = vadd.f32 %v1650_v3, %v1546_v31  ;;  %v1718_v48 = vsel %vm586_vm2, %v6901_v13, %v6830_v14  ;;  %v11842_v59 = vld [vmem:[#allocation54_spill] sm:$0xff] }
 0x4e5   :  { %v7508_v26 = vadd.f32 %v1648_v45, %v7321_v21  ;;  %v7510_v23 = vadd.f32 %v1651_v20, %v1547_v1  ;;  %v1714_v15 = vsel %vm586_vm2, %v6903_v49, %v6851_v51  ;;  %v1710_v35 = vsel %vm586_vm2, %v6830_v14, %v6901_v13  ;;  %v11841_v1 = vld [vmem:[#allocation49_spill] sm:$0xff] }
 0x4e6   :  { %v1705_v21 = vsel %vm586_vm2, %v6865_v55, %v6843_v8  ;;  %v1713_v53 = vsel %vm586_vm2, %v6843_v8, %v6865_v55  ;;  %v1712_v14 = vsel %vm586_vm2, %v6875_v58, %v6803_v0  ;;  %v1706_v13 = vsel %vm586_vm2, %v6851_v51, %v6903_v49 }
 0x4e7   :  { %v1732_v10 = vmul.f32 %v1718_v48, %v11838_v27  ;;  %v1709_v56 = vsel %vm586_vm2, %v6863_v4, %v6916_v60  ;;  %v1717_v8 = vsel %vm586_vm2, %v6916_v60, %v6863_v4  ;;  %v11459_v55 = vmov 5  }
 0x4e8   :  { %v7505_v18 = vpop.permute.xlu0 %2303  ;;  %2632 = vperm.xlu1 %5076, %v7288_v54   ;;  %v7521_v34 = vpop.permute.xlu1 %2295  ;;  %v1716_v51 = vsel %vm586_vm2, %v11839_v47, %v6877_v62  ;;  %v1704_v49 = vsel %vm586_vm2, %v6803_v0, %v6875_v58  ;;  %v1724_v30 = vmul.f32 %v1714_v15, %v11838_v27  ;;  %v1733_v36 = vmul.f32 %v1710_v35, %v11840_v19 }
 0x4e9   :  { %v7523_v25 = vpop.permute.xlu2 %2404  ;;  %5085 = vset.pattern.permute.xlu0 %v11459_v55  ;;  %v1665_v4 = vadd.f32 %v1649_v6, %v7324_v7  ;;  %v1722_v60 = vmul.f32 %v1713_v53, %v11838_v27  ;;  %v1708_v38 = vsel %vm586_vm2, %v6877_v62, %v11839_v47  ;;  %v1725_v24 = vmul.f32 %v1706_v13, %v11840_v19  ;;  %v11843_v62 = vld [vmem:[#allocation53_spill] sm:$0xff]  ;;  %v11844_v53 = vld [vmem:[#allocation58_spill] sm:$0xff] }
 0x4ea   :  { %2684 = vperm.xlu2 %5079, %v7288_v54   ;;  %2784 = vperm.xlu0 %5085, %v7258_v61   ;;  %v1723_v2 = vmul.f32 %v1705_v21, %v11840_v19  ;;  %v1720_v0 = vmul.f32 %v1712_v14, %v11838_v27  ;;  %v1730_v58 = vmul.f32 %v1717_v8, %v11838_v27 }
 0x4eb   :  { %v1731_v5 = vmul.f32 %v1709_v56, %v11840_v19  ;;  %v1728_v31 = vmul.f32 %v1716_v51, %v11838_v27  ;;  %v1721_v7 = vmul.f32 %v1704_v49, %v11840_v19  ;;  %v1715_v3 = vsel %vm586_vm2, %v11842_v59, %v11841_v1  ;;  %v11846_v49 = vld [vmem:[#allocation61_spill] sm:$0xff] }
 0x4ec   :  { %v1773_v45 = vmul.f32 %v11843_v62, %v1732_v10  ;;  %v1729_v20 = vmul.f32 %v1708_v38, %v11840_v19  ;;  %v1707_v6 = vsel %vm586_vm2, %v11841_v1, %v11842_v59  ;;  %v1765_v48 = vmul.f32 %v11843_v62, %v1724_v30 }
 0x4ed   :  { %v1774_v15 = vmul.f32 %v11843_v62, %v1733_v36  ;;  %v1766_v21 = vmul.f32 %v11843_v62, %v1725_v24  ;;  %v1763_v14 = vmul.f32 %v11844_v53, %v1722_v60  ;;  %v1764_v13 = vmul.f32 %v11844_v53, %v1723_v2  ;;  %v11849_v62 = vld [vmem:[#allocation72_spill] sm:$0xff] }
 0x4ee   :  { %v1726_v8 = vmul.f32 %v1715_v3, %v11838_v27  ;;  %v1771_v47 = vmul.f32 %v11844_v53, %v1730_v58  ;;  %v1772_v51 = vmul.f32 %v11844_v53, %v1731_v5  ;;  %v1761_v30 = vmul.f32 %v11846_v49, %v1720_v0  ;;  %v11847_v58 = vld [vmem:[#allocation64_spill] sm:$0xff]  ;;  %v11848_v3 = vld [vmem:[#allocation57_spill] sm:$0xff] }
 0x4ef   :  { %v1727_v36 = vmul.f32 %v1707_v6, %v11840_v19  ;;  %v7604_v60 = vadd.f32 %v1773_v45, %v1668_v46  ;;  %v1769_v38 = vmul.f32 %v11846_v49, %v1728_v31  ;;  %v7610_v24 = vadd.f32 %v1774_v15, %v7487_v41  ;;  %v11851_v45 = vld [vmem:[#allocation73_spill] sm:$0xff]  ;;  %v11852_v6 = vld [vmem:[#allocation67_spill] sm:$0xff] }
 0x4f0   :  { %v7588_v35 = vpop.permute.xlu0 %2348  ;;  %5080 = vset.pattern.permute.xlu1 %v11837_v42  ;;  %v7594_v10 = vpop.permute.xlu1 %2301  ;;  %v1762_v42 = vmul.f32 %v11846_v49, %v1721_v7  ;;  %v1770_v2 = vmul.f32 %v11846_v49, %v1729_v20  ;;  %v1767_v5 = vmul.f32 %v11847_v58, %v1726_v8  ;;  %v11457_v0 = vmov 6   ;;  %v11856_v8 = vld [vmem:[#allocation76_spill] sm:$0xff] }
 0x4f1   :  { %v7596_v56 = vpop.permute.xlu2 %2410  ;;  %2680 = vperm.xlu1 %5080, %v7258_v61   ;;  %v7617_v46 = vadd.f32 %v1765_v48, %v7494_v50  ;;  %v7620_v7 = vadd.f32 %v1766_v21, %v7496_v11  ;;  %v7623_v31 = vadd.f32 %v1763_v14, %v7489_v12  ;;  %v7626_v41 = vadd.f32 %v1764_v13, %v7491_v39  ;;  %v11850_v39 = vld [vmem:[#allocation60_spill] sm:$0xff]  ;;  %v11853_v48 = vld [vmem:[#allocation62_spill] sm:$0xff] }
 0x4f2   :  { %11845 = vst [vmem:[#allocation51_spill] sm:$0xff] %v7596_v56  ;;  %5082 = vset.pattern.permute.xlu2 %v11461_v44  ;;  %5089 = vset.pattern.permute.xlu0 %v11457_v0  ;;  %v7630_v1 = vadd.f32 %v1771_v47, %v7499_v32  ;;  %v7633_v59 = vadd.f32 %v1772_v51, %v7510_v23  ;;  %v11855_v14 = vld [vmem:[#allocation32_spill] sm:$0xff]  ;;  %v11857_v47 = vld [vmem:[#allocation63_spill] sm:$0xff] }
 0x4f3   :  { %2732 = vperm.xlu2 %5082, %v7258_v61   ;;  %2840 = vperm.xlu0 %5089, %v7288_v54   ;;  %v1777_v50 = vadd.f32 %v1761_v30, %v7472_v43  ;;  %v1837_v11 = vsel %vm644_vm1, %v11849_v62, %v11848_v3  ;;  %v7641_v12 = vadd.f32 %v1762_v42, %v7475_v17 }
 0x4f4   :  { %v1833_v20 = vsel %vm644_vm1, %v11851_v45, %v11850_v39  ;;  %v1785_v32 = vadd.f32 %v1769_v38, %v7508_v26  ;;  %v1829_v43 = vsel %vm644_vm1, %v11848_v3, %v11849_v62  ;;  %v1768_v23 = vmul.f32 %v11847_v58, %v1727_v36  ;;  %v11859_v36 = vld [vmem:[#allocation28_spill] sm:$0xff]  ;;  %v11860_v38 = vld [vmem:[#allocation66_spill] sm:$0xff]  ;;  %v11862_v62 = vld [vmem:[#allocation69_spill] sm:$0xff] }
 0x4f5   :  { %v1835_v17 = vsel %vm644_vm1, %v11853_v48, %v11852_v6  ;;  %v1786_v15 = vadd.f32 %v1770_v2, %v1665_v4  ;;  %v1783_v21 = vadd.f32 %v1767_v5, %v7480_v57  ;;  %v1825_v26 = vsel %vm644_vm1, %v11850_v39, %v11851_v45  ;;  %v11861_v2 = vld [vmem:[#allocation79_spill] sm:$0xff] }
 0x4f6   :  { %v1849_v13 = vmul.f32 %v1837_v11, %v11855_v14  ;;  %v1828_v51 = vsel %vm644_vm1, %v11857_v47, %v11856_v8  ;;  %v1836_v4 = vsel %vm644_vm1, %v11856_v8, %v11857_v47  ;;  %v1841_v30 = vmul.f32 %v1833_v20, %v11855_v14  ;;  %v11863_v11 = vld [vmem:[#allocation56_spill] sm:$0xff]  ;;  %v11865_v8 = vld [vmem:[#allocation65_spill] sm:$0xff] }
 0x4f7   :  { %v1850_v42 = vmul.f32 %v1829_v43, %v11859_v36  ;;  %v1839_v5 = vsel %vm644_vm1, %v11861_v2, %v11860_v38  ;;  %v1827_v3 = vsel %vm644_vm1, %v11852_v6, %v11853_v48  ;;  %v1826_v39 = vsel %vm644_vm1, %v11863_v11, %v11862_v62  ;;  %v11864_v43 = vld [vmem:[#allocation70_spill] sm:$0xff] }
 0x4f8   :  { %v7658_v53 = vpop.permute.xlu0 %2363  ;;  %v7673_v57 = vpop.permute.xlu1 %2307  ;;  %v1834_v45 = vsel %vm644_vm1, %v11862_v62, %v11863_v11  ;;  %v1831_v20 = vsel %vm644_vm1, %v11860_v38, %v11861_v2  ;;  %v1838_v6 = vsel %vm644_vm1, %v11865_v8, %v11864_v43  ;;  %v1842_v48 = vmul.f32 %v1825_v26, %v11859_v36  ;;  %v11866_v11 = vld [vmem:[#allocation68_spill] sm:$0xff] }
 0x4f9   :  { %11854 = vst [vmem:[#allocation49_spill] sm:$0xff] %v7658_v53  ;;  %v7675_v49 = vpop.permute.xlu2 %2416  ;;  %2688 = vperm.xlu1 %5080, %v7271_v37   ;;  %v1847_v47 = vmul.f32 %v1836_v4, %v11855_v14  ;;  %v1848_v0 = vmul.f32 %v1828_v51, %v11859_v36  ;;  %v1845_v62 = vmul.f32 %v1835_v17, %v11855_v14  ;;  %v11462_v2 = vmov 7  }
 0x4fa   :  { %11858 = vst [vmem:[#allocation54_spill] sm:$0xff] %v7673_v57  ;;  %v1890_v55 = vmul.f32 %v11866_v11, %v1849_v13  ;;  %v1784_v44 = vadd.f32 %v1768_v23, %v7483_v16  ;;  %v1853_v38 = vmul.f32 %v1839_v5, %v11855_v14  ;;  %v1830_v26 = vsel %vm644_vm1, %v11864_v43, %v11865_v8  ;;  %v11867_v57 = vld [vmem:[#allocation71_spill] sm:$0xff]  ;;  %v11868_v8 = vld [vmem:[#allocation78_spill] sm:$0xff] }
 0x4fb   :  { %2740 = vperm.xlu2 %5082, %v7271_v37   ;;  %5092 = vset.pattern.permute.xlu0 %v11462_v2  ;;  %v1882_v51 = vmul.f32 %v11866_v11, %v1841_v30  ;;  %v1891_v4 = vmul.f32 %v11866_v11, %v1850_v42  ;;  %v1854_v17 = vmul.f32 %v1831_v20, %v11859_v36 }
 0x4fc   :  { %2896 = vperm.xlu0 %5092, %v7271_v37   ;;  %v1846_v16 = vmul.f32 %v1827_v3, %v11859_v36  ;;  %v1851_v23 = vmul.f32 %v1838_v6, %v11855_v14  ;;  %v1843_v13 = vmul.f32 %v1834_v45, %v11855_v14  ;;  %v1844_v5 = vmul.f32 %v1826_v39, %v11859_v36  ;;  %v11891_v14 = vld [vmem:[#allocation89_spill] sm:$0xff] }
 0x4fd   :  { %v1883_v2 = vmul.f32 %v11866_v11, %v1842_v48  ;;  %v1888_v43 = vmul.f32 %v11867_v57, %v1847_v47  ;;  %v1889_v30 = vmul.f32 %v11867_v57, %v1848_v0  ;;  %v1886_v42 = vmul.f32 %v11868_v8, %v1845_v62  ;;  %v11871_v62 = vld [vmem:[#allocation82_spill] sm:$0xff] }
 0x4fe   :  { %v1852_v20 = vmul.f32 %v1830_v26, %v11859_v36  ;;  %v7732_v19 = vadd.f32 %v1890_v55, %v1785_v32  ;;  %v1887_v3 = vmul.f32 %v11868_v8, %v1846_v16  ;;  %v1894_v45 = vmul.f32 %v11868_v8, %v1853_v38  ;;  %v11874_v16 = vld [vmem:[#allocation93_spill] sm:$0xff] }
 0x4ff   :  { %v7740_v48 = vadd.f32 %v1882_v51, %v1777_v50  ;;  %v7742_v47 = vadd.f32 %v1891_v4, %v1786_v15  ;;  %v1895_v0 = vmul.f32 %v11868_v8, %v1854_v17  ;;  %v1884_v11 = vmul.f32 %v11871_v62, %v1843_v13  ;;  %v11879_v13 = vld [vmem:[#allocation81_spill] sm:$0xff] }
 0x500   :  { %v7729_v58 = vpop.permute.xlu0 %2402  ;;  %v7736_v6 = vpop.permute.xlu1 %2358  ;;  %v11872_v57 = vmov 4   ;;  %v1885_v55 = vmul.f32 %v11871_v62, %v1844_v5  ;;  %v1892_v32 = vmul.f32 %v11871_v62, %v1851_v23  ;;  %v1893_v38 = vmul.f32 %v11871_v62, %v1852_v20  ;;  %v11875_v23 = vld [vmem:[#allocation77_spill] sm:$0xff] }
 0x501   :  { %11869 = vst [vmem:[#allocation53_spill] sm:$0xff] %v7729_v58  ;;  %v7738_v39 = vpop.permute.xlu2 %2422  ;;  %5083 = vset.pattern.permute.xlu1 %v11872_v57  ;;  %v7752_v26 = vadd.f32 %v1883_v2, %v7641_v12  ;;  %v7754_v50 = vadd.f32 %v1888_v43, %v1783_v21  ;;  %v7756_v15 = vadd.f32 %v1889_v30, %v1784_v44  ;;  %v11873_v4 = vmov 5   ;;  %v11877_v21 = vld [vmem:[#allocation80_spill] sm:$0xff]  ;;  %v11878_v2 = vld [vmem:[#allocation94_spill] sm:$0xff] }
 0x502   :  { %11870 = vst [vmem:[#allocation58_spill] sm:$0xff] %v7736_v6  ;;  %2736 = vperm.xlu1 %5083, %v7288_v54   ;;  %v7759_v51 = vadd.f32 %v1886_v42, %v7617_v46  ;;  %v7763_v57 = vadd.f32 %v1887_v3, %v7620_v7  ;;  %v7766_v17 = vadd.f32 %v1894_v45, %v7604_v60  ;;  %v11876_v7 = vld [vmem:[#allocation85_spill] sm:$0xff]  ;;  %v11468_v30 = vmov 9  }
 0x503   :  { %5086 = vset.pattern.permute.xlu2 %v11873_v4  ;;  %v1951_v12 = vsel %vm702_vm4, %v11875_v23, %v11874_v16  ;;  %v1959_v44 = vsel %vm702_vm4, %v11874_v16, %v11875_v23  ;;  %v7778_v46 = vadd.f32 %v1895_v0, %v7610_v24  ;;  %v1954_v60 = vsel %vm702_vm4, %v11877_v21, %v11876_v7  ;;  %v11880_v3 = vld [vmem:[#allocation33_spill] sm:$0xff]  ;;  %v11881_v0 = vld [vmem:[#allocation34_spill] sm:$0xff]  ;;  %v11883_v23 = vld [vmem:[#allocation84_spill] sm:$0xff] }
 0x504   :  { %2788 = vperm.xlu2 %5086, %v7288_v54   ;;  %v1947_v5 = vsel %vm702_vm4, %v11879_v13, %v11878_v2  ;;  %v1955_v43 = vsel %vm702_vm4, %v11878_v2, %v11879_v13  ;;  %5095 = vset.pattern.permute.xlu0 %v11468_v30  ;;  %v1900_v24 = vadd.f32 %v1884_v11, %v7623_v31  ;;  %v11882_v16 = vld [vmem:[#allocation97_spill] sm:$0xff] }
 0x505   :  { %v1901_v8 = vadd.f32 %v1885_v55, %v7626_v41  ;;  %v1908_v42 = vadd.f32 %v1892_v32, %v7630_v1  ;;  %v1909_v20 = vadd.f32 %v1893_v38, %v7633_v59  ;;  %2988 = vperm.xlu0 %5095, %v7250_v9   ;;  %v1972_v45 = vmul.f32 %v1959_v44, %v11880_v3  ;;  %v11886_v44 = vld [vmem:[#allocation88_spill] sm:$0xff] }
 0x506   :  { %v1973_v62 = vmul.f32 %v1951_v12, %v11881_v0  ;;  %v1950_v2 = vsel %vm702_vm4, %v11883_v23, %v11882_v16  ;;  %v1958_v31 = vsel %vm702_vm4, %v11882_v16, %v11883_v23  ;;  %v1946_v1 = vsel %vm702_vm4, %v11876_v7, %v11877_v21  ;;  %v11885_v12 = vld [vmem:[#allocation83_spill] sm:$0xff]  ;;  %v11887_v21 = vld [vmem:[#allocation90_spill] sm:$0xff] }
 0x507   :  { %v1962_v59 = vmul.f32 %v1954_v60, %v11880_v3  ;;  %v1964_v11 = vmul.f32 %v1955_v43, %v11880_v3  ;;  %v1965_v55 = vmul.f32 %v1947_v5, %v11881_v0  ;;  %v1949_v13 = vsel %vm702_vm4, %v11886_v44, %v11885_v12  ;;  %v11888_v60 = vld [vmem:[#allocation74_spill] sm:$0xff]  ;;  %v11890_v23 = vld [vmem:[#allocation91_spill] sm:$0xff] }
 0x508   :  { %v7808_v41 = vpop.permute.xlu0 %2408  ;;  %v7817_v32 = vpop.permute.xlu1 %2400  ;;  %v1957_v7 = vsel %vm702_vm4, %v11885_v12, %v11886_v44  ;;  %v1948_v43 = vsel %vm702_vm4, %v11888_v60, %v11887_v21  ;;  %v1956_v5 = vsel %vm702_vm4, %v11887_v21, %v11888_v60  ;;  %v11889_v16 = vld [vmem:[#allocation86_spill] sm:$0xff]  ;;  %v1970_v44 = vmul.f32 %v1958_v31, %v11880_v3 }
 0x509   :  { %v7819_v38 = vpop.permute.xlu2 %2428  ;;  %v1952_v30 = vsel %vm702_vm4, %v11890_v23, %v11889_v16  ;;  %v1960_v12 = vsel %vm702_vm4, %v11889_v16, %v11890_v23  ;;  %v1963_v36 = vmul.f32 %v1946_v1, %v11881_v0  ;;  %v2013_v21 = vmul.f32 %v11891_v14, %v1972_v45  ;;  %v11893_v1 = vld [vmem:[#allocation96_spill] sm:$0xff] }
 0x50a   :  { %11884 = vst [vmem:[#allocation61_spill] sm:$0xff] %v7819_v38  ;;  %v1971_v38 = vmul.f32 %v1950_v2, %v11881_v0  ;;  %5084 = vset.pattern.permute.xlu1 %v11873_v4  ;;  %v2014_v60 = vmul.f32 %v11891_v14, %v1973_v62  ;;  %v1968_v27 = vmul.f32 %v1957_v7, %v11880_v3  ;;  %v11892_v23 = vmov 6  }
 0x50b   :  { %2780 = vperm.xlu1 %5084, %v7250_v9   ;;  %v1969_v28 = vmul.f32 %v1949_v13, %v11881_v0  ;;  %v2005_v16 = vmul.f32 %v11891_v14, %v1964_v11  ;;  %v2006_v31 = vmul.f32 %v11891_v14, %v1965_v55  ;;  %v1974_v4 = vmul.f32 %v1960_v12, %v11880_v3 }
 0x50c   :  { %5087 = vset.pattern.permute.xlu2 %v11892_v23  ;;  %v1975_v2 = vmul.f32 %v1952_v30, %v11881_v0  ;;  %v1966_v45 = vmul.f32 %v1956_v5, %v11880_v3  ;;  %v1967_v62 = vmul.f32 %v1948_v43, %v11881_v0  ;;  %v2003_v7 = vmul.f32 %v11893_v1, %v1962_v59  ;;  %v11894_v5 = vld [vmem:[#allocation99_spill] sm:$0xff] }
 0x50d   :  { %2832 = vperm.xlu2 %5087, %v7250_v9   ;;  %v2004_v13 = vmul.f32 %v11893_v1, %v1963_v36  ;;  %v2011_v11 = vmul.f32 %v11893_v1, %v1970_v44  ;;  %v2012_v14 = vmul.f32 %v11893_v1, %v1971_v38  ;;  %v11477_v55 = vmov 10   ;;  %v11895_v38 = vld [vmem:[#allocation103_spill] sm:$0xff] }
 0x50e   :  { %5099 = vset.pattern.permute.xlu0 %v11477_v55  ;;  %v7867_v12 = vadd.f32 %v2013_v21, %v1908_v42  ;;  %v7869_v30 = vadd.f32 %v2014_v60, %v1909_v20  ;;  %v2009_v3 = vmul.f32 %v11894_v5, %v1968_v27  ;;  %v2010_v43 = vmul.f32 %v11894_v5, %v1969_v28  ;;  %v11897_v21 = vld [vmem:[#allocation114_spill] sm:$0xff] }
 0x50f   :  { %3044 = vperm.xlu0 %5099, %v7258_v61   ;;  %v7876_v36 = vadd.f32 %v2005_v16, %v1900_v24  ;;  %v7878_v44 = vadd.f32 %v2006_v31, %v1901_v8  ;;  %v2007_v1 = vmul.f32 %v11895_v38, %v1966_v45  ;;  %v2008_v55 = vmul.f32 %v11895_v38, %v1967_v62  ;;  %v11898_v60 = vld [vmem:[#allocation98_spill] sm:$0xff] }
 0x510   :  { %v7874_v59 = vpop.permute.xlu0 %2414  ;;  %v7882_v42 = vpop.permute.xlu1 %2406  ;;  %v2015_v27 = vmul.f32 %v11895_v38, %v1974_v4  ;;  %v2016_v28 = vmul.f32 %v11895_v38, %v1975_v2  ;;  %v2073_v24 = vsel %vm760_vm5, %v11898_v60, %v11897_v21  ;;  %v2081_v8 = vsel %vm760_vm5, %v11897_v21, %v11898_v60  ;;  %v11899_v38 = vld [vmem:[#allocation101_spill] sm:$0xff]  ;;  %v11900_v21 = vld [vmem:[#allocation106_spill] sm:$0xff] }
 0x511   :  { %v7884_v20 = vpop.permute.xlu2 %2479  ;;  %v7897_v16 = vadd.f32 %v2003_v7, %v7740_v48  ;;  %v7900_v31 = vadd.f32 %v2004_v13, %v7752_v26  ;;  %v7903_v4 = vadd.f32 %v2011_v11, %v7732_v19  ;;  %v7906_v2 = vadd.f32 %v2012_v14, %v7742_v47  ;;  %v11901_v7 = vld [vmem:[#allocation115_spill] sm:$0xff]  ;;  %v11902_v26 = vld [vmem:[#allocation102_spill] sm:$0xff] }
 0x512   :  { %11896 = vst [vmem:[#allocation57_spill] sm:$0xff] %v7884_v20  ;;  %v7909_v45 = vadd.f32 %v2009_v3, %v7754_v50  ;;  %v7912_v62 = vadd.f32 %v2010_v43, %v7756_v15  ;;  %v2068_v48 = vsel %vm760_vm5, %v11900_v21, %v11899_v38  ;;  %v2069_v19 = vsel %vm760_vm5, %v11902_v26, %v11901_v7  ;;  %v11903_v50 = vld [vmem:[#allocation35_spill] sm:$0xff]  ;;  %v11904_v3 = vld [vmem:[#allocation36_spill] sm:$0xff] }
 0x513   :  { %2792 = vperm.xlu1 %5084, %v7271_v37   ;;  %v2077_v47 = vsel %vm760_vm5, %v11901_v7, %v11902_v26  ;;  %v2095_v15 = vmul.f32 %v2073_v24, %v11903_v50  ;;  %v2096_v13 = vmul.f32 %v2081_v8, %v11904_v3  ;;  %v2023_v11 = vadd.f32 %v2007_v1, %v7759_v51  ;;  %v11905_v8 = vld [vmem:[#allocation118_spill] sm:$0xff]  ;;  %v11906_v26 = vld [vmem:[#allocation105_spill] sm:$0xff] }
 0x514   :  { %v2024_v14 = vadd.f32 %v2008_v55, %v7763_v57  ;;  %v2031_v43 = vadd.f32 %v2015_v27, %v7766_v17  ;;  %v2032_v60 = vadd.f32 %v2016_v28, %v7778_v46  ;;  %v2076_v5 = vsel %vm760_vm5, %v11899_v38, %v11900_v21  ;;  %v11907_v57 = vld [vmem:[#allocation108_spill] sm:$0xff] }
 0x515   :  { %2844 = vperm.xlu2 %5087, %v7271_v37   ;;  %v2085_v7 = vmul.f32 %v2068_v48, %v11903_v50  ;;  %v2087_v24 = vmul.f32 %v2069_v19, %v11903_v50  ;;  %v2072_v51 = vsel %vm760_vm5, %v11906_v26, %v11905_v8  ;;  %v11908_v17 = vld [vmem:[#allocation92_spill] sm:$0xff]  ;;  %v2088_v1 = vmul.f32 %v2077_v47, %v11904_v3  ;;  %v11910_v48 = vld [vmem:[#allocation109_spill] sm:$0xff] }
 0x516   :  { %v2067_v46 = vsel %vm760_vm5, %v11908_v17, %v11907_v57  ;;  %v2075_v55 = vsel %vm760_vm5, %v11907_v57, %v11908_v17  ;;  %v2080_v27 = vsel %vm760_vm5, %v11905_v8, %v11906_v26  ;;  %v11481_v28 = vmov 11   ;;  %v11909_v21 = vld [vmem:[#allocation104_spill] sm:$0xff]  ;;  %v11911_v57 = vld [vmem:[#allocation110_spill] sm:$0xff] }
 0x517   :  { %5103 = vset.pattern.permute.xlu0 %v11481_v28  ;;  %v2071_v19 = vsel %vm760_vm5, %v11910_v48, %v11909_v21  ;;  %v2079_v47 = vsel %vm760_vm5, %v11909_v21, %v11910_v48  ;;  %v2136_v17 = vmul.f32 %v11911_v57, %v2095_v15  ;;  %v2137_v0 = vmul.f32 %v11911_v57, %v2096_v13  ;;  %v11913_v28 = vld [vmem:[#allocation111_spill] sm:$0xff] }
 0x518   :  { %v7958_v38 = vpop.permute.xlu0 %2420  ;;  %3100 = vperm.xlu0 %5103, %v7288_v54   ;;  %v7971_v8 = vpop.permute.xlu1 %2412  ;;  %v2086_v26 = vmul.f32 %v2076_v5, %v11904_v3  ;;  %v2070_v40 = vsel %vm760_vm5, %v11914_v29, %v11913_v28  ;;  %v2078_v21 = vsel %vm760_vm5, %v11913_v28, %v11914_v29  ;;  %v2093_v15 = vmul.f32 %v2072_v51, %v11903_v50 }
 0x519   :  { %11912 = vst [vmem:[#allocation72_spill] sm:$0xff] %v7971_v8  ;;  %v7983_v48 = vpop.permute.xlu2 %2538  ;;  %v2083_v13 = vmul.f32 %v2067_v46, %v11903_v50  ;;  %v2084_v8 = vmul.f32 %v2075_v55, %v11904_v3  ;;  %v2128_v5 = vmul.f32 %v11911_v57, %v2087_v24  ;;  %v2094_v20 = vmul.f32 %v2080_v27, %v11904_v3 }
 0x51a   :  { %v2091_v56 = vmul.f32 %v2071_v19, %v11903_v50  ;;  %v2092_v58 = vmul.f32 %v2079_v47, %v11904_v3  ;;  %v2129_v6 = vmul.f32 %v11911_v57, %v2088_v1  ;;  %v2126_v29 = vmul.f32 %v11915_v22, %v2085_v7  ;;  %v11918_v19 = vld [vmem:[#allocation132_spill] sm:$0xff]  ;;  %v11922_v47 = vld [vmem:[#allocation121_spill] sm:$0xff] }
 0x51b   :  { %5088 = vset.pattern.permute.xlu1 %v11892_v23  ;;  %v2089_v51 = vmul.f32 %v2070_v40, %v11903_v50  ;;  %v2090_v46 = vmul.f32 %v2078_v21, %v11904_v3  ;;  %v7996_v28 = vadd.f32 %v2136_v17, %v2031_v43  ;;  %v7998_v55 = vadd.f32 %v2137_v0, %v2032_v60  ;;  %v11919_v1 = vld [vmem:[#allocation116_spill] sm:$0xff]  ;;  %v11944_v3 = vld [vmem:[#allocation41_spill] sm:$0xff] }
 0x51c   :  { %2836 = vperm.xlu1 %5088, %v7258_v61   ;;  %v2127_v24 = vmul.f32 %v11915_v22, %v2086_v26  ;;  %v2134_v27 = vmul.f32 %v11915_v22, %v2093_v15  ;;  %v2192_v7 = vsel %vm818_vm6, %v11919_v1, %v11918_v19  ;;  %v11920_v23 = vmov 7  }
 0x51d   :  { %11916 = vst [vmem:[#allocation60_spill] sm:$0xff] %v7996_v28  ;;  %5091 = vset.pattern.permute.xlu2 %v11920_v23  ;;  %v8008_v40 = vadd.f32 %v2128_v5, %v2023_v11  ;;  %v2135_v43 = vmul.f32 %v11915_v22, %v2094_v20  ;;  %v2124_v0 = vmul.f32 %v11922_v47, %v2083_v13  ;;  %v11925_v20 = vld [vmem:[#allocation133_spill] sm:$0xff]  ;;  %v11491_v15 = vmov 12  }
 0x51e   :  { %11917 = vst [vmem:[#allocation73_spill] sm:$0xff] %v7998_v55  ;;  %v2125_v60 = vmul.f32 %v11922_v47, %v2084_v8  ;;  %2888 = vperm.xlu2 %5091, %v7258_v61   ;;  %v8014_v57 = vadd.f32 %v2129_v6, %v2024_v14  ;;  %v8017_v17 = vadd.f32 %v2126_v29, %v7876_v36  ;;  %v11926_v8 = vld [vmem:[#allocation120_spill] sm:$0xff]  ;;  %v11502_v28 = vmov 15  }
 0x51f   :  { %11921 = vst [vmem:[#allocation67_spill] sm:$0xff] %v8008_v40  ;;  %v2132_v26 = vmul.f32 %v11922_v47, %v2091_v56  ;;  %v2200_v11 = vsel %vm818_vm6, %v11918_v19, %v11919_v1  ;;  %v2133_v22 = vmul.f32 %v11922_v47, %v2092_v58  ;;  %v2188_v6 = vsel %vm818_vm6, %v11926_v8, %v11925_v20  ;;  %v11927_v56 = vld [vmem:[#allocation37_spill] sm:$0xff]  ;;  %v11929_v29 = vld [vmem:[#allocation124_spill] sm:$0xff]  ;;  %v11956_v40 = vld [vmem:[#allocation130_spill] sm:$0xff] }
 0x520   :  { %11923 = vst [vmem:[#allocation62_spill] sm:$0xff] %v8014_v57  ;;  %v8024_v21 = vpop.permute.xlu0 %2426  ;;  %v2196_v36 = vsel %vm818_vm6, %v11925_v20, %v11926_v8  ;;  %v2212_v14 = vmul.f32 %v2192_v7, %v11927_v56  ;;  %5106 = vset.pattern.permute.xlu0 %v11491_v15  ;;  %v8037_v13 = vpop.permute.xlu1 %2418  ;;  %v8040_v5 = vadd.f32 %v2127_v24, %v7878_v44  ;;  %v11930_v44 = vld [vmem:[#allocation38_spill] sm:$0xff] }
 0x521   :  { %11924 = vst [vmem:[#allocation76_spill] sm:$0xff] %v8024_v21  ;;  %v8043_v58 = vadd.f32 %v2134_v27, %v7867_v12  ;;  %v2130_v19 = vmul.f32 %v11929_v29, %v2089_v51  ;;  %v2131_v1 = vmul.f32 %v11929_v29, %v2090_v46  ;;  %3156 = vperm.xlu0 %5106, %v7271_v37   ;;  %v11931_v37 = vld [vmem:[#allocation128_spill] sm:$0xff]  ;;  %v11945_v21 = vld [vmem:[#allocation42_spill] sm:$0xff] }
 0x522   :  { %11928 = vst [vmem:[#allocation63_spill] sm:$0xff] %v8037_v13  ;;  %v8048_v47 = vpop.permute.xlu2 %2572  ;;  %v8051_v7 = vadd.f32 %v2135_v43, %v7869_v30  ;;  %v2140_v20 = vadd.f32 %v2124_v0, %v7897_v16  ;;  %v2141_v8 = vadd.f32 %v2125_v60, %v7900_v31  ;;  %v2213_v24 = vmul.f32 %v2200_v11, %v11930_v44  ;;  %v11932_v29 = vld [vmem:[#allocation144_spill] sm:$0xff]  ;;  %v11934_v43 = vld [vmem:[#allocation145_spill] sm:$0xff] }
 0x523   :  { %v2204_v12 = vmul.f32 %v2188_v6, %v11927_v56  ;;  %v2205_v27 = vmul.f32 %v2196_v36, %v11930_v44  ;;  %v2148_v51 = vadd.f32 %v2132_v26, %v7903_v4  ;;  %v2149_v46 = vadd.f32 %v2133_v22, %v7906_v2  ;;  %v11933_v2 = vld [vmem:[#allocation140_spill] sm:$0xff]  ;;  %v11937_v36 = vld [vmem:[#allocation39_spill] sm:$0xff] }
 0x524   :  { %v2253_v15 = vmul.f32 %v11931_v37, %v2212_v14  ;;  %v2313_v30 = vsel %vm876_vm7, %v11932_v29, %v7594_v10  ;;  %v2321_v16 = vsel %vm876_vm7, %v7594_v10, %v11932_v29  ;;  %5090 = vset.pattern.permute.xlu1 %v11920_v23  ;;  %v8071_v31 = vadd.f32 %v2130_v19, %v7909_v45  ;;  %v11935_v10 = vld [vmem:[#allocation122_spill] sm:$0xff]  ;;  %v11936_v23 = vld [vmem:[#allocation127_spill] sm:$0xff]  ;;  %v11938_v29 = vld [vmem:[#allocation40_spill] sm:$0xff] }
 0x525   :  { %v8074_v4 = vadd.f32 %v2131_v1, %v7912_v62  ;;  %v2309_v0 = vsel %vm876_vm7, %v11934_v43, %v11933_v2  ;;  %v2317_v60 = vsel %vm876_vm7, %v11933_v2, %v11934_v43  ;;  %2884 = vperm.xlu1 %5090, %v7250_v9   ;;  %v8089_v45 = vsel %vm818_vm6, %v11936_v23, %v11935_v10  ;;  %v11940_v43 = vld [vmem:[#allocation136_spill] sm:$0xff] }
 0x526   :  { %v8095_v62 = vsel %vm818_vm6, %v11935_v10, %v11936_v23  ;;  %v2254_v26 = vmul.f32 %v11931_v37, %v2213_v24  ;;  %v11494_v11 = vmov 8   ;;  %v2245_v22 = vmul.f32 %v11931_v37, %v2204_v12  ;;  %v11941_v10 = vld [vmem:[#allocation123_spill] sm:$0xff] }
 0x527   :  { %5093 = vset.pattern.permute.xlu2 %v11494_v11  ;;  %v2246_v6 = vmul.f32 %v11931_v37, %v2205_v27  ;;  %v2333_v14 = vmul.f32 %v2313_v30, %v11937_v36  ;;  %v2334_v19 = vmul.f32 %v2321_v16, %v11938_v29  ;;  %v2269_v2 = vadd.f32 %v2253_v15, %v2148_v51  ;;  %v11942_v37 = vld [vmem:[#allocation143_spill] sm:$0xff]  ;;  %v11943_v30 = vld [vmem:[#allocation148_spill] sm:$0xff] }
 0x528   :  { %2936 = vperm.xlu2 %5093, %v7250_v9   ;;  %v8104_v1 = vpop.permute.xlu0 %2474  ;;  %v2191_v24 = vsel %vm818_vm6, %v11941_v10, %v11940_v43  ;;  %v2325_v23 = vmul.f32 %v2309_v0, %v11937_v36  ;;  %v2326_v12 = vmul.f32 %v2317_v60, %v11938_v29  ;;  %v2425_v11 = vpop.permute.xlu1 %2424  ;;  %v2199_v27 = vsel %vm818_vm6, %v11940_v43, %v11941_v10 }
 0x529   :  { %11939 = vst [vmem:[#allocation66_spill] sm:$0xff] %v8104_v1  ;;  %v2312_v15 = vsel %vm876_vm7, %v11943_v30, %v11942_v37  ;;  %v2435_v51 = vsel %vm934_vm8, %v7808_v41, %v2425_v11  ;;  %v2443_v16 = vsel %vm934_vm8, %v2425_v11, %v7808_v41  ;;  %v11500_v0 = vmov 14  }
 0x52a   :  { %5109 = vset.pattern.permute.xlu0 %v11500_v0  ;;  %v8127_v60 = vpop.permute.xlu2 %2584  ;;  %v2366_v43 = vmul.f32 %v7588_v35, %v2325_v23  ;;  %v2367_v10 = vmul.f32 %v7588_v35, %v2326_v12  ;;  %v2456_v50 = vmul.f32 %v2435_v51, %v11944_v3  ;;  %v2457_v13 = vmul.f32 %v2443_v16, %v11945_v21  ;;  %v11948_v0 = vld [vmem:[#allocation131_spill] sm:$0xff] }
 0x52b   :  { %3248 = vperm.xlu0 %5109, %v7250_v9   ;;  %v2374_v33 = vmul.f32 %v7588_v35, %v2333_v14  ;;  %v2375_v55 = vmul.f32 %v7588_v35, %v2334_v19  ;;  %v2430_v41 = vsel %vm934_vm8, %v7453_v63, %v7874_v59  ;;  %v2438_v11 = vsel %vm934_vm8, %v7874_v59, %v7453_v63 }
 0x52c   :  { %v2434_v23 = vsel %vm934_vm8, %v7882_v42, %v7738_v39  ;;  %v2442_v9 = vsel %vm934_vm8, %v7738_v39, %v7882_v42  ;;  %v8153_v35 = vmul.f32 %v8104_v1, %v2456_v50  ;;  %v8156_v14 = vmul.f32 %v8104_v1, %v2457_v13  ;;  %v11961_v1 = vld [vmem:[#allocation139_spill] sm:$0xff] }
 0x52d   :  { %v2261_v19 = vadd.f32 %v2245_v22, %v2140_v20  ;;  %v2262_v12 = vadd.f32 %v2246_v6, %v2141_v8  ;;  %v2270_v51 = vadd.f32 %v2254_v26, %v2149_v46  ;;  %v2210_v63 = vmul.f32 %v2191_v24, %v11927_v56  ;;  %2892 = vperm.xlu1 %5090, %v7288_v54  }
 0x52e   :  { %11946 = vst [vmem:[#allocation79_spill] sm:$0xff] %v8153_v35  ;;  %v2211_v59 = vmul.f32 %v2199_v27, %v11930_v44  ;;  %v2320_v39 = vsel %vm876_vm7, %v11942_v37, %v11943_v30  ;;  %v2331_v42 = vmul.f32 %v2312_v15, %v11937_v36  ;;  %v2446_v50 = vmul.f32 %v2430_v41, %v11944_v3  ;;  %v11955_v35 = vld [vmem:[#allocation125_spill] sm:$0xff] }
 0x52f   :  { %11947 = vst [vmem:[#allocation69_spill] sm:$0xff] %v8156_v14  ;;  %v2454_v13 = vmul.f32 %v2434_v23, %v11944_v3  ;;  %v2455_v20 = vmul.f32 %v2442_v9, %v11945_v21  ;;  %v2447_v8 = vmul.f32 %v2438_v11, %v11945_v21  ;;  %v2382_v26 = vadd.f32 %v2366_v43, %v2261_v19 }
 0x530   :  { %2944 = vperm.xlu2 %5093, %v7288_v54   ;;  %v2534_v46 = vpop.permute.xlu0 %2533  ;;  %v2383_v22 = vadd.f32 %v2367_v10, %v2262_v12  ;;  %v2390_v6 = vadd.f32 %v2374_v33, %v2269_v2  ;;  %v2391_v24 = vadd.f32 %v2375_v55, %v2270_v51  ;;  %v2470_v27 = vpop.permute.xlu1 %2469  ;;  %v2251_v41 = vmul.f32 %v11948_v0, %v2210_v63 }
 0x531   :  { %v2487_v16 = vmul.f32 %v2470_v27, %v2446_v50  ;;  %v2488_v37 = vmul.f32 %v2470_v27, %v2447_v8  ;;  %v2495_v30 = vmul.f32 %v2470_v27, %v2454_v13  ;;  %v2496_v15 = vmul.f32 %v2470_v27, %v2455_v20  ;;  %v8224_v13 = vld [vmem:[%s11263_s10 + $0x8] sm:$0xff] }
 0x532   :  { %v2252_v23 = vmul.f32 %v11948_v0, %v2211_v59  ;;  %v2332_v9 = vmul.f32 %v2320_v39, %v11938_v29  ;;  %v2372_v11 = vmul.f32 %v7658_v53, %v2331_v42  ;;  %v2433_v19 = vsel %vm934_vm8, %v7523_v25, %v7958_v38 }
 0x533   :  { %5113 = vset.pattern.permute.xlu0 %v11502_v28  ;;  %v8176_v54 = vpop.permute.xlu2 %2628  ;;  %v8178_v33 = vadd.f32 %v2487_v16, %v2382_v26  ;;  %v8180_v55 = vadd.f32 %v2488_v37, %v2383_v22  ;;  %v8182_v2 = vadd.f32 %v2495_v30, %v2390_v6  ;;  %v8184_v43 = vadd.f32 %v2496_v15, %v2391_v24 }
 0x534   :  { %3304 = vperm.xlu0 %5113, %v7258_v61   ;;  %v2373_v10 = vmul.f32 %v7658_v53, %v2332_v9  ;;  %v2441_v12 = vsel %vm934_vm8, %v7958_v38, %v7523_v25  ;;  %v11949_v39 = vmov 8   ;;  %v11953_v6 = vmov 9  }
 0x535   :  { %v8197_v51 = vperm.slane %v8178_v33, 0  ;;  %v8200_v63 = vperm.slane %v8180_v55, 0  ;;  %v8203_v61 = vperm.slane %v8182_v2, 0  ;;  %v8206_v59 = vperm.slane %v8184_v43, 0  ;;  %5094 = vset.pattern.permute.xlu1 %v11949_v39 }
 0x536   :  { %v8210_v42 = vperm.slane %v8178_v33, 1  ;;  %v8213_v50 = vperm.slane %v8180_v55, 1  ;;  %v8216_v25 = vperm.slane %v8182_v2, 1  ;;  %v8219_v38 = vperm.slane %v8184_v43, 1  ;;  %2940 = vperm.xlu1 %5094, %v8224_v13  }
 0x537   :  { %v2551_v20 = vmul.f32 %v2534_v46, %v8197_v51  ;;  %v2552_v8 = vmul.f32 %v2534_v46, %v8200_v63  ;;  %v2559_v26 = vmul.f32 %v2534_v46, %v8203_v61  ;;  %v2560_v22 = vmul.f32 %v2534_v46, %v8206_v59 }
 0x538   :  { %11950 = vst [vmem:[#allocation56_spill] sm:$0xff] %v8210_v42  ;;  %5096 = vset.pattern.permute.xlu2 %v11953_v6  ;;  %v2549_v24 = vpop.permute.xlu0 %2548  ;;  %v2587_v27 = vmul.f32 %v8048_v47, %v8210_v42  ;;  %v2588_v16 = vmul.f32 %v8048_v47, %v8213_v50  ;;  %v2595_v37 = vmul.f32 %v8048_v47, %v8216_v25  ;;  %v8241_v15 = vpop.permute.xlu1 %2484 }
 0x539   :  { %11951 = vst [vmem:[#allocation70_spill] sm:$0xff] %v8216_v25  ;;  %v2596_v30 = vmul.f32 %v8048_v47, %v8219_v38  ;;  %2992 = vperm.xlu2 %5096, %v8224_v13   ;;  %v2267_v46 = vadd.f32 %v2251_v41, %v8071_v31  ;;  %v2268_v9 = vadd.f32 %v2252_v23, %v8074_v4  ;;  %v11957_v4 = vld [vmem:[#allocation129_spill] sm:$0xff] }
 0x53a   :  { %11952 = vst [vmem:[#allocation65_spill] sm:$0xff] %v8219_v38  ;;  %v2452_v39 = vmul.f32 %v2433_v19, %v11944_v3  ;;  %v2453_v28 = vmul.f32 %v2441_v12, %v11945_v21  ;;  %v8247_v53 = vadd.f32 %v2587_v27, %v2551_v20  ;;  %v8249_v0 = vadd.f32 %v2588_v16, %v2552_v8  ;;  %v11958_v41 = vld [vmem:[#allocation113_spill] sm:$0xff]  ;;  %v11962_v21 = vld [vmem:[#allocation126_spill] sm:$0xff] }
 0x53b   :  { %11954 = vst [vmem:[#allocation68_spill] sm:$0xff] %v8241_v15  ;;  %v8251_v57 = vadd.f32 %v2595_v37, %v2559_v26  ;;  %v8253_v14 = vadd.f32 %v2596_v30, %v2560_v22  ;;  %v2208_v47 = vmul.f32 %v8089_v45, %v11927_v56  ;;  %v2193_v31 = vsel %vm818_vm6, %v11956_v40, %v11955_v35  ;;  %v8275_v22 = vld [vmem:[%s11263_s10 + $0x10] sm:$0xff] }
 0x53c   :  { %v2189_v23 = vsel %vm818_vm6, %v11958_v41, %v11957_v4  ;;  %v2197_v19 = vsel %vm818_vm6, %v11957_v4, %v11958_v41  ;;  %v11507_v12 = vmov 16   ;;  %v2388_v20 = vadd.f32 %v2372_v11, %v2267_v46  ;;  %v8278_v27 = vpop.permute.xlu2 %2676 }
 0x53d   :  { %5117 = vset.pattern.permute.xlu0 %v11507_v12  ;;  %v2389_v45 = vadd.f32 %v2373_v10, %v2268_v9  ;;  %v2493_v8 = vmul.f32 %v8241_v15, %v2452_v39  ;;  %v2494_v26 = vmul.f32 %v8241_v15, %v2453_v28  ;;  %v2557_v16 = vmul.f32 %v2549_v24, %v8197_v51  ;;  %v8297_v39 = vld [vmem:[%s11263_s10 + $0x18] sm:$0xff] }
 0x53e   :  { %3360 = vperm.xlu0 %5117, %v8275_v22   ;;  %v2558_v37 = vmul.f32 %v2549_v24, %v8200_v63  ;;  %v2565_v11 = vmul.f32 %v2549_v24, %v8203_v61  ;;  %v2566_v10 = vmul.f32 %v2549_v24, %v8206_v59  ;;  %v2209_v28 = vmul.f32 %v8095_v62, %v11930_v44 }
 0x53f   :  { %v2201_v30 = vsel %vm818_vm6, %v11955_v35, %v11956_v40  ;;  %v8290_v46 = vadd.f32 %v2493_v8, %v2388_v20  ;;  %v8292_v9 = vadd.f32 %v2494_v26, %v2389_v45  ;;  %2948 = vperm.xlu1 %5094, %v8297_v39   ;;  %v2593_v24 = vmul.f32 %v8127_v60, %v8210_v42 }
 0x540   :  { %v2594_v62 = vmul.f32 %v8127_v60, %v8213_v50  ;;  %v2601_v40 = vmul.f32 %v8127_v60, %v8216_v25  ;;  %v2602_v35 = vmul.f32 %v8127_v60, %v8219_v38  ;;  %v2214_v4 = vmul.f32 %v2193_v31, %v11927_v56  ;;  %v2544_v45 = vpop.permute.xlu1 %2543 }
 0x541   :  { %11959 = vst [vmem:[#allocation78_spill] sm:$0xff] %v8290_v46  ;;  %v2206_v41 = vmul.f32 %v2189_v23, %v11927_v56  ;;  %v2207_v20 = vmul.f32 %v2197_v19, %v11930_v44  ;;  %3000 = vperm.xlu2 %5096, %v8297_v39   ;;  %v2581_v8 = vpop.permute.xlu0 %2580  ;;  %v2609_v26 = vadd.f32 %v2593_v24, %v2557_v16  ;;  %v11963_v23 = vld [vmem:[#allocation142_spill] sm:$0xff] }
 0x542   :  { %11960 = vst [vmem:[#allocation82_spill] sm:$0xff] %v8292_v9  ;;  %v2610_v12 = vadd.f32 %v2594_v62, %v2558_v37  ;;  %v2617_v9 = vadd.f32 %v2601_v40, %v2565_v11  ;;  %v2618_v46 = vadd.f32 %v2602_v35, %v2566_v10  ;;  %v2215_v15 = vmul.f32 %v2201_v30, %v11930_v44 }
 0x543   :  { %v2194_v60 = vsel %vm818_vm6, %v11962_v21, %v11961_v1  ;;  %v2202_v31 = vsel %vm818_vm6, %v11961_v1, %v11962_v21  ;;  %v2247_v19 = vmul.f32 %v11963_v23, %v2206_v41  ;;  %v2555_v3 = vmul.f32 %v2544_v45, %v8197_v51  ;;  %v11964_v1 = vld [vmem:[#allocation138_spill] sm:$0xff] }
 0x544   :  { %v2556_v16 = vmul.f32 %v2544_v45, %v8200_v63  ;;  %v2563_v37 = vmul.f32 %v2544_v45, %v8203_v61  ;;  %v2564_v11 = vmul.f32 %v2544_v45, %v8206_v59  ;;  %v2591_v10 = vmul.f32 %v2581_v8, %v8210_v42  ;;  %v8331_v21 = vpop.permute.xlu2 %2684 }
 0x545   :  { %v2592_v30 = vmul.f32 %v2581_v8, %v8213_v50  ;;  %v2599_v24 = vmul.f32 %v2581_v8, %v8216_v25  ;;  %v2600_v62 = vmul.f32 %v2581_v8, %v8219_v38  ;;  %v11520_v40 = vmov 17  }
 0x546   :  { %5120 = vset.pattern.permute.xlu0 %v11520_v40  ;;  %v8334_v35 = vmul.f32 %v11964_v1, %v2208_v47  ;;  %v8337_v41 = vmul.f32 %v11964_v1, %v2209_v28  ;;  %v2248_v45 = vmul.f32 %v11963_v23, %v2207_v20  ;;  %v2255_v42 = vmul.f32 %v11963_v23, %v2214_v4  ;;  %v11969_v20 = vld [vmem:[#allocation137_spill] sm:$0xff] }
 0x547   :  { %3416 = vperm.xlu0 %5120, %v8297_v39   ;;  %v8342_v25 = vadd.f32 %v2591_v10, %v2555_v3  ;;  %v8344_v8 = vadd.f32 %v2592_v30, %v2556_v16  ;;  %v8346_v38 = vadd.f32 %v2599_v24, %v2563_v37  ;;  %v8348_v40 = vadd.f32 %v2600_v62, %v2564_v11 }
 0x548   :  { %11965 = vst [vmem:[#allocation93_spill] sm:$0xff] %v8334_v35  ;;  %5097 = vset.pattern.permute.xlu1 %v11953_v6  ;;  %v8352_v47 = vmul.f32 %v2194_v60, %v11927_v56  ;;  %v8355_v28 = vmul.f32 %v2202_v31, %v11930_v44  ;;  %v2256_v4 = vmul.f32 %v11963_v23, %v2215_v15  ;;  %v11971_v6 = vld [vmem:[#allocation141_spill] sm:$0xff]  ;;  %v11972_v23 = vmov 10  }
 0x549   :  { %11966 = vst [vmem:[#allocation77_spill] sm:$0xff] %v8337_v41  ;;  %v2314_v3 = vsel %vm876_vm7, %v11969_v20, %v7505_v18  ;;  %2996 = vperm.xlu1 %5097, %v8275_v22   ;;  %v8364_v16 = vadd.f32 %v2247_v19, %v8017_v17  ;;  %v2310_v60 = vsel %vm876_vm7, %v11971_v6, %v7521_v34  ;;  %v8380_v17 = vperm.slane %v8178_v33, 2 }
 0x54a   :  { %11967 = vst [vmem:[#allocation85_spill] sm:$0xff] %v8352_v47  ;;  %v2318_v15 = vsel %vm876_vm7, %v7521_v34, %v11971_v6  ;;  %v2322_v31 = vsel %vm876_vm7, %v7505_v18, %v11969_v20  ;;  %5100 = vset.pattern.permute.xlu2 %v11972_v23  ;;  %v8383_v19 = vperm.slane %v8180_v55, 2  ;;  %v8386_v37 = vperm.slane %v8182_v2, 2  ;;  %v8392_v34 = vpop.permute.xlu1 %2576  ;;  %v2637_v24 = vpop.permute.xlu0 %2636 }
 0x54b   :  { %11968 = vst [vmem:[#allocation80_spill] sm:$0xff] %v8355_v28  ;;  %v8389_v11 = vperm.slane %v8184_v43, 2  ;;  %3048 = vperm.xlu2 %5100, %v8275_v22   ;;  %v8395_v18 = vadd.f32 %v2248_v45, %v8040_v5  ;;  %v8398_v10 = vadd.f32 %v2255_v42, %v8043_v58  ;;  %v2335_v30 = vmul.f32 %v2314_v3, %v11937_v36 }
 0x54c   :  { %11970 = vst [vmem:[#allocation94_spill] sm:$0xff] %v8364_v16  ;;  %v2645_v62 = vmul.f32 %v2637_v24, %v8380_v17  ;;  %v2646_v20 = vmul.f32 %v2637_v24, %v8383_v19  ;;  %v2653_v6 = vmul.f32 %v2637_v24, %v8386_v37  ;;  %v8406_v56 = vmul.f32 %v2310_v60, %v11937_v36 }
 0x54d   :  { %11973 = vst [vmem:[#allocation81_spill] sm:$0xff] %v8395_v18  ;;  %v2654_v44 = vmul.f32 %v2637_v24, %v8389_v11  ;;  %v8409_v5 = vmul.f32 %v2318_v15, %v11938_v29  ;;  %v8412_v58 = vadd.f32 %v2256_v4, %v8051_v7  ;;  %v8415_v42 = vmul.f32 %v2322_v31, %v11938_v29  ;;  %v8426_v60 = vpop.permute.xlu2 %2732  ;;  %v11982_v15 = vld [vmem:[#allocation149_spill] sm:$0xff] }
 0x54e   :  { %11974 = vst [vmem:[#allocation97_spill] sm:$0xff] %v8398_v10  ;;  %v8417_v45 = vadd.f32 %v2645_v62, %v2609_v26  ;;  %v8419_v3 = vadd.f32 %v2646_v20, %v2610_v12  ;;  %v8421_v41 = vadd.f32 %v2653_v6, %v2617_v9  ;;  %v11525_v24 = vmov 19  }
 0x54f   :  { %11975 = vst [vmem:[#allocation84_spill] sm:$0xff] %v8409_v5  ;;  %v8423_v35 = vadd.f32 %v2654_v44, %v2618_v46  ;;  %5123 = vset.pattern.permute.xlu0 %v11525_v24  ;;  %v8429_v36 = vmul.f32 %v11982_v15, %v2335_v30  ;;  %v8432_v7 = vperm.slane %v8178_v33, 3  ;;  %v8435_v26 = vperm.slane %v8180_v55, 3  ;;  %v8443_v44 = vld [vmem:[%s11263_s10] sm:$0xff] }
 0x550   :  { %11976 = vst [vmem:[#allocation83_spill] sm:$0xff] %v8412_v58  ;;  %v8438_v12 = vperm.slane %v8182_v2, 3  ;;  %3508 = vperm.xlu0 %5123, %v8443_v44   ;;  %v8450_v46 = vsel %vm934_vm8, %v7817_v32, %v7675_v49  ;;  %v8456_v9 = vsel %vm934_vm8, %v7675_v49, %v7817_v32  ;;  %v8460_v4 = vmul.f32 %v8176_v54, %v8380_v17 }
 0x551   :  { %11977 = vst [vmem:[#allocation88_spill] sm:$0xff] %v8415_v42  ;;  %v8463_v31 = vperm.slane %v8184_v43, 3  ;;  %5098 = vset.pattern.permute.xlu1 %v11972_v23  ;;  %v8468_v30 = vmul.f32 %v8176_v54, %v8383_v19  ;;  %v2691_v62 = vmul.f32 %v8278_v27, %v8432_v7  ;;  %v2692_v49 = vmul.f32 %v8278_v27, %v8435_v26 }
 0x552   :  { %11978 = vst [vmem:[#allocation90_spill] sm:$0xff] %v8417_v45  ;;  %v2699_v32 = vmul.f32 %v8278_v27, %v8438_v12  ;;  %3040 = vperm.xlu1 %5098, %v8443_v44   ;;  %v8481_v23 = vmul.f32 %v8331_v21, %v8432_v7  ;;  %v8485_v6 = vmul.f32 %v8331_v21, %v8435_v26  ;;  %v11987_v29 = vmov 11   ;;  %v2625_v1 = vpop.permute.xlu1 %2624 }
 0x553   :  { %11979 = vst [vmem:[#allocation74_spill] sm:$0xff] %v8419_v3  ;;  %v2700_v20 = vmul.f32 %v8278_v27, %v8463_v31  ;;  %v8489_v24 = vmul.f32 %v8331_v21, %v8438_v12  ;;  %5101 = vset.pattern.permute.xlu2 %v11987_v29  ;;  %v2553_v52 = vmul.f32 %v7983_v48, %v8197_v51  ;;  %v8504_v18 = vperm.slane %v8178_v33, 4  ;;  %v2729_v16 = vpop.permute.xlu0 %2728 }
 0x554   :  { %11980 = vst [vmem:[#allocation86_spill] sm:$0xff] %v8421_v41  ;;  %v2554_v27 = vmul.f32 %v7983_v48, %v8200_v63  ;;  %v2561_v28 = vmul.f32 %v7983_v48, %v8203_v61  ;;  %3092 = vperm.xlu2 %5101, %v8443_v44   ;;  %v2639_v47 = vmul.f32 %v2625_v1, %v8380_v17  ;;  %v8507_v51 = vperm.slane %v8180_v55, 4 }
 0x555   :  { %11981 = vst [vmem:[#allocation91_spill] sm:$0xff] %v8423_v35  ;;  %v2640_v58 = vmul.f32 %v2625_v1, %v8383_v19  ;;  %v2648_v10 = vmul.f32 %v2625_v1, %v8389_v11  ;;  %v8510_v63 = vperm.slane %v8182_v2, 4  ;;  %v8513_v61 = vperm.slane %v8184_v43, 4  ;;  %v8519_v45 = vpop.permute.xlu2 %2740 }
 0x556   :  { %11983 = vst [vmem:[#allocation89_spill] sm:$0xff] %v8429_v36  ;;  %v2647_v36 = vmul.f32 %v2625_v1, %v8386_v37  ;;  %v2655_v35 = vadd.f32 %v2639_v47, %v8247_v53  ;;  %v2744_v5 = vmul.f32 %v2729_v16, %v8507_v51  ;;  %v11534_v42 = vmov 20  }
 0x557   :  { %11984 = vst [vmem:[#allocation96_spill] sm:$0xff] %v8443_v44  ;;  %v2656_v41 = vadd.f32 %v2640_v58, %v8249_v0  ;;  %v2664_v1 = vadd.f32 %v2648_v10, %v8253_v14  ;;  %v2743_v44 = vmul.f32 %v2729_v16, %v8504_v18  ;;  %v2590_v10 = vmul.f32 %v8392_v34, %v8213_v50 }
 0x558   :  { %11985 = vst [vmem:[#allocation103_spill] sm:$0xff] %v8450_v46  ;;  %v2663_v3 = vadd.f32 %v2647_v36, %v8251_v57  ;;  %v2752_v46 = vmul.f32 %v2729_v16, %v8513_v61  ;;  %5127 = vset.pattern.permute.xlu0 %v11534_v42  ;;  %v2707_v53 = vadd.f32 %v2691_v62, %v2655_v35  ;;  %v11988_v36 = vld [vmem:[#allocation56_spill] sm:$0xff] }
 0x559   :  { %11986 = vst [vmem:[#allocation114_spill] sm:$0xff] %v8456_v9  ;;  %v2751_v9 = vmul.f32 %v2729_v16, %v8510_v63  ;;  %v2708_v47 = vadd.f32 %v2692_v49, %v2656_v41  ;;  %v2716_v58 = vadd.f32 %v2700_v20, %v2664_v1  ;;  %3564 = vperm.xlu0 %5127, %v8224_v13   ;;  %v8535_v16 = vperm.slane %v8178_v33, 5  ;;  %v11990_v49 = vld [vmem:[#allocation65_spill] sm:$0xff] }
 0x55a   :  { %v2715_v0 = vadd.f32 %v2699_v32, %v2663_v3  ;;  %v2562_v57 = vmul.f32 %v7983_v48, %v8206_v59  ;;  %v2589_v14 = vmul.f32 %v8392_v34, %v11988_v36  ;;  %3052 = vperm.xlu1 %5098, %v8297_v39   ;;  %v8537_v35 = vadd.f32 %v2743_v44, %v2707_v53  ;;  %v11989_v48 = vld [vmem:[#allocation70_spill] sm:$0xff]  ;;  %v2633_v50 = vpop.permute.xlu1 %2632 }
 0x55b   :  { %v8539_v41 = vadd.f32 %v2744_v5, %v2708_v47  ;;  %v8543_v62 = vadd.f32 %v2752_v46, %v2716_v58  ;;  %v2597_v59 = vmul.f32 %v8392_v34, %v11989_v48  ;;  %v2598_v32 = vmul.f32 %v8392_v34, %v11990_v49 }
 0x55c   :  { %v8541_v3 = vadd.f32 %v2751_v9, %v2715_v0  ;;  %3104 = vperm.xlu2 %5101, %v8297_v39   ;;  %v8551_v20 = vperm.slane %v8180_v55, 5  ;;  %v8554_v44 = vperm.slane %v8182_v2, 5  ;;  %v2643_v5 = vmul.f32 %v2633_v50, %v8380_v17  ;;  %v2785_v17 = vpop.permute.xlu0 %2784 }
 0x55d   :  { %v2644_v46 = vmul.f32 %v2633_v50, %v8383_v19  ;;  %v2651_v9 = vmul.f32 %v2633_v50, %v8386_v37  ;;  %v2652_v1 = vmul.f32 %v2633_v50, %v8389_v11  ;;  %v2605_v53 = vadd.f32 %v2589_v14, %v2553_v52 }
 0x55e   :  { %v2606_v47 = vadd.f32 %v2590_v10, %v2554_v27  ;;  %v8561_v34 = vperm.slane %v8184_v43, 5  ;;  %v2659_v0 = vadd.f32 %v2643_v5, %v8342_v25  ;;  %v2797_v19 = vmul.f32 %v2785_v17, %v8535_v16  ;;  %v8571_v27 = vpop.permute.xlu2 %2788 }
 0x55f   :  { %v2660_v58 = vadd.f32 %v2644_v46, %v8344_v8  ;;  %v2667_v36 = vadd.f32 %v2651_v9, %v8346_v38  ;;  %v2668_v48 = vadd.f32 %v2652_v1, %v8348_v40  ;;  %v2798_v49 = vmul.f32 %v2785_v17, %v8551_v20  ;;  %v11997_v42 = vld [vmem:[#allocation103_spill] sm:$0xff] }
 0x560   :  { %v2805_v50 = vmul.f32 %v2785_v17, %v8554_v44  ;;  %v2806_v52 = vmul.f32 %v2785_v17, %v8561_v34  ;;  %v2649_v25 = vmul.f32 %v8176_v54, %v8386_v37  ;;  %v2704_v8 = vmul.f32 %v8331_v21, %v8463_v31 }
 0x561   :  { %v2613_v38 = vadd.f32 %v2597_v59, %v2561_v28  ;;  %v2614_v14 = vadd.f32 %v2598_v32, %v2562_v57  ;;  %v11532_v40 = vmov 21   ;;  %v8581_v10 = vadd.f32 %v8481_v23, %v2659_v0 }
 0x562   :  { %5131 = vset.pattern.permute.xlu0 %v11532_v40  ;;  %5102 = vset.pattern.permute.xlu1 %v11987_v29  ;;  %v8584_v5 = vadd.f32 %v8485_v6, %v2660_v58  ;;  %v8587_v37 = vadd.f32 %v8489_v24, %v2667_v36  ;;  %v2650_v21 = vmul.f32 %v8176_v54, %v8389_v11  ;;  %v11991_v6 = vmov 12  }
 0x563   :  { %3620 = vperm.xlu0 %5131, %v8275_v22   ;;  %v2745_v28 = vmul.f32 %v8426_v60, %v8504_v18  ;;  %v2746_v57 = vmul.f32 %v8426_v60, %v8507_v51  ;;  %3096 = vperm.xlu1 %5102, %v8224_v13   ;;  %v8596_v29 = vadd.f32 %v2704_v8, %v2668_v48  ;;  %v2681_v59 = vpop.permute.xlu1 %2680  ;;  %v8607_v9 = vperm.slane %v8178_v33, 6 }
 0x564   :  { %v2753_v23 = vmul.f32 %v8426_v60, %v8510_v63  ;;  %v2754_v24 = vmul.f32 %v8426_v60, %v8513_v61  ;;  %5105 = vset.pattern.permute.xlu2 %v11991_v6  ;;  %v2657_v54 = vadd.f32 %v8460_v4, %v2605_v53  ;;  %v2658_v11 = vadd.f32 %v8468_v30, %v2606_v47 }
 0x565   :  { %3148 = vperm.xlu2 %5105, %v8224_v13   ;;  %v2665_v32 = vadd.f32 %v2649_v25, %v2613_v38  ;;  %v2666_v46 = vadd.f32 %v2650_v21, %v2614_v14  ;;  %v8610_v1 = vperm.slane %v8180_v55, 6  ;;  %v2693_v0 = vmul.f32 %v2681_v59, %v8432_v7  ;;  %v2841_v25 = vpop.permute.xlu0 %2840 }
 0x566   :  { %v2694_v60 = vmul.f32 %v2681_v59, %v8435_v26  ;;  %v2701_v58 = vmul.f32 %v2681_v59, %v8438_v12  ;;  %v2702_v4 = vmul.f32 %v2681_v59, %v8463_v31  ;;  %v8617_v30 = vperm.slane %v8182_v2, 6 }
 0x567   :  { %v8620_v53 = vperm.slane %v8184_v43, 6  ;;  %v2709_v47 = vadd.f32 %v2693_v0, %v2657_v54  ;;  %v8623_v8 = vmul.f32 %v2841_v25, %v8607_v9  ;;  %v8626_v38 = vmul.f32 %v2841_v25, %v8610_v1  ;;  %v8634_v59 = vpop.permute.xlu2 %2832 }
 0x568   :  { %11992 = vst [vmem:[#allocation98_spill] sm:$0xff] %v8617_v30  ;;  %v2710_v36 = vadd.f32 %v2694_v60, %v2658_v11  ;;  %v2717_v48 = vadd.f32 %v2701_v58, %v2665_v32  ;;  %v2718_v17 = vadd.f32 %v2702_v4, %v2666_v46  ;;  %v8629_v14 = vmul.f32 %v2841_v25, %v8617_v30  ;;  %v11995_v60 = vld [vmem:[#allocation88_spill] sm:$0xff]  ;;  %v11996_v4 = vld [vmem:[#allocation41_spill] sm:$0xff] }
 0x569   :  { %11993 = vst [vmem:[#allocation101_spill] sm:$0xff] %v8620_v53  ;;  %v8632_v21 = vmul.f32 %v2841_v25, %v8620_v53  ;;  %v2761_v40 = vadd.f32 %v2745_v28, %v2709_v47  ;;  %v11540_v46 = vmov 22   ;;  %v2368_v0 = vmul.f32 %v11982_v15, %v8406_v56  ;;  %v11998_v25 = vld [vmem:[#allocation42_spill] sm:$0xff] }
 0x56a   :  { %v2762_v54 = vadd.f32 %v2746_v57, %v2710_v36  ;;  %v2769_v11 = vadd.f32 %v2753_v23, %v2717_v48  ;;  %v2770_v32 = vadd.f32 %v2754_v24, %v2718_v17  ;;  %v2377_v58 = vmul.f32 %v11982_v15, %v11995_v60  ;;  %v11999_v53 = vld [vmem:[#allocation114_spill] sm:$0xff]  ;;  %v12000_v24 = vld [vmem:[#allocation84_spill] sm:$0xff] }
 0x56b   :  { %11994 = vst [vmem:[#allocation106_spill] sm:$0xff] %v8632_v21  ;;  %5134 = vset.pattern.permute.xlu0 %v11540_v46  ;;  %v2448_v30 = vmul.f32 %v11997_v42, %v11996_v4  ;;  %v2449_v21 = vmul.f32 %v11999_v53, %v11998_v25  ;;  %5104 = vset.pattern.permute.xlu1 %v11991_v6  ;;  %v12001_v36 = vld [vmem:[#allocation66_spill] sm:$0xff]  ;;  %v12002_v53 = vld [vmem:[#allocation96_spill] sm:$0xff]  ;;  %v11542_v17 = vmov 13   ;;  %v8670_v6 = vperm.slane %v8180_v55, 7 }
 0x56c   :  { %3676 = vperm.xlu0 %5134, %v8297_v39   ;;  %v8647_v28 = vadd.f32 %v2797_v19, %v2761_v40  ;;  %v8649_v57 = vadd.f32 %v2798_v49, %v2762_v54  ;;  %v8651_v23 = vadd.f32 %v2805_v50, %v2769_v11  ;;  %v8653_v56 = vadd.f32 %v2806_v52, %v2770_v32  ;;  %v2689_v19 = vpop.permute.xlu1 %2688 }
 0x56d   :  { %v2369_v47 = vmul.f32 %v11982_v15, %v12000_v24  ;;  %v2489_v42 = vmul.f32 %v12001_v36, %v2448_v30  ;;  %v2490_v48 = vmul.f32 %v12001_v36, %v2449_v21  ;;  %3144 = vperm.xlu1 %5104, %v12002_v53   ;;  %5107 = vset.pattern.permute.xlu2 %v11542_v17  ;;  %v8662_v49 = vperm.slane %v8178_v33, 7  ;;  %v12007_v33 = vld [vmem:[#allocation90_spill] sm:$0xff]  ;;  %v12015_v17 = vld [vmem:[#allocation83_spill] sm:$0xff] }
 0x56e   :  { %v2697_v50 = vmul.f32 %v2689_v19, %v8432_v7  ;;  %v2698_v52 = vmul.f32 %v2689_v19, %v8435_v26  ;;  %v2705_v40 = vmul.f32 %v2689_v19, %v8438_v12  ;;  %v2706_v15 = vmul.f32 %v2689_v19, %v8463_v31  ;;  %3196 = vperm.xlu2 %5107, %v12002_v53   ;;  %v12008_v7 = vld [vmem:[#allocation74_spill] sm:$0xff]  ;;  %v12010_v12 = vld [vmem:[#allocation91_spill] sm:$0xff]  ;;  %v2897_v24 = vpop.permute.xlu0 %2896 }
 0x56f   :  { %12003 = vst [vmem:[#allocation115_spill] sm:$0xff] %v8662_v49  ;;  %v8673_v30 = vperm.slane %v8182_v2, 7  ;;  %v8676_v21 = vperm.slane %v8184_v43, 7  ;;  %v12009_v26 = vld [vmem:[#allocation86_spill] sm:$0xff]  ;;  %v2749_v31 = vmul.f32 %v8519_v45, %v8504_v18  ;;  %v2750_v55 = vmul.f32 %v8519_v45, %v8507_v51  ;;  %v8690_v36 = vpop.permute.xlu2 %2844 }
 0x570   :  { %12004 = vst [vmem:[#allocation102_spill] sm:$0xff] %v8670_v6  ;;  %v2713_v54 = vadd.f32 %v2697_v50, %v12007_v33  ;;  %v2714_v11 = vadd.f32 %v2698_v52, %v12008_v7  ;;  %v2721_v32 = vadd.f32 %v2705_v40, %v12009_v26  ;;  %v2722_v60 = vadd.f32 %v2706_v15, %v12010_v12  ;;  %v12011_v15 = vld [vmem:[#allocation94_spill] sm:$0xff]  ;;  %v12012_v7 = vld [vmem:[#allocation81_spill] sm:$0xff] }
 0x571   :  { %12005 = vst [vmem:[#allocation118_spill] sm:$0xff] %v8673_v30  ;;  %v2757_v2 = vmul.f32 %v8519_v45, %v8510_v63  ;;  %v2758_v43 = vmul.f32 %v8519_v45, %v8513_v61  ;;  %v8693_v19 = vmul.f32 %v2897_v24, %v8662_v49  ;;  %v8696_v50 = vmul.f32 %v2897_v24, %v8670_v6  ;;  %v12013_v45 = vld [vmem:[#allocation97_spill] sm:$0xff] }
 0x572   :  { %12006 = vst [vmem:[#allocation105_spill] sm:$0xff] %v8676_v21  ;;  %v8699_v52 = vmul.f32 %v2897_v24, %v8673_v30  ;;  %v8702_v40 = vmul.f32 %v2897_v24, %v8676_v21  ;;  %v2384_v33 = vadd.f32 %v2368_v0, %v12011_v15  ;;  %v2385_v26 = vadd.f32 %v2369_v47, %v12012_v7  ;;  %v12014_v12 = vld [vmem:[#allocation89_spill] sm:$0xff]  ;;  %v12017_v47 = vld [vmem:[#allocation138_spill] sm:$0xff]  ;;  %v12018_v7 = vld [vmem:[#allocation80_spill] sm:$0xff] }
 0x573   :  { %v2392_v46 = vadd.f32 %v12014_v12, %v12013_v45  ;;  %v2393_v25 = vadd.f32 %v2377_v58, %v12015_v17  ;;  %v11551_v49 = vmov 24   ;;  %v8711_v6 = vadd.f32 %v2749_v31, %v2713_v54  ;;  %v12016_v0 = vld [vmem:[#allocation85_spill] sm:$0xff]  ;;  %v12019_v58 = vld [vmem:[#allocation67_spill] sm:$0xff] }
 0x574   :  { %5137 = vset.pattern.permute.xlu0 %v11551_v49  ;;  %v8713_v30 = vadd.f32 %v2750_v55, %v2714_v11  ;;  %v8715_v24 = vadd.f32 %v2757_v2, %v2721_v32  ;;  %v8717_v21 = vadd.f32 %v2758_v43, %v2722_v60  ;;  %v2257_v15 = vmul.f32 %v12017_v47, %v12016_v0  ;;  %v12020_v17 = vld [vmem:[#allocation93_spill] sm:$0xff]  ;;  %v12021_v11 = vld [vmem:[#allocation79_spill] sm:$0xff]  ;;  %v2737_v55 = vpop.permute.xlu1 %2736 }
 0x575   :  { %3768 = vperm.xlu0 %5137, %v12002_v53   ;;  %v2258_v45 = vmul.f32 %v12017_v47, %v12018_v7  ;;  %v8725_v12 = vadd.f32 %v12020_v17, %v12019_v58  ;;  %v8727_v49 = vadd.f32 %v2489_v42, %v2384_v33  ;;  %3152 = vperm.xlu1 %5104, %v8275_v22   ;;  %v12022_v60 = vld [vmem:[#allocation69_spill] sm:$0xff] }
 0x576   :  { %v8730_v54 = vadd.f32 %v2490_v48, %v2385_v26  ;;  %v8733_v32 = vadd.f32 %v12021_v11, %v2392_v46  ;;  %v8736_v31 = vadd.f32 %v12022_v60, %v2393_v25  ;;  %3204 = vperm.xlu2 %5107, %v8275_v22   ;;  %v2747_v2 = vmul.f32 %v2737_v55, %v8504_v18 }
 0x577   :  { %v2748_v43 = vmul.f32 %v2737_v55, %v8507_v51  ;;  %v2755_v42 = vmul.f32 %v2737_v55, %v8510_v63  ;;  %v2756_v33 = vmul.f32 %v2737_v55, %v8513_v61  ;;  %v2799_v48 = vmul.f32 %v8571_v27, %v8535_v16  ;;  %v2989_v0 = vpop.permute.xlu0 %2988 }
 0x578   :  { %v2800_v46 = vmul.f32 %v8571_v27, %v8551_v20  ;;  %v2807_v25 = vmul.f32 %v8571_v27, %v8554_v44  ;;  %v2808_v26 = vmul.f32 %v8571_v27, %v8561_v34  ;;  %v2763_v18 = vadd.f32 %v2747_v2, %v8581_v10  ;;  %v8767_v10 = vpop.permute.xlu2 %2888 }
 0x579   :  { %v2764_v51 = vadd.f32 %v2748_v43, %v8584_v5  ;;  %v2771_v63 = vadd.f32 %v2755_v42, %v8587_v37  ;;  %v2772_v61 = vadd.f32 %v2756_v33, %v8596_v29  ;;  %v8756_v47 = vperm.slane %v8727_v49, 1  ;;  %v12031_v42 = vld [vmem:[#allocation62_spill] sm:$0xff]  ;;  %v12032_v33 = vld [vmem:[#allocation77_spill] sm:$0xff] }
 0x57a   :  { %v8759_v7 = vperm.slane %v8730_v54, 1  ;;  %v8762_v58 = vperm.slane %v8733_v32, 1  ;;  %v8765_v27 = vperm.slane %v8736_v31, 1  ;;  %v2815_v5 = vadd.f32 %v2799_v48, %v2763_v18 }
 0x57b   :  { %12023 = vst [vmem:[#allocation108_spill] sm:$0xff] %v8756_v47  ;;  %v2816_v17 = vadd.f32 %v2800_v46, %v2764_v51  ;;  %v2823_v37 = vadd.f32 %v2807_v25, %v2771_v63  ;;  %v2824_v11 = vadd.f32 %v2808_v26, %v2772_v61  ;;  %v8770_v29 = vmul.f32 %v2989_v0, %v8756_v47  ;;  %v12033_v46 = vld [vmem:[#allocation60_spill] sm:$0xff]  ;;  %v12035_v26 = vld [vmem:[#allocation73_spill] sm:$0xff]  ;;  %v12037_v51 = vld [vmem:[#allocation150_spill] sm:$0xff] }
 0x57c   :  { %12024 = vst [vmem:[#allocation92_spill] sm:$0xff] %v8759_v7  ;;  %v8773_v60 = vmul.f32 %v2989_v0, %v8759_v7  ;;  %v8776_v55 = vmul.f32 %v2989_v0, %v8762_v58  ;;  %v8779_v2 = vmul.f32 %v2989_v0, %v8765_v27  ;;  %v11559_v43 = vmov 25   ;;  %v12038_v63 = vld [vmem:[#allocation134_spill] sm:$0xff]  ;;  %v12042_v7 = vld [vmem:[#allocation151_spill] sm:$0xff] }
 0x57d   :  { %12025 = vst [vmem:[#allocation104_spill] sm:$0xff] %v8762_v58  ;;  %5141 = vset.pattern.permute.xlu0 %v11559_v43  ;;  %v8784_v48 = vadd.f32 %v12032_v33, %v12031_v42  ;;  %v8787_v25 = vadd.f32 %v2257_v15, %v12033_v46  ;;  %v8790_v18 = vadd.f32 %v2258_v45, %v12035_v26  ;;  %v12040_v0 = vmov 13   ;;  %v2781_v33 = vpop.permute.xlu1 %2780 }
 0x57e   :  { %12026 = vst [vmem:[#allocation109_spill] sm:$0xff] %v8765_v27  ;;  %v2311_v58 = vsel %vm876_vm7, %v12038_v63, %v12037_v51  ;;  %5108 = vset.pattern.permute.xlu1 %v12040_v0  ;;  %v12041_v27 = vld [vmem:[#allocation146_spill] sm:$0xff]  ;;  %v2319_v45 = vsel %vm876_vm7, %v12037_v51, %v12038_v63  ;;  %3824 = vperm.xlu0 %5141, %v8224_v13   ;;  %v12043_v42 = vmov 14   ;;  %v8813_v46 = vperm.slane %v8727_v49, 2 }
 0x57f   :  { %12027 = vst [vmem:[#allocation110_spill] sm:$0xff] %v8770_v29  ;;  %v2315_v43 = vsel %vm876_vm7, %v12042_v7, %v12041_v27  ;;  %v2323_v15 = vsel %vm876_vm7, %v12041_v27, %v12042_v7  ;;  %3200 = vperm.xlu1 %5108, %v8224_v13   ;;  %5110 = vset.pattern.permute.xlu2 %v12043_v42  ;;  %v8816_v26 = vperm.slane %v8730_v54, 2  ;;  %v8819_v7 = vperm.slane %v8733_v32, 2 }
 0x580   :  { %12028 = vst [vmem:[#allocation111_spill] sm:$0xff] %v8773_v60  ;;  %v8822_v27 = vperm.slane %v8736_v31, 2  ;;  %3252 = vperm.xlu2 %5110, %v8224_v13   ;;  %v2795_v51 = vmul.f32 %v2781_v33, %v8535_v16  ;;  %v2796_v63 = vmul.f32 %v2781_v33, %v8551_v20  ;;  %v2803_v0 = vmul.f32 %v2781_v33, %v8554_v44 }
 0x581   :  { %12029 = vst [vmem:[#allocation95_spill] sm:$0xff] %v8776_v55  ;;  %v2804_v47 = vmul.f32 %v2781_v33, %v8561_v34  ;;  %v8833_v55 = vadd.f32 %v8626_v38, %v2816_v17  ;;  %v8836_v60 = vadd.f32 %v8629_v14, %v2823_v37  ;;  %v2847_v33 = vmul.f32 %v8634_v59, %v8607_v9  ;;  %v3045_v17 = vpop.permute.xlu0 %3044  ;;  %v12051_v37 = vld [vmem:[#allocation106_spill] sm:$0xff] }
 0x582   :  { %12030 = vst [vmem:[#allocation117_spill] sm:$0xff] %v8779_v2  ;;  %v8830_v2 = vadd.f32 %v8623_v8, %v2815_v5  ;;  %v2811_v29 = vadd.f32 %v2795_v51, %v8537_v35  ;;  %v2812_v13 = vadd.f32 %v2796_v63, %v8539_v41  ;;  %v2848_v8 = vmul.f32 %v8634_v59, %v8610_v1  ;;  %v12050_v5 = vld [vmem:[#allocation98_spill] sm:$0xff]  ;;  %v8848_v14 = vpop.permute.xlu2 %2936  ;;  %v12056_v51 = vld [vmem:[#allocation39_spill] sm:$0xff] }
 0x583   :  { %12034 = vst [vmem:[#allocation132_spill] sm:$0xff] %v8787_v25  ;;  %v2820_v25 = vadd.f32 %v2804_v47, %v8543_v62  ;;  %v2855_v38 = vmul.f32 %v8634_v59, %v12050_v5  ;;  %v8851_v35 = vadd.f32 %v12051_v37, %v2824_v11  ;;  %v8854_v41 = vmul.f32 %v3045_v17, %v8813_v46  ;;  %v12058_v11 = vld [vmem:[#allocation101_spill] sm:$0xff] }
 0x584   :  { %12036 = vst [vmem:[#allocation116_spill] sm:$0xff] %v8790_v18  ;;  %v2819_v18 = vadd.f32 %v2803_v0, %v8541_v3  ;;  %v8857_v3 = vmul.f32 %v3045_v17, %v8816_v26  ;;  %v8860_v62 = vmul.f32 %v3045_v17, %v8819_v7  ;;  %v8863_v47 = vmul.f32 %v3045_v17, %v8822_v27 }
 0x585   :  { %12044 = vst [vmem:[#allocation121_spill] sm:$0xff] %v8813_v46  ;;  %v2337_v63 = vmul.f32 %v2315_v43, %v12056_v51  ;;  %v2329_v0 = vmul.f32 %v2311_v58, %v12056_v51  ;;  %v2856_v37 = vmul.f32 %v8634_v59, %v12058_v11  ;;  %v11572_v46 = vmov 26  }
 0x586   :  { %12045 = vst [vmem:[#allocation133_spill] sm:$0xff] %v8816_v26  ;;  %5145 = vset.pattern.permute.xlu0 %v11572_v46  ;;  %v8872_v26 = vadd.f32 %v2847_v33, %v2811_v29  ;;  %v8876_v17 = vadd.f32 %v2855_v38, %v2819_v18  ;;  %v8882_v59 = vperm.slane %v8727_v49, 3  ;;  %v2853_v33 = vmul.f32 %v8690_v36, %v8607_v9 }
 0x587   :  { %12046 = vst [vmem:[#allocation120_spill] sm:$0xff] %v8819_v7  ;;  %3208 = vperm.xlu1 %5108, %v8297_v39   ;;  %v8874_v7 = vadd.f32 %v2848_v8, %v2812_v13  ;;  %3880 = vperm.xlu0 %5145, %v8275_v22   ;;  %v8884_v51 = vadd.f32 %v2856_v37, %v2820_v25  ;;  %v8906_v37 = vperm.slane %v8730_v54, 3  ;;  %v8912_v46 = vperm.slane %v8736_v31, 3 }
 0x588   :  { %12047 = vst [vmem:[#allocation128_spill] sm:$0xff] %v8822_v27  ;;  %v12059_v27 = vld [vmem:[#allocation58_spill] sm:$0xff]  ;;  %3260 = vperm.xlu2 %5110, %v8297_v39   ;;  %v2854_v8 = vmul.f32 %v8690_v36, %v8610_v1  ;;  %v2861_v25 = vmul.f32 %v8690_v36, %v12050_v5  ;;  %v2862_v38 = vmul.f32 %v8690_v36, %v12058_v11 }
 0x589   :  { %12048 = vst [vmem:[#allocation144_spill] sm:$0xff] %v8833_v55  ;;  %v2370_v58 = vmul.f32 %v12059_v27, %v2329_v0 }
 0x58a   :  { %12049 = vst [vmem:[#allocation140_spill] sm:$0xff] %v8836_v60  ;;  %v12057_v60 = vld [vmem:[#allocation40_spill] sm:$0xff]  ;;  %v8903_v0 = vpop.permute.xlu2 %2944 }
 0x58b   :  { %12052 = vst [vmem:[#allocation145_spill] sm:$0xff] %v8854_v41  ;;  %v2330_v55 = vmul.f32 %v2319_v45, %v12057_v60  ;;  %v2338_v43 = vmul.f32 %v2323_v15, %v12057_v60  ;;  %v2793_v45 = vpop.permute.xlu1 %2792 }
 0x58c   :  { %12053 = vst [vmem:[#allocation122_spill] sm:$0xff] %v8857_v3  ;;  %v2801_v29 = vmul.f32 %v2793_v45, %v8535_v16  ;;  %v2802_v13 = vmul.f32 %v2793_v45, %v8551_v20  ;;  %v2809_v18 = vmul.f32 %v2793_v45, %v8554_v44  ;;  %v2810_v15 = vmul.f32 %v2793_v45, %v8561_v34 }
 0x58d   :  { %12054 = vst [vmem:[#allocation127_spill] sm:$0xff] %v8860_v62  ;;  %v8909_v45 = vperm.slane %v8733_v32, 3  ;;  %v12063_v62 = vld [vmem:[#allocation51_spill] sm:$0xff]  ;;  %v9075_v3 = vperm.slane %v8736_v31, 6 }
 0x58e   :  { %12055 = vst [vmem:[#allocation136_spill] sm:$0xff] %v8863_v47  ;;  %v2817_v16 = vadd.f32 %v2801_v29, %v8711_v6  ;;  %v2818_v20 = vadd.f32 %v2802_v13, %v8713_v30  ;;  %v2825_v44 = vadd.f32 %v2809_v18, %v8715_v24  ;;  %v2826_v34 = vadd.f32 %v2810_v15, %v8717_v21  ;;  %v3101_v30 = vpop.permute.xlu0 %3100  ;;  %v12060_v13 = vld [vmem:[#allocation63_spill] sm:$0xff]  ;;  %v12061_v18 = vld [vmem:[#allocation53_spill] sm:$0xff]  ;;  %v12062_v47 = vld [vmem:[#allocation76_spill] sm:$0xff] }
 0x58f   :  { %v8915_v24 = vmul.f32 %v12059_v27, %v2330_v55  ;;  %v8918_v21 = vmul.f32 %v12059_v27, %v2337_v63  ;;  %v2432_v15 = vsel %vm934_vm8, %v12061_v18, %v12060_v13  ;;  %v8935_v55 = vmul.f32 %v3101_v30, %v8909_v45  ;;  %5111 = vset.pattern.permute.xlu1 %v12043_v42 }
 0x590   :  { %v2869_v36 = vadd.f32 %v2853_v33, %v2817_v16  ;;  %v2870_v60 = vadd.f32 %v2854_v8, %v2818_v20  ;;  %v2877_v6 = vadd.f32 %v2861_v25, %v2825_v44  ;;  %v2878_v29 = vadd.f32 %v2862_v38, %v2826_v34  ;;  %3256 = vperm.xlu1 %5111, %v8275_v22  }
 0x591   :  { %v2436_v33 = vsel %vm934_vm8, %v12063_v62, %v12062_v47  ;;  %v8929_v8 = vmul.f32 %v3101_v30, %v8882_v59  ;;  %v8932_v25 = vmul.f32 %v3101_v30, %v8906_v37  ;;  %12066 = vst [vmem:[#allocation148_spill] sm:$0xff] %v8935_v55  ;;  %v8938_v63 = vmul.f32 %v3101_v30, %v8912_v46  ;;  %v12082_v55 = vld [vmem:[#allocation57_spill] sm:$0xff] }
 0x592   :  { %v8942_v38 = vmul.f32 %v12059_v27, %v2338_v43  ;;  %v8945_v16 = vadd.f32 %v2370_v58, %v8725_v12  ;;  %v2444_v20 = vsel %vm934_vm8, %v12062_v47, %v12063_v62  ;;  %v11575_v44 = vmov 27   ;;  %12087 = vst [vmem:[#allocation65_spill] sm:$0xff] %v9075_v3 }
 0x593   :  { %12064 = vst [vmem:[#allocation123_spill] sm:$0xff] %v8929_v8  ;;  %5148 = vset.pattern.permute.xlu0 %v11575_v44  ;;  %v2440_v42 = vsel %vm934_vm8, %v12060_v13, %v12061_v18  ;;  %v2450_v27 = vmul.f32 %v2432_v15, %v11996_v4  ;;  %v8959_v12 = vmul.f32 %v2436_v33, %v11996_v4  ;;  %v12068_v43 = vmov 15   ;;  %v2837_v62 = vpop.permute.xlu1 %2836 }
 0x594   :  { %12065 = vst [vmem:[#allocation143_spill] sm:$0xff] %v8932_v25  ;;  %3936 = vperm.xlu0 %5148, %v8297_v39   ;;  %5114 = vset.pattern.permute.xlu2 %v12068_v43  ;;  %v8964_v47 = vperm.slane %v8727_v49, 4  ;;  %v2849_v58 = vmul.f32 %v2837_v62, %v8607_v9  ;;  %v2850_v34 = vmul.f32 %v2837_v62, %v8610_v1  ;;  %v8972_v18 = vperm.slane %v8730_v54, 4 }
 0x595   :  { %12067 = vst [vmem:[#allocation125_spill] sm:$0xff] %v8938_v63  ;;  %3308 = vperm.xlu2 %5114, %v8275_v22   ;;  %v2857_v30 = vmul.f32 %v2837_v62, %v12050_v5  ;;  %v2858_v13 = vmul.f32 %v2837_v62, %v12058_v11  ;;  %v8975_v15 = vperm.slane %v8733_v32, 4  ;;  %v8978_v33 = vperm.slane %v8736_v31, 4  ;;  %v8984_v5 = vpop.permute.xlu2 %2992 }
 0x596   :  { %12069 = vst [vmem:[#allocation130_spill] sm:$0xff] %v8964_v47  ;;  %v2865_v44 = vadd.f32 %v2849_v58, %v8647_v28  ;;  %v2866_v22 = vadd.f32 %v2850_v34, %v8649_v57  ;;  %v8987_v11 = vadd.f32 %v8693_v19, %v2869_v36  ;;  %v8990_v62 = vadd.f32 %v8696_v50, %v2870_v60  ;;  %v12073_v28 = vld [vmem:[#allocation115_spill] sm:$0xff]  ;;  %v12075_v58 = vld [vmem:[#allocation118_spill] sm:$0xff]  ;;  %v12076_v19 = vld [vmem:[#allocation105_spill] sm:$0xff]  ;;  %v3157_v50 = vpop.permute.xlu0 %3156 }
 0x597   :  { %12070 = vst [vmem:[#allocation129_spill] sm:$0xff] %v8972_v18  ;;  %v2873_v9 = vadd.f32 %v2857_v30, %v8651_v23  ;;  %v2874_v1 = vadd.f32 %v2858_v13, %v8653_v56  ;;  %v8993_v4 = vadd.f32 %v8699_v52, %v2877_v6  ;;  %v8996_v61 = vadd.f32 %v8702_v40, %v2878_v29  ;;  %v12074_v23 = vld [vmem:[#allocation102_spill] sm:$0xff] }
 0x598   :  { %12071 = vst [vmem:[#allocation113_spill] sm:$0xff] %v8975_v15  ;;  %v2901_v57 = vmul.f32 %v8767_v10, %v12073_v28  ;;  %v2902_v56 = vmul.f32 %v8767_v10, %v12074_v23  ;;  %v2909_v34 = vmul.f32 %v8767_v10, %v12075_v58  ;;  %v2910_v36 = vmul.f32 %v8767_v10, %v12076_v19 }
 0x599   :  { %12072 = vst [vmem:[#allocation139_spill] sm:$0xff] %v8978_v33  ;;  %v9007_v60 = vmul.f32 %v3157_v50, %v8964_v47  ;;  %v9010_v52 = vmul.f32 %v3157_v50, %v8972_v18  ;;  %v9013_v40 = vmul.f32 %v3157_v50, %v8975_v15  ;;  %v9016_v6 = vmul.f32 %v3157_v50, %v8978_v33 }
 0x59a   :  { %5112 = vset.pattern.permute.xlu1 %v12068_v43  ;;  %v9019_v29 = vadd.f32 %v2901_v57, %v2865_v44  ;;  %v9021_v30 = vadd.f32 %v2902_v56, %v2866_v22  ;;  %v9023_v10 = vadd.f32 %v2909_v34, %v2873_v9  ;;  %v9025_v13 = vadd.f32 %v2910_v36, %v2874_v1 }
 0x59b   :  { %12077 = vst [vmem:[#allocation126_spill] sm:$0xff] %v9007_v60  ;;  %v12081_v60 = vld [vmem:[#allocation42_spill] sm:$0xff]  ;;  %v11579_v50 = vmov 29   ;;  %3300 = vperm.xlu1 %5112, %v12002_v53   ;;  %v9036_v44 = vperm.slane %v8730_v54, 0  ;;  %v9039_v43 = vperm.slane %v8733_v32, 0  ;;  %v9047_v22 = vperm.slane %v8727_v49, 6 }
 0x59c   :  { %12078 = vst [vmem:[#allocation142_spill] sm:$0xff] %v9010_v52  ;;  %v2451_v63 = vmul.f32 %v2440_v42, %v12081_v60  ;;  %v2491_v52 = vmul.f32 %v12082_v55, %v2450_v27  ;;  %v2459_v25 = vmul.f32 %v2444_v20, %v12081_v60  ;;  %5151 = vset.pattern.permute.xlu0 %v11579_v50  ;;  %v9042_v42 = vperm.slane %v8736_v31, 0  ;;  %v2885_v27 = vpop.permute.xlu1 %2884 }
 0x59d   :  { %12079 = vst [vmem:[#allocation137_spill] sm:$0xff] %v9013_v40  ;;  %v9031_v40 = vperm.slane %v8727_v49, 0  ;;  %4028 = vperm.xlu0 %5151, %v12002_v53   ;;  %v12083_v20 = vmov 16   ;;  %v2899_v9 = vmul.f32 %v2885_v27, %v12073_v28  ;;  %v2900_v1 = vmul.f32 %v2885_v27, %v12074_v23  ;;  %v9066_v15 = vpop.permute.xlu2 %3000 }
 0x59e   :  { %12080 = vst [vmem:[#allocation141_spill] sm:$0xff] %v9016_v6  ;;  %5115 = vset.pattern.permute.xlu2 %v12083_v20  ;;  %v2907_v57 = vmul.f32 %v2885_v27, %v12075_v58  ;;  %v2908_v56 = vmul.f32 %v2885_v27, %v12076_v19  ;;  %v2952_v36 = vmul.f32 %v8848_v14, %v9036_v44  ;;  %v9069_v18 = vperm.slane %v8730_v54, 6 }
 0x59f   :  { %12084 = vst [vmem:[#allocation149_spill] sm:$0xff] %v9047_v22  ;;  %3352 = vperm.xlu2 %5115, %v12002_v53   ;;  %v2951_v34 = vmul.f32 %v8848_v14, %v9031_v40  ;;  %v2959_v50 = vmul.f32 %v8848_v14, %v9039_v43  ;;  %v2960_v60 = vmul.f32 %v8848_v14, %v9042_v42  ;;  %v9072_v47 = vperm.slane %v8733_v32, 6 }
 0x5a0   :  { %v2915_v6 = vadd.f32 %v2899_v9, %v8872_v26  ;;  %v2916_v8 = vadd.f32 %v2900_v1, %v8874_v7  ;;  %v2923_v33 = vadd.f32 %v2907_v57, %v8876_v17  ;;  %v2924_v27 = vadd.f32 %v2908_v56, %v8884_v51  ;;  %12085 = vst [vmem:[#allocation56_spill] sm:$0xff] %v9069_v18  ;;  %v3249_v7 = vpop.permute.xlu0 %3248 }
 0x5a1   :  { %12086 = vst [vmem:[#allocation70_spill] sm:$0xff] %v9072_v47  ;;  %v9078_v17 = vmul.f32 %v3249_v7, %v9047_v22  ;;  %v9081_v51 = vmul.f32 %v3249_v7, %v9069_v18  ;;  %v9084_v1 = vmul.f32 %v3249_v7, %v9072_v47  ;;  %v9087_v57 = vmul.f32 %v3249_v7, %v9075_v3 }
 0x5a2   :  { %v2967_v14 = vadd.f32 %v2951_v34, %v2915_v6  ;;  %v2968_v41 = vadd.f32 %v2952_v36, %v2916_v8  ;;  %v2975_v26 = vadd.f32 %v2959_v50, %v2923_v33  ;;  %v2976_v9 = vadd.f32 %v2960_v60, %v2924_v27  ;;  %v12092_v6 = vld [vmem:[#allocation132_spill] sm:$0xff] }
 0x5a3   :  { %12088 = vst [vmem:[#allocation88_spill] sm:$0xff] %v9078_v17  ;;  %v2387_v56 = vadd.f32 %v8915_v24, %v8784_v48  ;;  %v2394_v8 = vadd.f32 %v8918_v21, %v12092_v6  ;;  %v12093_v33 = vld [vmem:[#allocation116_spill] sm:$0xff]  ;;  %3312 = vperm.xlu1 %5112, %v8297_v39   ;;  %v2492_v50 = vmul.f32 %v12082_v55, %v2451_v63  ;;  %v11590_v7 = vmov 30   ;;  %v9107_v24 = vld [vmem:[%s11263_s10 + $0x8] sm:$0xff]  ;;  %v12100_v17 = vld [vmem:[#allocation111_spill] sm:$0xff] }
 0x5a4   :  { %12089 = vst [vmem:[#allocation103_spill] sm:$0xff] %v9081_v51  ;;  %v2395_v60 = vadd.f32 %v8942_v38, %v12093_v33  ;;  %v9098_v34 = vadd.f32 %v2491_v52, %v8945_v16  ;;  %v2499_v36 = vmul.f32 %v12082_v55, %v8959_v12  ;;  %v2500_v27 = vmul.f32 %v12082_v55, %v2459_v25  ;;  %v2893_v48 = vpop.permute.xlu1 %2892  ;;  %v12098_v6 = vld [vmem:[#allocation140_spill] sm:$0xff] }
 0x5a5   :  { %12090 = vst [vmem:[#allocation114_spill] sm:$0xff] %v9084_v1  ;;  %5155 = vset.pattern.permute.xlu0 %v11590_v7  ;;  %v2903_v21 = vmul.f32 %v2893_v48, %v12073_v28  ;;  %v2904_v63 = vmul.f32 %v2893_v48, %v12074_v23  ;;  %v2911_v38 = vmul.f32 %v2893_v48, %v12075_v58  ;;  %v9115_v25 = vperm.slane %v8727_v49, 7  ;;  %v12097_v58 = vld [vmem:[#allocation144_spill] sm:$0xff]  ;;  %v12099_v1 = vld [vmem:[#allocation110_spill] sm:$0xff] }
 0x5a6   :  { %12091 = vst [vmem:[#allocation84_spill] sm:$0xff] %v9087_v57  ;;  %4084 = vperm.xlu0 %5155, %v9107_v24   ;;  %v2955_v55 = vmul.f32 %v8903_v0, %v9031_v40  ;;  %v2956_v16 = vmul.f32 %v8903_v0, %v9036_v44  ;;  %v2963_v12 = vmul.f32 %v8903_v0, %v9039_v43  ;;  %v9130_v57 = vpop.permute.xlu2 %3048 }
 0x5a7   :  { %12094 = vst [vmem:[#allocation66_spill] sm:$0xff] %v9098_v34  ;;  %3364 = vperm.xlu2 %5115, %v8297_v39   ;;  %v2912_v39 = vmul.f32 %v2893_v48, %v12076_v19  ;;  %v2964_v28 = vmul.f32 %v8903_v0, %v9042_v42  ;;  %v2919_v23 = vadd.f32 %v2903_v21, %v8830_v2  ;;  %v12101_v19 = vld [vmem:[#allocation95_spill] sm:$0xff]  ;;  %v9142_v0 = vperm.slane %v8730_v54, 7 }
 0x5a8   :  { %12095 = vst [vmem:[#allocation96_spill] sm:$0xff] %v9107_v24  ;;  %v2920_v52 = vadd.f32 %v2904_v63, %v12097_v58  ;;  %v2927_v33 = vadd.f32 %v2911_v38, %v12098_v6  ;;  %v9133_v51 = vadd.f32 %v12099_v1, %v2967_v14  ;;  %v9136_v3 = vadd.f32 %v12100_v17, %v2968_v41 }
 0x5a9   :  { %12096 = vst [vmem:[#allocation90_spill] sm:$0xff] %v9115_v25  ;;  %v2928_v7 = vadd.f32 %v2912_v39, %v8851_v35  ;;  %v9139_v48 = vadd.f32 %v12101_v19, %v2975_v26  ;;  %v9145_v2 = vperm.slane %v8733_v32, 7  ;;  %v9148_v21 = vperm.slane %v8736_v31, 7  ;;  %v3305_v35 = vpop.permute.xlu0 %3304 }
 0x5aa   :  { %12102 = vst [vmem:[#allocation74_spill] sm:$0xff] %v9142_v0  ;;  %v9150_v63 = vadd.f32 %v2955_v55, %v2919_v23  ;;  %v9152_v14 = vadd.f32 %v2956_v16, %v2920_v52  ;;  %v9154_v1 = vadd.f32 %v2963_v12, %v2927_v33  ;;  %v9159_v26 = vmul.f32 %v3305_v35, %v9115_v25 }
 0x5ab   :  { %12103 = vst [vmem:[#allocation86_spill] sm:$0xff] %v9145_v2  ;;  %v9156_v41 = vadd.f32 %v2964_v28, %v2928_v7  ;;  %v9162_v17 = vmul.f32 %v3305_v35, %v9142_v0  ;;  %v9165_v38 = vmul.f32 %v3305_v35, %v9145_v2  ;;  %v9168_v39 = vmul.f32 %v3305_v35, %v9148_v21  ;;  %v12110_v7 = vld [vmem:[#allocation117_spill] sm:$0xff] }
 0x5ac   :  { %12104 = vst [vmem:[#allocation91_spill] sm:$0xff] %v9148_v21  ;;  %5116 = vset.pattern.permute.xlu1 %v12083_v20  ;;  %v9171_v55 = vadd.f32 %v2492_v50, %v2387_v56  ;;  %v9175_v16 = vadd.f32 %v12110_v7, %v2976_v9  ;;  %v9177_v12 = vadd.f32 %v2499_v36, %v2394_v8  ;;  %v11594_v23 = vmov 31   ;;  %v2941_v52 = vpop.permute.xlu1 %2940  ;;  %v9186_v20 = vld [vmem:[%s11263_s10 + $0x10] sm:$0xff]  ;;  %v12127_v21 = vld [vmem:[#allocation104_spill] sm:$0xff]  ;;  %v12128_v2 = vld [vmem:[#allocation109_spill] sm:$0xff] }
 0x5ad   :  { %12105 = vst [vmem:[#allocation94_spill] sm:$0xff] %v9159_v26  ;;  %3356 = vperm.xlu1 %5116, %v9107_v24   ;;  %v9179_v28 = vadd.f32 %v2500_v27, %v2395_v60  ;;  %v12113_v58 = vmov 17   ;;  %v2953_v9 = vmul.f32 %v2941_v52, %v9031_v40  ;;  %v2954_v56 = vmul.f32 %v2941_v52, %v9036_v44  ;;  %v12126_v26 = vld [vmem:[#allocation92_spill] sm:$0xff] }
 0x5ae   :  { %12106 = vst [vmem:[#allocation81_spill] sm:$0xff] %v9162_v17  ;;  %5159 = vset.pattern.permute.xlu0 %v11594_v23  ;;  %v2961_v8 = vmul.f32 %v2941_v52, %v9039_v43  ;;  %v2962_v60 = vmul.f32 %v2941_v52, %v9042_v42  ;;  %v9195_v50 = vperm.slane %v9098_v34, 0  ;;  %v9201_v33 = vperm.slane %v9171_v55, 0  ;;  %v3093_v35 = vpop.permute.xlu2 %3092 }
 0x5af   :  { %12107 = vst [vmem:[#allocation97_spill] sm:$0xff] %v9165_v38  ;;  %5119 = vset.pattern.permute.xlu2 %v12113_v58  ;;  %4140 = vperm.xlu0 %5159, %v9186_v20   ;;  %v2969_v36 = vadd.f32 %v2953_v9, %v9019_v29  ;;  %v2970_v27 = vadd.f32 %v2954_v56, %v9021_v30  ;;  %v9205_v7 = vperm.slane %v9177_v12, 0  ;;  %v9208_v52 = vperm.slane %v9179_v28, 0  ;;  %v12119_v9 = vld [vmem:[#allocation108_spill] sm:$0xff] }
 0x5b0   :  { %12108 = vst [vmem:[#allocation89_spill] sm:$0xff] %v9168_v39  ;;  %3408 = vperm.xlu2 %5119, %v9107_v24   ;;  %v2977_v6 = vadd.f32 %v2961_v8, %v9023_v10  ;;  %v2978_v19 = vadd.f32 %v2962_v60, %v9025_v13  ;;  %v9211_v23 = vperm.slane %v9098_v34, 1  ;;  %v9214_v29 = vmul.f32 %v3093_v35, %v8882_v59 }
 0x5b1   :  { %12109 = vst [vmem:[#allocation83_spill] sm:$0xff] %v9171_v55  ;;  %v9217_v30 = vmul.f32 %v3093_v35, %v8906_v37  ;;  %v9220_v10 = vmul.f32 %v3093_v35, %v8909_v45  ;;  %v9223_v13 = vmul.f32 %v3093_v35, %v8912_v46  ;;  %v3005_v56 = vmul.f32 %v8984_v5, %v12119_v9  ;;  %v3361_v8 = vpop.permute.xlu0 %3360 }
 0x5b2   :  { %12111 = vst [vmem:[#allocation85_spill] sm:$0xff] %v9177_v12  ;;  %v9228_v60 = vperm.slane %v9171_v55, 1  ;;  %v9231_v34 = vperm.slane %v9177_v12, 1  ;;  %v9234_v39 = vmul.f32 %v3361_v8, %v9195_v50  ;;  %v9237_v38 = vmul.f32 %v3361_v8, %v9201_v33 }
 0x5b3   :  { %12112 = vst [vmem:[#allocation138_spill] sm:$0xff] %v9179_v28  ;;  %v9240_v17 = vmul.f32 %v3361_v8, %v9205_v7  ;;  %v9243_v35 = vmul.f32 %v3361_v8, %v9208_v52  ;;  %v3006_v55 = vmul.f32 %v8984_v5, %v12126_v26  ;;  %v3013_v12 = vmul.f32 %v8984_v5, %v12127_v21 }
 0x5b4   :  { %12114 = vst [vmem:[#allocation80_spill] sm:$0xff] %v9195_v50  ;;  %v3018_v50 = vmul.f32 %v9066_v15, %v12128_v2  ;;  %v9267_v0 = vperm.slane %v9179_v28, 1  ;;  %v3021_v47 = vadd.f32 %v3005_v56, %v2969_v36 }
 0x5b5   :  { %12115 = vst [vmem:[#allocation67_spill] sm:$0xff] %v9201_v33  ;;  %5118 = vset.pattern.permute.xlu1 %v12113_v58  ;;  %v3010_v33 = vmul.f32 %v9066_v15, %v12126_v26  ;;  %v3022_v18 = vadd.f32 %v3006_v55, %v2970_v27  ;;  %v3029_v22 = vadd.f32 %v3013_v12, %v2977_v6  ;;  %v12131_v12 = vld [vmem:[#allocation145_spill] sm:$0xff]  ;;  %v12132_v27 = vld [vmem:[#allocation122_spill] sm:$0xff] }
 0x5b6   :  { %12116 = vst [vmem:[#allocation93_spill] sm:$0xff] %v9205_v7  ;;  %3404 = vperm.xlu1 %5118, %v12002_v53   ;;  %v5270_v7 = vmov 18   ;;  %v3105_v25 = vpop.permute.xlu2 %3104  ;;  %v9295_v36 = vadd.f32 %v12131_v12, %v3021_v47  ;;  %v12140_v12 = vld [vmem:[#allocation129_spill] sm:$0xff] }
 0x5b7   :  { %12117 = vst [vmem:[#allocation79_spill] sm:$0xff] %v9208_v52  ;;  %v9278_v28 = vmul.f32 %v3105_v25, %v8906_v37  ;;  %v9298_v6 = vadd.f32 %v12132_v27, %v3022_v18 }
 0x5b8   :  { %12118 = vst [vmem:[#allocation69_spill] sm:$0xff] %v9211_v23  ;;  %5121 = vset.pattern.permute.xlu2 %v5270_v7 }
 0x5b9   :  { %12120 = vst [vmem:[#allocation62_spill] sm:$0xff] %v9228_v60  ;;  %3456 = vperm.xlu2 %5121, %v12002_v53   ;;  %v9275_v53 = vmul.f32 %v3105_v25, %v8882_v59 }
 0x5ba   :  { %12121 = vst [vmem:[#allocation77_spill] sm:$0xff] %v9231_v34 }
 0x5bb   :  { %12122 = vst [vmem:[#allocation60_spill] sm:$0xff] %v9234_v39  ;;  %v3014_v39 = vmul.f32 %v8984_v5, %v12128_v2  ;;  %v3017_v5 = vmul.f32 %v9066_v15, %v12127_v21 }
 0x5bc   :  { %12123 = vst [vmem:[#allocation73_spill] sm:$0xff] %v9237_v38  ;;  %v3009_v38 = vmul.f32 %v9066_v15, %v12119_v9 }
 0x5bd   :  { %12124 = vst [vmem:[#allocation150_spill] sm:$0xff] %v9240_v17  ;;  %v2949_v17 = vpop.permute.xlu1 %2948  ;;  %v3030_v15 = vadd.f32 %v3014_v39, %v2978_v19  ;;  %v3417_v39 = vpop.permute.xlu0 %3416  ;;  %v12133_v19 = vld [vmem:[#allocation127_spill] sm:$0xff] }
 0x5be   :  { %12125 = vst [vmem:[#allocation134_spill] sm:$0xff] %v9243_v35  ;;  %v2957_v8 = vmul.f32 %v2949_v17, %v9031_v40  ;;  %v2958_v58 = vmul.f32 %v2949_v17, %v9036_v44  ;;  %v2965_v35 = vmul.f32 %v2949_v17, %v9039_v43  ;;  %v2966_v52 = vmul.f32 %v2949_v17, %v9042_v42 }
 0x5bf   :  { %12129 = vst [vmem:[#allocation146_spill] sm:$0xff] %v9267_v0  ;;  %v12130_v40 = vmov 0   ;;  %v9316_v47 = vmul.f32 %v3417_v39, %v9267_v0  ;;  %3412 = vperm.xlu1 %5118, %v9186_v20  }
 0x5c0   :  { %5162 = vset.pattern.permute.xlu0 %v12130_v40  ;;  %v2973_v44 = vadd.f32 %v2957_v8, %v8987_v11  ;;  %v2974_v43 = vadd.f32 %v2958_v58, %v8990_v62  ;;  %v2981_v42 = vadd.f32 %v2965_v35, %v8993_v4  ;;  %v2982_v17 = vadd.f32 %v2966_v52, %v8996_v61 }
 0x5c1   :  { %v9281_v40 = vmul.f32 %v3105_v25, %v8909_v45  ;;  %v9284_v11 = vmul.f32 %v3105_v25, %v8912_v46  ;;  %v9301_v52 = vadd.f32 %v12133_v19, %v3029_v22  ;;  %v12134_v25 = vld [vmem:[#allocation136_spill] sm:$0xff]  ;;  %12138 = vst [vmem:[#allocation101_spill] sm:$0xff] %v9316_v47  ;;  %3464 = vperm.xlu2 %5121, %v9186_v20   ;;  %v9349_v19 = vperm.slane %v8733_v32, 5 }
 0x5c2   :  { %v9286_v4 = vadd.f32 %v3009_v38, %v2973_v44  ;;  %v9288_v61 = vadd.f32 %v3010_v33, %v2974_v43  ;;  %v9290_v62 = vadd.f32 %v3017_v5, %v2981_v42  ;;  %v9292_v55 = vadd.f32 %v3018_v50, %v2982_v17  ;;  %v3149_v17 = vpop.permute.xlu2 %3148 }
 0x5c3   :  { %v9304_v56 = vadd.f32 %v12134_v25, %v3030_v15  ;;  %v9307_v38 = vmul.f32 %v3417_v39, %v9211_v23  ;;  %v9310_v33 = vmul.f32 %v3417_v39, %v9228_v60  ;;  %v9313_v50 = vmul.f32 %v3417_v39, %v9231_v34  ;;  %v12139_v15 = vld [vmem:[#allocation130_spill] sm:$0xff] }
 0x5c4   :  { %v9329_v39 = vmul.f32 %v3149_v17, %v12139_v15  ;;  %v9352_v25 = vperm.slane %v8736_v31, 5 }
 0x5c5   :  { %12135 = vst [vmem:[#allocation151_spill] sm:$0xff] %v9307_v38  ;;  %v2997_v18 = vpop.permute.xlu1 %2996 }
 0x5c6   :  { %12136 = vst [vmem:[#allocation98_spill] sm:$0xff] %v9310_v33  ;;  %v3007_v22 = vmul.f32 %v2997_v18, %v12119_v9  ;;  %v3008_v35 = vmul.f32 %v2997_v18, %v12126_v26  ;;  %v3015_v8 = vmul.f32 %v2997_v18, %v12127_v21  ;;  %v3016_v58 = vmul.f32 %v2997_v18, %v12128_v2  ;;  %v12141_v26 = vld [vmem:[#allocation113_spill] sm:$0xff]  ;;  %v12142_v21 = vld [vmem:[#allocation139_spill] sm:$0xff] }
 0x5c7   :  { %12137 = vst [vmem:[#allocation106_spill] sm:$0xff] %v9313_v50  ;;  %v9332_v9 = vmul.f32 %v3149_v17, %v12140_v12  ;;  %v9335_v27 = vmul.f32 %v3149_v17, %v12141_v26  ;;  %v9338_v2 = vmul.f32 %v3149_v17, %v12142_v21  ;;  %5122 = vset.pattern.permute.xlu1 %v5270_v7  ;;  %v12144_v7 = vld [vmem:[#allocation121_spill] sm:$0xff]  ;;  %v12147_v17 = vld [vmem:[#allocation128_spill] sm:$0xff] }
 0x5c8   :  { %v3023_v5 = vadd.f32 %v3007_v22, %v9150_v63  ;;  %v3024_v44 = vadd.f32 %v3008_v35, %v9152_v14  ;;  %v3031_v43 = vadd.f32 %v3015_v8, %v9154_v1  ;;  %v3032_v42 = vadd.f32 %v3016_v58, %v9156_v41  ;;  %3460 = vperm.xlu1 %5122, %v9107_v24   ;;  %v12145_v22 = vld [vmem:[#allocation133_spill] sm:$0xff]  ;;  %v12146_v8 = vld [vmem:[#allocation120_spill] sm:$0xff] }
 0x5c9   :  { %v12143_v63 = vmov 19   ;;  %v9343_v1 = vperm.slane %v8727_v49, 5  ;;  %v9346_v41 = vperm.slane %v8730_v54, 5  ;;  %v3059_v54 = vmul.f32 %v9130_v57, %v12144_v7 }
 0x5ca   :  { %5124 = vset.pattern.permute.xlu2 %v12143_v63  ;;  %v3060_v32 = vmul.f32 %v9130_v57, %v12145_v22  ;;  %v3067_v31 = vmul.f32 %v9130_v57, %v12146_v8  ;;  %v3068_v47 = vmul.f32 %v9130_v57, %v12147_v17  ;;  %v3197_v0 = vpop.permute.xlu2 %3196 }
 0x5cb   :  { %3512 = vperm.xlu2 %5124, %v9107_v24   ;;  %v3075_v34 = vadd.f32 %v3059_v54, %v3023_v5  ;;  %v9372_v21 = vmul.f32 %v3197_v0, %v9343_v1  ;;  %v9375_v26 = vmul.f32 %v3197_v0, %v9346_v41  ;;  %v9378_v57 = vmul.f32 %v3197_v0, %v9349_v19  ;;  %v9398_v5 = vld [vmem:[%s11263_s10 + $0x18] sm:$0xff] }
 0x5cc   :  { %v3076_v60 = vadd.f32 %v3060_v32, %v3024_v44  ;;  %v3083_v23 = vadd.f32 %v3067_v31, %v3031_v43  ;;  %v3084_v24 = vadd.f32 %v3068_v47, %v3032_v42  ;;  %12148 = vst [vmem:[#allocation58_spill] sm:$0xff] %v9398_v5 }
 0x5cd   :  { %v3041_v14 = vpop.permute.xlu1 %3040 }
 0x5ce   :  { %v3055_v18 = vmul.f32 %v3041_v14, %v12144_v7  ;;  %v3056_v35 = vmul.f32 %v3041_v14, %v12145_v22  ;;  %v3063_v58 = vmul.f32 %v3041_v14, %v12146_v8  ;;  %v3064_v49 = vmul.f32 %v3041_v14, %v12147_v17 }
 0x5d0   :  { %v3071_v50 = vadd.f32 %v3055_v18, %v9133_v51  ;;  %v3072_v33 = vadd.f32 %v3056_v35, %v9136_v3  ;;  %v3079_v38 = vadd.f32 %v3063_v58, %v9139_v48  ;;  %v3080_v14 = vadd.f32 %v3064_v49, %v9175_v16  ;;  %3468 = vperm.xlu1 %5122, %v9398_v5  }
 0x5d1   :  { %v9381_v3 = vmul.f32 %v3197_v0, %v9352_v25  ;;  %v12149_v0 = vld [vmem:[#allocation123_spill] sm:$0xff] }
 0x5d2   :  { %v9384_v51 = vadd.f32 %v9214_v29, %v3071_v50  ;;  %v9387_v48 = vadd.f32 %v9217_v30, %v3072_v33  ;;  %v9390_v16 = vadd.f32 %v9220_v10, %v3079_v38  ;;  %v9393_v47 = vadd.f32 %v9223_v13, %v3080_v14  ;;  %v12150_v29 = vld [vmem:[#allocation143_spill] sm:$0xff]  ;;  %v12151_v30 = vld [vmem:[#allocation148_spill] sm:$0xff]  ;;  %v12152_v10 = vld [vmem:[#allocation125_spill] sm:$0xff]  ;;  %v3205_v58 = vpop.permute.xlu2 %3204 }
 0x5d3   :  { %v9402_v44 = vadd.f32 %v12149_v0, %v3075_v34  ;;  %v9405_v50 = vadd.f32 %v12150_v29, %v3076_v60  ;;  %v9408_v33 = vadd.f32 %v12151_v30, %v3083_v23  ;;  %v9411_v38 = vadd.f32 %v12152_v10, %v3084_v24  ;;  %3520 = vperm.xlu2 %5124, %v9398_v5   ;;  %v12154_v0 = vld [vmem:[#allocation126_spill] sm:$0xff] }
 0x5d4   :  { %v12155_v30 = vld [vmem:[#allocation142_spill] sm:$0xff] }
 0x5d5   :  { %v3053_v13 = vpop.permute.xlu1 %3052 }
 0x5d6   :  { %v3061_v43 = vmul.f32 %v3053_v13, %v12144_v7  ;;  %v3062_v42 = vmul.f32 %v3053_v13, %v12145_v22  ;;  %v3069_v18 = vmul.f32 %v3053_v13, %v12146_v8  ;;  %v3070_v34 = vmul.f32 %v3053_v13, %v12147_v17 }
 0x5d7   :  { %v9427_v8 = vmul.f32 %v3205_v58, %v9343_v1 }
 0x5d8   :  { %v3077_v60 = vadd.f32 %v3061_v43, %v9286_v4  ;;  %v3078_v35 = vadd.f32 %v3062_v42, %v9288_v61  ;;  %v3085_v23 = vadd.f32 %v3069_v18, %v9290_v62  ;;  %v3086_v24 = vadd.f32 %v3070_v34, %v9292_v55  ;;  %5125 = vset.pattern.permute.xlu1 %v12143_v63  ;;  %v12158_v43 = vld [vmem:[#allocation149_spill] sm:$0xff]  ;;  %v12159_v18 = vld [vmem:[#allocation56_spill] sm:$0xff] }
 0x5d9   :  { %v9430_v4 = vmul.f32 %v3205_v58, %v9346_v41  ;;  %v9433_v61 = vmul.f32 %v3205_v58, %v9349_v19  ;;  %v9436_v62 = vmul.f32 %v3205_v58, %v9352_v25  ;;  %3516 = vperm.xlu1 %5125, %v9186_v20  }
 0x5da   :  { %v3129_v49 = vadd.f32 %v9275_v53, %v3077_v60  ;;  %v3130_v54 = vadd.f32 %v9278_v28, %v3078_v35  ;;  %v3137_v7 = vadd.f32 %v9281_v40, %v3085_v23  ;;  %v3138_v22 = vadd.f32 %v9284_v11, %v3086_v24  ;;  %v12160_v60 = vld [vmem:[#allocation70_spill] sm:$0xff] }
 0x5db   :  { %v12153_v28 = vmov 20  }
 0x5dc   :  { %5128 = vset.pattern.permute.xlu2 %v12153_v28  ;;  %v9451_v29 = vadd.f32 %v12154_v0, %v3129_v49  ;;  %v9454_v10 = vadd.f32 %v12155_v30, %v3130_v54  ;;  %v12164_v49 = vld [vmem:[#allocation113_spill] sm:$0xff] }
 0x5dd   :  { %v3097_v40 = vpop.permute.xlu1 %3096  ;;  %3568 = vperm.xlu2 %5128, %v9186_v20  }
 0x5de   :  { %v3109_v53 = vmul.f32 %v3097_v40, %v8882_v59  ;;  %v3110_v11 = vmul.f32 %v3097_v40, %v8906_v37  ;;  %v3117_v55 = vmul.f32 %v3097_v40, %v8909_v45  ;;  %v3118_v17 = vmul.f32 %v3097_v40, %v8912_v46  ;;  %v12156_v59 = vld [vmem:[#allocation137_spill] sm:$0xff]  ;;  %v3253_v46 = vpop.permute.xlu2 %3252 }
 0x5df   :  { %v9457_v37 = vadd.f32 %v12156_v59, %v3137_v7  ;;  %v12157_v45 = vld [vmem:[#allocation141_spill] sm:$0xff]  ;;  %v9475_v42 = vmul.f32 %v3253_v46, %v12158_v43  ;;  %v9478_v34 = vmul.f32 %v3253_v46, %v12159_v18  ;;  %v9481_v35 = vmul.f32 %v3253_v46, %v12160_v60  ;;  %v12165_v7 = vld [vmem:[#allocation139_spill] sm:$0xff] }
 0x5e0   :  { %v3125_v32 = vadd.f32 %v3109_v53, %v9295_v36  ;;  %v3126_v31 = vadd.f32 %v3110_v11, %v9298_v6  ;;  %v3133_v63 = vadd.f32 %v3117_v55, %v9301_v52  ;;  %v3134_v14 = vadd.f32 %v3118_v17, %v9304_v56 }
 0x5e1   :  { %v9460_v13 = vadd.f32 %v12157_v45, %v3138_v22  ;;  %5126 = vset.pattern.permute.xlu1 %v12153_v28 }
 0x5e2   :  { %v9463_v36 = vadd.f32 %v9329_v39, %v3125_v32  ;;  %v9466_v6 = vadd.f32 %v9332_v9, %v3126_v31  ;;  %v9469_v52 = vadd.f32 %v9335_v27, %v3133_v63  ;;  %v9472_v56 = vadd.f32 %v9338_v2, %v3134_v14  ;;  %v12161_v39 = vld [vmem:[#allocation65_spill] sm:$0xff] }
 0x5e3   :  { %v9484_v23 = vmul.f32 %v3253_v46, %v12161_v39  ;;  %v9490_v9 = vld [vmem:[%s11263_s10] sm:$0xff]  ;;  %v12163_v27 = vmov 21  }
 0x5e4   :  { %12162 = vst [vmem:[#allocation63_spill] sm:$0xff] %v9490_v9  ;;  %3560 = vperm.xlu1 %5126, %v9490_v9  }
 0x5e5   :  { %5129 = vset.pattern.permute.xlu2 %v12163_v27  ;;  %v3145_v2 = vpop.permute.xlu1 %3144 }
 0x5e6   :  { %3612 = vperm.xlu2 %5129, %v9490_v9   ;;  %v3159_v24 = vmul.f32 %v3145_v2, %v12139_v15  ;;  %v3160_v58 = vmul.f32 %v3145_v2, %v12140_v12  ;;  %v3167_v54 = vmul.f32 %v3145_v2, %v12164_v49  ;;  %v3168_v22 = vmul.f32 %v3145_v2, %v12165_v7  ;;  %v3261_v55 = vpop.permute.xlu2 %3260  ;;  %v12166_v2 = vld [vmem:[#allocation88_spill] sm:$0xff] }
 0x5e7   :  { %v9504_v17 = vmul.f32 %v3261_v55, %v12158_v43  ;;  %v9507_v32 = vmul.f32 %v3261_v55, %v12159_v18  ;;  %v9510_v31 = vmul.f32 %v3261_v55, %v12160_v60  ;;  %v9513_v63 = vmul.f32 %v3261_v55, %v12161_v39 }
 0x5e8   :  { %v3175_v28 = vadd.f32 %v3159_v24, %v9384_v51  ;;  %v3176_v40 = vadd.f32 %v3160_v58, %v9387_v48  ;;  %v3183_v53 = vadd.f32 %v3167_v54, %v9390_v16  ;;  %v3184_v11 = vadd.f32 %v3168_v22, %v9393_v47  ;;  %v12167_v58 = vld [vmem:[#allocation103_spill] sm:$0xff] }
 0x5ea   :  { %v3227_v51 = vadd.f32 %v9372_v21, %v3175_v28  ;;  %v3228_v48 = vadd.f32 %v9375_v26, %v3176_v40  ;;  %v3235_v16 = vadd.f32 %v9378_v57, %v3183_v53  ;;  %v3236_v47 = vadd.f32 %v9381_v3, %v3184_v11  ;;  %v12173_v40 = vld [vmem:[#allocation91_spill] sm:$0xff] }
 0x5ec   :  { %3572 = vperm.xlu1 %5126, %v9398_v5   ;;  %v9530_v24 = vadd.f32 %v12166_v2, %v3227_v51 }
 0x5ed   :  { %v3153_v14 = vpop.permute.xlu1 %3152 }
 0x5ee   :  { %3624 = vperm.xlu2 %5129, %v9398_v5   ;;  %v3163_v0 = vmul.f32 %v3153_v14, %v12139_v15  ;;  %v3164_v30 = vmul.f32 %v3153_v14, %v12140_v12  ;;  %v3171_v59 = vmul.f32 %v3153_v14, %v12164_v49  ;;  %v3172_v45 = vmul.f32 %v3153_v14, %v12165_v7  ;;  %v12168_v12 = vld [vmem:[#allocation114_spill] sm:$0xff]  ;;  %v12169_v49 = vld [vmem:[#allocation84_spill] sm:$0xff] }
 0x5ef   :  { %v3309_v46 = vpop.permute.xlu2 %3308  ;;  %v9533_v15 = vadd.f32 %v12167_v58, %v3228_v48  ;;  %v9536_v54 = vadd.f32 %v12168_v12, %v3235_v16  ;;  %v9539_v7 = vadd.f32 %v12169_v49, %v3236_v47  ;;  %v12174_v16 = vld [vmem:[#allocation96_spill] sm:$0xff]  ;;  %v12175_v47 = vmov 22   ;;  %v12179_v58 = vld [vmem:[#allocation79_spill] sm:$0xff] }
 0x5f0   :  { %v3179_v21 = vadd.f32 %v3163_v0, %v9402_v44  ;;  %v3180_v26 = vadd.f32 %v3164_v30, %v9405_v50  ;;  %v3187_v57 = vadd.f32 %v3171_v59, %v9408_v33  ;;  %v3188_v3 = vadd.f32 %v3172_v45, %v9411_v38  ;;  %v12170_v44 = vld [vmem:[#allocation90_spill] sm:$0xff] }
 0x5f1   :  { %v9542_v22 = vmul.f32 %v3309_v46, %v12170_v44  ;;  %v12171_v50 = vld [vmem:[#allocation74_spill] sm:$0xff]  ;;  %v9551_v53 = vmul.f32 %v3309_v46, %v12173_v40  ;;  %v5271_v49 = vmov 23  }
 0x5f2   :  { %v9545_v33 = vmul.f32 %v3309_v46, %v12171_v50  ;;  %v12172_v38 = vld [vmem:[#allocation86_spill] sm:$0xff]  ;;  %v3231_v11 = vadd.f32 %v9427_v8, %v3179_v21  ;;  %v3232_v55 = vadd.f32 %v9430_v4, %v3180_v26  ;;  %v3239_v51 = vadd.f32 %v9433_v61, %v3187_v57  ;;  %v12176_v21 = vld [vmem:[#allocation80_spill] sm:$0xff]  ;;  %v12177_v57 = vld [vmem:[#allocation67_spill] sm:$0xff] }
 0x5f3   :  { %v9548_v28 = vmul.f32 %v3309_v46, %v12172_v38  ;;  %v3240_v48 = vadd.f32 %v9436_v62, %v3188_v3  ;;  %v12178_v46 = vld [vmem:[#allocation93_spill] sm:$0xff] }
 0x5f4   :  { %5130 = vset.pattern.permute.xlu1 %v12163_v27 }
 0x5f5   :  { %3616 = vperm.xlu1 %5130, %v12174_v16   ;;  %v3201_v14 = vpop.permute.xlu1 %3200 }
 0x5f6   :  { %5133 = vset.pattern.permute.xlu2 %v12175_v47  ;;  %v3213_v0 = vmul.f32 %v3201_v14, %v9343_v1  ;;  %v3214_v30 = vmul.f32 %v3201_v14, %v9346_v41  ;;  %v3221_v27 = vmul.f32 %v3201_v14, %v9349_v19  ;;  %v3222_v8 = vmul.f32 %v3201_v14, %v9352_v25 }
 0x5f7   :  { %3668 = vperm.xlu2 %5133, %v12174_v16  }
 0x5f8   :  { %v3229_v4 = vadd.f32 %v3213_v0, %v9463_v36  ;;  %v3230_v61 = vadd.f32 %v3214_v30, %v9466_v6  ;;  %v3237_v62 = vadd.f32 %v3221_v27, %v9469_v52  ;;  %v3238_v59 = vadd.f32 %v3222_v8, %v9472_v56 }
 0x5f9   :  { %v3353_v45 = vpop.permute.xlu2 %3352 }
 0x5fa   :  { %v9570_v26 = vmul.f32 %v3353_v45, %v12176_v21  ;;  %v9573_v3 = vmul.f32 %v3353_v45, %v12177_v57  ;;  %v9576_v2 = vmul.f32 %v3353_v45, %v12178_v46  ;;  %v9579_v12 = vmul.f32 %v3353_v45, %v12179_v58 }
 0x5fb   :  { %v3281_v36 = vadd.f32 %v9475_v42, %v3229_v4  ;;  %v3282_v6 = vadd.f32 %v9478_v34, %v3230_v61  ;;  %v3289_v52 = vadd.f32 %v9481_v35, %v3237_v62  ;;  %v3290_v56 = vadd.f32 %v9484_v23, %v3238_v59  ;;  %v12180_v4 = vld [vmem:[#allocation94_spill] sm:$0xff] }
 0x5fd   :  { %5132 = vset.pattern.permute.xlu1 %v12175_v47  ;;  %v3209_v14 = vpop.permute.xlu1 %3208  ;;  %v9597_v61 = vadd.f32 %v12180_v4, %v3281_v36 }
 0x5fe   :  { %3664 = vperm.xlu1 %5132, %v9490_v9   ;;  %v3217_v0 = vmul.f32 %v3209_v14, %v9343_v1  ;;  %v3218_v30 = vmul.f32 %v3209_v14, %v9346_v41  ;;  %v3225_v27 = vmul.f32 %v3209_v14, %v9349_v19  ;;  %v3226_v42 = vmul.f32 %v3209_v14, %v9352_v25  ;;  %v12181_v1 = vld [vmem:[#allocation81_spill] sm:$0xff] }
 0x5ff   :  { %5135 = vset.pattern.permute.xlu2 %v5271_v49  ;;  %v9600_v41 = vadd.f32 %v12181_v1, %v3282_v6  ;;  %v12182_v19 = vld [vmem:[#allocation97_spill] sm:$0xff]  ;;  %v12189_v1 = vld [vmem:[#allocation66_spill] sm:$0xff] }
 0x600   :  { %3716 = vperm.xlu2 %5135, %v9490_v9   ;;  %v3233_v34 = vadd.f32 %v3217_v0, %v9451_v29  ;;  %v3234_v35 = vadd.f32 %v3218_v30, %v9454_v10  ;;  %v3241_v23 = vadd.f32 %v3225_v27, %v9457_v37  ;;  %v3242_v47 = vadd.f32 %v3226_v42, %v9460_v13  ;;  %v12183_v25 = vld [vmem:[#allocation89_spill] sm:$0xff] }
 0x601   :  { %v3365_v8 = vpop.permute.xlu2 %3364  ;;  %v9603_v62 = vadd.f32 %v12182_v19, %v3289_v52  ;;  %v9606_v59 = vadd.f32 %v12183_v25, %v3290_v56  ;;  %v9654_v19 = vperm.slane %v12189_v1, 2  ;;  %v12190_v25 = vld [vmem:[#allocation83_spill] sm:$0xff] }
 0x602   :  { %v9609_v29 = vmul.f32 %v3365_v8, %v12176_v21  ;;  %v9612_v10 = vmul.f32 %v3365_v8, %v12177_v57  ;;  %v9615_v37 = vmul.f32 %v3365_v8, %v12178_v46  ;;  %v9618_v13 = vmul.f32 %v3365_v8, %v12179_v58 }
 0x603   :  { %v3285_v45 = vadd.f32 %v9504_v17, %v3233_v34  ;;  %v3286_v36 = vadd.f32 %v9507_v32, %v3234_v35  ;;  %v3293_v6 = vadd.f32 %v9510_v31, %v3241_v23  ;;  %v3294_v52 = vadd.f32 %v9513_v63, %v3242_v47 }
 0x605   :  { %v3257_v56 = vpop.permute.xlu1 %3256 }
 0x606   :  { %3672 = vperm.xlu1 %5132, %v9186_v20   ;;  %v3267_v14 = vmul.f32 %v3257_v56, %v12158_v43  ;;  %v3268_v0 = vmul.f32 %v3257_v56, %v12159_v18  ;;  %v3275_v30 = vmul.f32 %v3257_v56, %v12160_v60  ;;  %v3276_v27 = vmul.f32 %v3257_v56, %v12161_v39  ;;  %v12184_v43 = vld [vmem:[#allocation69_spill] sm:$0xff]  ;;  %v12185_v18 = vld [vmem:[#allocation62_spill] sm:$0xff] }
 0x607   :  { %v12186_v39 = vld [vmem:[#allocation77_spill] sm:$0xff] }
 0x608   :  { %3724 = vperm.xlu2 %5135, %v9186_v20   ;;  %v3283_v17 = vadd.f32 %v3267_v14, %v3231_v11  ;;  %v3284_v42 = vadd.f32 %v3268_v0, %v3232_v55  ;;  %v3291_v32 = vadd.f32 %v3275_v30, %v3239_v51  ;;  %v3292_v34 = vadd.f32 %v3276_v27, %v3240_v48  ;;  %v12187_v55 = vld [vmem:[#allocation146_spill] sm:$0xff]  ;;  %v12191_v56 = vld [vmem:[#allocation85_spill] sm:$0xff] }
 0x609   :  { %v9660_v14 = vperm.slane %v12191_v56, 2  ;;  %v12192_v0 = vld [vmem:[#allocation138_spill] sm:$0xff] }
 0x60a   :  { %v3409_v31 = vpop.permute.xlu2 %3408  ;;  %v3335_v63 = vadd.f32 %v9542_v22, %v3283_v17  ;;  %v3336_v35 = vadd.f32 %v9545_v33, %v3284_v42  ;;  %v3343_v23 = vadd.f32 %v9548_v28, %v3291_v32  ;;  %v3344_v47 = vadd.f32 %v9551_v53, %v3292_v34 }
 0x60b   :  { %v9635_v8 = vmul.f32 %v3409_v31, %v12184_v43  ;;  %v9638_v60 = vmul.f32 %v3409_v31, %v12185_v18  ;;  %v9641_v11 = vmul.f32 %v3409_v31, %v12186_v39  ;;  %v9644_v51 = vmul.f32 %v3409_v31, %v12187_v55  ;;  %v12193_v31 = vld [vmem:[#allocation60_spill] sm:$0xff]  ;;  %v12195_v39 = vld [vmem:[#allocation150_spill] sm:$0xff] }
 0x60c   :  { %v12188_v22 = vmov 24   ;;  %v9663_v30 = vperm.slane %v12192_v0, 2  ;;  %v9676_v18 = vadd.f32 %v12195_v39, %v3343_v23  ;;  %v12196_v43 = vld [vmem:[#allocation134_spill] sm:$0xff] }
 0x60d   :  { %v3301_v33 = vpop.permute.xlu1 %3300  ;;  %v9679_v9 = vadd.f32 %v12196_v43, %v3344_v47 }
 0x60e   :  { %5136 = vset.pattern.permute.xlu1 %v5271_v49  ;;  %v3315_v28 = vmul.f32 %v3301_v33, %v12170_v44  ;;  %v3316_v53 = vmul.f32 %v3301_v33, %v12171_v50  ;;  %v3323_v48 = vmul.f32 %v3301_v33, %v12172_v38  ;;  %v3324_v4 = vmul.f32 %v3301_v33, %v12173_v40 }
 0x60f   :  { %3720 = vperm.xlu1 %5136, %v12174_v16   ;;  %v9657_v49 = vperm.slane %v12190_v25, 2  ;;  %v9670_v33 = vadd.f32 %v12193_v31, %v3335_v63 }
 0x610   :  { %5138 = vset.pattern.permute.xlu2 %v12188_v22  ;;  %v3331_v27 = vadd.f32 %v3315_v28, %v9530_v24  ;;  %v3332_v17 = vadd.f32 %v3316_v53, %v9533_v15  ;;  %v3339_v42 = vadd.f32 %v3323_v48, %v9536_v54  ;;  %v3340_v32 = vadd.f32 %v3324_v4, %v9539_v7 }
 0x611   :  { %3772 = vperm.xlu2 %5138, %v12174_v16   ;;  %v12194_v16 = vld [vmem:[#allocation73_spill] sm:$0xff] }
 0x612   :  { %v9673_v55 = vadd.f32 %v12194_v16, %v3336_v35  ;;  %v9695_v16 = vadd.f32 %v9570_v26, %v3331_v27  ;;  %v9698_v63 = vadd.f32 %v9573_v3, %v3332_v17  ;;  %v9701_v35 = vadd.f32 %v9576_v2, %v3339_v42 }
 0x613   :  { %v3457_v34 = vpop.permute.xlu2 %3456  ;;  %v9704_v23 = vadd.f32 %v9579_v12, %v3340_v32 }
 0x614   :  { %v9682_v24 = vmul.f32 %v3457_v34, %v9654_v19  ;;  %v9685_v15 = vmul.f32 %v3457_v34, %v9657_v49  ;;  %v9688_v54 = vmul.f32 %v3457_v34, %v9660_v14  ;;  %v9691_v7 = vmul.f32 %v3457_v34, %v9663_v30 }
 0x615   :  { %v3313_v47 = vpop.permute.xlu1 %3312 }
 0x616   :  { %v3321_v43 = vmul.f32 %v3313_v47, %v12170_v44  ;;  %v3322_v39 = vmul.f32 %v3313_v47, %v12171_v50  ;;  %v3329_v28 = vmul.f32 %v3313_v47, %v12172_v38  ;;  %v3330_v26 = vmul.f32 %v3313_v47, %v12173_v40 }
 0x617   :  { %3728 = vperm.xlu1 %5136, %v9398_v5  }
 0x618   :  { %v3337_v53 = vadd.f32 %v3321_v43, %v3285_v45  ;;  %v3338_v3 = vadd.f32 %v3322_v39, %v3286_v36  ;;  %v3345_v48 = vadd.f32 %v3329_v28, %v3293_v6  ;;  %v3346_v4 = vadd.f32 %v3330_v26, %v3294_v52  ;;  %v12203_v39 = vld [vmem:[#allocation151_spill] sm:$0xff]  ;;  %v12205_v26 = vld [vmem:[#allocation98_spill] sm:$0xff] }
 0x619   :  { %3780 = vperm.xlu2 %5138, %v9398_v5   ;;  %v9735_v36 = vperm.slane %v12189_v1, 3  ;;  %v9738_v6 = vperm.slane %v12190_v25, 3  ;;  %v9741_v52 = vperm.slane %v12191_v56, 3  ;;  %v9749_v43 = vperm.slane %v12192_v0, 3 }
 0x61a   :  { %v3389_v27 = vadd.f32 %v9609_v29, %v3337_v53  ;;  %v3390_v12 = vadd.f32 %v9612_v10, %v3338_v3  ;;  %v3397_v17 = vadd.f32 %v9615_v37, %v3345_v48  ;;  %v3398_v42 = vadd.f32 %v9618_v13, %v3346_v4  ;;  %v12198_v10 = vld [vmem:[#allocation48_spill] sm:$0xff]  ;;  %v12199_v37 = vld [vmem:[#allocation50_spill] sm:$0xff]  ;;  %v12209_v48 = vld [vmem:[#allocation43_spill] sm:$0xff] }
 0x61b   :  { %v3465_v2 = vpop.permute.xlu2 %3464  ;;  %v12197_v29 = vmov 25   ;;  %v1599_v45 = vsel %vm529_vm0, %v12199_v37, %v12198_v10  ;;  %12201 = vst [vmem:[#allocation53_spill] sm:$0xff] %v9738_v6  ;;  %v12207_v3 = vld [vmem:[#allocation106_spill] sm:$0xff]  ;;  %v10126_v13 = vperm.slane %v12192_v0, 7 }
 0x61c   :  { %v9716_v44 = vmul.f32 %v3465_v2, %v9654_v19  ;;  %v9719_v50 = vmul.f32 %v3465_v2, %v9657_v49  ;;  %v9722_v38 = vmul.f32 %v3465_v2, %v9660_v14  ;;  %v9725_v40 = vmul.f32 %v3465_v2, %v9663_v30  ;;  %12202 = vst [vmem:[#allocation76_spill] sm:$0xff] %v9741_v52  ;;  %v12210_v4 = vld [vmem:[#allocation46_spill] sm:$0xff] }
 0x61d   :  { %v9752_v28 = vadd.f32 %v12203_v39, %v3389_v27  ;;  %v9755_v53 = vadd.f32 %v12205_v26, %v3390_v12  ;;  %v1514_v2 = vmul.f32 %v12210_v4, %v12209_v48  ;;  %v1591_v27 = vsel %vm529_vm0, %v12198_v10, %v12199_v37  ;;  %v12211_v12 = vld [vmem:[#allocation29_spill] sm:$0xff]  ;;  %v12219_v26 = vld [vmem:[#allocation55_spill] sm:$0xff] }
 0x61f   :  { %5139 = vset.pattern.permute.xlu1 %v12188_v22  ;;  %v3357_v22 = vpop.permute.xlu1 %3356  ;;  %12204 = vst [vmem:[#allocation51_spill] sm:$0xff] %v9752_v28  ;;  %v12229_v28 = vld [vmem:[#allocation30_spill] sm:$0xff] }
 0x620   :  { %3776 = vperm.xlu1 %5139, %v9186_v20   ;;  %v3369_v32 = vmul.f32 %v3357_v22, %v12176_v21  ;;  %v3370_v34 = vmul.f32 %v3357_v22, %v12177_v57  ;;  %v3377_v31 = vmul.f32 %v3357_v22, %v12178_v46  ;;  %v3378_v47 = vmul.f32 %v3357_v22, %v12179_v58 }
 0x621   :  { %5142 = vset.pattern.permute.xlu2 %v12197_v29  ;;  %12206 = vst [vmem:[#allocation115_spill] sm:$0xff] %v9755_v53  ;;  %v1614_v22 = vmul.f32 %v1599_v45, %v12211_v12  ;;  %v12225_v12 = vld [vmem:[#allocation69_spill] sm:$0xff] }
 0x622   :  { %3828 = vperm.xlu2 %5142, %v9186_v20   ;;  %v9758_v20 = vadd.f32 %v12207_v3, %v3397_v17  ;;  %v3385_v21 = vadd.f32 %v3369_v32, %v9597_v61  ;;  %v3386_v57 = vadd.f32 %v3370_v34, %v9600_v41  ;;  %v3393_v46 = vadd.f32 %v3377_v31, %v9603_v62  ;;  %v12215_v32 = vld [vmem:[#allocation63_spill] sm:$0xff]  ;;  %v12216_v34 = vld [vmem:[#allocation101_spill] sm:$0xff] }
 0x623   :  { %v3394_v58 = vadd.f32 %v3378_v47, %v9606_v59  ;;  %v9798_v31 = vadd.f32 %v12216_v34, %v3398_v42  ;;  %v12218_v47 = vld [vmem:[#allocation52_spill] sm:$0xff]  ;;  %v12222_v3 = vld [vmem:[#allocation45_spill] sm:$0xff]  ;;  %v12226_v34 = vld [vmem:[#allocation62_spill] sm:$0xff] }
 0x624   :  { %12208 = vst [vmem:[#allocation102_spill] sm:$0xff] %v9758_v20  ;;  %v9785_v59 = vadd.f32 %v9635_v8, %v3385_v21  ;;  %v9788_v10 = vadd.f32 %v9638_v60, %v3386_v57  ;;  %v9791_v37 = vadd.f32 %v9641_v11, %v3393_v46  ;;  %v1711_v8 = vsel %vm586_vm2, %v12219_v26, %v12218_v47  ;;  %v12223_v57 = vld [vmem:[#allocation27_spill] sm:$0xff]  ;;  %v12227_v20 = vld [vmem:[#allocation77_spill] sm:$0xff] }
 0x625   :  { %v3513_v17 = vpop.permute.xlu2 %3512  ;;  %v9794_v45 = vadd.f32 %v9644_v51, %v3394_v58  ;;  %12217 = vst [vmem:[#allocation132_spill] sm:$0xff] %v9798_v31  ;;  %v1719_v60 = vsel %vm586_vm2, %v12218_v47, %v12219_v26  ;;  %v12220_v11 = vmov 26   ;;  %v1550_v21 = vadd.f32 %v12222_v3, %v1514_v2  ;;  %v12224_v46 = vld [vmem:[#allocation47_spill] sm:$0xff]  ;;  %v12228_v26 = vld [vmem:[#allocation146_spill] sm:$0xff] }
 0x626   :  { %v9772_v39 = vmul.f32 %v3513_v17, %v9735_v36  ;;  %v9775_v61 = vmul.f32 %v3513_v17, %v9738_v6  ;;  %v9778_v41 = vmul.f32 %v3513_v17, %v9741_v52  ;;  %v9781_v62 = vmul.f32 %v3513_v17, %v9749_v43  ;;  %v12231_v2 = vld [vmem:[#allocation75_spill] sm:$0xff] }
 0x627   :  { %v1615_v42 = vmul.f32 %v1591_v27, %v12223_v57  ;;  %v1654_v58 = vmul.f32 %v12224_v46, %v1614_v22 }
 0x628   :  { %12212 = vst [vmem:[#allocation118_spill] sm:$0xff] %v9775_v61  ;;  %5140 = vset.pattern.permute.xlu1 %v12197_v29  ;;  %v12221_v29 = vld [vmem:[#allocation44_spill] sm:$0xff]  ;;  %v3405_v48 = vpop.permute.xlu1 %3404 }
 0x629   :  { %12213 = vst [vmem:[#allocation105_spill] sm:$0xff] %v9778_v41  ;;  %3820 = vperm.xlu1 %5140, %v12215_v32   ;;  %v1515_v51 = vmul.f32 %v12210_v4, %v12221_v29  ;;  %v3419_v17 = vmul.f32 %v3405_v48, %v12225_v12  ;;  %v3420_v31 = vmul.f32 %v3405_v48, %v12226_v34  ;;  %v12230_v4 = vld [vmem:[#allocation31_spill] sm:$0xff] }
 0x62a   :  { %12214 = vst [vmem:[#allocation57_spill] sm:$0xff] %v9781_v62  ;;  %5143 = vset.pattern.permute.xlu2 %v12220_v11  ;;  %v3427_v47 = vmul.f32 %v3405_v48, %v12227_v20  ;;  %v3428_v53 = vmul.f32 %v3405_v48, %v12228_v26  ;;  %v1734_v62 = vmul.f32 %v1719_v60, %v12229_v28  ;;  %v12232_v41 = vld [vmem:[#allocation59_spill] sm:$0xff] }
 0x62b   :  { %3872 = vperm.xlu2 %5143, %v12215_v32   ;;  %v1735_v29 = vmul.f32 %v1711_v8, %v12230_v4  ;;  %v1832_v27 = vsel %vm644_vm1, %v12232_v41, %v12231_v2  ;;  %v1840_v22 = vsel %vm644_vm1, %v12231_v2, %v12232_v41  ;;  %v3435_v57 = vadd.f32 %v3419_v17, %v9695_v16 }
 0x62c   :  { %v3436_v32 = vadd.f32 %v3420_v31, %v9698_v63  ;;  %v3443_v48 = vadd.f32 %v3427_v47, %v9701_v35  ;;  %v3444_v28 = vadd.f32 %v3428_v53, %v9704_v23  ;;  %v1551_v53 = vadd.f32 %v12222_v3, %v1515_v51  ;;  %v12235_v47 = vld [vmem:[#allocation64_spill] sm:$0xff] }
 0x62d   :  { %v3521_v60 = vpop.permute.xlu2 %3520  ;;  %v3487_v16 = vadd.f32 %v9682_v24, %v3435_v57  ;;  %v1655_v31 = vmul.f32 %v12224_v46, %v1615_v42  ;;  %v1670_v17 = vadd.f32 %v1654_v58, %v1550_v21  ;;  %v1775_v2 = vmul.f32 %v12235_v47, %v1734_v62  ;;  %v12237_v24 = vld [vmem:[#allocation28_spill] sm:$0xff] }
 0x62e   :  { %v9834_v8 = vmul.f32 %v3521_v60, %v9735_v36  ;;  %v9837_v4 = vmul.f32 %v3521_v60, %v9738_v6  ;;  %v9840_v61 = vmul.f32 %v3521_v60, %v9741_v52  ;;  %v9843_v41 = vmul.f32 %v3521_v60, %v9749_v43 }
 0x62f   :  { %v3488_v63 = vadd.f32 %v9685_v15, %v3436_v32  ;;  %v3495_v35 = vadd.f32 %v9688_v54, %v3443_v48  ;;  %v3496_v23 = vadd.f32 %v9691_v7, %v3444_v28  ;;  %v1776_v60 = vmul.f32 %v12235_v47, %v1735_v29  ;;  %v12238_v15 = vld [vmem:[#allocation87_spill] sm:$0xff]  ;;  %v12239_v32 = vld [vmem:[#allocation100_spill] sm:$0xff]  ;;  %v3509_v7 = vpop.permute.xlu0 %3508 }
 0x630   :  { %12233 = vst [vmem:[#allocation116_spill] sm:$0xff] %v9840_v61  ;;  %v1856_v57 = vmul.f32 %v1832_v27, %v12237_v24  ;;  %v1961_v54 = vsel %vm702_vm4, %v12239_v32, %v12238_v15  ;;  %v9861_v51 = vperm.slane %v12189_v1, 4  ;;  %v9864_v3 = vperm.slane %v12190_v25, 4 }
 0x631   :  { %12234 = vst [vmem:[#allocation144_spill] sm:$0xff] %v9843_v41  ;;  %3832 = vperm.xlu1 %5140, %v9398_v5   ;;  %v12236_v41 = vld [vmem:[#allocation32_spill] sm:$0xff]  ;;  %v9867_v62 = vperm.slane %v12191_v56, 4  ;;  %v9870_v21 = vperm.slane %v12192_v0, 4  ;;  %v3413_v42 = vpop.permute.xlu1 %3412  ;;  %v3524_v48 = vmul.f32 %v3509_v7, %v9738_v6  ;;  %v3531_v28 = vmul.f32 %v3509_v7, %v9741_v52 }
 0x632   :  { %v1855_v61 = vmul.f32 %v1840_v22, %v12236_v41  ;;  %v3423_v46 = vmul.f32 %v3413_v42, %v12225_v12  ;;  %v3424_v58 = vmul.f32 %v3413_v42, %v12226_v34  ;;  %v3431_v29 = vmul.f32 %v3413_v42, %v12227_v20 }
 0x633   :  { %3884 = vperm.xlu2 %5143, %v9398_v5   ;;  %v3432_v27 = vmul.f32 %v3413_v42, %v12228_v26  ;;  %v3523_v22 = vmul.f32 %v3509_v7, %v9735_v36  ;;  %v3532_v41 = vmul.f32 %v3509_v7, %v9749_v43  ;;  %v9887_v26 = vadd.f32 %v3524_v48, %v3488_v63  ;;  %v12240_v7 = vld [vmem:[#allocation96_spill] sm:$0xff] }
 0x634   :  { %v3439_v47 = vadd.f32 %v3423_v46, %v9670_v33  ;;  %v3440_v24 = vadd.f32 %v3424_v58, %v9673_v55  ;;  %v3447_v12 = vadd.f32 %v3431_v29, %v9676_v18  ;;  %v9889_v42 = vadd.f32 %v3531_v28, %v3495_v35  ;;  %v12245_v58 = vld [vmem:[#allocation33_spill] sm:$0xff]  ;;  %v12246_v28 = vld [vmem:[#allocation34_spill] sm:$0xff] }
 0x635   :  { %v3448_v34 = vadd.f32 %v3432_v27, %v9679_v9  ;;  %v9885_v20 = vadd.f32 %v3523_v22, %v3487_v16  ;;  %v9891_v6 = vadd.f32 %v3532_v41, %v3496_v23  ;;  %v1671_v23 = vadd.f32 %v1655_v31, %v1551_v53  ;;  %v12244_v31 = vld [vmem:[#allocation71_spill] sm:$0xff] }
 0x636   :  { %v9907_v18 = vadd.f32 %v9716_v44, %v3439_v47  ;;  %v9910_v16 = vadd.f32 %v9719_v50, %v3440_v24  ;;  %v9913_v63 = vadd.f32 %v9722_v38, %v3447_v12  ;;  %v1791_v46 = vadd.f32 %v1775_v2, %v1670_v17  ;;  %v12241_v44 = vld [vmem:[#allocation107_spill] sm:$0xff] }
 0x637   :  { %v3569_v5 = vpop.permute.xlu2 %3568  ;;  %v9916_v35 = vadd.f32 %v9725_v40, %v3448_v34  ;;  %v12243_v40 = vmov 27   ;;  %v1792_v53 = vadd.f32 %v1776_v60, %v1671_v23  ;;  %v1896_v17 = vmul.f32 %v12244_v31, %v1855_v61  ;;  %v12247_v60 = vld [vmem:[#allocation35_spill] sm:$0xff]  ;;  %v12248_v61 = vld [vmem:[#allocation36_spill] sm:$0xff] }
 0x638   :  { %v9894_v52 = vmul.f32 %v3569_v5, %v9861_v51  ;;  %v9897_v33 = vmul.f32 %v3569_v5, %v9864_v3  ;;  %v9900_v55 = vmul.f32 %v3569_v5, %v9867_v62  ;;  %v9903_v9 = vmul.f32 %v3569_v5, %v9870_v21 }
 0x639   :  { %5144 = vset.pattern.permute.xlu1 %v12220_v11  ;;  %v1953_v5 = vsel %vm702_vm4, %v12238_v15, %v12239_v32  ;;  %v12242_v11 = vld [vmem:[#allocation112_spill] sm:$0xff]  ;;  %v1897_v2 = vmul.f32 %v12244_v31, %v1856_v57  ;;  %v1976_v29 = vmul.f32 %v1961_v54, %v12245_v58  ;;  %v9944_v57 = vperm.slane %v12189_v1, 5  ;;  %v12250_v31 = vld [vmem:[#allocation105_spill] sm:$0xff] }
 0x63a   :  { %3876 = vperm.xlu1 %5144, %v12240_v7   ;;  %v2074_v50 = vsel %vm760_vm5, %v12242_v11, %v12241_v44  ;;  %v2082_v38 = vsel %vm760_vm5, %v12241_v44, %v12242_v11  ;;  %v3461_v15 = vpop.permute.xlu1 %3460  ;;  %v1977_v41 = vmul.f32 %v1953_v5, %v12246_v28  ;;  %v9954_v5 = vperm.slane %v12191_v56, 5  ;;  %v12251_v58 = vld [vmem:[#allocation57_spill] sm:$0xff] }
 0x63b   :  { %5147 = vset.pattern.permute.xlu2 %v12243_v40  ;;  %v3473_v32 = vmul.f32 %v3461_v15, %v9654_v19  ;;  %v3474_v27 = vmul.f32 %v3461_v15, %v9657_v49  ;;  %v3481_v22 = vmul.f32 %v3461_v15, %v9660_v14  ;;  %v3482_v48 = vmul.f32 %v3461_v15, %v9663_v30 }
 0x63c   :  { %3928 = vperm.xlu2 %5147, %v12240_v7   ;;  %v2097_v47 = vmul.f32 %v2074_v50, %v12247_v60  ;;  %v2098_v24 = vmul.f32 %v2082_v38, %v12248_v61  ;;  %v9951_v7 = vperm.slane %v12190_v25, 5  ;;  %v9957_v44 = vperm.slane %v12192_v0, 5  ;;  %v12249_v38 = vld [vmem:[#allocation118_spill] sm:$0xff]  ;;  %v3565_v61 = vpop.permute.xlu0 %3564 }
 0x63d   :  { %v3489_v54 = vadd.f32 %v3473_v32, %v9785_v59  ;;  %v3490_v12 = vadd.f32 %v3474_v27, %v9788_v10  ;;  %v3497_v34 = vadd.f32 %v3481_v22, %v9791_v37  ;;  %v3498_v23 = vadd.f32 %v3482_v48, %v9794_v45  ;;  %v12256_v48 = vld [vmem:[#allocation99_spill] sm:$0xff] }
 0x63e   :  { %v1913_v22 = vadd.f32 %v1897_v2, %v1792_v53  ;;  %v2017_v28 = vmul.f32 %v12256_v48, %v1976_v29  ;;  %v2018_v60 = vmul.f32 %v12256_v48, %v1977_v41  ;;  %v3586_v48 = vmul.f32 %v3565_v61, %v9870_v21 }
 0x63f   :  { %v3541_v50 = vadd.f32 %v9772_v39, %v3489_v54  ;;  %v3542_v59 = vadd.f32 %v12249_v38, %v3490_v12  ;;  %v3549_v10 = vadd.f32 %v12250_v31, %v3497_v34  ;;  %v3550_v37 = vadd.f32 %v12251_v58, %v3498_v23  ;;  %v12257_v54 = vld [vmem:[#allocation63_spill] sm:$0xff]  ;;  %v12258_v12 = vld [vmem:[#allocation124_spill] sm:$0xff] }
 0x640   :  { %v3613_v11 = vpop.permute.xlu2 %3612  ;;  %v1912_v39 = vadd.f32 %v1896_v17, %v1791_v46  ;;  %v2138_v34 = vmul.f32 %v12258_v12, %v2097_v47  ;;  %v2139_v23 = vmul.f32 %v12258_v12, %v2098_v24  ;;  %v12259_v38 = vld [vmem:[#allocation135_spill] sm:$0xff]  ;;  %v3577_v47 = vmul.f32 %v3565_v61, %v9861_v51 }
 0x641   :  { %v9964_v45 = vmul.f32 %v3613_v11, %v9944_v57  ;;  %v9967_v15 = vmul.f32 %v3613_v11, %v9951_v7  ;;  %v9970_v32 = vmul.f32 %v3613_v11, %v9954_v5  ;;  %v9973_v27 = vmul.f32 %v3613_v11, %v9957_v44  ;;  %v12260_v31 = vld [vmem:[#allocation119_spill] sm:$0xff] }
 0x642   :  { %5146 = vset.pattern.permute.xlu1 %v12243_v40  ;;  %v2195_v11 = vsel %vm818_vm6, %v12260_v31, %v12259_v38  ;;  %v2203_v46 = vsel %vm818_vm6, %v12259_v38, %v12260_v31  ;;  %v11644_v40 = vmov 28   ;;  %v3469_v53 = vpop.permute.xlu1 %3468  ;;  %v3578_v24 = vmul.f32 %v3565_v61, %v9864_v3  ;;  %v12261_v12 = vld [vmem:[#allocation51_spill] sm:$0xff] }
 0x643   :  { %12252 = vst [vmem:[#allocation140_spill] sm:$0xff] %v9964_v45  ;;  %3924 = vperm.xlu1 %5146, %v12257_v54   ;;  %v3477_v17 = vmul.f32 %v3469_v53, %v9654_v19  ;;  %v3478_v2 = vmul.f32 %v3469_v53, %v9657_v49  ;;  %v3485_v29 = vmul.f32 %v3469_v53, %v9660_v14  ;;  %v12262_v31 = vld [vmem:[#allocation115_spill] sm:$0xff] }
 0x644   :  { %12253 = vst [vmem:[#allocation110_spill] sm:$0xff] %v9967_v15  ;;  %5149 = vset.pattern.permute.xlu2 %v11644_v40  ;;  %v3486_v41 = vmul.f32 %v3469_v53, %v9663_v30  ;;  %v3585_v58 = vmul.f32 %v3565_v61, %v9867_v62  ;;  %v12263_v40 = vld [vmem:[#allocation102_spill] sm:$0xff]  ;;  %v10003_v30 = vadd.f32 %v3577_v47, %v3541_v50  ;;  %v12268_v47 = vld [vmem:[#allocation37_spill] sm:$0xff] }
 0x645   :  { %12254 = vst [vmem:[#allocation111_spill] sm:$0xff] %v9970_v32  ;;  %3976 = vperm.xlu2 %5149, %v12257_v54   ;;  %v3493_v38 = vadd.f32 %v3477_v17, %v12261_v12  ;;  %v3494_v19 = vadd.f32 %v3478_v2, %v12262_v31  ;;  %v3501_v49 = vadd.f32 %v3485_v29, %v12263_v40  ;;  %v12267_v40 = vld [vmem:[#allocation144_spill] sm:$0xff] }
 0x646   :  { %12255 = vst [vmem:[#allocation95_spill] sm:$0xff] %v9973_v27  ;;  %v12264_v27 = vld [vmem:[#allocation132_spill] sm:$0xff]  ;;  %v10005_v53 = vadd.f32 %v3578_v24, %v3542_v59  ;;  %v10007_v54 = vadd.f32 %v3585_v58, %v3549_v10  ;;  %v10009_v15 = vadd.f32 %v3586_v48, %v3550_v37  ;;  %v2033_v29 = vadd.f32 %v2017_v28, %v1912_v39  ;;  %v12269_v58 = vld [vmem:[#allocation38_spill] sm:$0xff] }
 0x647   :  { %v3502_v14 = vadd.f32 %v3486_v41, %v12264_v27  ;;  %v10024_v50 = vadd.f32 %v9834_v8, %v3493_v38  ;;  %v10027_v59 = vadd.f32 %v9837_v4, %v3494_v19  ;;  %v12266_v10 = vld [vmem:[#allocation116_spill] sm:$0xff]  ;;  %v2034_v41 = vadd.f32 %v2018_v60, %v1913_v22  ;;  %v10040_v8 = vld [vmem:[%s11263_s10 + $0x10] sm:$0xff]  ;;  %v12270_v22 = vld [vmem:[#allocation53_spill] sm:$0xff] }
 0x648   :  { %v3625_v32 = vpop.permute.xlu2 %3624  ;;  %12265 = vst [vmem:[#allocation117_spill] sm:$0xff] %v10009_v15  ;;  %v10030_v37 = vadd.f32 %v12266_v10, %v3501_v49  ;;  %v2218_v24 = vmul.f32 %v2195_v11, %v12268_v47  ;;  %v2219_v48 = vmul.f32 %v2203_v46, %v12269_v58  ;;  %v10043_v4 = vadd.f32 %v2138_v34, %v2033_v29  ;;  %v12271_v60 = vld [vmem:[#allocation76_spill] sm:$0xff]  ;;  %v12272_v38 = vld [vmem:[#allocation131_spill] sm:$0xff]  ;;  %v12273_v34 = vld [vmem:[#allocation54_spill] sm:$0xff] }
 0x649   :  { %v10012_v45 = vmul.f32 %v3625_v32, %v9944_v57  ;;  %v10015_v61 = vmul.f32 %v3625_v32, %v9951_v7  ;;  %v10018_v17 = vmul.f32 %v3625_v32, %v9954_v5  ;;  %v10021_v27 = vmul.f32 %v3625_v32, %v9957_v44 }
 0x64a   :  { %v10033_v2 = vadd.f32 %v12267_v40, %v3502_v14  ;;  %v10045_v32 = vadd.f32 %v2139_v23, %v2034_v41  ;;  %v10053_v31 = vmul.f32 %v12272_v38, %v2218_v24  ;;  %v10056_v19 = vmul.f32 %v12272_v38, %v2219_v48  ;;  %v12274_v23 = vld [vmem:[#allocation147_spill] sm:$0xff]  ;;  %v3621_v48 = vpop.permute.xlu0 %3620 }
 0x64b   :  { %3932 = vperm.xlu1 %5146, %v10040_v8   ;;  %v3517_v12 = vpop.permute.xlu1 %3516  ;;  %v2316_v49 = vsel %vm876_vm7, %v12274_v23, %v12273_v34  ;;  %v10071_v29 = vperm.slane %v12189_v1, 6  ;;  %v10074_v41 = vperm.slane %v12190_v25, 6  ;;  %v10077_v47 = vperm.slane %v12191_v56, 6 }
 0x64c   :  { %v3527_v39 = vmul.f32 %v3517_v12, %v9735_v36  ;;  %v3528_v28 = vmul.f32 %v3517_v12, %v12270_v22  ;;  %v3535_v11 = vmul.f32 %v3517_v12, %v12271_v60  ;;  %v3536_v46 = vmul.f32 %v3517_v12, %v9749_v43 }
 0x64d   :  { %3984 = vperm.xlu2 %5149, %v10040_v8   ;;  %v2324_v36 = vsel %vm876_vm7, %v12273_v34, %v12274_v23  ;;  %v10080_v24 = vperm.slane %v12192_v0, 6  ;;  %v10112_v23 = vld [vmem:[%s11263_s10 + $0x8] sm:$0xff] }
 0x64e   :  { %v3543_v14 = vadd.f32 %v3527_v39, %v9907_v18  ;;  %v3544_v43 = vadd.f32 %v3528_v28, %v9910_v16  ;;  %v3551_v10 = vadd.f32 %v3535_v11, %v9913_v63  ;;  %v3552_v40 = vadd.f32 %v3536_v46, %v9916_v35  ;;  %v12283_v46 = vld [vmem:[#allocation72_spill] sm:$0xff]  ;;  %12284 = vst [vmem:[#allocation145_spill] sm:$0xff] %v10112_v23 }
 0x650   :  { %v3595_v18 = vadd.f32 %v9894_v52, %v3543_v14  ;;  %v3596_v16 = vadd.f32 %v9897_v33, %v3544_v43  ;;  %v3603_v63 = vadd.f32 %v9900_v55, %v3551_v10  ;;  %v3604_v35 = vadd.f32 %v9903_v9, %v3552_v40  ;;  %v12280_v33 = vld [vmem:[#allocation39_spill] sm:$0xff]  ;;  %v12281_v55 = vld [vmem:[#allocation40_spill] sm:$0xff]  ;;  %v12282_v9 = vld [vmem:[#allocation61_spill] sm:$0xff] }
 0x651   :  { %v3669_v58 = vpop.permute.xlu2 %3668  ;;  %v12279_v52 = vmov 28   ;;  %v2339_v60 = vmul.f32 %v2316_v49, %v12280_v33  ;;  %v2340_v11 = vmul.f32 %v2324_v36, %v12281_v55  ;;  %v2437_v38 = vsel %vm934_vm8, %v12283_v46, %v12282_v9 }
 0x652   :  { %v10087_v12 = vmul.f32 %v3669_v58, %v10071_v29  ;;  %v10090_v39 = vmul.f32 %v3669_v58, %v10074_v41  ;;  %v10093_v22 = vmul.f32 %v3669_v58, %v10077_v47  ;;  %v10096_v28 = vmul.f32 %v3669_v58, %v10080_v24 }
 0x653   :  { %5150 = vset.pattern.permute.xlu1 %v12279_v52  ;;  %v2445_v34 = vsel %vm934_vm8, %v12282_v9, %v12283_v46  ;;  %v12285_v49 = vmov 29   ;;  %v10117_v36 = vperm.slane %v12189_v1, 7  ;;  %v10120_v14 = vperm.slane %v12190_v25, 7 }
 0x654   :  { %12275 = vst [vmem:[#allocation108_spill] sm:$0xff] %v10087_v12  ;;  %3980 = vperm.xlu1 %5150, %v10112_v23   ;;  %v10123_v43 = vperm.slane %v12191_v56, 7  ;;  %v3631_v10 = vmul.f32 %v3621_v48, %v9944_v57  ;;  %v3632_v40 = vmul.f32 %v3621_v48, %v9951_v7  ;;  %v3639_v58 = vmul.f32 %v3621_v48, %v9954_v5  ;;  %v12286_v12 = vld [vmem:[#allocation49_spill] sm:$0xff] }
 0x655   :  { %12276 = vst [vmem:[#allocation92_spill] sm:$0xff] %v10090_v39  ;;  %5152 = vset.pattern.permute.xlu2 %v12285_v49  ;;  %v3640_v52 = vmul.f32 %v3621_v48, %v9957_v44  ;;  %v2380_v15 = vmul.f32 %v12286_v12, %v2339_v60 }
 0x656   :  { %12277 = vst [vmem:[#allocation104_spill] sm:$0xff] %v10093_v22  ;;  %4032 = vperm.xlu2 %5152, %v10112_v23   ;;  %v3561_v1 = vpop.permute.xlu1 %3560  ;;  %v10137_v55 = vadd.f32 %v3631_v10, %v3595_v18  ;;  %v10139_v9 = vadd.f32 %v3632_v40, %v3596_v16  ;;  %v10141_v46 = vadd.f32 %v3639_v58, %v3603_v63  ;;  %v12287_v18 = vld [vmem:[#allocation41_spill] sm:$0xff]  ;;  %v12288_v16 = vld [vmem:[#allocation42_spill] sm:$0xff] }
 0x657   :  { %12278 = vst [vmem:[#allocation109_spill] sm:$0xff] %v10096_v28  ;;  %v3575_v25 = vmul.f32 %v3561_v1, %v9861_v51  ;;  %v3576_v33 = vmul.f32 %v3561_v1, %v9864_v3  ;;  %v3583_v56 = vmul.f32 %v3561_v1, %v9867_v62  ;;  %v3584_v0 = vmul.f32 %v3561_v1, %v9870_v21 }
 0x658   :  { %v10143_v28 = vadd.f32 %v3640_v52, %v3604_v35  ;;  %v2381_v1 = vmul.f32 %v12286_v12, %v2340_v11  ;;  %v2460_v10 = vmul.f32 %v2437_v38, %v12287_v18  ;;  %v2461_v40 = vmul.f32 %v2445_v34, %v12288_v16  ;;  %v12290_v12 = vld [vmem:[#allocation140_spill] sm:$0xff]  ;;  %v12291_v11 = vld [vmem:[#allocation110_spill] sm:$0xff]  ;;  %v12292_v34 = vld [vmem:[#allocation111_spill] sm:$0xff] }
 0x659   :  { %v3591_v48 = vadd.f32 %v3575_v25, %v9885_v20  ;;  %v3592_v23 = vadd.f32 %v3576_v33, %v9887_v26  ;;  %v3599_v22 = vadd.f32 %v3583_v56, %v9889_v42  ;;  %v3600_v39 = vadd.f32 %v3584_v0, %v9891_v6  ;;  %v12289_v42 = vld [vmem:[#allocation58_spill] sm:$0xff]  ;;  %v12293_v52 = vld [vmem:[#allocation95_spill] sm:$0xff]  ;;  %v2526_v56 = vld [vmem:[%s11264_s11 + $0x18] sm:$0xff] }
 0x65a   :  { %v3717_v63 = vpop.permute.xlu2 %3716  ;;  %v2275_v33 = vadd.f32 %v10053_v31, %v10043_v4  ;;  %v2276_v0 = vadd.f32 %v10056_v19, %v10045_v32  ;;  %4196 = vperm.xlu0 %5162, %v2526_v56  }
 0x65b   :  { %v10154_v35 = vmul.f32 %v3717_v63, %v10117_v36  ;;  %v10157_v20 = vmul.f32 %v3717_v63, %v10120_v14  ;;  %v10160_v26 = vmul.f32 %v3717_v63, %v10123_v43  ;;  %v10163_v6 = vmul.f32 %v3717_v63, %v10126_v13 }
 0x65c   :  { %3988 = vperm.xlu1 %5150, %v12289_v42   ;;  %v10167_v60 = vadd.f32 %v12290_v12, %v3591_v48  ;;  %v10170_v38 = vadd.f32 %v12291_v11, %v3592_v23  ;;  %v10173_v58 = vadd.f32 %v12292_v34, %v3599_v22  ;;  %v10176_v25 = vadd.f32 %v12293_v52, %v3600_v39  ;;  %v12294_v48 = vld [vmem:[#allocation68_spill] sm:$0xff] }
 0x65d   :  { %v2501_v18 = vmul.f32 %v12294_v48, %v2460_v10  ;;  %v2502_v23 = vmul.f32 %v12294_v48, %v2461_v40  ;;  %v2396_v63 = vadd.f32 %v2380_v15, %v2275_v33  ;;  %v2397_v12 = vadd.f32 %v2381_v1, %v2276_v0 }
 0x65e   :  { %4040 = vperm.xlu2 %5152, %v12289_v42   ;;  %v3573_v22 = vpop.permute.xlu1 %3572  ;;  %v12297_v33 = vmov 30  }
 0x65f   :  { %v3581_v39 = vmul.f32 %v3573_v22, %v9861_v51  ;;  %v3582_v16 = vmul.f32 %v3573_v22, %v9864_v3  ;;  %v3589_v4 = vmul.f32 %v3573_v22, %v9867_v62  ;;  %v3590_v31 = vmul.f32 %v3573_v22, %v9870_v21 }
 0x660   :  { %v10196_v42 = vadd.f32 %v2501_v18, %v2396_v63  ;;  %v10198_v11 = vadd.f32 %v2502_v23, %v2397_v12 }
 0x661   :  { %v3597_v32 = vadd.f32 %v3581_v39, %v10024_v50  ;;  %v3598_v19 = vadd.f32 %v3582_v16, %v10027_v59  ;;  %v3605_v10 = vadd.f32 %v3589_v4, %v10030_v37  ;;  %v3606_v40 = vadd.f32 %v3590_v31, %v10033_v2  ;;  %v3677_v50 = vpop.permute.xlu0 %3676 }
 0x662   :  { %v3725_v51 = vpop.permute.xlu2 %3724  ;;  %v10225_v34 = vperm.slane %v10196_v42, 0  ;;  %v10228_v52 = vperm.slane %v10198_v11, 0  ;;  %v3685_v56 = vmul.f32 %v3677_v50, %v10071_v29  ;;  %v3693_v0 = vmul.f32 %v3677_v50, %v10077_v47 }
 0x663   :  { %v3649_v3 = vadd.f32 %v10012_v45, %v3597_v32  ;;  %v3650_v62 = vadd.f32 %v10015_v61, %v3598_v19  ;;  %v3657_v21 = vadd.f32 %v10018_v17, %v3605_v10  ;;  %v3658_v15 = vadd.f32 %v10021_v27, %v3606_v40  ;;  %v12295_v45 = vld [vmem:[#allocation78_spill] sm:$0xff]  ;;  %v12298_v19 = vld [vmem:[#allocation117_spill] sm:$0xff] }
 0x664   :  { %v10205_v59 = vmul.f32 %v3725_v51, %v10117_v36  ;;  %v10208_v37 = vmul.f32 %v3725_v51, %v10120_v14  ;;  %v10211_v2 = vmul.f32 %v3725_v51, %v10123_v43  ;;  %v10214_v1 = vmul.f32 %v3725_v51, %v10126_v13  ;;  %5153 = vset.pattern.permute.xlu1 %v12285_v49  ;;  %v12296_v17 = vld [vmem:[#allocation82_spill] sm:$0xff] }
 0x665   :  { %4036 = vperm.xlu1 %5153, %v10040_v8   ;;  %v10219_v61 = vperm.slane %v12295_v45, 0  ;;  %v10222_v27 = vperm.slane %v12296_v17, 0  ;;  %v3686_v49 = vmul.f32 %v3677_v50, %v10074_v41  ;;  %v3694_v48 = vmul.f32 %v3677_v50, %v10080_v24 }
 0x666   :  { %5156 = vset.pattern.permute.xlu2 %v12297_v33  ;;  %v10240_v4 = vadd.f32 %v3685_v56, %v3649_v3  ;;  %v10244_v63 = vadd.f32 %v3693_v0, %v3657_v21  ;;  %v12303_v56 = vld [vmem:[#allocation63_spill] sm:$0xff] }
 0x667   :  { %4088 = vperm.xlu2 %5156, %v10040_v8   ;;  %v3617_v18 = vpop.permute.xlu1 %3616  ;;  %v10242_v31 = vadd.f32 %v3686_v49, %v3650_v62  ;;  %v10246_v12 = vadd.f32 %v3694_v48, %v3658_v15  ;;  %v12301_v62 = vld [vmem:[#allocation104_spill] sm:$0xff]  ;;  %v12302_v15 = vld [vmem:[#allocation109_spill] sm:$0xff]  ;;  %v12304_v49 = vmov 31  }
 0x668   :  { %v3629_v23 = vmul.f32 %v3617_v18, %v9944_v57  ;;  %v3630_v22 = vmul.f32 %v3617_v18, %v9951_v7  ;;  %v3637_v39 = vmul.f32 %v3617_v18, %v9954_v5  ;;  %v3638_v16 = vmul.f32 %v3617_v18, %v9957_v44 }
 0x66a   :  { %v3645_v32 = vadd.f32 %v3629_v23, %v10003_v30  ;;  %v3646_v8 = vadd.f32 %v3630_v22, %v10005_v53  ;;  %v3653_v57 = vadd.f32 %v3637_v39, %v10007_v54  ;;  %v3654_v7 = vadd.f32 %v3638_v16, %v12298_v19  ;;  %v12299_v30 = vld [vmem:[#allocation108_spill] sm:$0xff] }
 0x66b   :  { %v3773_v10 = vpop.permute.xlu2 %3772  ;;  %v12300_v54 = vld [vmem:[#allocation92_spill] sm:$0xff] }
 0x66c   :  { %v10253_v5 = vmul.f32 %v3773_v10, %v10219_v61  ;;  %v10256_v44 = vmul.f32 %v3773_v10, %v10222_v27  ;;  %v10259_v40 = vmul.f32 %v3773_v10, %v10225_v34  ;;  %v10262_v51 = vmul.f32 %v3773_v10, %v10228_v52 }
 0x66d   :  { %5154 = vset.pattern.permute.xlu1 %v12297_v33  ;;  %v10266_v53 = vadd.f32 %v12299_v30, %v3645_v32  ;;  %v10269_v3 = vadd.f32 %v12300_v54, %v3646_v8  ;;  %v10272_v21 = vadd.f32 %v12301_v62, %v3653_v57  ;;  %v10275_v50 = vadd.f32 %v12302_v15, %v3654_v7  ;;  %v5231_v30 = vld [vmem:[%s11263_s10 + $0x18] sm:$0xff]  ;;  %v3769_v54 = vpop.permute.xlu0 %3768 }
 0x66e   :  { %4080 = vperm.xlu1 %5154, %v12303_v56   ;;  %v10308_v62 = vperm.slane %v12295_v45, 1  ;;  %v10311_v15 = vperm.slane %v12296_v17, 1 }
 0x66f   :  { %5157 = vset.pattern.permute.xlu2 %v12304_v49 }
 0x670   :  { %4132 = vperm.xlu2 %5157, %v12303_v56   ;;  %v3665_v0 = vpop.permute.xlu1 %3664 }
 0x671   :  { %v3679_v33 = vmul.f32 %v3665_v0, %v10071_v29  ;;  %v3680_v48 = vmul.f32 %v3665_v0, %v10074_v41  ;;  %v3687_v18 = vmul.f32 %v3665_v0, %v10077_v47  ;;  %v3688_v23 = vmul.f32 %v3665_v0, %v10080_v24 }
 0x673   :  { %v3695_v22 = vadd.f32 %v3679_v33, %v10167_v60  ;;  %v3696_v39 = vadd.f32 %v3680_v48, %v10170_v38  ;;  %v3703_v16 = vadd.f32 %v3687_v18, %v10173_v58  ;;  %v3704_v32 = vadd.f32 %v3688_v23, %v10176_v25  ;;  %v3781_v8 = vpop.permute.xlu2 %3780 }
 0x674   :  { %v10289_v57 = vmul.f32 %v3781_v8, %v10219_v61  ;;  %v10292_v19 = vmul.f32 %v3781_v8, %v10222_v27  ;;  %v10295_v7 = vmul.f32 %v3781_v8, %v10225_v34  ;;  %v10298_v10 = vmul.f32 %v3781_v8, %v10228_v52 }
 0x675   :  { %v3747_v60 = vadd.f32 %v10154_v35, %v3695_v22  ;;  %v3748_v38 = vadd.f32 %v10157_v20, %v3696_v39  ;;  %v3755_v58 = vadd.f32 %v10160_v26, %v3703_v16  ;;  %v3756_v25 = vadd.f32 %v10163_v6, %v3704_v32 }
 0x676   :  { %4092 = vperm.xlu1 %5154, %v5231_v30   ;;  %v10314_v35 = vperm.slane %v10196_v42, 1  ;;  %v10317_v20 = vperm.slane %v10198_v11, 1  ;;  %v3783_v48 = vmul.f32 %v3769_v54, %v10219_v61  ;;  %v3784_v18 = vmul.f32 %v3769_v54, %v10222_v27 }
 0x677   :  { %v3791_v23 = vmul.f32 %v3769_v54, %v10225_v34  ;;  %v3792_v22 = vmul.f32 %v3769_v54, %v10228_v52  ;;  %v12305_v54 = vld [vmem:[#allocation145_spill] sm:$0xff] }
 0x678   :  { %4144 = vperm.xlu2 %5157, %v5231_v30   ;;  %v3673_v26 = vpop.permute.xlu1 %3672 }
 0x679   :  { %v3683_v6 = vmul.f32 %v3673_v26, %v10071_v29  ;;  %v3684_v56 = vmul.f32 %v3673_v26, %v10074_v41  ;;  %v3691_v0 = vmul.f32 %v3673_v26, %v10077_v47  ;;  %v3692_v33 = vmul.f32 %v3673_v26, %v10080_v24 }
 0x67a   :  { %v10331_v47 = vadd.f32 %v3783_v48, %v3747_v60  ;;  %v10333_v24 = vadd.f32 %v3784_v18, %v3748_v38  ;;  %v10335_v8 = vadd.f32 %v3791_v23, %v3755_v58  ;;  %v10337_v30 = vadd.f32 %v3792_v22, %v3756_v25  ;;  %v2524_v25 = vld [vmem:[%s11264_s11 + $0x8] sm:$0xff] }
 0x67b   :  { %v3699_v39 = vadd.f32 %v3683_v6, %v10137_v55  ;;  %v3700_v16 = vadd.f32 %v3684_v56, %v10139_v9  ;;  %v3707_v29 = vadd.f32 %v3691_v0, %v10141_v46  ;;  %v3708_v41 = vadd.f32 %v3692_v33, %v10143_v28 }
 0x67c   :  { %v3829_v32 = vpop.permute.xlu2 %3828  ;;  %v12306_v6 = vmov 0   ;;  %v10378_v18 = vperm.slane %v12295_v45, 2  ;;  %v10381_v23 = vperm.slane %v12296_v17, 2  ;;  %v10384_v22 = vperm.slane %v10196_v42, 2 }
 0x67d   :  { %v10340_v26 = vmul.f32 %v3829_v32, %v10308_v62  ;;  %v10343_v55 = vmul.f32 %v3829_v32, %v10311_v15  ;;  %v10346_v9 = vmul.f32 %v3829_v32, %v10314_v35  ;;  %v10349_v28 = vmul.f32 %v3829_v32, %v10317_v20 }
 0x67e   :  { %5158 = vset.pattern.permute.xlu1 %v12304_v49  ;;  %v10353_v46 = vadd.f32 %v10205_v59, %v3699_v39  ;;  %v10356_v60 = vadd.f32 %v10208_v37, %v3700_v16  ;;  %v10359_v38 = vadd.f32 %v10211_v2, %v3707_v29  ;;  %v10362_v58 = vadd.f32 %v10214_v1, %v3708_v41 }
 0x67f   :  { %4136 = vperm.xlu1 %5158, %v12305_v54   ;;  %v10387_v39 = vperm.slane %v10198_v11, 2 }
 0x680   :  { %5161 = vset.pattern.permute.xlu2 %v12306_v6 }
 0x681   :  { %v3721_v49 = vpop.permute.xlu1 %3720  ;;  %4186 = vperm.xlu2 %5161, %v2524_v25  }
 0x682   :  { %v3733_v59 = vmul.f32 %v3721_v49, %v10117_v36  ;;  %v3734_v37 = vmul.f32 %v3721_v49, %v10120_v14  ;;  %v3741_v2 = vmul.f32 %v3721_v49, %v10123_v43  ;;  %v3742_v56 = vmul.f32 %v3721_v49, %v10126_v13 }
 0x684   :  { %v3749_v1 = vadd.f32 %v3733_v59, %v10266_v53  ;;  %v3750_v0 = vadd.f32 %v3734_v37, %v10269_v3  ;;  %v3757_v33 = vadd.f32 %v3741_v2, %v10272_v21  ;;  %v3758_v48 = vadd.f32 %v3742_v56, %v10275_v50  ;;  %v2523_v53 = vld [vmem:[%s11264_s11] sm:$0xff] }
 0x685   :  { %v3873_v16 = vpop.permute.xlu2 %3872 }
 0x686   :  { %v3801_v3 = vadd.f32 %v10253_v5, %v3749_v1  ;;  %v3802_v21 = vadd.f32 %v10256_v44, %v3750_v0  ;;  %v3809_v50 = vadd.f32 %v10259_v40, %v3757_v33  ;;  %v3810_v29 = vadd.f32 %v10262_v51, %v3758_v48  ;;  %v3825_v5 = vpop.permute.xlu0 %3824 }
 0x687   :  { %v10397_v41 = vmul.f32 %v3873_v16, %v10378_v18  ;;  %v10400_v32 = vmul.f32 %v3873_v16, %v10381_v23  ;;  %v10403_v25 = vmul.f32 %v3873_v16, %v10384_v22  ;;  %v10406_v54 = vmul.f32 %v3873_v16, %v10387_v39  ;;  %5160 = vset.pattern.permute.xlu1 %v12306_v6 }
 0x688   :  { %4181 = vperm.xlu1 %5160, %v2523_v53   ;;  %v3837_v37 = vmul.f32 %v3825_v5, %v10308_v62  ;;  %v3838_v2 = vmul.f32 %v3825_v5, %v10311_v15  ;;  %v3845_v56 = vmul.f32 %v3825_v5, %v10314_v35  ;;  %v3846_v1 = vmul.f32 %v3825_v5, %v10317_v20 }
 0x689   :  { %v3729_v44 = vpop.permute.xlu1 %3728 }
 0x68a   :  { %v3737_v40 = vmul.f32 %v3729_v44, %v10117_v36  ;;  %v3738_v51 = vmul.f32 %v3729_v44, %v10120_v14  ;;  %v3745_v49 = vmul.f32 %v3729_v44, %v10123_v43  ;;  %v3746_v59 = vmul.f32 %v3729_v44, %v10126_v13  ;;  %v2525_v43 = vld [vmem:[%s11264_s11 + $0x10] sm:$0xff] }
 0x68b   :  { %v10424_v13 = vadd.f32 %v3837_v37, %v3801_v3  ;;  %v10426_v48 = vadd.f32 %v3838_v2, %v3802_v21  ;;  %v10428_v16 = vadd.f32 %v3845_v56, %v3809_v50  ;;  %v10430_v53 = vadd.f32 %v3846_v1, %v3810_v29 }
 0x68c   :  { %v3753_v6 = vadd.f32 %v3737_v40, %v10240_v4  ;;  %v3754_v0 = vadd.f32 %v3738_v51, %v10242_v31  ;;  %v3761_v36 = vadd.f32 %v3745_v49, %v10244_v63  ;;  %v3762_v14 = vadd.f32 %v3746_v59, %v10246_v12 }
 0x68d   :  { %v3885_v33 = vpop.permute.xlu2 %3884 }
 0x68e   :  { %v3893_v4 = vmul.f32 %v3885_v33, %v10378_v18  ;;  %v3894_v31 = vmul.f32 %v3885_v33, %v10381_v23  ;;  %v3901_v63 = vmul.f32 %v3885_v33, %v10384_v22  ;;  %v3902_v12 = vmul.f32 %v3885_v33, %v10387_v39  ;;  %v3881_v2 = vpop.permute.xlu0 %3880 }
 0x68f   :  { %v3805_v5 = vadd.f32 %v10289_v57, %v3753_v6  ;;  %v3806_v44 = vadd.f32 %v10292_v19, %v3754_v0  ;;  %v3813_v3 = vadd.f32 %v10295_v7, %v3761_v36  ;;  %v3814_v21 = vadd.f32 %v10298_v10, %v3762_v14 }
 0x690   :  { %4191 = vperm.xlu1 %5160, %v2525_v43  }
 0x692   :  { %v3777_v50 = vpop.permute.xlu1 %3776 }
 0x693   :  { %v3787_v29 = vmul.f32 %v3777_v50, %v10219_v61  ;;  %v3788_v40 = vmul.f32 %v3777_v50, %v10222_v27  ;;  %v3795_v51 = vmul.f32 %v3777_v50, %v10225_v34  ;;  %v3796_v49 = vmul.f32 %v3777_v50, %v10228_v52 }
 0x694   :  { %v3891_v34 = vmul.f32 %v3881_v2, %v10378_v18  ;;  %v3892_v52 = vmul.f32 %v3881_v2, %v10381_v23 }
 0x695   :  { %v3803_v59 = vadd.f32 %v3787_v29, %v10353_v46  ;;  %v3804_v57 = vadd.f32 %v3788_v40, %v10356_v60  ;;  %v3811_v19 = vadd.f32 %v3795_v51, %v10359_v38  ;;  %v3812_v7 = vadd.f32 %v3796_v49, %v10362_v58 }
 0x696   :  { %v3899_v46 = vmul.f32 %v3881_v2, %v10384_v22  ;;  %v3900_v60 = vmul.f32 %v3881_v2, %v10387_v39  ;;  %v3929_v43 = vpop.permute.xlu2 %3928 }
 0x697   :  { %v3855_v10 = vadd.f32 %v10340_v26, %v3803_v59  ;;  %v3856_v37 = vadd.f32 %v10343_v55, %v3804_v57  ;;  %v3863_v61 = vadd.f32 %v10346_v9, %v3811_v19  ;;  %v3864_v27 = vadd.f32 %v10349_v28, %v3812_v7 }
 0x699   :  { %v10460_v56 = vadd.f32 %v3891_v34, %v3855_v10  ;;  %v10462_v28 = vadd.f32 %v3892_v52, %v3856_v37  ;;  %v10464_v1 = vadd.f32 %v3899_v46, %v3863_v61  ;;  %v10466_v6 = vadd.f32 %v3900_v60, %v3864_v27 }
 0x69a   :  { %v3920_v61 = vperm.slane %v12296_v17, 3 }
 0x69b   :  { %v3821_v38 = vpop.permute.xlu1 %3820 }
 0x69c   :  { %v3835_v58 = vmul.f32 %v3821_v38, %v10308_v62  ;;  %v3836_v26 = vmul.f32 %v3821_v38, %v10311_v15  ;;  %v3843_v55 = vmul.f32 %v3821_v38, %v10314_v35  ;;  %v3844_v9 = vmul.f32 %v3821_v38, %v10317_v20 }
 0x69e   :  { %v3851_v0 = vadd.f32 %v3835_v58, %v10331_v47  ;;  %v3852_v36 = vadd.f32 %v3836_v26, %v10333_v24  ;;  %v3859_v14 = vadd.f32 %v3843_v55, %v10335_v8  ;;  %v3860_v33 = vadd.f32 %v3844_v9, %v10337_v30 }
 0x6a0   :  { %v3903_v50 = vadd.f32 %v10397_v41, %v3851_v0  ;;  %v3904_v29 = vadd.f32 %v10400_v32, %v3852_v36  ;;  %v3911_v40 = vadd.f32 %v10403_v25, %v3859_v14  ;;  %v3912_v51 = vadd.f32 %v10406_v54, %v3860_v33  ;;  %v3937_v25 = vpop.permute.xlu0 %3936 }
 0x6a1   :  { %v3919_v54 = vperm.slane %v12295_v45, 3 }
 0x6a3   :  { %v3833_v49 = vpop.permute.xlu1 %3832  ;;  %v3945_v27 = vmul.f32 %v3937_v25, %v3919_v54  ;;  %v3941_v38 = vmul.f32 %v3929_v43, %v3919_v54 }
 0x6a4   :  { %v3841_v59 = vmul.f32 %v3833_v49, %v10308_v62  ;;  %v3842_v47 = vmul.f32 %v3833_v49, %v10311_v15  ;;  %v3849_v24 = vmul.f32 %v3833_v49, %v10314_v35  ;;  %v3850_v8 = vmul.f32 %v3833_v49, %v10317_v20  ;;  %v3977_v35 = vpop.permute.xlu2 %3976 }
 0x6a5   :  { %v3921_v62 = vperm.slane %v10196_v42, 3  ;;  %v3922_v15 = vperm.slane %v10198_v11, 3  ;;  %v3946_v20 = vmul.f32 %v3937_v25, %v3920_v61 }
 0x6a6   :  { %v3857_v57 = vadd.f32 %v3841_v59, %v3805_v5  ;;  %v3858_v30 = vadd.f32 %v3842_v47, %v3806_v44  ;;  %v3865_v19 = vadd.f32 %v3849_v24, %v3813_v3  ;;  %v3866_v7 = vadd.f32 %v3850_v8, %v3814_v21 }
 0x6a7   :  { %v3953_v5 = vmul.f32 %v3937_v25, %v3921_v62  ;;  %v3954_v44 = vmul.f32 %v3937_v25, %v3922_v15  ;;  %v3949_v58 = vmul.f32 %v3929_v43, %v3921_v62 }
 0x6a8   :  { %v3909_v41 = vadd.f32 %v3893_v4, %v3857_v57  ;;  %v3910_v10 = vadd.f32 %v3894_v31, %v3858_v30  ;;  %v3917_v32 = vadd.f32 %v3901_v63, %v3865_v19  ;;  %v3918_v37 = vadd.f32 %v3902_v12, %v3866_v7 }
 0x6aa   :  { %v10488_v21 = vadd.f32 %v3945_v27, %v3909_v41  ;;  %v10490_v2 = vadd.f32 %v3946_v20, %v3910_v10  ;;  %v10492_v34 = vadd.f32 %v3953_v5, %v3917_v32  ;;  %v10494_v52 = vadd.f32 %v3954_v44, %v3918_v37  ;;  %v4029_v10 = vpop.permute.xlu0 %4028 }
 0x6ab   :  { %v10525_v20 = vperm.slane %v12295_v45, 5  ;;  %v10528_v5 = vperm.slane %v12296_v17, 5  ;;  %v10531_v44 = vperm.slane %v10196_v42, 5 }
 0x6ac   :  { %v3877_v3 = vpop.permute.xlu1 %3876  ;;  %v3985_v36 = vpop.permute.xlu2 %3984 }
 0x6ad   :  { %v3889_v4 = vmul.f32 %v3877_v3, %v10378_v18  ;;  %v3890_v31 = vmul.f32 %v3877_v3, %v10381_v23  ;;  %v3897_v63 = vmul.f32 %v3877_v3, %v10384_v22  ;;  %v3898_v12 = vmul.f32 %v3877_v3, %v10387_v39 }
 0x6ae   :  { %v3942_v22 = vmul.f32 %v3929_v43, %v3920_v61  ;;  %v3950_v39 = vmul.f32 %v3929_v43, %v3922_v15 }
 0x6af   :  { %v3905_v46 = vadd.f32 %v3889_v4, %v10424_v13  ;;  %v3906_v60 = vadd.f32 %v3890_v31, %v10426_v48  ;;  %v3913_v18 = vadd.f32 %v3897_v63, %v10428_v16  ;;  %v3914_v23 = vadd.f32 %v3898_v12, %v10430_v53 }
 0x6b0   :  { %v10509_v13 = vperm.slane %v12295_v45, 4  ;;  %v10512_v48 = vperm.slane %v12296_v17, 4  ;;  %v10515_v16 = vperm.slane %v10196_v42, 4  ;;  %v10518_v53 = vperm.slane %v10198_v11, 4 }
 0x6b1   :  { %v10500_v26 = vadd.f32 %v3941_v38, %v3905_v46  ;;  %v10502_v55 = vadd.f32 %v3942_v22, %v3906_v60  ;;  %v10504_v9 = vadd.f32 %v3949_v58, %v3913_v18  ;;  %v10506_v0 = vadd.f32 %v3950_v39, %v3914_v23 }
 0x6b2   :  { %v3991_v47 = vmul.f32 %v3977_v35, %v10509_v13  ;;  %v3992_v24 = vmul.f32 %v3977_v35, %v10512_v48  ;;  %v3999_v8 = vmul.f32 %v3977_v35, %v10515_v16  ;;  %v4000_v57 = vmul.f32 %v3977_v35, %v10518_v53 }
 0x6b3   :  { %v10534_v35 = vperm.slane %v10198_v11, 5  ;;  %v3995_v46 = vmul.f32 %v3985_v36, %v10509_v13  ;;  %v3996_v60 = vmul.f32 %v3985_v36, %v10512_v48  ;;  %v4003_v18 = vmul.f32 %v3985_v36, %v10515_v16 }
 0x6b4   :  { %v4004_v23 = vmul.f32 %v3985_v36, %v10518_v53  ;;  %v4033_v38 = vpop.permute.xlu2 %4032 }
 0x6b5   :  { %v3925_v14 = vpop.permute.xlu1 %3924 }
 0x6b6   :  { %v3939_v33 = vmul.f32 %v3925_v14, %v3919_v54  ;;  %v3940_v43 = vmul.f32 %v3925_v14, %v3920_v61  ;;  %v3947_v49 = vmul.f32 %v3925_v14, %v3921_v62  ;;  %v3948_v59 = vmul.f32 %v3925_v14, %v3922_v15 }
 0x6b8   :  { %v3955_v30 = vadd.f32 %v3939_v33, %v3903_v50  ;;  %v3956_v19 = vadd.f32 %v3940_v43, %v3904_v29  ;;  %v3963_v7 = vadd.f32 %v3947_v49, %v3911_v40  ;;  %v3964_v41 = vadd.f32 %v3948_v59, %v3912_v51 }
 0x6b9   :  { %v4043_v50 = vmul.f32 %v4029_v10, %v10525_v20  ;;  %v4044_v29 = vmul.f32 %v4029_v10, %v10528_v5  ;;  %v4051_v40 = vmul.f32 %v4029_v10, %v10531_v44  ;;  %v4052_v51 = vmul.f32 %v4029_v10, %v10534_v35 }
 0x6ba   :  { %v4007_v32 = vadd.f32 %v3991_v47, %v3955_v30  ;;  %v4008_v37 = vadd.f32 %v3992_v24, %v3956_v19  ;;  %v4015_v25 = vadd.f32 %v3999_v8, %v3963_v7  ;;  %v4016_v27 = vadd.f32 %v4000_v57, %v3964_v41 }
 0x6bb   :  { %v4045_v47 = vmul.f32 %v4033_v38, %v10525_v20  ;;  %v4046_v24 = vmul.f32 %v4033_v38, %v10528_v5  ;;  %v4053_v8 = vmul.f32 %v4033_v38, %v10531_v44  ;;  %v4054_v57 = vmul.f32 %v4033_v38, %v10534_v35 }
 0x6bc   :  { %v10554_v14 = vadd.f32 %v4052_v51, %v4016_v27  ;;  %v4041_v30 = vpop.permute.xlu2 %4040  ;;  %v10575_v51 = vperm.slane %v10196_v42, 6 }
 0x6bd   :  { %v3933_v3 = vpop.permute.xlu1 %3932  ;;  %v4058_v38 = vmul.f32 %v4041_v30, %v10534_v35 }
 0x6be   :  { %v3943_v4 = vmul.f32 %v3933_v3, %v3919_v54  ;;  %v3944_v31 = vmul.f32 %v3933_v3, %v3920_v61  ;;  %v3951_v63 = vmul.f32 %v3933_v3, %v3921_v62  ;;  %v3952_v12 = vmul.f32 %v3933_v3, %v3922_v15 }
 0x6bf   :  { %v10548_v61 = vadd.f32 %v4043_v50, %v4007_v32  ;;  %v10550_v62 = vadd.f32 %v4044_v29, %v4008_v37  ;;  %v10552_v15 = vadd.f32 %v4051_v40, %v4015_v25  ;;  %v4085_v32 = vpop.permute.xlu0 %4084  ;;  %v10569_v29 = vperm.slane %v12295_v45, 6 }
 0x6c0   :  { %v3959_v22 = vadd.f32 %v3943_v4, %v10460_v56  ;;  %v3960_v58 = vadd.f32 %v3944_v31, %v10462_v28  ;;  %v3967_v39 = vadd.f32 %v3951_v63, %v10464_v1  ;;  %v3968_v54 = vadd.f32 %v3952_v12, %v10466_v6 }
 0x6c1   :  { %v10572_v40 = vperm.slane %v12296_v17, 6 }
 0x6c2   :  { %v4011_v33 = vadd.f32 %v3995_v46, %v3959_v22  ;;  %v4012_v43 = vadd.f32 %v3996_v60, %v3960_v58  ;;  %v4019_v36 = vadd.f32 %v4003_v18, %v3967_v39  ;;  %v4020_v49 = vadd.f32 %v4004_v23, %v3968_v54 }
 0x6c3   :  { %v4049_v60 = vmul.f32 %v4041_v30, %v10525_v20  ;;  %v4050_v18 = vmul.f32 %v4041_v30, %v10528_v5  ;;  %v4057_v23 = vmul.f32 %v4041_v30, %v10531_v44 }
 0x6c6   :  { %v3981_v59 = vpop.permute.xlu1 %3980 }
 0x6c7   :  { %v3993_v56 = vmul.f32 %v3981_v59, %v10509_v13  ;;  %v3994_v28 = vmul.f32 %v3981_v59, %v10512_v48  ;;  %v4001_v1 = vmul.f32 %v3981_v59, %v10515_v16  ;;  %v4002_v6 = vmul.f32 %v3981_v59, %v10518_v53  ;;  %v4089_v59 = vpop.permute.xlu2 %4088 }
 0x6c9   :  { %v4009_v19 = vadd.f32 %v3993_v56, %v10500_v26  ;;  %v4010_v7 = vadd.f32 %v3994_v28, %v10502_v55  ;;  %v4017_v41 = vadd.f32 %v4001_v1, %v10504_v9  ;;  %v4018_v10 = vadd.f32 %v4002_v6, %v10506_v0 }
 0x6ca   :  { %v10578_v26 = vperm.slane %v10198_v11, 6  ;;  %v4097_v55 = vmul.f32 %v4085_v32, %v10569_v29  ;;  %v4098_v9 = vmul.f32 %v4085_v32, %v10572_v40  ;;  %v4105_v0 = vmul.f32 %v4085_v32, %v10575_v51 }
 0x6cb   :  { %v4061_v37 = vadd.f32 %v4045_v47, %v4009_v19  ;;  %v4062_v25 = vadd.f32 %v4046_v24, %v4010_v7  ;;  %v4069_v27 = vadd.f32 %v4053_v8, %v4017_v41  ;;  %v4070_v50 = vadd.f32 %v4054_v57, %v4018_v10  ;;  %v4141_v19 = vpop.permute.xlu0 %4140 }
 0x6cc   :  { %v4106_v3 = vmul.f32 %v4085_v32, %v10578_v26  ;;  %v4127_v7 = vperm.slane %v12295_v45, 7  ;;  %v4128_v41 = vperm.slane %v12296_v17, 7  ;;  %v4129_v10 = vperm.slane %v10196_v42, 7 }
 0x6cd   :  { %v10596_v39 = vadd.f32 %v4097_v55, %v4061_v37  ;;  %v4130_v32 = vperm.slane %v10198_v11, 7 }
 0x6ce   :  { %v3989_v4 = vpop.permute.xlu1 %3988  ;;  %v10602_v54 = vadd.f32 %v4106_v3, %v4070_v50  ;;  %v4151_v37 = vmul.f32 %v4141_v19, %v4127_v7 }
 0x6cf   :  { %v3997_v31 = vmul.f32 %v3989_v4, %v10509_v13  ;;  %v3998_v63 = vmul.f32 %v3989_v4, %v10512_v48  ;;  %v4005_v12 = vmul.f32 %v3989_v4, %v10515_v16  ;;  %v4006_v46 = vmul.f32 %v3989_v4, %v10518_v53 }
 0x6d0   :  { %v10598_v16 = vadd.f32 %v4098_v9, %v4062_v25  ;;  %v10600_v53 = vadd.f32 %v4105_v0, %v4069_v27  ;;  %v4159_v25 = vmul.f32 %v4141_v19, %v4129_v10 }
 0x6d1   :  { %v4013_v22 = vadd.f32 %v3997_v31, %v10488_v21  ;;  %v4014_v58 = vadd.f32 %v3998_v63, %v10490_v2  ;;  %v4021_v13 = vadd.f32 %v4005_v12, %v10492_v34  ;;  %v4022_v48 = vadd.f32 %v4006_v46, %v10494_v52 }
 0x6d3   :  { %v4065_v56 = vadd.f32 %v4049_v60, %v4013_v22  ;;  %v4066_v28 = vadd.f32 %v4050_v18, %v4014_v58  ;;  %v4073_v1 = vadd.f32 %v4057_v23, %v4021_v13  ;;  %v4074_v6 = vadd.f32 %v4058_v38, %v4022_v48 }
 0x6d7   :  { %v4037_v21 = vpop.permute.xlu1 %4036 }
 0x6d8   :  { %v4047_v2 = vmul.f32 %v4037_v21, %v10525_v20  ;;  %v4048_v34 = vmul.f32 %v4037_v21, %v10528_v5  ;;  %v4055_v52 = vmul.f32 %v4037_v21, %v10531_v44  ;;  %v4056_v47 = vmul.f32 %v4037_v21, %v10534_v35  ;;  %v4133_v20 = vpop.permute.xlu2 %4132 }
 0x6d9   :  { %v4152_v5 = vmul.f32 %v4141_v19, %v4128_v41  ;;  %v4160_v44 = vmul.f32 %v4141_v19, %v4130_v32  ;;  %v4099_v35 = vmul.f32 %v4089_v59, %v10569_v29  ;;  %v4147_v45 = vmul.f32 %v4133_v20, %v4127_v7 }
 0x6da   :  { %v4063_v24 = vadd.f32 %v4047_v2, %v4011_v33  ;;  %v4064_v8 = vadd.f32 %v4048_v34, %v4012_v43  ;;  %v4071_v57 = vadd.f32 %v4055_v52, %v4019_v36  ;;  %v4072_v30 = vadd.f32 %v4056_v47, %v4020_v49 }
 0x6db   :  { %v4100_v33 = vmul.f32 %v4089_v59, %v10572_v40  ;;  %v4107_v43 = vmul.f32 %v4089_v59, %v10575_v51  ;;  %v4108_v36 = vmul.f32 %v4089_v59, %v10578_v26  ;;  %v4148_v49 = vmul.f32 %v4133_v20, %v4128_v41 }
 0x6dc   :  { %v4155_v17 = vmul.f32 %v4133_v20, %v4129_v10  ;;  %v4156_v27 = vmul.f32 %v4133_v20, %v4130_v32  ;;  %v4115_v0 = vadd.f32 %v4099_v35, %v4063_v24 }
 0x6dd   :  { %v4116_v3 = vadd.f32 %v4100_v33, %v4064_v8  ;;  %v4123_v4 = vadd.f32 %v4107_v43, %v4071_v57  ;;  %v4124_v31 = vadd.f32 %v4108_v36, %v4072_v30 }
 0x6de   :  { %v10624_v18 = vadd.f32 %v4151_v37, %v4115_v0 }
 0x6df   :  { %v10626_v23 = vadd.f32 %v4152_v5, %v4116_v3  ;;  %v10628_v38 = vadd.f32 %v4159_v25, %v4123_v4  ;;  %v10630_v22 = vadd.f32 %v4160_v44, %v4124_v31 }
 0x6e0   :  { %v4081_v42 = vpop.permute.xlu1 %4080  ;;  %v4145_v21 = vpop.permute.xlu2 %4144 }
 0x6e1   :  { %v4095_v11 = vmul.f32 %v4081_v42, %v10569_v29  ;;  %v4096_v50 = vmul.f32 %v4081_v42, %v10572_v40  ;;  %v4103_v55 = vmul.f32 %v4081_v42, %v10575_v51  ;;  %v4104_v9 = vmul.f32 %v4081_v42, %v10578_v26 }
 0x6e2   :  { %v4153_v34 = vmul.f32 %v4145_v21, %v4127_v7  ;;  %v4154_v52 = vmul.f32 %v4145_v21, %v4128_v41  ;;  %v4161_v47 = vmul.f32 %v4145_v21, %v4129_v10  ;;  %v4162_v24 = vmul.f32 %v4145_v21, %v4130_v32 }
 0x6e3   :  { %v4111_v63 = vadd.f32 %v4095_v11, %v10548_v61  ;;  %v4112_v12 = vadd.f32 %v4096_v50, %v10550_v62  ;;  %v4119_v46 = vadd.f32 %v4103_v55, %v10552_v15  ;;  %v4120_v60 = vadd.f32 %v4104_v9, %v10554_v14 }
 0x6e5   :  { %v4163_v58 = vadd.f32 %v4147_v45, %v4111_v63  ;;  %v4164_v13 = vadd.f32 %v4148_v49, %v4112_v12  ;;  %v4171_v48 = vadd.f32 %v4155_v17, %v4119_v46  ;;  %v4172_v59 = vadd.f32 %v4156_v27, %v4120_v60 }
 0x6e8   :  { %v4093_v61 = vpop.permute.xlu1 %4092 }
 0x6e9   :  { %v4101_v62 = vmul.f32 %v4093_v61, %v10569_v29  ;;  %v4102_v15 = vmul.f32 %v4093_v61, %v10572_v40  ;;  %v4109_v14 = vmul.f32 %v4093_v61, %v10575_v51  ;;  %v4110_v2 = vmul.f32 %v4093_v61, %v10578_v26  ;;  %v4187_v51 = vpop.permute.xlu2 %4186 }
 0x6eb   :  { %v4117_v8 = vadd.f32 %v4101_v62, %v4065_v56  ;;  %v4118_v57 = vadd.f32 %v4102_v15, %v4066_v28  ;;  %v4125_v30 = vadd.f32 %v4109_v14, %v4073_v1  ;;  %v4126_v19 = vadd.f32 %v4110_v2, %v4074_v6 }
 0x6ed   :  { %v4169_v20 = vadd.f32 %v4153_v34, %v4117_v8  ;;  %v4170_v37 = vadd.f32 %v4154_v52, %v4118_v57  ;;  %v4177_v5 = vadd.f32 %v4161_v47, %v4125_v30  ;;  %v4178_v25 = vadd.f32 %v4162_v24, %v4126_v19 }
 0x6f1   :  { %v4137_v44 = vpop.permute.xlu1 %4136 }
 0x6f2   :  { %v4149_v29 = vmul.f32 %v4137_v44, %v4127_v7  ;;  %v4150_v35 = vmul.f32 %v4137_v44, %v4128_v41  ;;  %v4157_v40 = vmul.f32 %v4137_v44, %v4129_v10  ;;  %v4158_v33 = vmul.f32 %v4137_v44, %v4130_v32  ;;  %v4197_v41 = vpop.permute.xlu0 %4196 }
 0x6f3   :  { %v10660_v45 = vadd.f32 %v4197_v41, %v4169_v20  ;;  %v10662_v49 = vadd.f32 %v4197_v41, %v4170_v37  ;;  %v10679_v63 = vadd.f32 %v4197_v41, %v4177_v5  ;;  %v10710_v2 = vadd.f32 %v4197_v41, %v4178_v25 }
 0x6f4   :  { %v4165_v26 = vadd.f32 %v4149_v29, %v10596_v39  ;;  %v4166_v43 = vadd.f32 %v4150_v35, %v10598_v16  ;;  %v4173_v36 = vadd.f32 %v4157_v40, %v10600_v53  ;;  %v4174_v56 = vadd.f32 %v4158_v33, %v10602_v54 }
 0x6f5   :  { %v4238_v3 = vadd.f32 %v10662_v49, %v10660_v45  ;;  %v4249_v60 = vmul.f32 %v10660_v45, %v10660_v45  ;;  %v4257_v37 = vmul.f32 %v10679_v63, %v10679_v63  ;;  %v4258_v29 = vmul.f32 %v10710_v2, %v10710_v2 }
 0x6f6   :  { %v10640_v28 = vadd.f32 %v4187_v51, %v4165_v26  ;;  %v10642_v1 = vadd.f32 %v4187_v51, %v4166_v43  ;;  %v10644_v6 = vadd.f32 %v4187_v51, %v4173_v36  ;;  %v10650_v10 = vadd.f32 %v4187_v51, %v4174_v56 }
 0x6f7   :  { %v4239_v61 = vadd.f32 %v4238_v3, %v10679_v63  ;;  %v4368_v43 = vadd.f32 %v10710_v2, %v10679_v63 }
 0x6f8   :  { %v10648_v7 = vadd.f32 %v10642_v1, %v10640_v28  ;;  %v4245_v62 = vmul.f32 %v10640_v28, %v10640_v28  ;;  %v4253_v5 = vmul.f32 %v10644_v6, %v10644_v6  ;;  %v4254_v35 = vmul.f32 %v10650_v10, %v10650_v10 }
 0x6f9   :  { %v4362_v26 = vadd.f32 %v10650_v10, %v10644_v6 }
 0x6fa   :  { %v4182_v39 = vpop.permute.xlu1 %4181  ;;  %v4229_v16 = vadd.f32 %v10648_v7, %v10644_v6 }
 0x6fb   :  { %v10654_v53 = vadd.f32 %v4182_v39, %v4163_v58  ;;  %v10656_v54 = vadd.f32 %v4182_v39, %v4164_v13  ;;  %v10658_v32 = vadd.f32 %v4182_v39, %v4171_v48  ;;  %v10671_v50 = vadd.f32 %v4182_v39, %v4172_v59 }
 0x6fc   :  { %v4230_v17 = vadd.f32 %v4229_v16, %v10650_v10  ;;  %v4250_v59 = vmul.f32 %v10662_v49, %v10662_v49 }
 0x6fd   :  { %v4223_v27 = vadd.f32 %v10656_v54, %v10654_v53  ;;  %v4243_v42 = vmul.f32 %v10654_v53, %v10654_v53  ;;  %v4244_v11 = vmul.f32 %v10656_v54, %v10656_v54  ;;  %v4251_v9 = vmul.f32 %v10658_v32, %v10658_v32 }
 0x6fe   :  { %4231 = vadd.xlane.f32.xlu1 %v4230_v17  ;;  %v4252_v46 = vmul.f32 %v10671_v50, %v10671_v50  ;;  %v4274_v24 = vadd.f32 %v4250_v59, %v4249_v60  ;;  %v4359_v51 = vadd.f32 %v10671_v50, %v10658_v32 }
 0x6ff   :  { %v4224_v55 = vadd.f32 %v4223_v27, %v10658_v32  ;;  %v4259_v0 = vadd.f32 %v4244_v11, %v4243_v42 }
 0x700   :  { %v4275_v25 = vadd.f32 %v4274_v24, %v4257_v37 }
 0x701   :  { %v4225_v4 = vadd.f32 %v4224_v55, %v10671_v50  ;;  %v4260_v31 = vadd.f32 %v4259_v0, %v4251_v9 }
 0x702   :  { %v4192_v12 = vpop.permute.xlu1 %4191  ;;  %v4276_v40 = vadd.f32 %v4275_v25, %v4258_v29 }
 0x703   :  { %v10686_v58 = vadd.f32 %v4192_v12, %v10624_v18  ;;  %v10689_v13 = vadd.f32 %v4192_v12, %v10626_v23  ;;  %v10692_v48 = vadd.f32 %v4192_v12, %v10628_v38  ;;  %4226 = vadd.xlane.f32.xlu2 %v4225_v4  ;;  %v4261_v21 = vadd.f32 %v4260_v31, %v4252_v46 }
 0x704   :  { %v4246_v18 = vmul.f32 %v10642_v1, %v10642_v1  ;;  %v10702_v15 = vadd.f32 %v4192_v12, %v10630_v22  ;;  %v4240_v22 = vadd.f32 %v4239_v61, %v10710_v2  ;;  %v5273_v4 = vmov 256.0  }
 0x705   :  { %v4233_v23 = vadd.f32 %v10689_v13, %v10686_v58  ;;  %v4247_v38 = vmul.f32 %v10686_v58, %v10686_v58  ;;  %v4248_v14 = vmul.f32 %v10689_v13, %v10689_v13  ;;  %v4255_v52 = vmul.f32 %v10692_v48, %v10692_v48 }
 0x706   :  { %4262 = vadd.xlane.f32.xlu1 %v4261_v21  ;;  %v4256_v57 = vmul.f32 %v10702_v15, %v10702_v15  ;;  %v4264_v19 = vadd.f32 %v4246_v18, %v4245_v62  ;;  %v4365_v36 = vadd.f32 %v10702_v15, %v10692_v48 }
 0x707   :  { %v4234_v34 = vadd.f32 %v4233_v23, %v10692_v48  ;;  %v4269_v47 = vadd.f32 %v4248_v14, %v4247_v38 }
 0x708   :  { %v4265_v44 = vadd.f32 %v4264_v19, %v4253_v5 }
 0x709   :  { %v4235_v8 = vadd.f32 %v4234_v34, %v10702_v15  ;;  %v4270_v30 = vadd.f32 %v4269_v47, %v4255_v52 }
 0x70a   :  { %v4266_v33 = vadd.f32 %v4265_v44, %v4254_v35  ;;  %v4215_v44 = vld [vmem:[%s11265_s12] sm:$0xff] }
 0x70b   :  { %4236 = vadd.xlane.f32.xlu0 %v4235_v8  ;;  %4241 = vadd.xlane.f32.xlu2 %v4240_v22  ;;  %v4271_v20 = vadd.f32 %v4270_v30, %v4256_v57 }
 0x70e   :  { %4272 = vadd.xlane.f32.xlu1 %v4271_v20 }
 0x713   :  { %4277 = vadd.xlane.f32.xlu0 %v4276_v40  ;;  %4267 = vadd.xlane.f32.xlu2 %v4266_v33 }
 0x716   :  { %4353 = vadd.xlane.f32.xlu1 %v10648_v7 }
 0x71b   :  { %4355 = vadd.xlane.f32.xlu0 %v4233_v23  ;;  %4351 = vadd.xlane.f32.xlu2 %v4223_v27 }
 0x71e   :  { %4360 = vadd.xlane.f32.xlu1 %v4359_v51 }
 0x723   :  { %4363 = vadd.xlane.f32.xlu0 %v4362_v26  ;;  %4357 = vadd.xlane.f32.xlu2 %v4238_v3 }
 0x726   :  { %4369 = vadd.xlane.f32.xlu1 %v4368_v43 }
 0x72b   :  { %4366 = vadd.xlane.f32.xlu2 %v4365_v36 }
 0x771   :  { %v4232_v56 = vpop.xlane.xlu1 %4231 }
 0x772   :  { %v10740_v31 = vmul.f32 0.001953125, %v4232_v56 }
 0x774   :  { %v4288_v21 = vmul.f32 %v10740_v31, %v10740_v31 }
 0x776   :  { %v4227_v7 = vpop.xlane.xlu2 %4226 }
 0x777   :  { %v4279_v41 = vmul.f32 0.001953125, %v4227_v7 }
 0x779   :  { %v4287_v39 = vmul.f32 %v4279_v41, %v4279_v41  ;;  %v4263_v16 = vpop.xlane.xlu1 %4262 }
 0x77a   :  { %v4283_v17 = vmul.f32 0.001953125, %v4263_v16 }
 0x77c   :  { %v4291_v27 = vsub.f32 %v4283_v17, %v4287_v39 }
 0x77e   :  { %v4295_v42 = vadd.f32 1e-05, %v4291_v27  ;;  %v4237_v11 = vpop.xlane.xlu0 %4236  ;;  %v4242_v55 = vpop.xlane.xlu2 %4241 }
 0x77f   :  { %v10736_v9 = vmul.f32 0.001953125, %v4237_v11  ;;  %v10742_v46 = vmul.f32 0.001953125, %v4242_v55  ;;  %v4219_v55 = vld [vmem:[%s11266_s13] sm:$0xff] }
 0x780   :  { %5171 = vrsqrt.f32 %v4295_v42  ;;  %vm4305_vm1 = vweird.f32 %v4295_v42 }
 0x781   :  { %v4289_v0 = vmul.f32 %v10736_v9, %v10736_v9  ;;  %v4273_v3 = vpop.xlane.xlu1 %4272  ;;  %5173 = vrcp.f32 %v5273_v4  ;;  %v4290_v14 = vmul.f32 %v10742_v46, %v10742_v46  ;;  %v4217_v4 = vld [vmem:[%s11265_s12 + $0x10] sm:$0xff] }
 0x782   :  { %v4285_v12 = vmul.f32 0.001953125, %v4273_v3 }
 0x784   :  { %v4293_v60 = vsub.f32 %v4285_v12, %v4289_v0 }
 0x786   :  { %v5172_v59 = vpop.eup %5171  ;;  %v4297_v61 = vadd.f32 1e-05, %v4293_v60  ;;  %v4278_v62 = vpop.xlane.xlu0 %4277 }
 0x787   :  { %v4268_v18 = vpop.xlane.xlu2 %4267  ;;  %v5174_v23 = vpop.eup %5173  ;;  %v4300_v38 = vmul.f32 %v5172_v59, %v4295_v42  ;;  %v4286_v34 = vmul.f32 0.001953125, %v4278_v62  ;;  %vm4306_vm0 = vweird.f32 %v5172_v59 }
 0x788   :  { %v4284_v52 = vmul.f32 0.001953125, %v4268_v18  ;;  %5175 = vrsqrt.f32 %v4297_v61  ;;  %v4372_v47 = vmul.f32 256.0, %v5174_v23  ;;  %vm4307_vm2 = vmor %vm4305_vm1, %vm4306_vm0  ;;  %vm4376_vm4 = vweird.f32 %v5174_v23 }
 0x789   :  { %v4301_v22 = vmul.f32 %v5172_v59, %v4300_v38  ;;  %v4294_v24 = vsub.f32 %v4286_v34, %v4290_v14  ;;  %v10752_v37 = vpop.xlane.xlu1 %4353  ;;  %vm4325_vm6 = vweird.f32 %v4297_v61 }
 0x78a   :  { %v4292_v8 = vsub.f32 %v4284_v52, %v4288_v21  ;;  %v4373_v20 = vsub.f32 1.0, %v4372_v47 }
 0x78b   :  { %v4302_v57 = vmul.f32 0.5, %v4301_v22  ;;  %v10748_v30 = vadd.f32 1e-05, %v4294_v24  ;;  %v4221_v22 = vld [vmem:[%s11266_s13 + $0x10] sm:$0xff] }
 0x78c   :  { %v10750_v19 = vadd.f32 1e-05, %v4292_v8  ;;  %v4374_v40 = vmul.f32 %v5174_v23, %v4373_v20  ;;  %v4218_v8 = vld [vmem:[%s11265_s12 + $0x18] sm:$0xff] }
 0x78d   :  { %v4303_v5 = vsub.f32 1.5, %v4302_v57  ;;  %5177 = vrsqrt.f32 %v10748_v30  ;;  %vm4335_vm13 = vweird.f32 %v10748_v30 }
 0x78e   :  { %v5176_v25 = vpop.eup %5175  ;;  %5179 = vrsqrt.f32 %v10750_v19  ;;  %v4375_v7 = vadd.f32 %v5174_v23, %v4374_v40  ;;  %v4356_v11 = vpop.xlane.xlu0 %4355  ;;  %vm4315_vm3 = vweird.f32 %v10750_v19 }
 0x78f   :  { %v4304_v29 = vmul.f32 %v5172_v59, %v4303_v5  ;;  %v4320_v35 = vmul.f32 %v5176_v25, %v4297_v61  ;;  %v4352_v33 = vpop.xlane.xlu2 %4351  ;;  %vm4326_vm5 = vweird.f32 %v5176_v25 }
 0x790   :  { %vm4327_vm7 = vmor %vm4325_vm6, %vm4326_vm5 }
 0x791   :  { %v4308_v51 = vsel %vm4307_vm2, %v5172_v59, %v4304_v29  ;;  %v4321_v26 = vmul.f32 %v5176_v25, %v4320_v35  ;;  %v4361_v0 = vpop.xlane.xlu1 %4360  ;;  %v10770_v59 = vsel %vm4376_vm4, %v5174_v23, %v4375_v7  ;;  %v4402_v29 = vld [vmem:[%s11267_s14] sm:$0xff] }
 0x792   :  { %v10759_v43 = vmul.f32 %v4308_v51, %v4215_v44  ;;  %v4378_v62 = vmul.f32 %v10770_v59, %v4352_v33  ;;  %v4382_v18 = vmul.f32 %v10770_v59, %v4361_v0  ;;  %v4380_v24 = vmul.f32 %v10770_v59, %v4356_v11  ;;  %v4991_v33 = vld [vmem:[%s11267_s14 + $0x20] sm:$0xff] }
 0x793   :  { %v5178_v36 = vpop.eup %5177  ;;  %v4322_v56 = vmul.f32 0.5, %v4321_v26  ;;  %v4379_v11 = vmul.f32 %v10770_v59, %v10752_v37 }
 0x794   :  { %v5180_v39 = vpop.eup %5179  ;;  %v4330_v16 = vmul.f32 %v5178_v36, %v10748_v30  ;;  %v4343_v17 = vmul.f32 %v10759_v43, %v4279_v41  ;;  %vm4336_vm8 = vweird.f32 %v5178_v36  ;;  %v4386_v47 = vmul.f32 %v4378_v62, %v10759_v43 }
 0x795   :  { %v4323_v27 = vsub.f32 1.5, %v4322_v56  ;;  %v4310_v42 = vmul.f32 %v5180_v39, %v10750_v19  ;;  %vm4316_vm14 = vweird.f32 %v5180_v39  ;;  %v4390_v30 = vmul.f32 %v4382_v18, %v10759_v43  ;;  %vm4337_vm15 = vmor %vm4335_vm13, %vm4336_vm8 }
 0x796   :  { %v4331_v3 = vmul.f32 %v5178_v36, %v4330_v16  ;;  %v10772_v21 = vsub.f32 %v4219_v55, %v4343_v17  ;;  %vm4317_vm9 = vmor %vm4315_vm3, %vm4316_vm14  ;;  %v4364_v19 = vpop.xlane.xlu0 %4363  ;;  %v4993_v16 = vld [vmem:[%s11267_s14 + $0x30] sm:$0xff] }
 0x797   :  { %v4324_v12 = vmul.f32 %v5176_v25, %v4323_v27  ;;  %v4311_v60 = vmul.f32 %v5180_v39, %v4310_v42  ;;  %v4358_v61 = vpop.xlane.xlu2 %4357  ;;  %v4222_v42 = vld [vmem:[%s11266_s13 + $0x18] sm:$0xff] }
 0x798   :  { %v4332_v41 = vmul.f32 0.5, %v4331_v3  ;;  %v4394_v5 = vadd.f32 %v4386_v47, %v10772_v21  ;;  %v4398_v51 = vadd.f32 %v4390_v30, %v10772_v21  ;;  %v4381_v3 = vmul.f32 %v10770_v59, %v4358_v61 }
 0x799   :  { %v4328_v38 = vsel %vm4327_vm7, %v5176_v25, %v4324_v12  ;;  %v4312_v14 = vmul.f32 0.5, %v4311_v60  ;;  %v4216_v25 = vld [vmem:[%s11265_s12 + $0x8] sm:$0xff]  ;;  %v4370_v61 = vpop.xlane.xlu1 %4369 }
 0x79a   :  { %v10776_v34 = vmul.f32 %v4328_v38, %v4217_v4  ;;  %v4333_v52 = vsub.f32 1.5, %v4332_v41  ;;  %v4406_v27 = vmul.f32 %v4402_v29, %v4394_v5  ;;  %v4465_v55 = vmul.f32 %v4991_v33, %v4394_v5 }
 0x79b   :  { %v4313_v23 = vsub.f32 1.5, %v4312_v14  ;;  %v4410_v12 = vmul.f32 %v4402_v29, %v4398_v51  ;;  %v4469_v60 = vmul.f32 %v4991_v33, %v4398_v51  ;;  %v4383_v41 = vmul.f32 %v10770_v59, %v4364_v19  ;;  %v4405_v29 = vld [vmem:[%s11267_s14 + $0x18] sm:$0xff] }
 0x79c   :  { %v4334_v57 = vmul.f32 %v5178_v36, %v4333_v52  ;;  %v4345_v20 = vmul.f32 %v10776_v34, %v10736_v9  ;;  %v4388_v9 = vmul.f32 %v4380_v24, %v10776_v34  ;;  %v4473_v24 = vsel %vm4414_vm10, %v4465_v55, 0.0 }
 0x79d   :  { %v4314_v44 = vmul.f32 %v5180_v39, %v4313_v23  ;;  %v4403_v23 = vld [vmem:[%s11267_s14 + $0x8] sm:$0xff]  ;;  %v4428_v30 = vsel %vm4414_vm10, %v4410_v12, 0.0 }
 0x79e   :  { %v4338_v35 = vsel %vm4337_vm15, %v5178_v36, %v4334_v57  ;;  %v10798_v40 = vsub.f32 %v4221_v22, %v4345_v20  ;;  %v4404_v36 = vld [vmem:[%s11267_s14 + $0x10] sm:$0xff]  ;;  %v4992_v22 = vld [vmem:[%s11267_s14 + $0x28] sm:$0xff]  ;;  %v4385_v57 = vmul.f32 %v10770_v59, %v4370_v61 }
 0x79f   :  { %v10805_v26 = vmul.f32 %v4338_v35, %v4218_v8  ;;  %v4318_v56 = vsel %vm4317_vm9, %v5180_v39, %v4314_v44  ;;  %v4220_v39 = vld [vmem:[%s11266_s13 + $0x8] sm:$0xff]  ;;  %v4994_v35 = vld [vmem:[%s11267_s14 + $0x38] sm:$0xff] }
 0x7a0   :  { %v10807_v7 = vmul.f32 %v4318_v56, %v4216_v25  ;;  %v4396_v17 = vadd.f32 %v4388_v9, %v10798_v40  ;;  %v4486_v25 = vsel %vm4414_vm10, %v4469_v60, 0.0 }
 0x7a1   :  { %v4346_v0 = vmul.f32 %v10805_v26, %v10742_v46  ;;  %v4389_v14 = vmul.f32 %v4381_v3, %v10805_v26  ;;  %v4415_v46 = vsel %vm4414_vm10, %v4406_v27, 0.0  ;;  %v4393_v33 = vmul.f32 %v4385_v57, %v10805_v26 }
 0x7a2   :  { %v4344_v4 = vmul.f32 %v10807_v7, %v10740_v31  ;;  %v4408_v62 = vmul.f32 %v4404_v36, %v4396_v17  ;;  %v4467_v18 = vmul.f32 %v4993_v16, %v4396_v17  ;;  %v4387_v52 = vmul.f32 %v4379_v11, %v10807_v7  ;;  %v4367_v31 = vpop.xlane.xlu2 %4366 }
 0x7a3   :  { %v10830_v38 = vsub.f32 %v4222_v42, %v4346_v0  ;;  %v4391_v47 = vmul.f32 %v4383_v41, %v10807_v7  ;;  %v4384_v20 = vmul.f32 %v10770_v59, %v4367_v31 }
 0x7a4   :  { %v10833_v37 = vsub.f32 %v4220_v39, %v4344_v4  ;;  %v4418_v9 = vsel %vm4414_vm10, %v4408_v62, 0.0  ;;  %v4476_v59 = vsel %vm4414_vm10, %v4467_v18, 0.0 }
 0x7a5   :  { %v4397_v8 = vadd.f32 %v4389_v14, %v10830_v38  ;;  %v4392_v51 = vmul.f32 %v4384_v20, %v10776_v34  ;;  %v4401_v11 = vadd.f32 %v4393_v33, %v10830_v38 }
 0x7a6   :  { %v4395_v5 = vadd.f32 %v4387_v52, %v10833_v37  ;;  %v4399_v44 = vadd.f32 %v4391_v47, %v10833_v37 }
 0x7a7   :  { %v4409_v42 = vmul.f32 %v4405_v29, %v4397_v8  ;;  %v4468_v39 = vmul.f32 %v4994_v35, %v4397_v8  ;;  %v4400_v55 = vadd.f32 %v4392_v51, %v10798_v40  ;;  %v4413_v14 = vmul.f32 %v4405_v29, %v4401_v11 }
 0x7a8   :  { %v4407_v56 = vmul.f32 %v4403_v23, %v4395_v5  ;;  %v4466_v19 = vmul.f32 %v4992_v22, %v4395_v5  ;;  %v4411_v17 = vmul.f32 %v4403_v23, %v4399_v44  ;;  %v4470_v27 = vmul.f32 %v4992_v22, %v4399_v44 }
 0x7a9   :  { %v4472_v52 = vmul.f32 %v4994_v35, %v4401_v11  ;;  %v4412_v47 = vmul.f32 %v4404_v36, %v4400_v55  ;;  %v4471_v61 = vmul.f32 %v4993_v16, %v4400_v55  ;;  %v4420_v22 = vsel %vm4414_vm10, %v4409_v42, 0.0 }
 0x7aa   :  { %v4416_v0 = vsel %vm4414_vm10, %v4407_v56, 0.0  ;;  %v4474_v3 = vsel %vm4414_vm10, %v4466_v19, 0.0  ;;  %v4429_v4 = vsel %vm4414_vm10, %v4411_v17, 0.0  ;;  %v4487_v12 = vsel %vm4414_vm10, %v4470_v27, 0.0 }
 0x7ab   :  { %v4417_v60 = vadd.f32 %v4416_v0, %v4415_v46  ;;  %v4475_v41 = vadd.f32 %v4474_v3, %v4473_v24  ;;  %v4430_v62 = vadd.f32 %v4429_v4, %v4428_v30  ;;  %v4488_v18 = vadd.f32 %v4487_v12, %v4486_v25  ;;  %v4441_v4 = vld [vmem:[%s11268_s15] sm:$0x1]  ;;  %v4995_v12 = vld [vmem:[%s11268_s15 + $0x1] sm:$0x1] }
 0x7ac   :  { %v4478_v8 = vsel %vm4414_vm10, %v4468_v39, 0.0  ;;  %v4431_v57 = vsel %vm4414_vm10, %v4412_v47, 0.0  ;;  %v4489_v20 = vsel %vm4414_vm10, %v4471_v61, 0.0  ;;  %v4433_v30 = vsel %vm4414_vm10, %v4413_v14, 0.0 }
 0x7ad   :  { %v4419_v31 = vadd.f32 %v4418_v9, %v4417_v60  ;;  %v4477_v23 = vadd.f32 %v4476_v59, %v4475_v41  ;;  %v4432_v46 = vadd.f32 %v4431_v57, %v4430_v62  ;;  %v4490_v24 = vadd.f32 %v4489_v20, %v4488_v18 }
 0x7ae   :  { %v4491_v25 = vsel %vm4414_vm10, %v4472_v52, 0.0 }
 0x7af   :  { %v4421_v5 = vadd.f32 %v4420_v22, %v4419_v31  ;;  %v4479_v44 = vadd.f32 %v4478_v8, %v4477_v23  ;;  %v4434_v29 = vadd.f32 %v4433_v30, %v4432_v46  ;;  %v4492_v35 = vadd.f32 %v4491_v25, %v4490_v24  ;;  %v4448_v22 = vld [vmem:[%s11269_s16 + $0x10] sm:$0xff] }
 0x7b0   :  { %v4998_v8 = vld [vmem:[%s11269_s16 + $0x30] sm:$0xff] }
 0x7b1   :  { %v4422_v36 = vrot.slane %v4421_v5, 4  ;;  %v4480_v16 = vrot.slane %v4479_v44, 4  ;;  %v4435_v33 = vrot.slane %v4434_v29, 4  ;;  %v4493_v51 = vrot.slane %v4492_v35, 4 }
 0x7b3   :  { %v4423_v9 = vadd.f32 %v4422_v36, %v4421_v5  ;;  %v4481_v59 = vadd.f32 %v4480_v16, %v4479_v44  ;;  %v4436_v17 = vadd.f32 %v4435_v33, %v4434_v29  ;;  %v4494_v27 = vadd.f32 %v4493_v51, %v4492_v35  ;;  %v10889_v5 = vld [vmem:[%s11269_s16 + $0x8] sm:$0xff]  ;;  %v4446_v36 = vld [vmem:[%s11269_s16] sm:$0xff]  ;;  %v4530_v51 = vld [vmem:[%s11270_s17 + $0x10] sm:$0xff] }
 0x7b4   :  { %v10894_v44 = vld [vmem:[%s11269_s16 + $0x28] sm:$0xff]  ;;  %v4996_v16 = vld [vmem:[%s11269_s16 + $0x20] sm:$0xff] }
 0x7b5   :  { %v4424_v56 = vrot.slane %v4423_v9, 2  ;;  %v4482_v19 = vrot.slane %v4481_v59, 2  ;;  %v4437_v11 = vrot.slane %v4436_v17, 2  ;;  %v4495_v55 = vrot.slane %v4494_v27, 2 }
 0x7b7   :  { %v4425_v42 = vadd.f32 %v4424_v56, %v4423_v9  ;;  %v4483_v39 = vadd.f32 %v4482_v19, %v4481_v59  ;;  %v4438_v60 = vadd.f32 %v4437_v11, %v4436_v17  ;;  %v4496_v41 = vadd.f32 %v4495_v55, %v4494_v27  ;;  %v4449_v56 = vld [vmem:[%s11269_s16 + $0x18] sm:$0xff]  ;;  %v10916_v11 = vld [vmem:[%s11270_s17 + $0x8] sm:$0xff] }
 0x7b8   :  { %v4999_v19 = vld [vmem:[%s11269_s16 + $0x38] sm:$0xff] }
 0x7b9   :  { %v4426_v0 = vrot.slane %v4425_v42, 1  ;;  %v4484_v3 = vrot.slane %v4483_v39, 1  ;;  %v4439_v47 = vrot.slane %v4438_v60, 1  ;;  %v4497_v61 = vrot.slane %v4496_v41, 1 }
 0x7bb   :  { %v4427_v62 = vadd.f32 %v4426_v0, %v4425_v42  ;;  %v4485_v18 = vadd.f32 %v4484_v3, %v4483_v39  ;;  %v4440_v46 = vadd.f32 %v4439_v47, %v4438_v60  ;;  %v4498_v24 = vadd.f32 %v4497_v61, %v4496_v41 }
 0x7bd   :  { %v4442_v14 = vadd.f32 %v4441_v4, %v4427_v62  ;;  %v4501_v52 = vadd.f32 %v4995_v12, %v4485_v18  ;;  %v4443_v9 = vadd.f32 %v4441_v4, %v4440_v46  ;;  %v4502_v59 = vadd.f32 %v4995_v12, %v4498_v24  ;;  %v4528_v62 = vld [vmem:[%s11270_s17] sm:$0xff] }
 0x7bf   :  { %v4444_v31 = vmax.f32 %v4442_v14, 0.0  ;;  %v4503_v23 = vmax.f32 %v4501_v52, 0.0  ;;  %v4445_v55 = vmax.f32 %v4443_v9, 0.0  ;;  %v4504_v0 = vmax.f32 %v4502_v59, 0.0 }
 0x7c1   :  { %v4450_v57 = vperm.slane %v4444_v31, 0  ;;  %v4510_v20 = vperm.slane %v4503_v23, 0  ;;  %v4451_v52 = vperm.slane %v4445_v55, 0  ;;  %v4511_v47 = vperm.slane %v4504_v0, 0  ;;  %v10925_v31 = vld [vmem:[%s11270_s17 + $0x18] sm:$0xff] }
 0x7c3   :  { %v4454_v30 = vmul.f32 %v4450_v57, %v4448_v22  ;;  %v4514_v25 = vmul.f32 %v4998_v8, %v4510_v20  ;;  %v4453_v29 = vmul.f32 %v4450_v57, %v10889_v5  ;;  %v4513_v35 = vmul.f32 %v10894_v44, %v4510_v20 }
 0x7c4   :  { %v4452_v17 = vmul.f32 %v4450_v57, %v4446_v36  ;;  %v4512_v27 = vmul.f32 %v4996_v16, %v4510_v20  ;;  %v4455_v3 = vmul.f32 %v4450_v57, %v4449_v56  ;;  %v4515_v4 = vmul.f32 %v4999_v19, %v4510_v20 }
 0x7c5   :  { %v4522_v33 = vadd.f32 %v4514_v25, %v4454_v30  ;;  %v4521_v39 = vadd.f32 %v4513_v35, %v4453_v29  ;;  %v4458_v46 = vmul.f32 %v4451_v52, %v4448_v22  ;;  %v4518_v24 = vmul.f32 %v4998_v8, %v4511_v47  ;;  %v12307_v35 = vld [vmem:[#allocation20_spill] sm:$0xff] }
 0x7c6   :  { %v4520_v41 = vadd.f32 %v4512_v27, %v4452_v17  ;;  %v4523_v61 = vadd.f32 %v4515_v4, %v4455_v3  ;;  %v10929_v9 = vmul.f32 0.001953125, %v12307_v35  ;;  %v4456_v27 = vmul.f32 %v4451_v52, %v4446_v36  ;;  %v12308_v3 = vld [vmem:[#allocation21_spill] sm:$0xff] }
 0x7c7   :  { %v4534_v42 = vadd.f32 %v4530_v51, %v4522_v33  ;;  %v4533_v60 = vadd.f32 %v10916_v11, %v4521_v39  ;;  %v4526_v33 = vadd.f32 %v4518_v24, %v4458_v46  ;;  %v10941_v4 = vmul.f32 0.001953125, %v12308_v3 }
 0x7c8   :  { %v4532_v14 = vadd.f32 %v4528_v62, %v4520_v41  ;;  %v4535_v57 = vadd.f32 %v10925_v31, %v4523_v61  ;;  %v10938_v55 = vmul.f32 %v10929_v9, %v10929_v9  ;;  %v12310_v41 = vld [vmem:[#allocation24_spill] sm:$0xff]  ;;  %v4457_v61 = vmul.f32 %v4451_v52, %v10889_v5 }
 0x7c9   :  { %v5002_v12 = vmul.f32 -1.442695, %v4534_v42  ;;  %v5001_v18 = vmul.f32 -1.442695, %v4533_v60  ;;  %v4516_v42 = vmul.f32 %v4996_v16, %v4511_v47  ;;  %v4538_v22 = vadd.f32 %v4530_v51, %v4526_v33 }
 0x7ca   :  { %v5000_v23 = vmul.f32 -1.442695, %v4532_v14  ;;  %v5003_v30 = vmul.f32 -1.442695, %v4535_v57  ;;  %v4517_v24 = vmul.f32 %v10894_v44, %v4511_v47  ;;  %v4519_v35 = vmul.f32 %v4999_v19, %v4511_v47 }
 0x7cb   :  { %5181 = vpow2.f32 %v5002_v12  ;;  %v12309_v12 = vld [vmem:[#allocation23_spill] sm:$0xff]  ;;  %v5006_v14 = vmul.f32 -1.442695, %v4538_v22 }
 0x7cc   :  { %5183 = vpow2.f32 %v5001_v18  ;;  %v10944_v60 = vmul.f32 0.001953125, %v12309_v12  ;;  %v10947_v18 = vmul.f32 0.001953125, %v12310_v41  ;;  %v4525_v41 = vadd.f32 %v4517_v24, %v4457_v61 }
 0x7cd   :  { %5185 = vpow2.f32 %v5000_v23  ;;  %v10953_v23 = vmul.f32 %v4451_v52, %v4449_v56 }
 0x7ce   :  { %5187 = vpow2.f32 %v5003_v30  ;;  %v4537_v24 = vadd.f32 %v10916_v11, %v4525_v41  ;;  %v425_v41 = vsub.f32 %v10944_v60, %v10938_v55 }
 0x7d1   :  { %v5182_v20 = vpop.eup %5181 }
 0x7d2   :  { %v4566_v25 = vadd.f32 1.0, %v5182_v20  ;;  %v5184_v29 = vpop.eup %5183  ;;  %v4524_v20 = vadd.f32 %v4516_v42, %v4456_v27 }
 0x7d3   :  { %v10931_v59 = vadd.f32 1.0, %v5184_v29  ;;  %v5186_v17 = vpop.eup %5185 }
 0x7d4   :  { %5189 = vrcp.f32 %v4566_v25  ;;  %v10934_v39 = vadd.f32 1.0, %v5186_v17  ;;  %v5188_v8 = vpop.eup %5187  ;;  %v4611_v16 = vand.u32 2147483647, %v4566_v25  ;;  %v4613_v57 = vand.u32 2147483648, %v4566_v25 }
 0x7d5   :  { %5191 = vrcp.f32 %v10931_v59  ;;  %v10950_v51 = vadd.f32 1.0, %v5188_v8  ;;  %v4598_v29 = vand.u32 2147483648, %v10931_v59  ;;  %vm4607_vm11 = vweird.f32 %v4566_v25 }
 0x7d6   :  { %5193 = vrcp.f32 %v10934_v39  ;;  %vm10959_vm0 = vcmp.eq.f32.partialorder %v4611_v16, 8.507059e+37  ;;  %v4536_v56 = vadd.f32 %v4528_v62, %v4524_v20  ;;  %v4614_v27 = vor.u32 1.1754944e-38, %v4613_v57 }
 0x7d7   :  { %5195 = vrcp.f32 %v10950_v51  ;;  %vm4592_vm1 = vweird.f32 %v10931_v59  ;;  %v4596_v42 = vand.u32 2147483647, %v10931_v59  ;;  %v4599_v19 = vor.u32 1.1754944e-38, %v4598_v29 }
 0x7d8   :  { %5197 = vpow2.f32 %v5006_v14  ;;  %v5004_v8 = vmul.f32 -1.442695, %v4536_v56  ;;  %v4581_v12 = vand.u32 2147483647, %v10934_v39  ;;  %v4583_v14 = vand.u32 2147483648, %v10934_v39 }
 0x7d9   :  { %vm4597_vm7 = vcmp.eq.f32.partialorder %v4596_v42, 8.507059e+37  ;;  %vm4577_vm8 = vweird.f32 %v10934_v39  ;;  %vm4622_vm15 = vweird.f32 %v10950_v51  ;;  %v4527_v42 = vadd.f32 %v4519_v35, %v10953_v23 }
 0x7da   :  { %v5190_v0 = vpop.eup %5189  ;;  %5199 = vpow2.f32 %v5004_v8  ;;  %vm4582_vm13 = vcmp.eq.f32.partialorder %v4581_v12, 8.507059e+37  ;;  %v4628_v8 = vand.u32 2147483648, %v10950_v51  ;;  %v420_v35 = vmul.f32 %v10941_v4, %v10941_v4 }
 0x7db   :  { %v4603_v36 = vmul.f32 %v5190_v0, %v4566_v25  ;;  %v5192_v46 = vpop.eup %5191  ;;  %vm4608_vm12 = vweird.f32 %v5190_v0 }
 0x7dc   :  { %v4588_v33 = vmul.f32 %v5192_v46, %v10931_v59  ;;  %v5194_v52 = vpop.eup %5193  ;;  %vm4609_vm2 = vmor %vm4607_vm11, %vm4608_vm12  ;;  %vm4593_vm4 = vweird.f32 %v5192_v46 }
 0x7dd   :  { %v4604_v30 = vsub.f32 1.0, %v4603_v36  ;;  %v4573_v47 = vmul.f32 %v5194_v52, %v10934_v39  ;;  %v5196_v62 = vpop.eup %5195  ;;  %vm4578_vm5 = vweird.f32 %v5194_v52  ;;  %vm4594_vm6 = vmor %vm4592_vm1, %vm4593_vm4  ;;  %v5005_v39 = vmul.f32 -1.442695, %v4537_v24 }
 0x7de   :  { %v4589_v44 = vsub.f32 1.0, %v4588_v33  ;;  %v5198_v57 = vpop.eup %5197  ;;  %v4618_v25 = vmul.f32 %v5196_v62, %v10950_v51  ;;  %vm4579_vm14 = vmor %vm4577_vm8, %vm4578_vm5  ;;  %vm4623_vm3 = vweird.f32 %v5196_v62  ;;  %v11013_v24 = vadd.f32 1e-05, %v425_v41 }
 0x7df   :  { %v4605_v17 = vmul.f32 %v5190_v0, %v4604_v30  ;;  %v4574_v16 = vsub.f32 1.0, %v4573_v47  ;;  %v10978_v61 = vadd.f32 1.0, %v5198_v57  ;;  %v4626_v47 = vand.u32 2147483647, %v10950_v51  ;;  %vm4624_vm9 = vmor %vm4622_vm15, %vm4623_vm3 }
 0x7e0   :  { %v4590_v3 = vmul.f32 %v5192_v46, %v4589_v44  ;;  %v5200_v11 = vpop.eup %5199  ;;  %v424_v57 = vsub.f32 %v10947_v18, %v420_v35 }
 0x7e1   :  { %v4606_v22 = vadd.f32 %v5190_v0, %v4605_v17  ;;  %v4619_v17 = vsub.f32 1.0, %v4618_v25  ;;  %5201 = vrcp.f32 %v10978_v61  ;;  %v10996_v12 = vadd.f32 1.0, %v5200_v11 }
 0x7e2   :  { %v4591_v30 = vadd.f32 %v5192_v46, %v4590_v3  ;;  %5203 = vpow2.f32 %v5005_v39  ;;  %vm4627_vm10 = vcmp.eq.f32.partialorder %v4626_v47, 8.507059e+37  ;;  %v4673_v55 = vand.u32 2147483648, %v10978_v61 }
 0x7e3   :  { %v4610_v36 = vsel %vm4609_vm2, %v5190_v0, %v4606_v22  ;;  %v4575_v0 = vmul.f32 %v5194_v52, %v4574_v16  ;;  %v4620_v44 = vmul.f32 %v5196_v62, %v4619_v17  ;;  %5205 = vrcp.f32 %v10996_v12 }
 0x7e4   :  { %v10971_v20 = vsel %vm10959_vm0, %v4614_v27, %v4610_v36  ;;  %v4595_v33 = vsel %vm4594_vm6, %v5192_v46, %v4591_v30  ;;  %v4584_v27 = vor.u32 1.1754944e-38, %v4583_v14  ;;  %v4629_v16 = vor.u32 1.1754944e-38, %v4628_v8 }
 0x7e5   :  { %v4694_v29 = vmul.f32 %v10971_v20, %v10776_v34  ;;  %v10982_v5 = vsel %vm4597_vm7, %v4599_v19, %v4595_v33  ;;  %v4576_v56 = vadd.f32 %v5194_v52, %v4575_v0  ;;  %v4621_v19 = vadd.f32 %v5196_v62, %v4620_v44 }
 0x7e6   :  { %v4693_v59 = vmul.f32 %v10982_v5, %v10807_v7  ;;  %v11019_v17 = vadd.f32 1e-05, %v424_v57  ;;  %vm4667_vm12 = vweird.f32 %v10978_v61  ;;  %v4674_v11 = vor.u32 1.1754944e-38, %v4673_v55 }
 0x7e7   :  { %4712 = vperm.xlu1 %5160, %v4694_v29   ;;  %v4580_v46 = vsel %vm4579_vm14, %v5194_v52, %v4576_v56  ;;  %v4539_v52 = vadd.f32 %v10925_v31, %v4527_v42  ;;  %v5202_v23 = vpop.eup %5201  ;;  %v4625_v36 = vsel %vm4624_vm9, %v5196_v62, %v4621_v19  ;;  %v12313_v29 = vld [vmem:[#allocation3_spill] sm:$0xff]  ;;  %v4671_v62 = vand.u32 2147483647, %v10978_v61 }
 0x7e8   :  { %4707 = vperm.xlu2 %5161, %v4693_v59   ;;  %v10990_v22 = vsel %vm4582_vm13, %v4584_v27, %v4580_v46  ;;  %v4663_v14 = vmul.f32 %v5202_v23, %v10978_v61  ;;  %v11008_v51 = vsel %vm4627_vm10, %v4629_v16, %v4625_v36  ;;  %v5204_v25 = vpop.eup %5203  ;;  %v11011_v0 = vmul.f32 0.001953125, %v12313_v29  ;;  %v12314_v46 = vld [vmem:[#allocation22_spill] sm:$0xff] }
 0x7e9   :  { %v4692_v3 = vmul.f32 %v10990_v22, %v10759_v43  ;;  %v5007_v31 = vmul.f32 -1.442695, %v4539_v52  ;;  %vm4668_vm11 = vweird.f32 %v5202_v23  ;;  %v11017_v33 = vadd.f32 1.0, %v5204_v25  ;;  %v5206_v18 = vpop.eup %5205 }
 0x7ea   :  { %v4664_v30 = vsub.f32 1.0, %v4663_v14  ;;  %v4695_v56 = vmul.f32 %v11008_v51, %v10805_v26  ;;  %v4633_v27 = vmul.f32 %v5206_v18, %v10996_v12  ;;  %v419_v44 = vmul.f32 %v11011_v0, %v11011_v0  ;;  %vm4669_vm0 = vmor %vm4667_vm12, %vm4668_vm11 }
 0x7eb   :  { %4702 = vperm.xlu0 %5162, %v4692_v3   ;;  %5207 = vpow2.f32 %v5007_v31  ;;  %v415_v39 = vmul.f32 0.001953125, %v12314_v46  ;;  %vm4672_vm1 = vcmp.eq.f32.partialorder %v4671_v62, 8.507059e+37  ;;  %v4641_v8 = vand.u32 2147483647, %v10996_v12 }
 0x7ec   :  { %v4665_v60 = vmul.f32 %v5202_v23, %v4664_v30  ;;  %5209 = vrcp.f32 %v11017_v33  ;;  %v4634_v19 = vsub.f32 1.0, %v4633_v27  ;;  %v4643_v3 = vand.u32 2147483648, %v10996_v12 }
 0x7ed   :  { %5211 = vrsqrt.f32 %v11013_v24  ;;  %vm4638_vm2 = vweird.f32 %v5206_v18  ;;  %v423_v16 = vsub.f32 %v415_v39, %v419_v44  ;;  %vm4637_vm4 = vweird.f32 %v10996_v12 }
 0x7ee   :  { %v4666_v59 = vadd.f32 %v5202_v23, %v4665_v60  ;;  %5213 = vrsqrt.f32 %v11019_v17  ;;  %v4635_v35 = vmul.f32 %v5206_v18, %v4634_v19  ;;  %vm4639_vm5 = vmor %vm4637_vm4, %vm4638_vm2  ;;  %v4644_v57 = vor.u32 1.1754944e-38, %v4643_v3 }
 0x7ef   :  { %vm4642_vm6 = vcmp.eq.f32.partialorder %v4641_v8, 8.507059e+37  ;;  %v11046_v62 = vadd.f32 1e-05, %v423_v16  ;;  %vm4652_vm8 = vweird.f32 %v11017_v33  ;;  %vm447_vm2 = vweird.f32 %v11019_v17 }
 0x7f0   :  { %v4670_v42 = vsel %vm4669_vm0, %v5202_v23, %v4666_v59  ;;  %v4636_v23 = vadd.f32 %v5206_v18, %v4635_v35  ;;  %v12316_v59 = vld [vmem:[#allocation25_spill] sm:$0xff]  ;;  %vm457_vm0 = vweird.f32 %v11013_v24 }
 0x7f1   :  { %v5208_v47 = vpop.eup %5207  ;;  %v11031_v61 = vsel %vm4672_vm1, %v4674_v11, %v4670_v42  ;;  %v418_v27 = vmul.f32 0.001953125, %v12316_v59  ;;  %v4757_v42 = vmul.f32 %v10982_v5, %v10833_v37 }
 0x7f2   :  { %v4698_v52 = vmul.f32 %v11031_v61, %v10776_v34  ;;  %v4571_v41 = vadd.f32 1.0, %v5208_v47  ;;  %v5210_v36 = vpop.eup %5209  ;;  %v4640_v30 = vsel %vm4639_vm5, %v5206_v18, %v4636_v23  ;;  %v12315_v34 = vld [vmem:[#allocation19_spill] sm:$0xff]  ;;  %v4656_v18 = vand.u32 2147483647, %v11017_v33 }
 0x7f3   :  { %4717 = vperm.xlu0 %5162, %v4695_v56   ;;  %v11038_v14 = vpop.eup %5211  ;;  %v4648_v31 = vmul.f32 %v5210_v36, %v11017_v33  ;;  %v11044_v29 = vmul.f32 0.001953125, %v12315_v34  ;;  %v4645_v55 = vsel %vm4642_vm6, %v4644_v57, %v4640_v30  ;;  %v4658_v56 = vand.u32 2147483648, %v11017_v33 }
 0x7f4   :  { %4732 = vperm.xlu1 %5160, %v4698_v52   ;;  %5215 = vrcp.f32 %v4571_v41  ;;  %v11041_v25 = vpop.eup %5213  ;;  %v4696_v12 = vmul.f32 %v4645_v55, %v10759_v43  ;;  %vm4653_vm7 = vweird.f32 %v5210_v36  ;;  %v452_v46 = vmul.f32 %v11038_v14, %v11013_v24 }
 0x7f5   :  { %v4649_v60 = vsub.f32 1.0, %v4648_v31  ;;  %v442_v39 = vmul.f32 %v11041_v25, %v11019_v17  ;;  %v422_v43 = vmul.f32 %v11044_v29, %v11044_v29  ;;  %5217 = vrsqrt.f32 %v11046_v62  ;;  %vm4654_vm13 = vmor %vm4652_vm8, %vm4653_vm7  ;;  %v348_v17 = vld [vmem:[%s11271_s20 + $0x8] sm:$0xff] }
 0x7f6   :  { %4722 = vperm.xlu2 %5161, %v4696_v12   ;;  %v4659_v8 = vor.u32 1.1754944e-38, %v4658_v56  ;;  %vm4657_vm14 = vcmp.eq.f32.partialorder %v4656_v18, 8.507059e+37  ;;  %v453_v16 = vmul.f32 %v11038_v14, %v452_v46  ;;  %v4688_v57 = vand.u32 2147483648, %v4571_v41 }
 0x7f7   :  { %v4650_v44 = vmul.f32 %v5210_v36, %v4649_v60  ;;  %v426_v3 = vsub.f32 %v418_v27, %v422_v43  ;;  %v443_v5 = vmul.f32 %v11041_v25, %v442_v39  ;;  %v4686_v33 = vand.u32 2147483647, %v4571_v41 }
 0x7f8   :  { %vm4682_vm3 = vweird.f32 %v4571_v41  ;;  %v4760_v56 = vmul.f32 %v4645_v55, %v10772_v21  ;;  %v454_v59 = vmul.f32 0.5, %v453_v16  ;;  %vm458_vm11 = vweird.f32 %v11038_v14 }
 0x7f9   :  { %v4651_v19 = vadd.f32 %v5210_v36, %v4650_v44  ;;  %v11065_v34 = vadd.f32 1e-05, %v426_v3  ;;  %v444_v27 = vmul.f32 0.5, %v443_v5  ;;  %vm4687_vm10 = vcmp.eq.f32.partialorder %v4686_v33, 8.507059e+37  ;;  %vm459_vm1 = vmor %vm457_vm0, %vm458_vm11  ;;  %v349_v3 = vld [vmem:[%s11271_s20 + $0x10] sm:$0xff] }
 0x7fa   :  { %v5216_v11 = vpop.eup %5215  ;;  %vm448_vm12 = vweird.f32 %v11041_v25  ;;  %vm437_vm6 = vweird.f32 %v11046_v62 }
 0x7fb   :  { %v4678_v47 = vmul.f32 %v5216_v11, %v4571_v41  ;;  %v4655_v52 = vsel %vm4654_vm13, %v5210_v36, %v4651_v19  ;;  %vm4683_vm15 = vweird.f32 %v5216_v11  ;;  %v11067_v12 = vpop.eup %5217  ;;  %v4689_v36 = vor.u32 1.1754944e-38, %v4688_v57  ;;  %vm449_vm4 = vmor %vm447_vm2, %vm448_vm12 }
 0x7fc   :  { %4771 = vperm.xlu1 %5160, %v4757_v42   ;;  %v4660_v23 = vsel %vm4657_vm14, %v4659_v8, %v4655_v52  ;;  %vm4684_vm9 = vmor %vm4682_vm3, %vm4683_vm15  ;;  %5219 = vrsqrt.f32 %v11065_v34  ;;  %v432_v46 = vmul.f32 %v11067_v12, %v11046_v62  ;;  %v455_v41 = vsub.f32 1.5, %v454_v59 }
 0x7fd   :  { %v4679_v35 = vsub.f32 1.0, %v4678_v47  ;;  %v4697_v31 = vmul.f32 %v4660_v23, %v10807_v7  ;;  %v445_v39 = vsub.f32 1.5, %v444_v27  ;;  %v4756_v42 = vmul.f32 %v10990_v22, %v10772_v21 }
 0x7fe   :  { %v433_v55 = vmul.f32 %v11067_v12, %v432_v46  ;;  %v4758_v21 = vmul.f32 %v10971_v20, %v10798_v40  ;;  %v4759_v8 = vmul.f32 %v11008_v51, %v10830_v38  ;;  %vm438_vm5 = vweird.f32 %v11067_v12 }
 0x7ff   :  { %v4680_v30 = vmul.f32 %v5216_v11, %v4679_v35  ;;  %4727 = vperm.xlu0 %5162, %v4697_v31   ;;  %v446_v19 = vmul.f32 %v11041_v25, %v445_v39  ;;  %v4762_v31 = vmul.f32 %v11031_v61, %v10798_v40  ;;  %vm439_vm7 = vmor %vm437_vm6, %vm438_vm5  ;;  %vm467_vm13 = vweird.f32 %v11065_v34  ;;  %v350_v61 = vld [vmem:[%s11271_s20 + $0x18] sm:$0xff] }
 0x800   :  { %v434_v22 = vmul.f32 0.5, %v433_v55 }
 0x801   :  { %v4681_v60 = vadd.f32 %v5216_v11, %v4680_v30  ;;  %v450_v20 = vsel %vm449_vm4, %v11041_v25, %v446_v19  ;;  %v352_v25 = vld [vmem:[%s11272_s21 + $0x8] sm:$0xff] }
 0x802   :  { %v5220_v43 = vpop.eup %5219  ;;  %v435_v52 = vsub.f32 1.5, %v434_v22  ;;  %v472_v5 = vmul.f32 %v450_v20, %v348_v17 }
 0x803   :  { %v4685_v44 = vsel %vm4684_vm9, %v5216_v11, %v4681_v60  ;;  %v462_v47 = vmul.f32 %v5220_v43, %v11065_v34  ;;  %vm468_vm8 = vweird.f32 %v5220_v43  ;;  %v353_v34 = vld [vmem:[%s11272_s21 + $0x10] sm:$0xff] }
 0x804   :  { %v4690_v18 = vsel %vm4687_vm10, %v4689_v36, %v4685_v44  ;;  %4786 = vperm.xlu1 %5160, %v4760_v56   ;;  %v436_v57 = vmul.f32 %v11067_v12, %v435_v52  ;;  %vm469_vm14 = vmor %vm467_vm13, %vm468_vm8  ;;  %v12317_v52 = vld [vmem:[#allocation13_spill] sm:$0xff] }
 0x805   :  { %v4699_v7 = vmul.f32 %v4690_v18, %v10805_v26  ;;  %v4763_v11 = vmul.f32 %v4690_v18, %v10830_v38  ;;  %v456_v26 = vmul.f32 %v11038_v14, %v455_v41  ;;  %v463_v35 = vmul.f32 %v5220_v43, %v462_v47 }
 0x806   :  { %v4761_v38 = vmul.f32 %v4660_v23, %v10833_v37  ;;  %v347_v23 = vld [vmem:[%s11271_s20] sm:$0xff]  ;;  %v440_v30 = vsel %vm439_vm7, %v11067_v12, %v436_v57  ;;  %v12320_v57 = vld [vmem:[#allocation16_spill] sm:$0xff] }
 0x807   :  { %4737 = vperm.xlu2 %5161, %v4699_v7   ;;  %4766 = vperm.xlu0 %5162, %v4756_v42   ;;  %v460_v24 = vsel %vm459_vm1, %v11038_v14, %v456_v26  ;;  %v464_v51 = vmul.f32 0.5, %v463_v35  ;;  %v476_v14 = vmul.f32 %v472_v5, %v10941_v4  ;;  %v471_v33 = vmul.f32 %v440_v30, %v347_v23  ;;  %v351_v12 = vld [vmem:[%s11272_s21] sm:$0xff] }
 0x808   :  { %v473_v16 = vmul.f32 %v460_v24, %v349_v3 }
 0x809   :  { %v465_v37 = vsub.f32 1.5, %v464_v51  ;;  %v480_v4 = vsub.f32 %v352_v25, %v476_v14  ;;  %v475_v60 = vmul.f32 %v471_v33, %v11011_v0  ;;  %v354_v0 = vld [vmem:[%s11272_s21 + $0x18] sm:$0xff] }
 0x80a   :  { %v477_v59 = vmul.f32 %v473_v16, %v10929_v9 }
 0x80b   :  { %v466_v40 = vmul.f32 %v5220_v43, %v465_v37  ;;  %v479_v56 = vsub.f32 %v351_v12, %v475_v60 }
 0x80c   :  { %4801 = vperm.xlu1 %5160, %v4763_v11   ;;  %v481_v44 = vsub.f32 %v353_v34, %v477_v59 }
 0x80d   :  { %v470_v62 = vsel %vm469_vm14, %v5220_v43, %v466_v40 }
 0x80e   :  { %v474_v36 = vmul.f32 %v470_v62, %v350_v61 }
 0x80f   :  { %4776 = vperm.xlu2 %5161, %v4758_v21   ;;  %4781 = vperm.xlu0 %5162, %v4759_v8  }
 0x810   :  { %v478_v27 = vmul.f32 %v474_v36, %v11044_v29 }
 0x812   :  { %v482_v18 = vsub.f32 %v354_v0, %v478_v27 }
 0x814   :  { %4832 = vperm.xlu1 %5160, %v473_v16   ;;  %v12318_v16 = vld [vmem:[#allocation14_spill] sm:$0xff] }
 0x817   :  { %4791 = vperm.xlu2 %5161, %v4761_v38   ;;  %4796 = vperm.xlu0 %5162, %v4762_v31   ;;  %v12319_v38 = vld [vmem:[#allocation15_spill] sm:$0xff] }
 0x81c   :  { %4863 = vperm.xlu1 %5160, %v480_v4  }
 0x81f   :  { %4822 = vperm.xlu2 %5161, %v471_v33   ;;  %4827 = vperm.xlu0 %5162, %v472_v5  }
 0x827   :  { %4837 = vperm.xlu2 %5161, %v474_v36   ;;  %4858 = vperm.xlu0 %5162, %v479_v56  }
 0x82f   :  { %4868 = vperm.xlu2 %5161, %v481_v44   ;;  %4873 = vperm.xlu0 %5162, %v482_v18  }
 0x842   :  { %v4708_v7 = vpop.permute.xlu2 %4707 }
 0x843   :  { %v4742_v44 = vmul.f32 %v4708_v7, %v10640_v28  ;;  %v4743_v18 = vmul.f32 %v4708_v7, %v10642_v1 }
 0x850   :  { %v11127_v46 = vpop.permute.xlu2 %4722 }
 0x859   :  { %v4713_v41 = vpop.permute.xlu1 %4712 }
 0x85a   :  { %v4744_v24 = vmul.f32 %v4713_v41, %v10686_v58  ;;  %v4745_v17 = vmul.f32 %v4713_v41, %v10689_v13 }
 0x85d   :  { %v11129_v39 = vpop.permute.xlu0 %4702 }
 0x861   :  { %v11131_v9 = vpop.permute.xlu2 %4737 }
 0x865   :  { %v11133_v11 = vpop.permute.xlu0 %4717 }
 0x866   :  { %v4733_v42 = vpop.permute.xlu1 %4732 }
 0x867   :  { %v4752_v37 = vmul.f32 %v4733_v42, %v10692_v48  ;;  %v4753_v23 = vmul.f32 %v4733_v42, %v10702_v15 }
 0x869   :  { %v4777_v55 = vpop.permute.xlu2 %4776 }
 0x86a   :  { %v4808_v31 = vadd.f32 %v4777_v55, %v4744_v24  ;;  %v4809_v25 = vadd.f32 %v4777_v55, %v4745_v17  ;;  %v12324_v17 = vld [vmem:[#allocation8_spill] sm:$0xff] }
 0x86e   :  { %v4772_v29 = vpop.permute.xlu1 %4771 }
 0x871   :  { %v4792_v43 = vpop.permute.xlu2 %4791  ;;  %v4728_v26 = vpop.permute.xlu0 %4727 }
 0x872   :  { %v4750_v48 = vmul.f32 %v4728_v26, %v10644_v6  ;;  %v4751_v15 = vmul.f32 %v4728_v26, %v10650_v10  ;;  %v12321_v6 = vld [vmem:[#allocation17_spill] sm:$0xff]  ;;  %v12322_v10 = vld [vmem:[#allocation18_spill] sm:$0xff] }
 0x873   :  { %v12323_v26 = vld [vmem:[#allocation5_spill] sm:$0xff] }
 0x876   :  { %v11135_v19 = vpop.permute.xlu1 %4786 }
 0x879   :  { %v11137_v21 = vpop.permute.xlu2 %4822  ;;  %v11139_v22 = vpop.permute.xlu0 %4766 }
 0x87e   :  { %v11141_v47 = vpop.permute.xlu1 %4801 }
 0x881   :  { %v11143_v8 = vpop.permute.xlu2 %4837  ;;  %v11145_v3 = vpop.permute.xlu0 %4781 }
 0x886   :  { %v4833_v20 = vpop.permute.xlu1 %4832 }
 0x887   :  { %v4844_v35 = vmul.f32 %v4833_v20, %v12317_v52  ;;  %v4845_v5 = vmul.f32 %v4833_v20, %v12318_v16  ;;  %v4852_v51 = vmul.f32 %v4833_v20, %v12319_v38  ;;  %v4853_v14 = vmul.f32 %v4833_v20, %v12320_v57 }
 0x888   :  { %v4806_v52 = vadd.f32 %v4772_v29, %v4742_v44  ;;  %v4814_v16 = vadd.f32 %v4792_v43, %v4750_v48  ;;  %v4748_v57 = vmul.f32 %v11127_v46, %v10658_v32  ;;  %v12327_v32 = vld [vmem:[#allocation11_spill] sm:$0xff]  ;;  %v4754_v48 = vmul.f32 %v11131_v9, %v10679_v63 }
 0x889   :  { %v4869_v30 = vpop.permute.xlu2 %4868  ;;  %v4797_v40 = vpop.permute.xlu0 %4796 }
 0x88a   :  { %v4880_v4 = vadd.f32 %v4869_v30, %v4844_v35  ;;  %v4881_v58 = vadd.f32 %v4869_v30, %v4845_v5  ;;  %v4888_v33 = vadd.f32 %v4869_v30, %v4852_v51  ;;  %v4889_v13 = vadd.f32 %v4869_v30, %v4853_v14  ;;  %v12325_v30 = vld [vmem:[#allocation9_spill] sm:$0xff] }
 0x88b   :  { %v4816_v61 = vadd.f32 %v4797_v40, %v4752_v37  ;;  %v4817_v62 = vadd.f32 %v4797_v40, %v4753_v23  ;;  %v4807_v35 = vadd.f32 %v4772_v29, %v4743_v18  ;;  %v4815_v5 = vadd.f32 %v4792_v43, %v4751_v15 }
 0x88c   :  { %v4896_v60 = vadd.f32 %v4880_v4, %v4808_v31  ;;  %v4897_v12 = vadd.f32 %v4881_v58, %v4809_v25  ;;  %v4749_v14 = vmul.f32 %v11127_v46, %v10671_v50  ;;  %v4740_v31 = vmul.f32 %v11129_v39, %v10654_v53  ;;  %v12326_v58 = vld [vmem:[#allocation10_spill] sm:$0xff]  ;;  %v12328_v46 = vld [vmem:[#allocation12_spill] sm:$0xff] }
 0x88d   :  { %v4904_v36 = vadd.f32 %v4888_v33, %v4816_v61  ;;  %v4905_v56 = vadd.f32 %v4889_v13, %v4817_v62  ;;  %v4741_v25 = vmul.f32 %v11129_v39, %v10656_v54  ;;  %v4840_v4 = vmul.f32 %v11137_v21, %v12325_v30 }
 0x88e   :  { %v4912_v59 = vmax.f32 %v4896_v60, 0.0  ;;  %v4913_v34 = vmax.f32 %v4897_v12, 0.0  ;;  %v4864_v28 = vpop.permute.xlu1 %4863  ;;  %v4841_v33 = vmul.f32 %v11137_v21, %v12326_v58  ;;  %v4848_v13 = vmul.f32 %v11137_v21, %v12327_v32 }
 0x88f   :  { %v4920_v27 = vmax.f32 %v4904_v36, 0.0  ;;  %v4921_v0 = vmax.f32 %v4905_v56, 0.0  ;;  %v4812_v50 = vadd.f32 %v11135_v19, %v4748_v57  ;;  %v4849_v53 = vmul.f32 %v11137_v21, %v12328_v46 }
 0x890   :  { %4928 = vst [vmem:[%s11273_s22 + $0x20] sm:$0xff] %v4912_v59  ;;  %v4804_v61 = vadd.f32 %v11139_v22, %v4740_v31  ;;  %v4805_v62 = vadd.f32 %v11139_v22, %v4741_v25  ;;  %v4813_v60 = vadd.f32 %v11135_v19, %v4749_v14 }
 0x891   :  { %4929 = vst [vmem:[%s11273_s22 + $0x28] sm:$0xff] %v4913_v34  ;;  %v4828_v41 = vpop.permute.xlu0 %4827 }
 0x892   :  { %4936 = vst [vmem:[%s11273_s22 + $0x60] sm:$0xff] %v4920_v27  ;;  %v4842_v42 = vmul.f32 %v4828_v41, %v12321_v6  ;;  %v4843_v55 = vmul.f32 %v4828_v41, %v12322_v10  ;;  %v4850_v24 = vmul.f32 %v4828_v41, %v12323_v26  ;;  %v4851_v20 = vmul.f32 %v4828_v41, %v12324_v17  ;;  %v12330_v26 = vld [vmem:[#allocation2_spill] sm:$0xff]  ;;  %v12331_v17 = vld [vmem:[#allocation4_spill] sm:$0xff] }
 0x893   :  { %4937 = vst [vmem:[%s11273_s22 + $0x68] sm:$0xff] %v4921_v0  ;;  %v4755_v41 = vmul.f32 %v11131_v9, %v10710_v2  ;;  %v4746_v6 = vmul.f32 %v11133_v11, %v10660_v45  ;;  %v4854_v2 = vmul.f32 %v11143_v8, %v12331_v17  ;;  %v12332_v9 = vld [vmem:[#allocation7_spill] sm:$0xff] }
 0x894   :  { %v4878_v38 = vadd.f32 %v4864_v28, %v4842_v42  ;;  %v4879_v1 = vadd.f32 %v4864_v28, %v4843_v55  ;;  %v4886_v7 = vadd.f32 %v4864_v28, %v4850_v24  ;;  %v4887_v51 = vadd.f32 %v4864_v28, %v4851_v20  ;;  %v12329_v55 = vld [vmem:[#allocation6_spill] sm:$0xff] }
 0x895   :  { %v4747_v42 = vmul.f32 %v11133_v11, %v10662_v49  ;;  %v4846_v63 = vmul.f32 %v11143_v8, %v12329_v55  ;;  %v4847_v24 = vmul.f32 %v11143_v8, %v12330_v26  ;;  %v4855_v45 = vmul.f32 %v11143_v8, %v12332_v9 }
 0x896   :  { %v4894_v29 = vadd.f32 %v4878_v38, %v4806_v52  ;;  %v4895_v37 = vadd.f32 %v4879_v1, %v4807_v35  ;;  %v4902_v43 = vadd.f32 %v4886_v7, %v4814_v16  ;;  %v4903_v23 = vadd.f32 %v4887_v51, %v4815_v5 }
 0x897   :  { %v4810_v20 = vadd.f32 %v11145_v3, %v4746_v6  ;;  %v4811_v49 = vadd.f32 %v11145_v3, %v4747_v42  ;;  %v4818_v11 = vadd.f32 %v11141_v47, %v4754_v48  ;;  %v4819_v52 = vadd.f32 %v11141_v47, %v4755_v41 }
 0x898   :  { %v4910_v40 = vmax.f32 %v4894_v29, 0.0  ;;  %v4911_v54 = vmax.f32 %v4895_v37, 0.0  ;;  %v4918_v39 = vmax.f32 %v4902_v43, 0.0  ;;  %v4919_v12 = vmax.f32 %v4903_v23, 0.0 }
 0x899   :  { %v4859_v36 = vpop.permute.xlu0 %4858 }
 0x89a   :  { %4926 = vst [vmem:[%s11273_s22 + $0x10] sm:$0xff] %v4910_v40  ;;  %v4876_v56 = vadd.f32 %v4859_v36, %v4840_v4  ;;  %v4877_v59 = vadd.f32 %v4859_v36, %v4841_v33  ;;  %v4884_v34 = vadd.f32 %v4859_v36, %v4848_v13  ;;  %v4885_v27 = vadd.f32 %v4859_v36, %v4849_v53 }
 0x89b   :  { %4927 = vst [vmem:[%s11273_s22 + $0x18] sm:$0xff] %v4911_v54 }
 0x89c   :  { %4934 = vst [vmem:[%s11273_s22 + $0x50] sm:$0xff] %v4918_v39  ;;  %v4892_v21 = vadd.f32 %v4876_v56, %v4804_v61  ;;  %v4893_v19 = vadd.f32 %v4877_v59, %v4805_v62  ;;  %v4900_v22 = vadd.f32 %v4884_v34, %v4812_v50  ;;  %v4901_v0 = vadd.f32 %v4885_v27, %v4813_v60 }
 0x89d   :  { %4935 = vst [vmem:[%s11273_s22 + $0x58] sm:$0xff] %v4919_v12 }
 0x89e   :  { %v4908_v15 = vmax.f32 %v4892_v21, 0.0  ;;  %v4909_v44 = vmax.f32 %v4893_v19, 0.0  ;;  %v4916_v18 = vmax.f32 %v4900_v22, 0.0  ;;  %v4917_v10 = vmax.f32 %v4901_v0, 0.0 }
 0x8a0   :  { %4924 = vst [vmem:[%s11273_s22] sm:$0xff] %v4908_v15 }
 0x8a1   :  { %4925 = vst [vmem:[%s11273_s22 + $0x8] sm:$0xff] %v4909_v44  ;;  %v4874_v35 = vpop.permute.xlu0 %4873 }
 0x8a2   :  { %4932 = vst [vmem:[%s11273_s22 + $0x40] sm:$0xff] %v4916_v18  ;;  %v4882_v16 = vadd.f32 %v4874_v35, %v4846_v63  ;;  %v4883_v5 = vadd.f32 %v4874_v35, %v4847_v24  ;;  %v4890_v8 = vadd.f32 %v4874_v35, %v4854_v2  ;;  %v4891_v28 = vadd.f32 %v4874_v35, %v4855_v45 }
 0x8a3   :  { %4933 = vst [vmem:[%s11273_s22 + $0x48] sm:$0xff] %v4917_v10 }
 0x8a4   :  { %v4898_v3 = vadd.f32 %v4882_v16, %v4810_v20  ;;  %v4899_v38 = vadd.f32 %v4883_v5, %v4811_v49  ;;  %v4906_v47 = vadd.f32 %v4890_v8, %v4818_v11  ;;  %v4907_v1 = vadd.f32 %v4891_v28, %v4819_v52 }
 0x8a6   :  { %v4914_v7 = vmax.f32 %v4898_v3, 0.0  ;;  %v4915_v51 = vmax.f32 %v4899_v38, 0.0  ;;  %v4922_v57 = vmax.f32 %v4906_v47, 0.0  ;;  %v4923_v14 = vmax.f32 %v4907_v1, 0.0 }
 0x8a8   :  { %4930 = vst [vmem:[%s11273_s22 + $0x30] sm:$0xff] %v4914_v7 }
 0x8a9   :  { %4931 = vst [vmem:[%s11273_s22 + $0x38] sm:$0xff] %v4915_v51 }
 0x8aa   :  { %4938 = vst [vmem:[%s11273_s22 + $0x70] sm:$0xff] %v4922_v57 }
 0x8ab   :  { %4939 = vst [vmem:[%s11273_s22 + $0x78] sm:$0xff] %v4923_v14 }

</bundles_post_ra>
